<compile_context>
chip_gen: v5e
topology: v5e:2x2
jax: 0.10.0
libtpu: 0.0.40
codegen_flags: <defaults>
</compile_context>

<pallas_src>
import math
from functools import partial

import jax
import jax.numpy as jnp
from jax.experimental import pallas as pl
from jax.experimental.pallas import tpu as pltpu

KSIZE = 5   # conv kernel size
PAD = 2     # spatial padding (kernel_size // 2)
NTAPS = KSIZE * KSIZE


def _round_up(x, m):
    return -(-x // m) * m


# ----------------------------- fused conv-chain kernel -----------------------------

def _chain_kernel(x_ref, w_ref, b_ref, mask_ref, o_ref, col_ref, *,
                  taps, p, c_pad, head, n_res):
    """Fused stride-1 5x5 conv chain for ONE image.

    x_ref    : (C_pad, P)                  padded-flat activation (channels on sublanes,
                                           flattened padded spatial on lanes)
    w_ref    : (n_convs, C_pad, 25*C_pad)  K-packed 5x5 weights (resident across grid)
    b_ref    : (n_convs, C_pad, 1)         biases
    mask_ref : (1, P)                      1.0 at valid (non-padding) spatial positions
    o_ref    : (C_pad, P)                  final activation, same layout as the input
    col_ref  : (25*C_pad, P) VMEM scratch  im2col buffer, reused by every conv
    """
    mask = mask_ref[...]

    def conv5x5(a, idx, *, relu, residual=None):
        # im2col: 25 lane rotations of the activation, stacked on the (8-aligned)
        # sublane axis -> ONE K = 25*C_pad MXU matmul for the whole conv.
        for t, off in enumerate(taps):
            shifted = a if off == 0 else pltpu.roll(a, shift=(-off) % p, axis=1)
            col_ref[t * c_pad:(t + 1) * c_pad, :] = shifted
        out = jnp.dot(w_ref[idx], col_ref[...], preferred_element_type=jnp.float32)
        out = out + b_ref[idx]
        if residual is not None:
            out = out + residual                 # BasicBlock: out += residual * 1.0
        if relu:
            out = jnp.maximum(out, 0.0)
        return out * mask                        # re-zero the spatial padding ring

    a = x_ref[...].astype(jnp.float32)
    idx = 0
    if head:                                     # conv5x5_relu
        a = conv5x5(a, 0, relu=True)
        idx = 1
    for _ in range(n_res):                       # resblock: conv1 (+ReLU), conv2 + skip
        y = conv5x5(a, idx, relu=True)
        a = conv5x5(y, idx + 1, relu=False, residual=a)
        idx += 2
    o_ref[...] = a.astype(o_ref.dtype)           # single lane-dense store per grid step


# ----------------------------- wrapper -----------------------------

def _prep_weight(w_hwio, c_pad):
    """(5,5,ci,co) -> (C_pad, 25*C_pad) with K index = (kh*5+kw)*C_pad + ci."""
    kh, kw, ci, co = w_hwio.shape
    w_p = jnp.pad(w_hwio, ((0, 0), (0, 0), (0, c_pad - ci), (0, c_pad - co)))
    return jnp.transpose(w_p, (3, 0, 1, 2)).reshape(c_pad, kh * kw * c_pad)


def _prep_bias(b, c_pad):
    return jnp.pad(b, (0, c_pad - b.shape[0])).reshape(c_pad, 1)


def _run_chain(x_nchw, wb, *, c_pad, head, n_res):
    """Runs a fused chain of stride-1 5x5 convs (optional head conv + n_res resblocks).

    x_nchw : (N, C, H, W) float32
    wb     : list of (weight(5,5,ci,co), bias(co,)) in execution order
    returns: (N, out_c, H, W)
    """
    assert len(wb) == (1 if head else 0) + 2 * n_res
    n, c, h, w = x_nchw.shape
    hp, wp = h + 2 * PAD, w + 2 * PAD
    p = _round_up(hp * wp, 128)                  # lane-dense flattened spatial extent
    n_convs = len(wb)
    out_c = wb[-1][0].shape[-1]

    # One-time layout transform: NCHW -> (N, C_pad, P) padded-flat, zeros in the pad ring.
    x_prep = jnp.pad(x_nchw, ((0, 0), (0, c_pad - c), (PAD, PAD), (PAD, PAD)))
    x_prep = x_prep.reshape(n, c_pad, hp * wp)
    x_prep = jnp.pad(x_prep, ((0, 0), (0, 0), (0, p - hp * wp)))

    w_stack = jnp.stack([_prep_weight(wm, c_pad) for wm, _ in wb])     # (n_convs, C_pad, 25*C_pad)
    b_stack = jnp.stack([_prep_bias(bv, c_pad) for _, bv in wb])       # (n_convs, C_pad, 1)

    mask = jnp.zeros((hp, wp), jnp.float32).at[PAD:PAD + h, PAD:PAD + w].set(1.0)
    mask = jnp.pad(mask.reshape(1, hp * wp), ((0, 0), (0, p - hp * wp)))

    # Tap lane-offsets in the padded-flat coordinate system (matches weight K layout).
    taps = tuple((kh - PAD) * wp + (kw - PAD) for kh in range(KSIZE) for kw in range(KSIZE))

    kernel = partial(_chain_kernel, taps=taps, p=p, c_pad=c_pad, head=head, n_res=n_res)

    flops = 2 * n * n_convs * p * (NTAPS * c_pad) * c_pad
    bytes_accessed = 4 * (x_prep.size + w_stack.size + b_stack.size + mask.size
                          + n * c_pad * p)

    out = pl.pallas_call(
        kernel,
        out_shape=jax.ShapeDtypeStruct((n, c_pad, p), x_nchw.dtype),
        grid_spec=pltpu.PrefetchScalarGridSpec(
            num_scalar_prefetch=0,
            grid=(n,),                                           # one image per grid step
            in_specs=[
                pl.BlockSpec((None, c_pad, p), lambda i: (i, 0, 0)),
                pl.BlockSpec((n_convs, c_pad, NTAPS * c_pad), lambda i: (0, 0, 0)),
                pl.BlockSpec((n_convs, c_pad, 1), lambda i: (0, 0, 0)),
                pl.BlockSpec((1, p), lambda i: (0, 0)),
            ],
            out_specs=pl.BlockSpec((None, c_pad, p), lambda i: (i, 0, 0)),
            scratch_shapes=[pltpu.VMEM((NTAPS * c_pad, p), jnp.float32)],
        ),
        compiler_params=pltpu.CompilerParams(
            dimension_semantics=("parallel",),                   # batch axis -> megacore
        ),
        cost_estimate=pl.CostEstimate(flops=int(flops), transcendentals=0,
                                      bytes_accessed=int(bytes_accessed)),
    )(x_prep, w_stack, b_stack, mask)

    # Inverse layout transform: drop channel / spatial padding -> NCHW.
    y = out[:, :out_c, :hp * wp].reshape(n, out_c, hp, wp)
    return y[:, :, PAD:PAD + h, PAD:PAD + w]


def eblock_forward(params, x_nchw, *, stride=1):
    """EBlock forward.  x_nchw: (N, C_in, H, W) -> (N, C_out, H_out, W_out)."""
    w0, b0 = params["conv"]
    in_c, out_c = w0.shape[2], w0.shape[3]
    c_pad = _round_up(max(in_c, out_c), 8)

    res_wb = []
    for (w1, b1, w2, b2) in params["resblocks"]:
        res_wb += [(w1, b1), (w2, b2)]
    n_res = len(params["resblocks"])

    if stride == 1:
        # Whole EBlock (7 convs) in one fused pallas_call.
        return _run_chain(x_nchw, [(w0, b0)] + res_wb, c_pad=c_pad, head=True, n_res=n_res)

    # stride > 1: stride-s conv == stride-1 conv subsampled at (s*i, s*j).
    y = _run_chain(x_nchw, [(w0, b0)], c_pad=c_pad, head=True, n_res=0)
    y = y[:, :, ::stride, ::stride]
    return _run_chain(y, res_wb, c_pad=c_pad, head=False, n_res=n_res)


# ----------------------------- reference & init -----------------------------

def _conv_ref(x, w, b, stride):
    y = jax.lax.conv_general_dilated(
        x, w, window_strides=(stride, stride), padding=((PAD, PAD), (PAD, PAD)),
        dimension_numbers=("NHWC", "HWIO", "NHWC"),
        precision=jax.lax.Precision.HIGHEST)
    return y + b


def eblock_reference(params, x_nchw, *, stride):
    x = jnp.transpose(x_nchw, (0, 2, 3, 1))
    w0, b0 = params["conv"]
    x = jax.nn.relu(_conv_ref(x, w0, b0, stride))
    for (w1, b1, w2, b2) in params["resblocks"]:
        y = jax.nn.relu(_conv_ref(x, w1, b1, 1))
        x = _conv_ref(y, w2, b2, 1) + x
    return jnp.transpose(x, (0, 3, 1, 2))


def init_eblock_params(key, in_channels, out_channels):
    """kaiming-style init for ReLU convs, xavier-style for the last conv of each resblock
    (mirrors get_weight_init_fn in the PyTorch module)."""
    ks = jax.random.split(key, 14)

    def kaiming(k, ci, co):
        std = math.sqrt(2.0 / (ci * KSIZE * KSIZE))
        return std * jax.random.normal(k, (KSIZE, KSIZE, ci, co), jnp.float32)

    def xavier(k, ci, co):
        std = math.sqrt(2.0 / ((ci + co) * KSIZE * KSIZE))
        return std * jax.random.normal(k, (KSIZE, KSIZE, ci, co), jnp.float32)

    def bias(k, co):
        return 0.01 * jax.random.normal(k, (co,), jnp.float32)

    params = {"conv": (kaiming(ks[0], in_channels, out_channels), bias(ks[1], out_channels)),
              "resblocks": []}
    idx = 2
    for _ in range(3):
        w1 = kaiming(ks[idx], out_channels, out_channels)
        b1 = bias(ks[idx + 1], out_channels)
        w2 = xavier(ks[idx + 2], out_channels, out_channels)
        b2 = bias(ks[idx + 3], out_channels)
        params["resblocks"].append((w1, b1, w2, b2))
        idx += 4
    return params


if __name__ == "__main__":
    IN_C, OUT_C = 4, 8                 # small EBlock(in_channels=4, out_channels=8, ...)
    key = jax.random.PRNGKey(0)
    kp, kx = jax.random.split(key)
    params = init_eblock_params(kp, IN_C, OUT_C)
    x = jax.random.normal(kx, (2, IN_C, 16, 16), jnp.float32)   # NCHW, like the PyTorch module

    # stride = 1: whole EBlock fused into one pallas_call.
    fwd1 = jax.jit(partial(eblock_forward, stride=1))
    out1 = jax.block_until_ready(fwd1(params, x))
    ref1 = eblock_reference(params, x, stride=1)
    assert out1.shape == ref1.shape == (2, OUT_C, 16, 16)
    err1 = float(jnp.max(jnp.abs(out1 - ref1)))
    assert jnp.allclose(out1, ref1, atol=5e-3, rtol=5e-3), f"stride=1 mismatch, max err {err1}"

    # stride = 2: head conv fused call + wrapper subsample + fused resblocks.
    fwd2 = jax.jit(partial(eblock_forward, stride=2))
    out2 = jax.block_until_ready(fwd2(params, x))
    ref2 = eblock_reference(params, x, stride=2)
    assert out2.shape == ref2.shape == (2, OUT_C, 8, 8)
    err2 = float(jnp.max(jnp.abs(out2 - ref2)))
    assert jnp.allclose(out2, ref2, atol=5e-3, rtol=5e-3), f"stride=2 mismatch, max err {err2}"

    print("KERNEL_OK")
</pallas_src>

<mosaic_0001>
module attributes {stable_mosaic.version = 11 : i64} {
  func.func @_chain_kernel(%arg0: i32, %arg1: memref<1x8x512xf32, #tpu.memory_space<vmem>>, %arg2: memref<7x8x200xf32, #tpu.memory_space<vmem>>, %arg3: memref<7x8x1xf32, #tpu.memory_space<vmem>>, %arg4: memref<1x512xf32, #tpu.memory_space<vmem>>, %arg5: memref<1x8x512xf32, #tpu.memory_space<vmem>>, %arg6: memref<200x512xf32, #tpu.memory_space<vmem>>) attributes {dimension_semantics = [#tpu.dimension_semantics<parallel>], iteration_bounds = array<i64: 2>, scalar_prefetch = 0 : i64, scratch_operands = 1 : i64, tpu.core_type = #tpu.core_type<tc>, window_params = [{transform_indices = @transform_0, window_bounds = array<i64: 1, 8, 512>}, {pipeline_mode = #tpu.pipeline_mode<synchronous>, transform_indices = @transform_1, window_bounds = array<i64: 7, 8, 200>}, {pipeline_mode = #tpu.pipeline_mode<synchronous>, transform_indices = @transform_2, window_bounds = array<i64: 7, 8, 1>}, {pipeline_mode = #tpu.pipeline_mode<synchronous>, transform_indices = @transform_3, window_bounds = array<i64: 1, 512>}, {transform_indices = @transform_4, window_bounds = array<i64: 1, 8, 512>}]} {
    %c0 = arith.constant 0 : index
    %c0_0 = arith.constant 0 : index
    %0 = vector.load %arg4[%c0, %c0_0] : memref<1x512xf32, #tpu.memory_space<vmem>>, vector<1x512xf32>
    %c0_1 = arith.constant 0 : index
    %c0_2 = arith.constant 0 : index
    %c0_3 = arith.constant 0 : index
    %1 = vector.load %arg1[%c0_1, %c0_2, %c0_3] : memref<1x8x512xf32, #tpu.memory_space<vmem>>, vector<1x8x512xf32>
    %2 = vector.shape_cast %1 : vector<1x8x512xf32> to vector<8x512xf32>
    %c42_i32 = arith.constant 42 : i32
    %3 = tpu.dynamic_rotate %2 by %c42_i32 dim 1 : vector<8x512xf32>, i32 -> vector<8x512xf32>
    %c0_4 = arith.constant 0 : index
    %c0_5 = arith.constant 0 : index
    %4 = vector.load %arg6[%c0_4, %c0_5] : memref<200x512xf32, #tpu.memory_space<vmem>>, vector<8x512xf32>
    tpu.vector_store %arg6[%c0_4, %c0_5], %3 {strides = array<i32>} : memref<200x512xf32, #tpu.memory_space<vmem>>, vector<8x512xf32>,
    %c41_i32 = arith.constant 41 : i32
    %5 = tpu.dynamic_rotate %2 by %c41_i32 dim 1 : vector<8x512xf32>, i32 -> vector<8x512xf32>
    %c8 = arith.constant 8 : index
    %c0_6 = arith.constant 0 : index
    %6 = vector.load %arg6[%c8, %c0_6] : memref<200x512xf32, #tpu.memory_space<vmem>>, vector<8x512xf32>
    tpu.vector_store %arg6[%c8, %c0_6], %5 {strides = array<i32>} : memref<200x512xf32, #tpu.memory_space<vmem>>, vector<8x512xf32>,
    %c40_i32 = arith.constant 40 : i32
    %7 = tpu.dynamic_rotate %2 by %c40_i32 dim 1 : vector<8x512xf32>, i32 -> vector<8x512xf32>
    %c16 = arith.constant 16 : index
    %c0_7 = arith.constant 0 : index
    %8 = vector.load %arg6[%c16, %c0_7] : memref<200x512xf32, #tpu.memory_space<vmem>>, vector<8x512xf32>
    tpu.vector_store %arg6[%c16, %c0_7], %7 {strides = array<i32>} : memref<200x512xf32, #tpu.memory_space<vmem>>, vector<8x512xf32>,
    %c39_i32 = arith.constant 39 : i32
    %9 = tpu.dynamic_rotate %2 by %c39_i32 dim 1 : vector<8x512xf32>, i32 -> vector<8x512xf32>
    %c24 = arith.constant 24 : index
    %c0_8 = arith.constant 0 : index
    %10 = vector.load %arg6[%c24, %c0_8] : memref<200x512xf32, #tpu.memory_space<vmem>>, vector<8x512xf32>
    tpu.vector_store %arg6[%c24, %c0_8], %9 {strides = array<i32>} : memref<200x512xf32, #tpu.memory_space<vmem>>, vector<8x512xf32>,
    %c38_i32 = arith.constant 38 : i32
    %11 = tpu.dynamic_rotate %2 by %c38_i32 dim 1 : vector<8x512xf32>, i32 -> vector<8x512xf32>
    %c32 = arith.constant 32 : index
    %c0_9 = arith.constant 0 : index
    %12 = vector.load %arg6[%c32, %c0_9] : memref<200x512xf32, #tpu.memory_space<vmem>>, vector<8x512xf32>
    tpu.vector_store %arg6[%c32, %c0_9], %11 {strides = array<i32>} : memref<200x512xf32, #tpu.memory_space<vmem>>, vector<8x512xf32>,
    %c22_i32 = arith.constant 22 : i32
    %13 = tpu.dynamic_rotate %2 by %c22_i32 dim 1 : vector<8x512xf32>, i32 -> vector<8x512xf32>
    %c40 = arith.constant 40 : index
    %c0_10 = arith.constant 0 : index
    %14 = vector.load %arg6[%c40, %c0_10] : memref<200x512xf32, #tpu.memory_space<vmem>>, vector<8x512xf32>
    tpu.vector_store %arg6[%c40, %c0_10], %13 {strides = array<i32>} : memref<200x512xf32, #tpu.memory_space<vmem>>, vector<8x512xf32>,
    %c21_i32 = arith.constant 21 : i32
    %15 = tpu.dynamic_rotate %2 by %c21_i32 dim 1 : vector<8x512xf32>, i32 -> vector<8x512xf32>
    %c48 = arith.constant 48 : index
    %c0_11 = arith.constant 0 : index
    %16 = vector.load %arg6[%c48, %c0_11] : memref<200x512xf32, #tpu.memory_space<vmem>>, vector<8x512xf32>
    tpu.vector_store %arg6[%c48, %c0_11], %15 {strides = array<i32>} : memref<200x512xf32, #tpu.memory_space<vmem>>, vector<8x512xf32>,
    %c20_i32 = arith.constant 20 : i32
    %17 = tpu.dynamic_rotate %2 by %c20_i32 dim 1 : vector<8x512xf32>, i32 -> vector<8x512xf32>
    %c56 = arith.constant 56 : index
    %c0_12 = arith.constant 0 : index
    %18 = vector.load %arg6[%c56, %c0_12] : memref<200x512xf32, #tpu.memory_space<vmem>>, vector<8x512xf32>
    tpu.vector_store %arg6[%c56, %c0_12], %17 {strides = array<i32>} : memref<200x512xf32, #tpu.memory_space<vmem>>, vector<8x512xf32>,
    %c19_i32 = arith.constant 19 : i32
    %19 = tpu.dynamic_rotate %2 by %c19_i32 dim 1 : vector<8x512xf32>, i32 -> vector<8x512xf32>
    %c64 = arith.constant 64 : index
    %c0_13 = arith.constant 0 : index
    %20 = vector.load %arg6[%c64, %c0_13] : memref<200x512xf32, #tpu.memory_space<vmem>>, vector<8x512xf32>
    tpu.vector_store %arg6[%c64, %c0_13], %19 {strides = array<i32>} : memref<200x512xf32, #tpu.memory_space<vmem>>, vector<8x512xf32>,
    %c18_i32 = arith.constant 18 : i32
    %21 = tpu.dynamic_rotate %2 by %c18_i32 dim 1 : vector<8x512xf32>, i32 -> vector<8x512xf32>
    %c72 = arith.constant 72 : index
    %c0_14 = arith.constant 0 : index
    %22 = vector.load %arg6[%c72, %c0_14] : memref<200x512xf32, #tpu.memory_space<vmem>>, vector<8x512xf32>
    tpu.vector_store %arg6[%c72, %c0_14], %21 {strides = array<i32>} : memref<200x512xf32, #tpu.memory_space<vmem>>, vector<8x512xf32>,
    %c2_i32 = arith.constant 2 : i32
    %23 = tpu.dynamic_rotate %2 by %c2_i32 dim 1 : vector<8x512xf32>, i32 -> vector<8x512xf32>
    %c80 = arith.constant 80 : index
    %c0_15 = arith.constant 0 : index
    %24 = vector.load %arg6[%c80, %c0_15] : memref<200x512xf32, #tpu.memory_space<vmem>>, vector<8x512xf32>
    tpu.vector_store %arg6[%c80, %c0_15], %23 {strides = array<i32>} : memref<200x512xf32, #tpu.memory_space<vmem>>, vector<8x512xf32>,
    %c1_i32 = arith.constant 1 : i32
    %25 = tpu.dynamic_rotate %2 by %c1_i32 dim 1 : vector<8x512xf32>, i32 -> vector<8x512xf32>
    %c88 = arith.constant 88 : index
    %c0_16 = arith.constant 0 : index
    %26 = vector.load %arg6[%c88, %c0_16] : memref<200x512xf32, #tpu.memory_space<vmem>>, vector<8x512xf32>
    tpu.vector_store %arg6[%c88, %c0_16], %25 {strides = array<i32>} : memref<200x512xf32, #tpu.memory_space<vmem>>, vector<8x512xf32>,
    %c96 = arith.constant 96 : index
    %c0_17 = arith.constant 0 : index
    %27 = vector.load %arg6[%c96, %c0_17] : memref<200x512xf32, #tpu.memory_space<vmem>>, vector<8x512xf32>
    tpu.vector_store %arg6[%c96, %c0_17], %2 {strides = array<i32>} : memref<200x512xf32, #tpu.memory_space<vmem>>, vector<8x512xf32>,
    %c511_i32 = arith.constant 511 : i32
    %28 = tpu.dynamic_rotate %2 by %c511_i32 dim 1 : vector<8x512xf32>, i32 -> vector<8x512xf32>
    %c104 = arith.constant 104 : index
    %c0_18 = arith.constant 0 : index
    %29 = vector.load %arg6[%c104, %c0_18] : memref<200x512xf32, #tpu.memory_space<vmem>>, vector<8x512xf32>
    tpu.vector_store %arg6[%c104, %c0_18], %28 {strides = array<i32>} : memref<200x512xf32, #tpu.memory_space<vmem>>, vector<8x512xf32>,
    %c510_i32 = arith.constant 510 : i32
    %30 = tpu.dynamic_rotate %2 by %c510_i32 dim 1 : vector<8x512xf32>, i32 -> vector<8x512xf32>
    %c112 = arith.constant 112 : index
    %c0_19 = arith.constant 0 : index
    %31 = vector.load %arg6[%c112, %c0_19] : memref<200x512xf32, #tpu.memory_space<vmem>>, vector<8x512xf32>
    tpu.vector_store %arg6[%c112, %c0_19], %30 {strides = array<i32>} : memref<200x512xf32, #tpu.memory_space<vmem>>, vector<8x512xf32>,
    %c494_i32 = arith.constant 494 : i32
    %32 = tpu.dynamic_rotate %2 by %c494_i32 dim 1 : vector<8x512xf32>, i32 -> vector<8x512xf32>
    %c120 = arith.constant 120 : index
    %c0_20 = arith.constant 0 : index
    %33 = vector.load %arg6[%c120, %c0_20] : memref<200x512xf32, #tpu.memory_space<vmem>>, vector<8x512xf32>
    tpu.vector_store %arg6[%c120, %c0_20], %32 {strides = array<i32>} : memref<200x512xf32, #tpu.memory_space<vmem>>, vector<8x512xf32>,
    %c493_i32 = arith.constant 493 : i32
    %34 = tpu.dynamic_rotate %2 by %c493_i32 dim 1 : vector<8x512xf32>, i32 -> vector<8x512xf32>
    %c128 = arith.constant 128 : index
    %c0_21 = arith.constant 0 : index
    %35 = vector.load %arg6[%c128, %c0_21] : memref<200x512xf32, #tpu.memory_space<vmem>>, vector<8x512xf32>
    tpu.vector_store %arg6[%c128, %c0_21], %34 {strides = array<i32>} : memref<200x512xf32, #tpu.memory_space<vmem>>, vector<8x512xf32>,
    %c492_i32 = arith.constant 492 : i32
    %36 = tpu.dynamic_rotate %2 by %c492_i32 dim 1 : vector<8x512xf32>, i32 -> vector<8x512xf32>
    %c136 = arith.constant 136 : index
    %c0_22 = arith.constant 0 : index
    %37 = vector.load %arg6[%c136, %c0_22] : memref<200x512xf32, #tpu.memory_space<vmem>>, vector<8x512xf32>
    tpu.vector_store %arg6[%c136, %c0_22], %36 {strides = array<i32>} : memref<200x512xf32, #tpu.memory_space<vmem>>, vector<8x512xf32>,
    %c491_i32 = arith.constant 491 : i32
    %38 = tpu.dynamic_rotate %2 by %c491_i32 dim 1 : vector<8x512xf32>, i32 -> vector<8x512xf32>
    %c144 = arith.constant 144 : index
    %c0_23 = arith.constant 0 : index
    %39 = vector.load %arg6[%c144, %c0_23] : memref<200x512xf32, #tpu.memory_space<vmem>>, vector<8x512xf32>
    tpu.vector_store %arg6[%c144, %c0_23], %38 {strides = array<i32>} : memref<200x512xf32, #tpu.memory_space<vmem>>, vector<8x512xf32>,
    %c490_i32 = arith.constant 490 : i32
    %40 = tpu.dynamic_rotate %2 by %c490_i32 dim 1 : vector<8x512xf32>, i32 -> vector<8x512xf32>
    %c152 = arith.constant 152 : index
    %c0_24 = arith.constant 0 : index
    %41 = vector.load %arg6[%c152, %c0_24] : memref<200x512xf32, #tpu.memory_space<vmem>>, vector<8x512xf32>
    tpu.vector_store %arg6[%c152, %c0_24], %40 {strides = array<i32>} : memref<200x512xf32, #tpu.memory_space<vmem>>, vector<8x512xf32>,
    %c474_i32 = arith.constant 474 : i32
    %42 = tpu.dynamic_rotate %2 by %c474_i32 dim 1 : vector<8x512xf32>, i32 -> vector<8x512xf32>
    %c160 = arith.constant 160 : index
    %c0_25 = arith.constant 0 : index
    %43 = vector.load %arg6[%c160, %c0_25] : memref<200x512xf32, #tpu.memory_space<vmem>>, vector<8x512xf32>
    tpu.vector_store %arg6[%c160, %c0_25], %42 {strides = array<i32>} : memref<200x512xf32, #tpu.memory_space<vmem>>, vector<8x512xf32>,
    %c473_i32 = arith.constant 473 : i32
    %44 = tpu.dynamic_rotate %2 by %c473_i32 dim 1 : vector<8x512xf32>, i32 -> vector<8x512xf32>
    %c168 = arith.constant 168 : index
    %c0_26 = arith.constant 0 : index
    %45 = vector.load %arg6[%c168, %c0_26] : memref<200x512xf32, #tpu.memory_space<vmem>>, vector<8x512xf32>
    tpu.vector_store %arg6[%c168, %c0_26], %44 {strides = array<i32>} : memref<200x512xf32, #tpu.memory_space<vmem>>, vector<8x512xf32>,
    %c472_i32 = arith.constant 472 : i32
    %46 = tpu.dynamic_rotate %2 by %c472_i32 dim 1 : vector<8x512xf32>, i32 -> vector<8x512xf32>
    %c176 = arith.constant 176 : index
    %c0_27 = arith.constant 0 : index
    %47 = vector.load %arg6[%c176, %c0_27] : memref<200x512xf32, #tpu.memory_space<vmem>>, vector<8x512xf32>
    tpu.vector_store %arg6[%c176, %c0_27], %46 {strides = array<i32>} : memref<200x512xf32, #tpu.memory_space<vmem>>, vector<8x512xf32>,
    %c471_i32 = arith.constant 471 : i32
    %48 = tpu.dynamic_rotate %2 by %c471_i32 dim 1 : vector<8x512xf32>, i32 -> vector<8x512xf32>
    %c184 = arith.constant 184 : index
    %c0_28 = arith.constant 0 : index
    %49 = vector.load %arg6[%c184, %c0_28] : memref<200x512xf32, #tpu.memory_space<vmem>>, vector<8x512xf32>
    tpu.vector_store %arg6[%c184, %c0_28], %48 {strides = array<i32>} : memref<200x512xf32, #tpu.memory_space<vmem>>, vector<8x512xf32>,
    %c470_i32 = arith.constant 470 : i32
    %50 = tpu.dynamic_rotate %2 by %c470_i32 dim 1 : vector<8x512xf32>, i32 -> vector<8x512xf32>
    %c192 = arith.constant 192 : index
    %c0_29 = arith.constant 0 : index
    %51 = vector.load %arg6[%c192, %c0_29] : memref<200x512xf32, #tpu.memory_space<vmem>>, vector<8x512xf32>
    tpu.vector_store %arg6[%c192, %c0_29], %50 {strides = array<i32>} : memref<200x512xf32, #tpu.memory_space<vmem>>, vector<8x512xf32>,
    %c0_30 = arith.constant 0 : index
    %c0_31 = arith.constant 0 : index
    %c0_32 = arith.constant 0 : index
    %52 = vector.load %arg2[%c0_30, %c0_31, %c0_32] : memref<7x8x200xf32, #tpu.memory_space<vmem>>, vector<1x8x200xf32>
    %53 = vector.shape_cast %52 : vector<1x8x200xf32> to vector<8x200xf32>
    %c0_33 = arith.constant 0 : index
    %c0_34 = arith.constant 0 : index
    %54 = vector.load %arg6[%c0_33, %c0_34] : memref<200x512xf32, #tpu.memory_space<vmem>>, vector<200x512xf32>
    %cst = arith.constant dense<0.000000e+00> : vector<8x512xf32>
    %55 = tpu.matmul %53, %54, %cst {dimension_numbers = #tpu.dot_dimension_numbers<[1], [0], [0], [1], [0, 0, 1, 1], [], []>} : vector<8x200xf32>, vector<200x512xf32>, vector<8x512xf32> -> vector<8x512xf32>
    %c0_35 = arith.constant 0 : index
    %c0_36 = arith.constant 0 : index
    %c0_37 = arith.constant 0 : index
    %56 = vector.load %arg3[%c0_35, %c0_36, %c0_37] : memref<7x8x1xf32, #tpu.memory_space<vmem>>, vector<1x8x1xf32>
    %57 = vector.shape_cast %56 : vector<1x8x1xf32> to vector<8x1xf32>
    %58 = vector.broadcast %57 : vector<8x1xf32> to vector<8x512xf32>
    %59 = arith.addf %55, %58 : vector<8x512xf32>
    %cst_38 = arith.constant 0.000000e+00 : f32
    %60 = vector.broadcast %cst_38 : f32 to vector<8x512xf32>
    %61 = arith.maximumf %59, %60 : vector<8x512xf32>
    %62 = vector.broadcast %0 : vector<1x512xf32> to vector<8x512xf32>
    %63 = arith.mulf %61, %62 : vector<8x512xf32>
    %c42_i32_39 = arith.constant 42 : i32
    %64 = tpu.dynamic_rotate %63 by %c42_i32_39 dim 1 : vector<8x512xf32>, i32 -> vector<8x512xf32>
    %c0_40 = arith.constant 0 : index
    %c0_41 = arith.constant 0 : index
    %65 = vector.load %arg6[%c0_40, %c0_41] : memref<200x512xf32, #tpu.memory_space<vmem>>, vector<8x512xf32>
    tpu.vector_store %arg6[%c0_40, %c0_41], %64 {strides = array<i32>} : memref<200x512xf32, #tpu.memory_space<vmem>>, vector<8x512xf32>,
    %c41_i32_42 = arith.constant 41 : i32
    %66 = tpu.dynamic_rotate %63 by %c41_i32_42 dim 1 : vector<8x512xf32>, i32 -> vector<8x512xf32>
    %c8_43 = arith.constant 8 : index
    %c0_44 = arith.constant 0 : index
    %67 = vector.load %arg6[%c8_43, %c0_44] : memref<200x512xf32, #tpu.memory_space<vmem>>, vector<8x512xf32>
    tpu.vector_store %arg6[%c8_43, %c0_44], %66 {strides = array<i32>} : memref<200x512xf32, #tpu.memory_space<vmem>>, vector<8x512xf32>,
    %c40_i32_45 = arith.constant 40 : i32
    %68 = tpu.dynamic_rotate %63 by %c40_i32_45 dim 1 : vector<8x512xf32>, i32 -> vector<8x512xf32>
    %c16_46 = arith.constant 16 : index
    %c0_47 = arith.constant 0 : index
    %69 = vector.load %arg6[%c16_46, %c0_47] : memref<200x512xf32, #tpu.memory_space<vmem>>, vector<8x512xf32>
    tpu.vector_store %arg6[%c16_46, %c0_47], %68 {strides = array<i32>} : memref<200x512xf32, #tpu.memory_space<vmem>>, vector<8x512xf32>,
    %c39_i32_48 = arith.constant 39 : i32
    %70 = tpu.dynamic_rotate %63 by %c39_i32_48 dim 1 : vector<8x512xf32>, i32 -> vector<8x512xf32>
    %c24_49 = arith.constant 24 : index
    %c0_50 = arith.constant 0 : index
    %71 = vector.load %arg6[%c24_49, %c0_50] : memref<200x512xf32, #tpu.memory_space<vmem>>, vector<8x512xf32>
    tpu.vector_store %arg6[%c24_49, %c0_50], %70 {strides = array<i32>} : memref<200x512xf32, #tpu.memory_space<vmem>>, vector<8x512xf32>,
    %c38_i32_51 = arith.constant 38 : i32
    %72 = tpu.dynamic_rotate %63 by %c38_i32_51 dim 1 : vector<8x512xf32>, i32 -> vector<8x512xf32>
    %c32_52 = arith.constant 32 : index
    %c0_53 = arith.constant 0 : index
    %73 = vector.load %arg6[%c32_52, %c0_53] : memref<200x512xf32, #tpu.memory_space<vmem>>, vector<8x512xf32>
    tpu.vector_store %arg6[%c32_52, %c0_53], %72 {strides = array<i32>} : memref<200x512xf32, #tpu.memory_space<vmem>>, vector<8x512xf32>,
    %c22_i32_54 = arith.constant 22 : i32
    %74 = tpu.dynamic_rotate %63 by %c22_i32_54 dim 1 : vector<8x512xf32>, i32 -> vector<8x512xf32>
    %c40_55 = arith.constant 40 : index
    %c0_56 = arith.constant 0 : index
    %75 = vector.load %arg6[%c40_55, %c0_56] : memref<200x512xf32, #tpu.memory_space<vmem>>, vector<8x512xf32>
    tpu.vector_store %arg6[%c40_55, %c0_56], %74 {strides = array<i32>} : memref<200x512xf32, #tpu.memory_space<vmem>>, vector<8x512xf32>,
    %c21_i32_57 = arith.constant 21 : i32
    %76 = tpu.dynamic_rotate %63 by %c21_i32_57 dim 1 : vector<8x512xf32>, i32 -> vector<8x512xf32>
    %c48_58 = arith.constant 48 : index
    %c0_59 = arith.constant 0 : index
    %77 = vector.load %arg6[%c48_58, %c0_59] : memref<200x512xf32, #tpu.memory_space<vmem>>, vector<8x512xf32>
    tpu.vector_store %arg6[%c48_58, %c0_59], %76 {strides = array<i32>} : memref<200x512xf32, #tpu.memory_space<vmem>>, vector<8x512xf32>,
    %c20_i32_60 = arith.constant 20 : i32
    %78 = tpu.dynamic_rotate %63 by %c20_i32_60 dim 1 : vector<8x512xf32>, i32 -> vector<8x512xf32>
    %c56_61 = arith.constant 56 : index
    %c0_62 = arith.constant 0 : index
    %79 = vector.load %arg6[%c56_61, %c0_62] : memref<200x512xf32, #tpu.memory_space<vmem>>, vector<8x512xf32>
    tpu.vector_store %arg6[%c56_61, %c0_62], %78 {strides = array<i32>} : memref<200x512xf32, #tpu.memory_space<vmem>>, vector<8x512xf32>,
    %c19_i32_63 = arith.constant 19 : i32
    %80 = tpu.dynamic_rotate %63 by %c19_i32_63 dim 1 : vector<8x512xf32>, i32 -> vector<8x512xf32>
    %c64_64 = arith.constant 64 : index
    %c0_65 = arith.constant 0 : index
    %81 = vector.load %arg6[%c64_64, %c0_65] : memref<200x512xf32, #tpu.memory_space<vmem>>, vector<8x512xf32>
    tpu.vector_store %arg6[%c64_64, %c0_65], %80 {strides = array<i32>} : memref<200x512xf32, #tpu.memory_space<vmem>>, vector<8x512xf32>,
    %c18_i32_66 = arith.constant 18 : i32
    %82 = tpu.dynamic_rotate %63 by %c18_i32_66 dim 1 : vector<8x512xf32>, i32 -> vector<8x512xf32>
    %c72_67 = arith.constant 72 : index
    %c0_68 = arith.constant 0 : index
    %83 = vector.load %arg6[%c72_67, %c0_68] : memref<200x512xf32, #tpu.memory_space<vmem>>, vector<8x512xf32>
    tpu.vector_store %arg6[%c72_67, %c0_68], %82 {strides = array<i32>} : memref<200x512xf32, #tpu.memory_space<vmem>>, vector<8x512xf32>,
    %c2_i32_69 = arith.constant 2 : i32
    %84 = tpu.dynamic_rotate %63 by %c2_i32_69 dim 1 : vector<8x512xf32>, i32 -> vector<8x512xf32>
    %c80_70 = arith.constant 80 : index
    %c0_71 = arith.constant 0 : index
    %85 = vector.load %arg6[%c80_70, %c0_71] : memref<200x512xf32, #tpu.memory_space<vmem>>, vector<8x512xf32>
    tpu.vector_store %arg6[%c80_70, %c0_71], %84 {strides = array<i32>} : memref<200x512xf32, #tpu.memory_space<vmem>>, vector<8x512xf32>,
    %c1_i32_72 = arith.constant 1 : i32
    %86 = tpu.dynamic_rotate %63 by %c1_i32_72 dim 1 : vector<8x512xf32>, i32 -> vector<8x512xf32>
    %c88_73 = arith.constant 88 : index
    %c0_74 = arith.constant 0 : index
    %87 = vector.load %arg6[%c88_73, %c0_74] : memref<200x512xf32, #tpu.memory_space<vmem>>, vector<8x512xf32>
    tpu.vector_store %arg6[%c88_73, %c0_74], %86 {strides = array<i32>} : memref<200x512xf32, #tpu.memory_space<vmem>>, vector<8x512xf32>,
    %c96_75 = arith.constant 96 : index
    %c0_76 = arith.constant 0 : index
    %88 = vector.load %arg6[%c96_75, %c0_76] : memref<200x512xf32, #tpu.memory_space<vmem>>, vector<8x512xf32>
    tpu.vector_store %arg6[%c96_75, %c0_76], %63 {strides = array<i32>} : memref<200x512xf32, #tpu.memory_space<vmem>>, vector<8x512xf32>,
    %c511_i32_77 = arith.constant 511 : i32
    %89 = tpu.dynamic_rotate %63 by %c511_i32_77 dim 1 : vector<8x512xf32>, i32 -> vector<8x512xf32>
    %c104_78 = arith.constant 104 : index
    %c0_79 = arith.constant 0 : index
    %90 = vector.load %arg6[%c104_78, %c0_79] : memref<200x512xf32, #tpu.memory_space<vmem>>, vector<8x512xf32>
    tpu.vector_store %arg6[%c104_78, %c0_79], %89 {strides = array<i32>} : memref<200x512xf32, #tpu.memory_space<vmem>>, vector<8x512xf32>,
    %c510_i32_80 = arith.constant 510 : i32
    %91 = tpu.dynamic_rotate %63 by %c510_i32_80 dim 1 : vector<8x512xf32>, i32 -> vector<8x512xf32>
    %c112_81 = arith.constant 112 : index
    %c0_82 = arith.constant 0 : index
    %92 = vector.load %arg6[%c112_81, %c0_82] : memref<200x512xf32, #tpu.memory_space<vmem>>, vector<8x512xf32>
    tpu.vector_store %arg6[%c112_81, %c0_82], %91 {strides = array<i32>} : memref<200x512xf32, #tpu.memory_space<vmem>>, vector<8x512xf32>,
    %c494_i32_83 = arith.constant 494 : i32
    %93 = tpu.dynamic_rotate %63 by %c494_i32_83 dim 1 : vector<8x512xf32>, i32 -> vector<8x512xf32>
    %c120_84 = arith.constant 120 : index
    %c0_85 = arith.constant 0 : index
    %94 = vector.load %arg6[%c120_84, %c0_85] : memref<200x512xf32, #tpu.memory_space<vmem>>, vector<8x512xf32>
    tpu.vector_store %arg6[%c120_84, %c0_85], %93 {strides = array<i32>} : memref<200x512xf32, #tpu.memory_space<vmem>>, vector<8x512xf32>,
    %c493_i32_86 = arith.constant 493 : i32
    %95 = tpu.dynamic_rotate %63 by %c493_i32_86 dim 1 : vector<8x512xf32>, i32 -> vector<8x512xf32>
    %c128_87 = arith.constant 128 : index
    %c0_88 = arith.constant 0 : index
    %96 = vector.load %arg6[%c128_87, %c0_88] : memref<200x512xf32, #tpu.memory_space<vmem>>, vector<8x512xf32>
    tpu.vector_store %arg6[%c128_87, %c0_88], %95 {strides = array<i32>} : memref<200x512xf32, #tpu.memory_space<vmem>>, vector<8x512xf32>,
    %c492_i32_89 = arith.constant 492 : i32
    %97 = tpu.dynamic_rotate %63 by %c492_i32_89 dim 1 : vector<8x512xf32>, i32 -> vector<8x512xf32>
    %c136_90 = arith.constant 136 : index
    %c0_91 = arith.constant 0 : index
    %98 = vector.load %arg6[%c136_90, %c0_91] : memref<200x512xf32, #tpu.memory_space<vmem>>, vector<8x512xf32>
    tpu.vector_store %arg6[%c136_90, %c0_91], %97 {strides = array<i32>} : memref<200x512xf32, #tpu.memory_space<vmem>>, vector<8x512xf32>,
    %c491_i32_92 = arith.constant 491 : i32
    %99 = tpu.dynamic_rotate %63 by %c491_i32_92 dim 1 : vector<8x512xf32>, i32 -> vector<8x512xf32>
    %c144_93 = arith.constant 144 : index
    %c0_94 = arith.constant 0 : index
    %100 = vector.load %arg6[%c144_93, %c0_94] : memref<200x512xf32, #tpu.memory_space<vmem>>, vector<8x512xf32>
    tpu.vector_store %arg6[%c144_93, %c0_94], %99 {strides = array<i32>} : memref<200x512xf32, #tpu.memory_space<vmem>>, vector<8x512xf32>,
    %c490_i32_95 = arith.constant 490 : i32
    %101 = tpu.dynamic_rotate %63 by %c490_i32_95 dim 1 : vector<8x512xf32>, i32 -> vector<8x512xf32>
    %c152_96 = arith.constant 152 : index
    %c0_97 = arith.constant 0 : index
    %102 = vector.load %arg6[%c152_96, %c0_97] : memref<200x512xf32, #tpu.memory_space<vmem>>, vector<8x512xf32>
    tpu.vector_store %arg6[%c152_96, %c0_97], %101 {strides = array<i32>} : memref<200x512xf32, #tpu.memory_space<vmem>>, vector<8x512xf32>,
    %c474_i32_98 = arith.constant 474 : i32
    %103 = tpu.dynamic_rotate %63 by %c474_i32_98 dim 1 : vector<8x512xf32>, i32 -> vector<8x512xf32>
    %c160_99 = arith.constant 160 : index
    %c0_100 = arith.constant 0 : index
    %104 = vector.load %arg6[%c160_99, %c0_100] : memref<200x512xf32, #tpu.memory_space<vmem>>, vector<8x512xf32>
    tpu.vector_store %arg6[%c160_99, %c0_100], %103 {strides = array<i32>} : memref<200x512xf32, #tpu.memory_space<vmem>>, vector<8x512xf32>,
    %c473_i32_101 = arith.constant 473 : i32
    %105 = tpu.dynamic_rotate %63 by %c473_i32_101 dim 1 : vector<8x512xf32>, i32 -> vector<8x512xf32>
    %c168_102 = arith.constant 168 : index
    %c0_103 = arith.constant 0 : index
    %106 = vector.load %arg6[%c168_102, %c0_103] : memref<200x512xf32, #tpu.memory_space<vmem>>, vector<8x512xf32>
    tpu.vector_store %arg6[%c168_102, %c0_103], %105 {strides = array<i32>} : memref<200x512xf32, #tpu.memory_space<vmem>>, vector<8x512xf32>,
    %c472_i32_104 = arith.constant 472 : i32
    %107 = tpu.dynamic_rotate %63 by %c472_i32_104 dim 1 : vector<8x512xf32>, i32 -> vector<8x512xf32>
    %c176_105 = arith.constant 176 : index
    %c0_106 = arith.constant 0 : index
    %108 = vector.load %arg6[%c176_105, %c0_106] : memref<200x512xf32, #tpu.memory_space<vmem>>, vector<8x512xf32>
    tpu.vector_store %arg6[%c176_105, %c0_106], %107 {strides = array<i32>} : memref<200x512xf32, #tpu.memory_space<vmem>>, vector<8x512xf32>,
    %c471_i32_107 = arith.constant 471 : i32
    %109 = tpu.dynamic_rotate %63 by %c471_i32_107 dim 1 : vector<8x512xf32>, i32 -> vector<8x512xf32>
    %c184_108 = arith.constant 184 : index
    %c0_109 = arith.constant 0 : index
    %110 = vector.load %arg6[%c184_108, %c0_109] : memref<200x512xf32, #tpu.memory_space<vmem>>, vector<8x512xf32>
    tpu.vector_store %arg6[%c184_108, %c0_109], %109 {strides = array<i32>} : memref<200x512xf32, #tpu.memory_space<vmem>>, vector<8x512xf32>,
    %c470_i32_110 = arith.constant 470 : i32
    %111 = tpu.dynamic_rotate %63 by %c470_i32_110 dim 1 : vector<8x512xf32>, i32 -> vector<8x512xf32>
    %c192_111 = arith.constant 192 : index
    %c0_112 = arith.constant 0 : index
    %112 = vector.load %arg6[%c192_111, %c0_112] : memref<200x512xf32, #tpu.memory_space<vmem>>, vector<8x512xf32>
    tpu.vector_store %arg6[%c192_111, %c0_112], %111 {strides = array<i32>} : memref<200x512xf32, #tpu.memory_space<vmem>>, vector<8x512xf32>,
    %c1 = arith.constant 1 : index
    %c0_113 = arith.constant 0 : index
    %c0_114 = arith.constant 0 : index
    %113 = vector.load %arg2[%c1, %c0_113, %c0_114] : memref<7x8x200xf32, #tpu.memory_space<vmem>>, vector<1x8x200xf32>
    %114 = vector.shape_cast %113 : vector<1x8x200xf32> to vector<8x200xf32>
    %c0_115 = arith.constant 0 : index
    %c0_116 = arith.constant 0 : index
    %115 = vector.load %arg6[%c0_115, %c0_116] : memref<200x512xf32, #tpu.memory_space<vmem>>, vector<200x512xf32>
    %cst_117 = arith.constant dense<0.000000e+00> : vector<8x512xf32>
    %116 = tpu.matmul %114, %115, %cst_117 {dimension_numbers = #tpu.dot_dimension_numbers<[1], [0], [0], [1], [0, 0, 1, 1], [], []>} : vector<8x200xf32>, vector<200x512xf32>, vector<8x512xf32> -> vector<8x512xf32>
    %c1_118 = arith.constant 1 : index
    %c0_119 = arith.constant 0 : index
    %c0_120 = arith.constant 0 : index
    %117 = vector.load %arg3[%c1_118, %c0_119, %c0_120] : memref<7x8x1xf32, #tpu.memory_space<vmem>>, vector<1x8x1xf32>
    %118 = vector.shape_cast %117 : vector<1x8x1xf32> to vector<8x1xf32>
    %119 = vector.broadcast %118 : vector<8x1xf32> to vector<8x512xf32>
    %120 = arith.addf %116, %119 : vector<8x512xf32>
    %cst_121 = arith.constant 0.000000e+00 : f32
    %121 = vector.broadcast %cst_121 : f32 to vector<8x512xf32>
    %122 = arith.maximumf %120, %121 : vector<8x512xf32>
    %123 = vector.broadcast %0 : vector<1x512xf32> to vector<8x512xf32>
    %124 = arith.mulf %122, %123 : vector<8x512xf32>
    %c42_i32_122 = arith.constant 42 : i32
    %125 = tpu.dynamic_rotate %124 by %c42_i32_122 dim 1 : vector<8x512xf32>, i32 -> vector<8x512xf32>
    %c0_123 = arith.constant 0 : index
    %c0_124 = arith.constant 0 : index
    %126 = vector.load %arg6[%c0_123, %c0_124] : memref<200x512xf32, #tpu.memory_space<vmem>>, vector<8x512xf32>
    tpu.vector_store %arg6[%c0_123, %c0_124], %125 {strides = array<i32>} : memref<200x512xf32, #tpu.memory_space<vmem>>, vector<8x512xf32>,
    %c41_i32_125 = arith.constant 41 : i32
    %127 = tpu.dynamic_rotate %124 by %c41_i32_125 dim 1 : vector<8x512xf32>, i32 -> vector<8x512xf32>
    %c8_126 = arith.constant 8 : index
    %c0_127 = arith.constant 0 : index
    %128 = vector.load %arg6[%c8_126, %c0_127] : memref<200x512xf32, #tpu.memory_space<vmem>>, vector<8x512xf32>
    tpu.vector_store %arg6[%c8_126, %c0_127], %127 {strides = array<i32>} : memref<200x512xf32, #tpu.memory_space<vmem>>, vector<8x512xf32>,
    %c40_i32_128 = arith.constant 40 : i32
    %129 = tpu.dynamic_rotate %124 by %c40_i32_128 dim 1 : vector<8x512xf32>, i32 -> vector<8x512xf32>
    %c16_129 = arith.constant 16 : index
    %c0_130 = arith.constant 0 : index
    %130 = vector.load %arg6[%c16_129, %c0_130] : memref<200x512xf32, #tpu.memory_space<vmem>>, vector<8x512xf32>
    tpu.vector_store %arg6[%c16_129, %c0_130], %129 {strides = array<i32>} : memref<200x512xf32, #tpu.memory_space<vmem>>, vector<8x512xf32>,
    %c39_i32_131 = arith.constant 39 : i32
    %131 = tpu.dynamic_rotate %124 by %c39_i32_131 dim 1 : vector<8x512xf32>, i32 -> vector<8x512xf32>
    %c24_132 = arith.constant 24 : index
    %c0_133 = arith.constant 0 : index
    %132 = vector.load %arg6[%c24_132, %c0_133] : memref<200x512xf32, #tpu.memory_space<vmem>>, vector<8x512xf32>
    tpu.vector_store %arg6[%c24_132, %c0_133], %131 {strides = array<i32>} : memref<200x512xf32, #tpu.memory_space<vmem>>, vector<8x512xf32>,
    %c38_i32_134 = arith.constant 38 : i32
    %133 = tpu.dynamic_rotate %124 by %c38_i32_134 dim 1 : vector<8x512xf32>, i32 -> vector<8x512xf32>
    %c32_135 = arith.constant 32 : index
    %c0_136 = arith.constant 0 : index
    %134 = vector.load %arg6[%c32_135, %c0_136] : memref<200x512xf32, #tpu.memory_space<vmem>>, vector<8x512xf32>
    tpu.vector_store %arg6[%c32_135, %c0_136], %133 {strides = array<i32>} : memref<200x512xf32, #tpu.memory_space<vmem>>, vector<8x512xf32>,
    %c22_i32_137 = arith.constant 22 : i32
    %135 = tpu.dynamic_rotate %124 by %c22_i32_137 dim 1 : vector<8x512xf32>, i32 -> vector<8x512xf32>
    %c40_138 = arith.constant 40 : index
    %c0_139 = arith.constant 0 : index
    %136 = vector.load %arg6[%c40_138, %c0_139] : memref<200x512xf32, #tpu.memory_space<vmem>>, vector<8x512xf32>
    tpu.vector_store %arg6[%c40_138, %c0_139], %135 {strides = array<i32>} : memref<200x512xf32, #tpu.memory_space<vmem>>, vector<8x512xf32>,
    %c21_i32_140 = arith.constant 21 : i32
    %137 = tpu.dynamic_rotate %124 by %c21_i32_140 dim 1 : vector<8x512xf32>, i32 -> vector<8x512xf32>
    %c48_141 = arith.constant 48 : index
    %c0_142 = arith.constant 0 : index
    %138 = vector.load %arg6[%c48_141, %c0_142] : memref<200x512xf32, #tpu.memory_space<vmem>>, vector<8x512xf32>
    tpu.vector_store %arg6[%c48_141, %c0_142], %137 {strides = array<i32>} : memref<200x512xf32, #tpu.memory_space<vmem>>, vector<8x512xf32>,
    %c20_i32_143 = arith.constant 20 : i32
    %139 = tpu.dynamic_rotate %124 by %c20_i32_143 dim 1 : vector<8x512xf32>, i32 -> vector<8x512xf32>
    %c56_144 = arith.constant 56 : index
    %c0_145 = arith.constant 0 : index
    %140 = vector.load %arg6[%c56_144, %c0_145] : memref<200x512xf32, #tpu.memory_space<vmem>>, vector<8x512xf32>
    tpu.vector_store %arg6[%c56_144, %c0_145], %139 {strides = array<i32>} : memref<200x512xf32, #tpu.memory_space<vmem>>, vector<8x512xf32>,
    %c19_i32_146 = arith.constant 19 : i32
    %141 = tpu.dynamic_rotate %124 by %c19_i32_146 dim 1 : vector<8x512xf32>, i32 -> vector<8x512xf32>
    %c64_147 = arith.constant 64 : index
    %c0_148 = arith.constant 0 : index
    %142 = vector.load %arg6[%c64_147, %c0_148] : memref<200x512xf32, #tpu.memory_space<vmem>>, vector<8x512xf32>
    tpu.vector_store %arg6[%c64_147, %c0_148], %141 {strides = array<i32>} : memref<200x512xf32, #tpu.memory_space<vmem>>, vector<8x512xf32>,
    %c18_i32_149 = arith.constant 18 : i32
    %143 = tpu.dynamic_rotate %124 by %c18_i32_149 dim 1 : vector<8x512xf32>, i32 -> vector<8x512xf32>
    %c72_150 = arith.constant 72 : index
    %c0_151 = arith.constant 0 : index
    %144 = vector.load %arg6[%c72_150, %c0_151] : memref<200x512xf32, #tpu.memory_space<vmem>>, vector<8x512xf32>
    tpu.vector_store %arg6[%c72_150, %c0_151], %143 {strides = array<i32>} : memref<200x512xf32, #tpu.memory_space<vmem>>, vector<8x512xf32>,
    %c2_i32_152 = arith.constant 2 : i32
    %145 = tpu.dynamic_rotate %124 by %c2_i32_152 dim 1 : vector<8x512xf32>, i32 -> vector<8x512xf32>
    %c80_153 = arith.constant 80 : index
    %c0_154 = arith.constant 0 : index
    %146 = vector.load %arg6[%c80_153, %c0_154] : memref<200x512xf32, #tpu.memory_space<vmem>>, vector<8x512xf32>
    tpu.vector_store %arg6[%c80_153, %c0_154], %145 {strides = array<i32>} : memref<200x512xf32, #tpu.memory_space<vmem>>, vector<8x512xf32>,
    %c1_i32_155 = arith.constant 1 : i32
    %147 = tpu.dynamic_rotate %124 by %c1_i32_155 dim 1 : vector<8x512xf32>, i32 -> vector<8x512xf32>
    %c88_156 = arith.constant 88 : index
    %c0_157 = arith.constant 0 : index
    %148 = vector.load %arg6[%c88_156, %c0_157] : memref<200x512xf32, #tpu.memory_space<vmem>>, vector<8x512xf32>
    tpu.vector_store %arg6[%c88_156, %c0_157], %147 {strides = array<i32>} : memref<200x512xf32, #tpu.memory_space<vmem>>, vector<8x512xf32>,
    %c96_158 = arith.constant 96 : index
    %c0_159 = arith.constant 0 : index
    %149 = vector.load %arg6[%c96_158, %c0_159] : memref<200x512xf32, #tpu.memory_space<vmem>>, vector<8x512xf32>
    tpu.vector_store %arg6[%c96_158, %c0_159], %124 {strides = array<i32>} : memref<200x512xf32, #tpu.memory_space<vmem>>, vector<8x512xf32>,
    %c511_i32_160 = arith.constant 511 : i32
    %150 = tpu.dynamic_rotate %124 by %c511_i32_160 dim 1 : vector<8x512xf32>, i32 -> vector<8x512xf32>
    %c104_161 = arith.constant 104 : index
    %c0_162 = arith.constant 0 : index
    %151 = vector.load %arg6[%c104_161, %c0_162] : memref<200x512xf32, #tpu.memory_space<vmem>>, vector<8x512xf32>
    tpu.vector_store %arg6[%c104_161, %c0_162], %150 {strides = array<i32>} : memref<200x512xf32, #tpu.memory_space<vmem>>, vector<8x512xf32>,
    %c510_i32_163 = arith.constant 510 : i32
    %152 = tpu.dynamic_rotate %124 by %c510_i32_163 dim 1 : vector<8x512xf32>, i32 -> vector<8x512xf32>
    %c112_164 = arith.constant 112 : index
    %c0_165 = arith.constant 0 : index
    %153 = vector.load %arg6[%c112_164, %c0_165] : memref<200x512xf32, #tpu.memory_space<vmem>>, vector<8x512xf32>
    tpu.vector_store %arg6[%c112_164, %c0_165], %152 {strides = array<i32>} : memref<200x512xf32, #tpu.memory_space<vmem>>, vector<8x512xf32>,
    %c494_i32_166 = arith.constant 494 : i32
    %154 = tpu.dynamic_rotate %124 by %c494_i32_166 dim 1 : vector<8x512xf32>, i32 -> vector<8x512xf32>
    %c120_167 = arith.constant 120 : index
    %c0_168 = arith.constant 0 : index
    %155 = vector.load %arg6[%c120_167, %c0_168] : memref<200x512xf32, #tpu.memory_space<vmem>>, vector<8x512xf32>
    tpu.vector_store %arg6[%c120_167, %c0_168], %154 {strides = array<i32>} : memref<200x512xf32, #tpu.memory_space<vmem>>, vector<8x512xf32>,
    %c493_i32_169 = arith.constant 493 : i32
    %156 = tpu.dynamic_rotate %124 by %c493_i32_169 dim 1 : vector<8x512xf32>, i32 -> vector<8x512xf32>
    %c128_170 = arith.constant 128 : index
    %c0_171 = arith.constant 0 : index
    %157 = vector.load %arg6[%c128_170, %c0_171] : memref<200x512xf32, #tpu.memory_space<vmem>>, vector<8x512xf32>
    tpu.vector_store %arg6[%c128_170, %c0_171], %156 {strides = array<i32>} : memref<200x512xf32, #tpu.memory_space<vmem>>, vector<8x512xf32>,
    %c492_i32_172 = arith.constant 492 : i32
    %158 = tpu.dynamic_rotate %124 by %c492_i32_172 dim 1 : vector<8x512xf32>, i32 -> vector<8x512xf32>
    %c136_173 = arith.constant 136 : index
    %c0_174 = arith.constant 0 : index
    %159 = vector.load %arg6[%c136_173, %c0_174] : memref<200x512xf32, #tpu.memory_space<vmem>>, vector<8x512xf32>
    tpu.vector_store %arg6[%c136_173, %c0_174], %158 {strides = array<i32>} : memref<200x512xf32, #tpu.memory_space<vmem>>, vector<8x512xf32>,
    %c491_i32_175 = arith.constant 491 : i32
    %160 = tpu.dynamic_rotate %124 by %c491_i32_175 dim 1 : vector<8x512xf32>, i32 -> vector<8x512xf32>
    %c144_176 = arith.constant 144 : index
    %c0_177 = arith.constant 0 : index
    %161 = vector.load %arg6[%c144_176, %c0_177] : memref<200x512xf32, #tpu.memory_space<vmem>>, vector<8x512xf32>
    tpu.vector_store %arg6[%c144_176, %c0_177], %160 {strides = array<i32>} : memref<200x512xf32, #tpu.memory_space<vmem>>, vector<8x512xf32>,
    %c490_i32_178 = arith.constant 490 : i32
    %162 = tpu.dynamic_rotate %124 by %c490_i32_178 dim 1 : vector<8x512xf32>, i32 -> vector<8x512xf32>
    %c152_179 = arith.constant 152 : index
    %c0_180 = arith.constant 0 : index
    %163 = vector.load %arg6[%c152_179, %c0_180] : memref<200x512xf32, #tpu.memory_space<vmem>>, vector<8x512xf32>
    tpu.vector_store %arg6[%c152_179, %c0_180], %162 {strides = array<i32>} : memref<200x512xf32, #tpu.memory_space<vmem>>, vector<8x512xf32>,
    %c474_i32_181 = arith.constant 474 : i32
    %164 = tpu.dynamic_rotate %124 by %c474_i32_181 dim 1 : vector<8x512xf32>, i32 -> vector<8x512xf32>
    %c160_182 = arith.constant 160 : index
    %c0_183 = arith.constant 0 : index
    %165 = vector.load %arg6[%c160_182, %c0_183] : memref<200x512xf32, #tpu.memory_space<vmem>>, vector<8x512xf32>
    tpu.vector_store %arg6[%c160_182, %c0_183], %164 {strides = array<i32>} : memref<200x512xf32, #tpu.memory_space<vmem>>, vector<8x512xf32>,
    %c473_i32_184 = arith.constant 473 : i32
    %166 = tpu.dynamic_rotate %124 by %c473_i32_184 dim 1 : vector<8x512xf32>, i32 -> vector<8x512xf32>
    %c168_185 = arith.constant 168 : index
    %c0_186 = arith.constant 0 : index
    %167 = vector.load %arg6[%c168_185, %c0_186] : memref<200x512xf32, #tpu.memory_space<vmem>>, vector<8x512xf32>
    tpu.vector_store %arg6[%c168_185, %c0_186], %166 {strides = array<i32>} : memref<200x512xf32, #tpu.memory_space<vmem>>, vector<8x512xf32>,
    %c472_i32_187 = arith.constant 472 : i32
    %168 = tpu.dynamic_rotate %124 by %c472_i32_187 dim 1 : vector<8x512xf32>, i32 -> vector<8x512xf32>
    %c176_188 = arith.constant 176 : index
    %c0_189 = arith.constant 0 : index
    %169 = vector.load %arg6[%c176_188, %c0_189] : memref<200x512xf32, #tpu.memory_space<vmem>>, vector<8x512xf32>
    tpu.vector_store %arg6[%c176_188, %c0_189], %168 {strides = array<i32>} : memref<200x512xf32, #tpu.memory_space<vmem>>, vector<8x512xf32>,
    %c471_i32_190 = arith.constant 471 : i32
    %170 = tpu.dynamic_rotate %124 by %c471_i32_190 dim 1 : vector<8x512xf32>, i32 -> vector<8x512xf32>
    %c184_191 = arith.constant 184 : index
    %c0_192 = arith.constant 0 : index
    %171 = vector.load %arg6[%c184_191, %c0_192] : memref<200x512xf32, #tpu.memory_space<vmem>>, vector<8x512xf32>
    tpu.vector_store %arg6[%c184_191, %c0_192], %170 {strides = array<i32>} : memref<200x512xf32, #tpu.memory_space<vmem>>, vector<8x512xf32>,
    %c470_i32_193 = arith.constant 470 : i32
    %172 = tpu.dynamic_rotate %124 by %c470_i32_193 dim 1 : vector<8x512xf32>, i32 -> vector<8x512xf32>
    %c192_194 = arith.constant 192 : index
    %c0_195 = arith.constant 0 : index
    %173 = vector.load %arg6[%c192_194, %c0_195] : memref<200x512xf32, #tpu.memory_space<vmem>>, vector<8x512xf32>
    tpu.vector_store %arg6[%c192_194, %c0_195], %172 {strides = array<i32>} : memref<200x512xf32, #tpu.memory_space<vmem>>, vector<8x512xf32>,
    %c2 = arith.constant 2 : index
    %c0_196 = arith.constant 0 : index
    %c0_197 = arith.constant 0 : index
    %174 = vector.load %arg2[%c2, %c0_196, %c0_197] : memref<7x8x200xf32, #tpu.memory_space<vmem>>, vector<1x8x200xf32>
    %175 = vector.shape_cast %174 : vector<1x8x200xf32> to vector<8x200xf32>
    %c0_198 = arith.constant 0 : index
    %c0_199 = arith.constant 0 : index
    %176 = vector.load %arg6[%c0_198, %c0_199] : memref<200x512xf32, #tpu.memory_space<vmem>>, vector<200x512xf32>
    %cst_200 = arith.constant dense<0.000000e+00> : vector<8x512xf32>
    %177 = tpu.matmul %175, %176, %cst_200 {dimension_numbers = #tpu.dot_dimension_numbers<[1], [0], [0], [1], [0, 0, 1, 1], [], []>} : vector<8x200xf32>, vector<200x512xf32>, vector<8x512xf32> -> vector<8x512xf32>
    %c2_201 = arith.constant 2 : index
    %c0_202 = arith.constant 0 : index
    %c0_203 = arith.constant 0 : index
    %178 = vector.load %arg3[%c2_201, %c0_202, %c0_203] : memref<7x8x1xf32, #tpu.memory_space<vmem>>, vector<1x8x1xf32>
    %179 = vector.shape_cast %178 : vector<1x8x1xf32> to vector<8x1xf32>
    %180 = vector.broadcast %179 : vector<8x1xf32> to vector<8x512xf32>
    %181 = arith.addf %177, %180 : vector<8x512xf32>
    %182 = arith.addf %181, %63 : vector<8x512xf32>
    %183 = vector.broadcast %0 : vector<1x512xf32> to vector<8x512xf32>
    %184 = arith.mulf %182, %183 : vector<8x512xf32>
    %c42_i32_204 = arith.constant 42 : i32
    %185 = tpu.dynamic_rotate %184 by %c42_i32_204 dim 1 : vector<8x512xf32>, i32 -> vector<8x512xf32>
    %c0_205 = arith.constant 0 : index
    %c0_206 = arith.constant 0 : index
    %186 = vector.load %arg6[%c0_205, %c0_206] : memref<200x512xf32, #tpu.memory_space<vmem>>, vector<8x512xf32>
    tpu.vector_store %arg6[%c0_205, %c0_206], %185 {strides = array<i32>} : memref<200x512xf32, #tpu.memory_space<vmem>>, vector<8x512xf32>,
    %c41_i32_207 = arith.constant 41 : i32
    %187 = tpu.dynamic_rotate %184 by %c41_i32_207 dim 1 : vector<8x512xf32>, i32 -> vector<8x512xf32>
    %c8_208 = arith.constant 8 : index
    %c0_209 = arith.constant 0 : index
    %188 = vector.load %arg6[%c8_208, %c0_209] : memref<200x512xf32, #tpu.memory_space<vmem>>, vector<8x512xf32>
    tpu.vector_store %arg6[%c8_208, %c0_209], %187 {strides = array<i32>} : memref<200x512xf32, #tpu.memory_space<vmem>>, vector<8x512xf32>,
    %c40_i32_210 = arith.constant 40 : i32
    %189 = tpu.dynamic_rotate %184 by %c40_i32_210 dim 1 : vector<8x512xf32>, i32 -> vector<8x512xf32>
    %c16_211 = arith.constant 16 : index
    %c0_212 = arith.constant 0 : index
    %190 = vector.load %arg6[%c16_211, %c0_212] : memref<200x512xf32, #tpu.memory_space<vmem>>, vector<8x512xf32>
    tpu.vector_store %arg6[%c16_211, %c0_212], %189 {strides = array<i32>} : memref<200x512xf32, #tpu.memory_space<vmem>>, vector<8x512xf32>,
    %c39_i32_213 = arith.constant 39 : i32
    %191 = tpu.dynamic_rotate %184 by %c39_i32_213 dim 1 : vector<8x512xf32>, i32 -> vector<8x512xf32>
    %c24_214 = arith.constant 24 : index
    %c0_215 = arith.constant 0 : index
    %192 = vector.load %arg6[%c24_214, %c0_215] : memref<200x512xf32, #tpu.memory_space<vmem>>, vector<8x512xf32>
    tpu.vector_store %arg6[%c24_214, %c0_215], %191 {strides = array<i32>} : memref<200x512xf32, #tpu.memory_space<vmem>>, vector<8x512xf32>,
    %c38_i32_216 = arith.constant 38 : i32
    %193 = tpu.dynamic_rotate %184 by %c38_i32_216 dim 1 : vector<8x512xf32>, i32 -> vector<8x512xf32>
    %c32_217 = arith.constant 32 : index
    %c0_218 = arith.constant 0 : index
    %194 = vector.load %arg6[%c32_217, %c0_218] : memref<200x512xf32, #tpu.memory_space<vmem>>, vector<8x512xf32>
    tpu.vector_store %arg6[%c32_217, %c0_218], %193 {strides = array<i32>} : memref<200x512xf32, #tpu.memory_space<vmem>>, vector<8x512xf32>,
    %c22_i32_219 = arith.constant 22 : i32
    %195 = tpu.dynamic_rotate %184 by %c22_i32_219 dim 1 : vector<8x512xf32>, i32 -> vector<8x512xf32>
    %c40_220 = arith.constant 40 : index
    %c0_221 = arith.constant 0 : index
    %196 = vector.load %arg6[%c40_220, %c0_221] : memref<200x512xf32, #tpu.memory_space<vmem>>, vector<8x512xf32>
    tpu.vector_store %arg6[%c40_220, %c0_221], %195 {strides = array<i32>} : memref<200x512xf32, #tpu.memory_space<vmem>>, vector<8x512xf32>,
    %c21_i32_222 = arith.constant 21 : i32
    %197 = tpu.dynamic_rotate %184 by %c21_i32_222 dim 1 : vector<8x512xf32>, i32 -> vector<8x512xf32>
    %c48_223 = arith.constant 48 : index
    %c0_224 = arith.constant 0 : index
    %198 = vector.load %arg6[%c48_223, %c0_224] : memref<200x512xf32, #tpu.memory_space<vmem>>, vector<8x512xf32>
    tpu.vector_store %arg6[%c48_223, %c0_224], %197 {strides = array<i32>} : memref<200x512xf32, #tpu.memory_space<vmem>>, vector<8x512xf32>,
    %c20_i32_225 = arith.constant 20 : i32
    %199 = tpu.dynamic_rotate %184 by %c20_i32_225 dim 1 : vector<8x512xf32>, i32 -> vector<8x512xf32>
    %c56_226 = arith.constant 56 : index
    %c0_227 = arith.constant 0 : index
    %200 = vector.load %arg6[%c56_226, %c0_227] : memref<200x512xf32, #tpu.memory_space<vmem>>, vector<8x512xf32>
    tpu.vector_store %arg6[%c56_226, %c0_227], %199 {strides = array<i32>} : memref<200x512xf32, #tpu.memory_space<vmem>>, vector<8x512xf32>,
    %c19_i32_228 = arith.constant 19 : i32
    %201 = tpu.dynamic_rotate %184 by %c19_i32_228 dim 1 : vector<8x512xf32>, i32 -> vector<8x512xf32>
    %c64_229 = arith.constant 64 : index
    %c0_230 = arith.constant 0 : index
    %202 = vector.load %arg6[%c64_229, %c0_230] : memref<200x512xf32, #tpu.memory_space<vmem>>, vector<8x512xf32>
    tpu.vector_store %arg6[%c64_229, %c0_230], %201 {strides = array<i32>} : memref<200x512xf32, #tpu.memory_space<vmem>>, vector<8x512xf32>,
    %c18_i32_231 = arith.constant 18 : i32
    %203 = tpu.dynamic_rotate %184 by %c18_i32_231 dim 1 : vector<8x512xf32>, i32 -> vector<8x512xf32>
    %c72_232 = arith.constant 72 : index
    %c0_233 = arith.constant 0 : index
    %204 = vector.load %arg6[%c72_232, %c0_233] : memref<200x512xf32, #tpu.memory_space<vmem>>, vector<8x512xf32>
    tpu.vector_store %arg6[%c72_232, %c0_233], %203 {strides = array<i32>} : memref<200x512xf32, #tpu.memory_space<vmem>>, vector<8x512xf32>,
    %c2_i32_234 = arith.constant 2 : i32
    %205 = tpu.dynamic_rotate %184 by %c2_i32_234 dim 1 : vector<8x512xf32>, i32 -> vector<8x512xf32>
    %c80_235 = arith.constant 80 : index
    %c0_236 = arith.constant 0 : index
    %206 = vector.load %arg6[%c80_235, %c0_236] : memref<200x512xf32, #tpu.memory_space<vmem>>, vector<8x512xf32>
    tpu.vector_store %arg6[%c80_235, %c0_236], %205 {strides = array<i32>} : memref<200x512xf32, #tpu.memory_space<vmem>>, vector<8x512xf32>,
    %c1_i32_237 = arith.constant 1 : i32
    %207 = tpu.dynamic_rotate %184 by %c1_i32_237 dim 1 : vector<8x512xf32>, i32 -> vector<8x512xf32>
    %c88_238 = arith.constant 88 : index
    %c0_239 = arith.constant 0 : index
    %208 = vector.load %arg6[%c88_238, %c0_239] : memref<200x512xf32, #tpu.memory_space<vmem>>, vector<8x512xf32>
    tpu.vector_store %arg6[%c88_238, %c0_239], %207 {strides = array<i32>} : memref<200x512xf32, #tpu.memory_space<vmem>>, vector<8x512xf32>,
    %c96_240 = arith.constant 96 : index
    %c0_241 = arith.constant 0 : index
    %209 = vector.load %arg6[%c96_240, %c0_241] : memref<200x512xf32, #tpu.memory_space<vmem>>, vector<8x512xf32>
    tpu.vector_store %arg6[%c96_240, %c0_241], %184 {strides = array<i32>} : memref<200x512xf32, #tpu.memory_space<vmem>>, vector<8x512xf32>,
    %c511_i32_242 = arith.constant 511 : i32
    %210 = tpu.dynamic_rotate %184 by %c511_i32_242 dim 1 : vector<8x512xf32>, i32 -> vector<8x512xf32>
    %c104_243 = arith.constant 104 : index
    %c0_244 = arith.constant 0 : index
    %211 = vector.load %arg6[%c104_243, %c0_244] : memref<200x512xf32, #tpu.memory_space<vmem>>, vector<8x512xf32>
    tpu.vector_store %arg6[%c104_243, %c0_244], %210 {strides = array<i32>} : memref<200x512xf32, #tpu.memory_space<vmem>>, vector<8x512xf32>,
    %c510_i32_245 = arith.constant 510 : i32
    %212 = tpu.dynamic_rotate %184 by %c510_i32_245 dim 1 : vector<8x512xf32>, i32 -> vector<8x512xf32>
    %c112_246 = arith.constant 112 : index
    %c0_247 = arith.constant 0 : index
    %213 = vector.load %arg6[%c112_246, %c0_247] : memref<200x512xf32, #tpu.memory_space<vmem>>, vector<8x512xf32>
    tpu.vector_store %arg6[%c112_246, %c0_247], %212 {strides = array<i32>} : memref<200x512xf32, #tpu.memory_space<vmem>>, vector<8x512xf32>,
    %c494_i32_248 = arith.constant 494 : i32
    %214 = tpu.dynamic_rotate %184 by %c494_i32_248 dim 1 : vector<8x512xf32>, i32 -> vector<8x512xf32>
    %c120_249 = arith.constant 120 : index
    %c0_250 = arith.constant 0 : index
    %215 = vector.load %arg6[%c120_249, %c0_250] : memref<200x512xf32, #tpu.memory_space<vmem>>, vector<8x512xf32>
    tpu.vector_store %arg6[%c120_249, %c0_250], %214 {strides = array<i32>} : memref<200x512xf32, #tpu.memory_space<vmem>>, vector<8x512xf32>,
    %c493_i32_251 = arith.constant 493 : i32
    %216 = tpu.dynamic_rotate %184 by %c493_i32_251 dim 1 : vector<8x512xf32>, i32 -> vector<8x512xf32>
    %c128_252 = arith.constant 128 : index
    %c0_253 = arith.constant 0 : index
    %217 = vector.load %arg6[%c128_252, %c0_253] : memref<200x512xf32, #tpu.memory_space<vmem>>, vector<8x512xf32>
    tpu.vector_store %arg6[%c128_252, %c0_253], %216 {strides = array<i32>} : memref<200x512xf32, #tpu.memory_space<vmem>>, vector<8x512xf32>,
    %c492_i32_254 = arith.constant 492 : i32
    %218 = tpu.dynamic_rotate %184 by %c492_i32_254 dim 1 : vector<8x512xf32>, i32 -> vector<8x512xf32>
    %c136_255 = arith.constant 136 : index
    %c0_256 = arith.constant 0 : index
    %219 = vector.load %arg6[%c136_255, %c0_256] : memref<200x512xf32, #tpu.memory_space<vmem>>, vector<8x512xf32>
    tpu.vector_store %arg6[%c136_255, %c0_256], %218 {strides = array<i32>} : memref<200x512xf32, #tpu.memory_space<vmem>>, vector<8x512xf32>,
    %c491_i32_257 = arith.constant 491 : i32
    %220 = tpu.dynamic_rotate %184 by %c491_i32_257 dim 1 : vector<8x512xf32>, i32 -> vector<8x512xf32>
    %c144_258 = arith.constant 144 : index
    %c0_259 = arith.constant 0 : index
    %221 = vector.load %arg6[%c144_258, %c0_259] : memref<200x512xf32, #tpu.memory_space<vmem>>, vector<8x512xf32>
    tpu.vector_store %arg6[%c144_258, %c0_259], %220 {strides = array<i32>} : memref<200x512xf32, #tpu.memory_space<vmem>>, vector<8x512xf32>,
    %c490_i32_260 = arith.constant 490 : i32
    %222 = tpu.dynamic_rotate %184 by %c490_i32_260 dim 1 : vector<8x512xf32>, i32 -> vector<8x512xf32>
    %c152_261 = arith.constant 152 : index
    %c0_262 = arith.constant 0 : index
    %223 = vector.load %arg6[%c152_261, %c0_262] : memref<200x512xf32, #tpu.memory_space<vmem>>, vector<8x512xf32>
    tpu.vector_store %arg6[%c152_261, %c0_262], %222 {strides = array<i32>} : memref<200x512xf32, #tpu.memory_space<vmem>>, vector<8x512xf32>,
    %c474_i32_263 = arith.constant 474 : i32
    %224 = tpu.dynamic_rotate %184 by %c474_i32_263 dim 1 : vector<8x512xf32>, i32 -> vector<8x512xf32>
    %c160_264 = arith.constant 160 : index
    %c0_265 = arith.constant 0 : index
    %225 = vector.load %arg6[%c160_264, %c0_265] : memref<200x512xf32, #tpu.memory_space<vmem>>, vector<8x512xf32>
    tpu.vector_store %arg6[%c160_264, %c0_265], %224 {strides = array<i32>} : memref<200x512xf32, #tpu.memory_space<vmem>>, vector<8x512xf32>,
    %c473_i32_266 = arith.constant 473 : i32
    %226 = tpu.dynamic_rotate %184 by %c473_i32_266 dim 1 : vector<8x512xf32>, i32 -> vector<8x512xf32>
    %c168_267 = arith.constant 168 : index
    %c0_268 = arith.constant 0 : index
    %227 = vector.load %arg6[%c168_267, %c0_268] : memref<200x512xf32, #tpu.memory_space<vmem>>, vector<8x512xf32>
    tpu.vector_store %arg6[%c168_267, %c0_268], %226 {strides = array<i32>} : memref<200x512xf32, #tpu.memory_space<vmem>>, vector<8x512xf32>,
    %c472_i32_269 = arith.constant 472 : i32
    %228 = tpu.dynamic_rotate %184 by %c472_i32_269 dim 1 : vector<8x512xf32>, i32 -> vector<8x512xf32>
    %c176_270 = arith.constant 176 : index
    %c0_271 = arith.constant 0 : index
    %229 = vector.load %arg6[%c176_270, %c0_271] : memref<200x512xf32, #tpu.memory_space<vmem>>, vector<8x512xf32>
    tpu.vector_store %arg6[%c176_270, %c0_271], %228 {strides = array<i32>} : memref<200x512xf32, #tpu.memory_space<vmem>>, vector<8x512xf32>,
    %c471_i32_272 = arith.constant 471 : i32
    %230 = tpu.dynamic_rotate %184 by %c471_i32_272 dim 1 : vector<8x512xf32>, i32 -> vector<8x512xf32>
    %c184_273 = arith.constant 184 : index
    %c0_274 = arith.constant 0 : index
    %231 = vector.load %arg6[%c184_273, %c0_274] : memref<200x512xf32, #tpu.memory_space<vmem>>, vector<8x512xf32>
    tpu.vector_store %arg6[%c184_273, %c0_274], %230 {strides = array<i32>} : memref<200x512xf32, #tpu.memory_space<vmem>>, vector<8x512xf32>,
    %c470_i32_275 = arith.constant 470 : i32
    %232 = tpu.dynamic_rotate %184 by %c470_i32_275 dim 1 : vector<8x512xf32>, i32 -> vector<8x512xf32>
    %c192_276 = arith.constant 192 : index
    %c0_277 = arith.constant 0 : index
    %233 = vector.load %arg6[%c192_276, %c0_277] : memref<200x512xf32, #tpu.memory_space<vmem>>, vector<8x512xf32>
    tpu.vector_store %arg6[%c192_276, %c0_277], %232 {strides = array<i32>} : memref<200x512xf32, #tpu.memory_space<vmem>>, vector<8x512xf32>,
    %c3 = arith.constant 3 : index
    %c0_278 = arith.constant 0 : index
    %c0_279 = arith.constant 0 : index
    %234 = vector.load %arg2[%c3, %c0_278, %c0_279] : memref<7x8x200xf32, #tpu.memory_space<vmem>>, vector<1x8x200xf32>
    %235 = vector.shape_cast %234 : vector<1x8x200xf32> to vector<8x200xf32>
    %c0_280 = arith.constant 0 : index
    %c0_281 = arith.constant 0 : index
    %236 = vector.load %arg6[%c0_280, %c0_281] : memref<200x512xf32, #tpu.memory_space<vmem>>, vector<200x512xf32>
    %cst_282 = arith.constant dense<0.000000e+00> : vector<8x512xf32>
    %237 = tpu.matmul %235, %236, %cst_282 {dimension_numbers = #tpu.dot_dimension_numbers<[1], [0], [0], [1], [0, 0, 1, 1], [], []>} : vector<8x200xf32>, vector<200x512xf32>, vector<8x512xf32> -> vector<8x512xf32>
    %c3_283 = arith.constant 3 : index
    %c0_284 = arith.constant 0 : index
    %c0_285 = arith.constant 0 : index
    %238 = vector.load %arg3[%c3_283, %c0_284, %c0_285] : memref<7x8x1xf32, #tpu.memory_space<vmem>>, vector<1x8x1xf32>
    %239 = vector.shape_cast %238 : vector<1x8x1xf32> to vector<8x1xf32>
    %240 = vector.broadcast %239 : vector<8x1xf32> to vector<8x512xf32>
    %241 = arith.addf %237, %240 : vector<8x512xf32>
    %cst_286 = arith.constant 0.000000e+00 : f32
    %242 = vector.broadcast %cst_286 : f32 to vector<8x512xf32>
    %243 = arith.maximumf %241, %242 : vector<8x512xf32>
    %244 = vector.broadcast %0 : vector<1x512xf32> to vector<8x512xf32>
    %245 = arith.mulf %243, %244 : vector<8x512xf32>
    %c42_i32_287 = arith.constant 42 : i32
    %246 = tpu.dynamic_rotate %245 by %c42_i32_287 dim 1 : vector<8x512xf32>, i32 -> vector<8x512xf32>
    %c0_288 = arith.constant 0 : index
    %c0_289 = arith.constant 0 : index
    %247 = vector.load %arg6[%c0_288, %c0_289] : memref<200x512xf32, #tpu.memory_space<vmem>>, vector<8x512xf32>
    tpu.vector_store %arg6[%c0_288, %c0_289], %246 {strides = array<i32>} : memref<200x512xf32, #tpu.memory_space<vmem>>, vector<8x512xf32>,
    %c41_i32_290 = arith.constant 41 : i32
    %248 = tpu.dynamic_rotate %245 by %c41_i32_290 dim 1 : vector<8x512xf32>, i32 -> vector<8x512xf32>
    %c8_291 = arith.constant 8 : index
    %c0_292 = arith.constant 0 : index
    %249 = vector.load %arg6[%c8_291, %c0_292] : memref<200x512xf32, #tpu.memory_space<vmem>>, vector<8x512xf32>
    tpu.vector_store %arg6[%c8_291, %c0_292], %248 {strides = array<i32>} : memref<200x512xf32, #tpu.memory_space<vmem>>, vector<8x512xf32>,
    %c40_i32_293 = arith.constant 40 : i32
    %250 = tpu.dynamic_rotate %245 by %c40_i32_293 dim 1 : vector<8x512xf32>, i32 -> vector<8x512xf32>
    %c16_294 = arith.constant 16 : index
    %c0_295 = arith.constant 0 : index
    %251 = vector.load %arg6[%c16_294, %c0_295] : memref<200x512xf32, #tpu.memory_space<vmem>>, vector<8x512xf32>
    tpu.vector_store %arg6[%c16_294, %c0_295], %250 {strides = array<i32>} : memref<200x512xf32, #tpu.memory_space<vmem>>, vector<8x512xf32>,
    %c39_i32_296 = arith.constant 39 : i32
    %252 = tpu.dynamic_rotate %245 by %c39_i32_296 dim 1 : vector<8x512xf32>, i32 -> vector<8x512xf32>
    %c24_297 = arith.constant 24 : index
    %c0_298 = arith.constant 0 : index
    %253 = vector.load %arg6[%c24_297, %c0_298] : memref<200x512xf32, #tpu.memory_space<vmem>>, vector<8x512xf32>
    tpu.vector_store %arg6[%c24_297, %c0_298], %252 {strides = array<i32>} : memref<200x512xf32, #tpu.memory_space<vmem>>, vector<8x512xf32>,
    %c38_i32_299 = arith.constant 38 : i32
    %254 = tpu.dynamic_rotate %245 by %c38_i32_299 dim 1 : vector<8x512xf32>, i32 -> vector<8x512xf32>
    %c32_300 = arith.constant 32 : index
    %c0_301 = arith.constant 0 : index
    %255 = vector.load %arg6[%c32_300, %c0_301] : memref<200x512xf32, #tpu.memory_space<vmem>>, vector<8x512xf32>
    tpu.vector_store %arg6[%c32_300, %c0_301], %254 {strides = array<i32>} : memref<200x512xf32, #tpu.memory_space<vmem>>, vector<8x512xf32>,
    %c22_i32_302 = arith.constant 22 : i32
    %256 = tpu.dynamic_rotate %245 by %c22_i32_302 dim 1 : vector<8x512xf32>, i32 -> vector<8x512xf32>
    %c40_303 = arith.constant 40 : index
    %c0_304 = arith.constant 0 : index
    %257 = vector.load %arg6[%c40_303, %c0_304] : memref<200x512xf32, #tpu.memory_space<vmem>>, vector<8x512xf32>
    tpu.vector_store %arg6[%c40_303, %c0_304], %256 {strides = array<i32>} : memref<200x512xf32, #tpu.memory_space<vmem>>, vector<8x512xf32>,
    %c21_i32_305 = arith.constant 21 : i32
    %258 = tpu.dynamic_rotate %245 by %c21_i32_305 dim 1 : vector<8x512xf32>, i32 -> vector<8x512xf32>
    %c48_306 = arith.constant 48 : index
    %c0_307 = arith.constant 0 : index
    %259 = vector.load %arg6[%c48_306, %c0_307] : memref<200x512xf32, #tpu.memory_space<vmem>>, vector<8x512xf32>
    tpu.vector_store %arg6[%c48_306, %c0_307], %258 {strides = array<i32>} : memref<200x512xf32, #tpu.memory_space<vmem>>, vector<8x512xf32>,
    %c20_i32_308 = arith.constant 20 : i32
    %260 = tpu.dynamic_rotate %245 by %c20_i32_308 dim 1 : vector<8x512xf32>, i32 -> vector<8x512xf32>
    %c56_309 = arith.constant 56 : index
    %c0_310 = arith.constant 0 : index
    %261 = vector.load %arg6[%c56_309, %c0_310] : memref<200x512xf32, #tpu.memory_space<vmem>>, vector<8x512xf32>
    tpu.vector_store %arg6[%c56_309, %c0_310], %260 {strides = array<i32>} : memref<200x512xf32, #tpu.memory_space<vmem>>, vector<8x512xf32>,
    %c19_i32_311 = arith.constant 19 : i32
    %262 = tpu.dynamic_rotate %245 by %c19_i32_311 dim 1 : vector<8x512xf32>, i32 -> vector<8x512xf32>
    %c64_312 = arith.constant 64 : index
    %c0_313 = arith.constant 0 : index
    %263 = vector.load %arg6[%c64_312, %c0_313] : memref<200x512xf32, #tpu.memory_space<vmem>>, vector<8x512xf32>
    tpu.vector_store %arg6[%c64_312, %c0_313], %262 {strides = array<i32>} : memref<200x512xf32, #tpu.memory_space<vmem>>, vector<8x512xf32>,
    %c18_i32_314 = arith.constant 18 : i32
    %264 = tpu.dynamic_rotate %245 by %c18_i32_314 dim 1 : vector<8x512xf32>, i32 -> vector<8x512xf32>
    %c72_315 = arith.constant 72 : index
    %c0_316 = arith.constant 0 : index
    %265 = vector.load %arg6[%c72_315, %c0_316] : memref<200x512xf32, #tpu.memory_space<vmem>>, vector<8x512xf32>
    tpu.vector_store %arg6[%c72_315, %c0_316], %264 {strides = array<i32>} : memref<200x512xf32, #tpu.memory_space<vmem>>, vector<8x512xf32>,
    %c2_i32_317 = arith.constant 2 : i32
    %266 = tpu.dynamic_rotate %245 by %c2_i32_317 dim 1 : vector<8x512xf32>, i32 -> vector<8x512xf32>
    %c80_318 = arith.constant 80 : index
    %c0_319 = arith.constant 0 : index
    %267 = vector.load %arg6[%c80_318, %c0_319] : memref<200x512xf32, #tpu.memory_space<vmem>>, vector<8x512xf32>
    tpu.vector_store %arg6[%c80_318, %c0_319], %266 {strides = array<i32>} : memref<200x512xf32, #tpu.memory_space<vmem>>, vector<8x512xf32>,
    %c1_i32_320 = arith.constant 1 : i32
    %268 = tpu.dynamic_rotate %245 by %c1_i32_320 dim 1 : vector<8x512xf32>, i32 -> vector<8x512xf32>
    %c88_321 = arith.constant 88 : index
    %c0_322 = arith.constant 0 : index
    %269 = vector.load %arg6[%c88_321, %c0_322] : memref<200x512xf32, #tpu.memory_space<vmem>>, vector<8x512xf32>
    tpu.vector_store %arg6[%c88_321, %c0_322], %268 {strides = array<i32>} : memref<200x512xf32, #tpu.memory_space<vmem>>, vector<8x512xf32>,
    %c96_323 = arith.constant 96 : index
    %c0_324 = arith.constant 0 : index
    %270 = vector.load %arg6[%c96_323, %c0_324] : memref<200x512xf32, #tpu.memory_space<vmem>>, vector<8x512xf32>
    tpu.vector_store %arg6[%c96_323, %c0_324], %245 {strides = array<i32>} : memref<200x512xf32, #tpu.memory_space<vmem>>, vector<8x512xf32>,
    %c511_i32_325 = arith.constant 511 : i32
    %271 = tpu.dynamic_rotate %245 by %c511_i32_325 dim 1 : vector<8x512xf32>, i32 -> vector<8x512xf32>
    %c104_326 = arith.constant 104 : index
    %c0_327 = arith.constant 0 : index
    %272 = vector.load %arg6[%c104_326, %c0_327] : memref<200x512xf32, #tpu.memory_space<vmem>>, vector<8x512xf32>
    tpu.vector_store %arg6[%c104_326, %c0_327], %271 {strides = array<i32>} : memref<200x512xf32, #tpu.memory_space<vmem>>, vector<8x512xf32>,
    %c510_i32_328 = arith.constant 510 : i32
    %273 = tpu.dynamic_rotate %245 by %c510_i32_328 dim 1 : vector<8x512xf32>, i32 -> vector<8x512xf32>
    %c112_329 = arith.constant 112 : index
    %c0_330 = arith.constant 0 : index
    %274 = vector.load %arg6[%c112_329, %c0_330] : memref<200x512xf32, #tpu.memory_space<vmem>>, vector<8x512xf32>
    tpu.vector_store %arg6[%c112_329, %c0_330], %273 {strides = array<i32>} : memref<200x512xf32, #tpu.memory_space<vmem>>, vector<8x512xf32>,
    %c494_i32_331 = arith.constant 494 : i32
    %275 = tpu.dynamic_rotate %245 by %c494_i32_331 dim 1 : vector<8x512xf32>, i32 -> vector<8x512xf32>
    %c120_332 = arith.constant 120 : index
    %c0_333 = arith.constant 0 : index
    %276 = vector.load %arg6[%c120_332, %c0_333] : memref<200x512xf32, #tpu.memory_space<vmem>>, vector<8x512xf32>
    tpu.vector_store %arg6[%c120_332, %c0_333], %275 {strides = array<i32>} : memref<200x512xf32, #tpu.memory_space<vmem>>, vector<8x512xf32>,
    %c493_i32_334 = arith.constant 493 : i32
    %277 = tpu.dynamic_rotate %245 by %c493_i32_334 dim 1 : vector<8x512xf32>, i32 -> vector<8x512xf32>
    %c128_335 = arith.constant 128 : index
    %c0_336 = arith.constant 0 : index
    %278 = vector.load %arg6[%c128_335, %c0_336] : memref<200x512xf32, #tpu.memory_space<vmem>>, vector<8x512xf32>
    tpu.vector_store %arg6[%c128_335, %c0_336], %277 {strides = array<i32>} : memref<200x512xf32, #tpu.memory_space<vmem>>, vector<8x512xf32>,
    %c492_i32_337 = arith.constant 492 : i32
    %279 = tpu.dynamic_rotate %245 by %c492_i32_337 dim 1 : vector<8x512xf32>, i32 -> vector<8x512xf32>
    %c136_338 = arith.constant 136 : index
    %c0_339 = arith.constant 0 : index
    %280 = vector.load %arg6[%c136_338, %c0_339] : memref<200x512xf32, #tpu.memory_space<vmem>>, vector<8x512xf32>
    tpu.vector_store %arg6[%c136_338, %c0_339], %279 {strides = array<i32>} : memref<200x512xf32, #tpu.memory_space<vmem>>, vector<8x512xf32>,
    %c491_i32_340 = arith.constant 491 : i32
    %281 = tpu.dynamic_rotate %245 by %c491_i32_340 dim 1 : vector<8x512xf32>, i32 -> vector<8x512xf32>
    %c144_341 = arith.constant 144 : index
    %c0_342 = arith.constant 0 : index
    %282 = vector.load %arg6[%c144_341, %c0_342] : memref<200x512xf32, #tpu.memory_space<vmem>>, vector<8x512xf32>
    tpu.vector_store %arg6[%c144_341, %c0_342], %281 {strides = array<i32>} : memref<200x512xf32, #tpu.memory_space<vmem>>, vector<8x512xf32>,
    %c490_i32_343 = arith.constant 490 : i32
    %283 = tpu.dynamic_rotate %245 by %c490_i32_343 dim 1 : vector<8x512xf32>, i32 -> vector<8x512xf32>
    %c152_344 = arith.constant 152 : index
    %c0_345 = arith.constant 0 : index
    %284 = vector.load %arg6[%c152_344, %c0_345] : memref<200x512xf32, #tpu.memory_space<vmem>>, vector<8x512xf32>
    tpu.vector_store %arg6[%c152_344, %c0_345], %283 {strides = array<i32>} : memref<200x512xf32, #tpu.memory_space<vmem>>, vector<8x512xf32>,
    %c474_i32_346 = arith.constant 474 : i32
    %285 = tpu.dynamic_rotate %245 by %c474_i32_346 dim 1 : vector<8x512xf32>, i32 -> vector<8x512xf32>
    %c160_347 = arith.constant 160 : index
    %c0_348 = arith.constant 0 : index
    %286 = vector.load %arg6[%c160_347, %c0_348] : memref<200x512xf32, #tpu.memory_space<vmem>>, vector<8x512xf32>
    tpu.vector_store %arg6[%c160_347, %c0_348], %285 {strides = array<i32>} : memref<200x512xf32, #tpu.memory_space<vmem>>, vector<8x512xf32>,
    %c473_i32_349 = arith.constant 473 : i32
    %287 = tpu.dynamic_rotate %245 by %c473_i32_349 dim 1 : vector<8x512xf32>, i32 -> vector<8x512xf32>
    %c168_350 = arith.constant 168 : index
    %c0_351 = arith.constant 0 : index
    %288 = vector.load %arg6[%c168_350, %c0_351] : memref<200x512xf32, #tpu.memory_space<vmem>>, vector<8x512xf32>
    tpu.vector_store %arg6[%c168_350, %c0_351], %287 {strides = array<i32>} : memref<200x512xf32, #tpu.memory_space<vmem>>, vector<8x512xf32>,
    %c472_i32_352 = arith.constant 472 : i32
    %289 = tpu.dynamic_rotate %245 by %c472_i32_352 dim 1 : vector<8x512xf32>, i32 -> vector<8x512xf32>
    %c176_353 = arith.constant 176 : index
    %c0_354 = arith.constant 0 : index
    %290 = vector.load %arg6[%c176_353, %c0_354] : memref<200x512xf32, #tpu.memory_space<vmem>>, vector<8x512xf32>
    tpu.vector_store %arg6[%c176_353, %c0_354], %289 {strides = array<i32>} : memref<200x512xf32, #tpu.memory_space<vmem>>, vector<8x512xf32>,
    %c471_i32_355 = arith.constant 471 : i32
    %291 = tpu.dynamic_rotate %245 by %c471_i32_355 dim 1 : vector<8x512xf32>, i32 -> vector<8x512xf32>
    %c184_356 = arith.constant 184 : index
    %c0_357 = arith.constant 0 : index
    %292 = vector.load %arg6[%c184_356, %c0_357] : memref<200x512xf32, #tpu.memory_space<vmem>>, vector<8x512xf32>
    tpu.vector_store %arg6[%c184_356, %c0_357], %291 {strides = array<i32>} : memref<200x512xf32, #tpu.memory_space<vmem>>, vector<8x512xf32>,
    %c470_i32_358 = arith.constant 470 : i32
    %293 = tpu.dynamic_rotate %245 by %c470_i32_358 dim 1 : vector<8x512xf32>, i32 -> vector<8x512xf32>
    %c192_359 = arith.constant 192 : index
    %c0_360 = arith.constant 0 : index
    %294 = vector.load %arg6[%c192_359, %c0_360] : memref<200x512xf32, #tpu.memory_space<vmem>>, vector<8x512xf32>
    tpu.vector_store %arg6[%c192_359, %c0_360], %293 {strides = array<i32>} : memref<200x512xf32, #tpu.memory_space<vmem>>, vector<8x512xf32>,
    %c4 = arith.constant 4 : index
    %c0_361 = arith.constant 0 : index
    %c0_362 = arith.constant 0 : index
    %295 = vector.load %arg2[%c4, %c0_361, %c0_362] : memref<7x8x200xf32, #tpu.memory_space<vmem>>, vector<1x8x200xf32>
    %296 = vector.shape_cast %295 : vector<1x8x200xf32> to vector<8x200xf32>
    %c0_363 = arith.constant 0 : index
    %c0_364 = arith.constant 0 : index
    %297 = vector.load %arg6[%c0_363, %c0_364] : memref<200x512xf32, #tpu.memory_space<vmem>>, vector<200x512xf32>
    %cst_365 = arith.constant dense<0.000000e+00> : vector<8x512xf32>
    %298 = tpu.matmul %296, %297, %cst_365 {dimension_numbers = #tpu.dot_dimension_numbers<[1], [0], [0], [1], [0, 0, 1, 1], [], []>} : vector<8x200xf32>, vector<200x512xf32>, vector<8x512xf32> -> vector<8x512xf32>
    %c4_366 = arith.constant 4 : index
    %c0_367 = arith.constant 0 : index
    %c0_368 = arith.constant 0 : index
    %299 = vector.load %arg3[%c4_366, %c0_367, %c0_368] : memref<7x8x1xf32, #tpu.memory_space<vmem>>, vector<1x8x1xf32>
    %300 = vector.shape_cast %299 : vector<1x8x1xf32> to vector<8x1xf32>
    %301 = vector.broadcast %300 : vector<8x1xf32> to vector<8x512xf32>
    %302 = arith.addf %298, %301 : vector<8x512xf32>
    %303 = arith.addf %302, %184 : vector<8x512xf32>
    %304 = vector.broadcast %0 : vector<1x512xf32> to vector<8x512xf32>
    %305 = arith.mulf %303, %304 : vector<8x512xf32>
    %c42_i32_369 = arith.constant 42 : i32
    %306 = tpu.dynamic_rotate %305 by %c42_i32_369 dim 1 : vector<8x512xf32>, i32 -> vector<8x512xf32>
    %c0_370 = arith.constant 0 : index
    %c0_371 = arith.constant 0 : index
    %307 = vector.load %arg6[%c0_370, %c0_371] : memref<200x512xf32, #tpu.memory_space<vmem>>, vector<8x512xf32>
    tpu.vector_store %arg6[%c0_370, %c0_371], %306 {strides = array<i32>} : memref<200x512xf32, #tpu.memory_space<vmem>>, vector<8x512xf32>,
    %c41_i32_372 = arith.constant 41 : i32
    %308 = tpu.dynamic_rotate %305 by %c41_i32_372 dim 1 : vector<8x512xf32>, i32 -> vector<8x512xf32>
    %c8_373 = arith.constant 8 : index
    %c0_374 = arith.constant 0 : index
    %309 = vector.load %arg6[%c8_373, %c0_374] : memref<200x512xf32, #tpu.memory_space<vmem>>, vector<8x512xf32>
    tpu.vector_store %arg6[%c8_373, %c0_374], %308 {strides = array<i32>} : memref<200x512xf32, #tpu.memory_space<vmem>>, vector<8x512xf32>,
    %c40_i32_375 = arith.constant 40 : i32
    %310 = tpu.dynamic_rotate %305 by %c40_i32_375 dim 1 : vector<8x512xf32>, i32 -> vector<8x512xf32>
    %c16_376 = arith.constant 16 : index
    %c0_377 = arith.constant 0 : index
    %311 = vector.load %arg6[%c16_376, %c0_377] : memref<200x512xf32, #tpu.memory_space<vmem>>, vector<8x512xf32>
    tpu.vector_store %arg6[%c16_376, %c0_377], %310 {strides = array<i32>} : memref<200x512xf32, #tpu.memory_space<vmem>>, vector<8x512xf32>,
    %c39_i32_378 = arith.constant 39 : i32
    %312 = tpu.dynamic_rotate %305 by %c39_i32_378 dim 1 : vector<8x512xf32>, i32 -> vector<8x512xf32>
    %c24_379 = arith.constant 24 : index
    %c0_380 = arith.constant 0 : index
    %313 = vector.load %arg6[%c24_379, %c0_380] : memref<200x512xf32, #tpu.memory_space<vmem>>, vector<8x512xf32>
    tpu.vector_store %arg6[%c24_379, %c0_380], %312 {strides = array<i32>} : memref<200x512xf32, #tpu.memory_space<vmem>>, vector<8x512xf32>,
    %c38_i32_381 = arith.constant 38 : i32
    %314 = tpu.dynamic_rotate %305 by %c38_i32_381 dim 1 : vector<8x512xf32>, i32 -> vector<8x512xf32>
    %c32_382 = arith.constant 32 : index
    %c0_383 = arith.constant 0 : index
    %315 = vector.load %arg6[%c32_382, %c0_383] : memref<200x512xf32, #tpu.memory_space<vmem>>, vector<8x512xf32>
    tpu.vector_store %arg6[%c32_382, %c0_383], %314 {strides = array<i32>} : memref<200x512xf32, #tpu.memory_space<vmem>>, vector<8x512xf32>,
    %c22_i32_384 = arith.constant 22 : i32
    %316 = tpu.dynamic_rotate %305 by %c22_i32_384 dim 1 : vector<8x512xf32>, i32 -> vector<8x512xf32>
    %c40_385 = arith.constant 40 : index
    %c0_386 = arith.constant 0 : index
    %317 = vector.load %arg6[%c40_385, %c0_386] : memref<200x512xf32, #tpu.memory_space<vmem>>, vector<8x512xf32>
    tpu.vector_store %arg6[%c40_385, %c0_386], %316 {strides = array<i32>} : memref<200x512xf32, #tpu.memory_space<vmem>>, vector<8x512xf32>,
    %c21_i32_387 = arith.constant 21 : i32
    %318 = tpu.dynamic_rotate %305 by %c21_i32_387 dim 1 : vector<8x512xf32>, i32 -> vector<8x512xf32>
    %c48_388 = arith.constant 48 : index
    %c0_389 = arith.constant 0 : index
    %319 = vector.load %arg6[%c48_388, %c0_389] : memref<200x512xf32, #tpu.memory_space<vmem>>, vector<8x512xf32>
    tpu.vector_store %arg6[%c48_388, %c0_389], %318 {strides = array<i32>} : memref<200x512xf32, #tpu.memory_space<vmem>>, vector<8x512xf32>,
    %c20_i32_390 = arith.constant 20 : i32
    %320 = tpu.dynamic_rotate %305 by %c20_i32_390 dim 1 : vector<8x512xf32>, i32 -> vector<8x512xf32>
    %c56_391 = arith.constant 56 : index
    %c0_392 = arith.constant 0 : index
    %321 = vector.load %arg6[%c56_391, %c0_392] : memref<200x512xf32, #tpu.memory_space<vmem>>, vector<8x512xf32>
    tpu.vector_store %arg6[%c56_391, %c0_392], %320 {strides = array<i32>} : memref<200x512xf32, #tpu.memory_space<vmem>>, vector<8x512xf32>,
    %c19_i32_393 = arith.constant 19 : i32
    %322 = tpu.dynamic_rotate %305 by %c19_i32_393 dim 1 : vector<8x512xf32>, i32 -> vector<8x512xf32>
    %c64_394 = arith.constant 64 : index
    %c0_395 = arith.constant 0 : index
    %323 = vector.load %arg6[%c64_394, %c0_395] : memref<200x512xf32, #tpu.memory_space<vmem>>, vector<8x512xf32>
    tpu.vector_store %arg6[%c64_394, %c0_395], %322 {strides = array<i32>} : memref<200x512xf32, #tpu.memory_space<vmem>>, vector<8x512xf32>,
    %c18_i32_396 = arith.constant 18 : i32
    %324 = tpu.dynamic_rotate %305 by %c18_i32_396 dim 1 : vector<8x512xf32>, i32 -> vector<8x512xf32>
    %c72_397 = arith.constant 72 : index
    %c0_398 = arith.constant 0 : index
    %325 = vector.load %arg6[%c72_397, %c0_398] : memref<200x512xf32, #tpu.memory_space<vmem>>, vector<8x512xf32>
    tpu.vector_store %arg6[%c72_397, %c0_398], %324 {strides = array<i32>} : memref<200x512xf32, #tpu.memory_space<vmem>>, vector<8x512xf32>,
    %c2_i32_399 = arith.constant 2 : i32
    %326 = tpu.dynamic_rotate %305 by %c2_i32_399 dim 1 : vector<8x512xf32>, i32 -> vector<8x512xf32>
    %c80_400 = arith.constant 80 : index
    %c0_401 = arith.constant 0 : index
    %327 = vector.load %arg6[%c80_400, %c0_401] : memref<200x512xf32, #tpu.memory_space<vmem>>, vector<8x512xf32>
    tpu.vector_store %arg6[%c80_400, %c0_401], %326 {strides = array<i32>} : memref<200x512xf32, #tpu.memory_space<vmem>>, vector<8x512xf32>,
    %c1_i32_402 = arith.constant 1 : i32
    %328 = tpu.dynamic_rotate %305 by %c1_i32_402 dim 1 : vector<8x512xf32>, i32 -> vector<8x512xf32>
    %c88_403 = arith.constant 88 : index
    %c0_404 = arith.constant 0 : index
    %329 = vector.load %arg6[%c88_403, %c0_404] : memref<200x512xf32, #tpu.memory_space<vmem>>, vector<8x512xf32>
    tpu.vector_store %arg6[%c88_403, %c0_404], %328 {strides = array<i32>} : memref<200x512xf32, #tpu.memory_space<vmem>>, vector<8x512xf32>,
    %c96_405 = arith.constant 96 : index
    %c0_406 = arith.constant 0 : index
    %330 = vector.load %arg6[%c96_405, %c0_406] : memref<200x512xf32, #tpu.memory_space<vmem>>, vector<8x512xf32>
    tpu.vector_store %arg6[%c96_405, %c0_406], %305 {strides = array<i32>} : memref<200x512xf32, #tpu.memory_space<vmem>>, vector<8x512xf32>,
    %c511_i32_407 = arith.constant 511 : i32
    %331 = tpu.dynamic_rotate %305 by %c511_i32_407 dim 1 : vector<8x512xf32>, i32 -> vector<8x512xf32>
    %c104_408 = arith.constant 104 : index
    %c0_409 = arith.constant 0 : index
    %332 = vector.load %arg6[%c104_408, %c0_409] : memref<200x512xf32, #tpu.memory_space<vmem>>, vector<8x512xf32>
    tpu.vector_store %arg6[%c104_408, %c0_409], %331 {strides = array<i32>} : memref<200x512xf32, #tpu.memory_space<vmem>>, vector<8x512xf32>,
    %c510_i32_410 = arith.constant 510 : i32
    %333 = tpu.dynamic_rotate %305 by %c510_i32_410 dim 1 : vector<8x512xf32>, i32 -> vector<8x512xf32>
    %c112_411 = arith.constant 112 : index
    %c0_412 = arith.constant 0 : index
    %334 = vector.load %arg6[%c112_411, %c0_412] : memref<200x512xf32, #tpu.memory_space<vmem>>, vector<8x512xf32>
    tpu.vector_store %arg6[%c112_411, %c0_412], %333 {strides = array<i32>} : memref<200x512xf32, #tpu.memory_space<vmem>>, vector<8x512xf32>,
    %c494_i32_413 = arith.constant 494 : i32
    %335 = tpu.dynamic_rotate %305 by %c494_i32_413 dim 1 : vector<8x512xf32>, i32 -> vector<8x512xf32>
    %c120_414 = arith.constant 120 : index
    %c0_415 = arith.constant 0 : index
    %336 = vector.load %arg6[%c120_414, %c0_415] : memref<200x512xf32, #tpu.memory_space<vmem>>, vector<8x512xf32>
    tpu.vector_store %arg6[%c120_414, %c0_415], %335 {strides = array<i32>} : memref<200x512xf32, #tpu.memory_space<vmem>>, vector<8x512xf32>,
    %c493_i32_416 = arith.constant 493 : i32
    %337 = tpu.dynamic_rotate %305 by %c493_i32_416 dim 1 : vector<8x512xf32>, i32 -> vector<8x512xf32>
    %c128_417 = arith.constant 128 : index
    %c0_418 = arith.constant 0 : index
    %338 = vector.load %arg6[%c128_417, %c0_418] : memref<200x512xf32, #tpu.memory_space<vmem>>, vector<8x512xf32>
    tpu.vector_store %arg6[%c128_417, %c0_418], %337 {strides = array<i32>} : memref<200x512xf32, #tpu.memory_space<vmem>>, vector<8x512xf32>,
    %c492_i32_419 = arith.constant 492 : i32
    %339 = tpu.dynamic_rotate %305 by %c492_i32_419 dim 1 : vector<8x512xf32>, i32 -> vector<8x512xf32>
    %c136_420 = arith.constant 136 : index
    %c0_421 = arith.constant 0 : index
    %340 = vector.load %arg6[%c136_420, %c0_421] : memref<200x512xf32, #tpu.memory_space<vmem>>, vector<8x512xf32>
    tpu.vector_store %arg6[%c136_420, %c0_421], %339 {strides = array<i32>} : memref<200x512xf32, #tpu.memory_space<vmem>>, vector<8x512xf32>,
    %c491_i32_422 = arith.constant 491 : i32
    %341 = tpu.dynamic_rotate %305 by %c491_i32_422 dim 1 : vector<8x512xf32>, i32 -> vector<8x512xf32>
    %c144_423 = arith.constant 144 : index
    %c0_424 = arith.constant 0 : index
    %342 = vector.load %arg6[%c144_423, %c0_424] : memref<200x512xf32, #tpu.memory_space<vmem>>, vector<8x512xf32>
    tpu.vector_store %arg6[%c144_423, %c0_424], %341 {strides = array<i32>} : memref<200x512xf32, #tpu.memory_space<vmem>>, vector<8x512xf32>,
    %c490_i32_425 = arith.constant 490 : i32
    %343 = tpu.dynamic_rotate %305 by %c490_i32_425 dim 1 : vector<8x512xf32>, i32 -> vector<8x512xf32>
    %c152_426 = arith.constant 152 : index
    %c0_427 = arith.constant 0 : index
    %344 = vector.load %arg6[%c152_426, %c0_427] : memref<200x512xf32, #tpu.memory_space<vmem>>, vector<8x512xf32>
    tpu.vector_store %arg6[%c152_426, %c0_427], %343 {strides = array<i32>} : memref<200x512xf32, #tpu.memory_space<vmem>>, vector<8x512xf32>,
    %c474_i32_428 = arith.constant 474 : i32
    %345 = tpu.dynamic_rotate %305 by %c474_i32_428 dim 1 : vector<8x512xf32>, i32 -> vector<8x512xf32>
    %c160_429 = arith.constant 160 : index
    %c0_430 = arith.constant 0 : index
    %346 = vector.load %arg6[%c160_429, %c0_430] : memref<200x512xf32, #tpu.memory_space<vmem>>, vector<8x512xf32>
    tpu.vector_store %arg6[%c160_429, %c0_430], %345 {strides = array<i32>} : memref<200x512xf32, #tpu.memory_space<vmem>>, vector<8x512xf32>,
    %c473_i32_431 = arith.constant 473 : i32
    %347 = tpu.dynamic_rotate %305 by %c473_i32_431 dim 1 : vector<8x512xf32>, i32 -> vector<8x512xf32>
    %c168_432 = arith.constant 168 : index
    %c0_433 = arith.constant 0 : index
    %348 = vector.load %arg6[%c168_432, %c0_433] : memref<200x512xf32, #tpu.memory_space<vmem>>, vector<8x512xf32>
    tpu.vector_store %arg6[%c168_432, %c0_433], %347 {strides = array<i32>} : memref<200x512xf32, #tpu.memory_space<vmem>>, vector<8x512xf32>,
    %c472_i32_434 = arith.constant 472 : i32
    %349 = tpu.dynamic_rotate %305 by %c472_i32_434 dim 1 : vector<8x512xf32>, i32 -> vector<8x512xf32>
    %c176_435 = arith.constant 176 : index
    %c0_436 = arith.constant 0 : index
    %350 = vector.load %arg6[%c176_435, %c0_436] : memref<200x512xf32, #tpu.memory_space<vmem>>, vector<8x512xf32>
    tpu.vector_store %arg6[%c176_435, %c0_436], %349 {strides = array<i32>} : memref<200x512xf32, #tpu.memory_space<vmem>>, vector<8x512xf32>,
    %c471_i32_437 = arith.constant 471 : i32
    %351 = tpu.dynamic_rotate %305 by %c471_i32_437 dim 1 : vector<8x512xf32>, i32 -> vector<8x512xf32>
    %c184_438 = arith.constant 184 : index
    %c0_439 = arith.constant 0 : index
    %352 = vector.load %arg6[%c184_438, %c0_439] : memref<200x512xf32, #tpu.memory_space<vmem>>, vector<8x512xf32>
    tpu.vector_store %arg6[%c184_438, %c0_439], %351 {strides = array<i32>} : memref<200x512xf32, #tpu.memory_space<vmem>>, vector<8x512xf32>,
    %c470_i32_440 = arith.constant 470 : i32
    %353 = tpu.dynamic_rotate %305 by %c470_i32_440 dim 1 : vector<8x512xf32>, i32 -> vector<8x512xf32>
    %c192_441 = arith.constant 192 : index
    %c0_442 = arith.constant 0 : index
    %354 = vector.load %arg6[%c192_441, %c0_442] : memref<200x512xf32, #tpu.memory_space<vmem>>, vector<8x512xf32>
    tpu.vector_store %arg6[%c192_441, %c0_442], %353 {strides = array<i32>} : memref<200x512xf32, #tpu.memory_space<vmem>>, vector<8x512xf32>,
    %c5 = arith.constant 5 : index
    %c0_443 = arith.constant 0 : index
    %c0_444 = arith.constant 0 : index
    %355 = vector.load %arg2[%c5, %c0_443, %c0_444] : memref<7x8x200xf32, #tpu.memory_space<vmem>>, vector<1x8x200xf32>
    %356 = vector.shape_cast %355 : vector<1x8x200xf32> to vector<8x200xf32>
    %c0_445 = arith.constant 0 : index
    %c0_446 = arith.constant 0 : index
    %357 = vector.load %arg6[%c0_445, %c0_446] : memref<200x512xf32, #tpu.memory_space<vmem>>, vector<200x512xf32>
    %cst_447 = arith.constant dense<0.000000e+00> : vector<8x512xf32>
    %358 = tpu.matmul %356, %357, %cst_447 {dimension_numbers = #tpu.dot_dimension_numbers<[1], [0], [0], [1], [0, 0, 1, 1], [], []>} : vector<8x200xf32>, vector<200x512xf32>, vector<8x512xf32> -> vector<8x512xf32>
    %c5_448 = arith.constant 5 : index
    %c0_449 = arith.constant 0 : index
    %c0_450 = arith.constant 0 : index
    %359 = vector.load %arg3[%c5_448, %c0_449, %c0_450] : memref<7x8x1xf32, #tpu.memory_space<vmem>>, vector<1x8x1xf32>
    %360 = vector.shape_cast %359 : vector<1x8x1xf32> to vector<8x1xf32>
    %361 = vector.broadcast %360 : vector<8x1xf32> to vector<8x512xf32>
    %362 = arith.addf %358, %361 : vector<8x512xf32>
    %cst_451 = arith.constant 0.000000e+00 : f32
    %363 = vector.broadcast %cst_451 : f32 to vector<8x512xf32>
    %364 = arith.maximumf %362, %363 : vector<8x512xf32>
    %365 = vector.broadcast %0 : vector<1x512xf32> to vector<8x512xf32>
    %366 = arith.mulf %364, %365 : vector<8x512xf32>
    %c42_i32_452 = arith.constant 42 : i32
    %367 = tpu.dynamic_rotate %366 by %c42_i32_452 dim 1 : vector<8x512xf32>, i32 -> vector<8x512xf32>
    %c0_453 = arith.constant 0 : index
    %c0_454 = arith.constant 0 : index
    %368 = vector.load %arg6[%c0_453, %c0_454] : memref<200x512xf32, #tpu.memory_space<vmem>>, vector<8x512xf32>
    tpu.vector_store %arg6[%c0_453, %c0_454], %367 {strides = array<i32>} : memref<200x512xf32, #tpu.memory_space<vmem>>, vector<8x512xf32>,
    %c41_i32_455 = arith.constant 41 : i32
    %369 = tpu.dynamic_rotate %366 by %c41_i32_455 dim 1 : vector<8x512xf32>, i32 -> vector<8x512xf32>
    %c8_456 = arith.constant 8 : index
    %c0_457 = arith.constant 0 : index
    %370 = vector.load %arg6[%c8_456, %c0_457] : memref<200x512xf32, #tpu.memory_space<vmem>>, vector<8x512xf32>
    tpu.vector_store %arg6[%c8_456, %c0_457], %369 {strides = array<i32>} : memref<200x512xf32, #tpu.memory_space<vmem>>, vector<8x512xf32>,
    %c40_i32_458 = arith.constant 40 : i32
    %371 = tpu.dynamic_rotate %366 by %c40_i32_458 dim 1 : vector<8x512xf32>, i32 -> vector<8x512xf32>
    %c16_459 = arith.constant 16 : index
    %c0_460 = arith.constant 0 : index
    %372 = vector.load %arg6[%c16_459, %c0_460] : memref<200x512xf32, #tpu.memory_space<vmem>>, vector<8x512xf32>
    tpu.vector_store %arg6[%c16_459, %c0_460], %371 {strides = array<i32>} : memref<200x512xf32, #tpu.memory_space<vmem>>, vector<8x512xf32>,
    %c39_i32_461 = arith.constant 39 : i32
    %373 = tpu.dynamic_rotate %366 by %c39_i32_461 dim 1 : vector<8x512xf32>, i32 -> vector<8x512xf32>
    %c24_462 = arith.constant 24 : index
    %c0_463 = arith.constant 0 : index
    %374 = vector.load %arg6[%c24_462, %c0_463] : memref<200x512xf32, #tpu.memory_space<vmem>>, vector<8x512xf32>
    tpu.vector_store %arg6[%c24_462, %c0_463], %373 {strides = array<i32>} : memref<200x512xf32, #tpu.memory_space<vmem>>, vector<8x512xf32>,
    %c38_i32_464 = arith.constant 38 : i32
    %375 = tpu.dynamic_rotate %366 by %c38_i32_464 dim 1 : vector<8x512xf32>, i32 -> vector<8x512xf32>
    %c32_465 = arith.constant 32 : index
    %c0_466 = arith.constant 0 : index
    %376 = vector.load %arg6[%c32_465, %c0_466] : memref<200x512xf32, #tpu.memory_space<vmem>>, vector<8x512xf32>
    tpu.vector_store %arg6[%c32_465, %c0_466], %375 {strides = array<i32>} : memref<200x512xf32, #tpu.memory_space<vmem>>, vector<8x512xf32>,
    %c22_i32_467 = arith.constant 22 : i32
    %377 = tpu.dynamic_rotate %366 by %c22_i32_467 dim 1 : vector<8x512xf32>, i32 -> vector<8x512xf32>
    %c40_468 = arith.constant 40 : index
    %c0_469 = arith.constant 0 : index
    %378 = vector.load %arg6[%c40_468, %c0_469] : memref<200x512xf32, #tpu.memory_space<vmem>>, vector<8x512xf32>
    tpu.vector_store %arg6[%c40_468, %c0_469], %377 {strides = array<i32>} : memref<200x512xf32, #tpu.memory_space<vmem>>, vector<8x512xf32>,
    %c21_i32_470 = arith.constant 21 : i32
    %379 = tpu.dynamic_rotate %366 by %c21_i32_470 dim 1 : vector<8x512xf32>, i32 -> vector<8x512xf32>
    %c48_471 = arith.constant 48 : index
    %c0_472 = arith.constant 0 : index
    %380 = vector.load %arg6[%c48_471, %c0_472] : memref<200x512xf32, #tpu.memory_space<vmem>>, vector<8x512xf32>
    tpu.vector_store %arg6[%c48_471, %c0_472], %379 {strides = array<i32>} : memref<200x512xf32, #tpu.memory_space<vmem>>, vector<8x512xf32>,
    %c20_i32_473 = arith.constant 20 : i32
    %381 = tpu.dynamic_rotate %366 by %c20_i32_473 dim 1 : vector<8x512xf32>, i32 -> vector<8x512xf32>
    %c56_474 = arith.constant 56 : index
    %c0_475 = arith.constant 0 : index
    %382 = vector.load %arg6[%c56_474, %c0_475] : memref<200x512xf32, #tpu.memory_space<vmem>>, vector<8x512xf32>
    tpu.vector_store %arg6[%c56_474, %c0_475], %381 {strides = array<i32>} : memref<200x512xf32, #tpu.memory_space<vmem>>, vector<8x512xf32>,
    %c19_i32_476 = arith.constant 19 : i32
    %383 = tpu.dynamic_rotate %366 by %c19_i32_476 dim 1 : vector<8x512xf32>, i32 -> vector<8x512xf32>
    %c64_477 = arith.constant 64 : index
    %c0_478 = arith.constant 0 : index
    %384 = vector.load %arg6[%c64_477, %c0_478] : memref<200x512xf32, #tpu.memory_space<vmem>>, vector<8x512xf32>
    tpu.vector_store %arg6[%c64_477, %c0_478], %383 {strides = array<i32>} : memref<200x512xf32, #tpu.memory_space<vmem>>, vector<8x512xf32>,
    %c18_i32_479 = arith.constant 18 : i32
    %385 = tpu.dynamic_rotate %366 by %c18_i32_479 dim 1 : vector<8x512xf32>, i32 -> vector<8x512xf32>
    %c72_480 = arith.constant 72 : index
    %c0_481 = arith.constant 0 : index
    %386 = vector.load %arg6[%c72_480, %c0_481] : memref<200x512xf32, #tpu.memory_space<vmem>>, vector<8x512xf32>
    tpu.vector_store %arg6[%c72_480, %c0_481], %385 {strides = array<i32>} : memref<200x512xf32, #tpu.memory_space<vmem>>, vector<8x512xf32>,
    %c2_i32_482 = arith.constant 2 : i32
    %387 = tpu.dynamic_rotate %366 by %c2_i32_482 dim 1 : vector<8x512xf32>, i32 -> vector<8x512xf32>
    %c80_483 = arith.constant 80 : index
    %c0_484 = arith.constant 0 : index
    %388 = vector.load %arg6[%c80_483, %c0_484] : memref<200x512xf32, #tpu.memory_space<vmem>>, vector<8x512xf32>
    tpu.vector_store %arg6[%c80_483, %c0_484], %387 {strides = array<i32>} : memref<200x512xf32, #tpu.memory_space<vmem>>, vector<8x512xf32>,
    %c1_i32_485 = arith.constant 1 : i32
    %389 = tpu.dynamic_rotate %366 by %c1_i32_485 dim 1 : vector<8x512xf32>, i32 -> vector<8x512xf32>
    %c88_486 = arith.constant 88 : index
    %c0_487 = arith.constant 0 : index
    %390 = vector.load %arg6[%c88_486, %c0_487] : memref<200x512xf32, #tpu.memory_space<vmem>>, vector<8x512xf32>
    tpu.vector_store %arg6[%c88_486, %c0_487], %389 {strides = array<i32>} : memref<200x512xf32, #tpu.memory_space<vmem>>, vector<8x512xf32>,
    %c96_488 = arith.constant 96 : index
    %c0_489 = arith.constant 0 : index
    %391 = vector.load %arg6[%c96_488, %c0_489] : memref<200x512xf32, #tpu.memory_space<vmem>>, vector<8x512xf32>
    tpu.vector_store %arg6[%c96_488, %c0_489], %366 {strides = array<i32>} : memref<200x512xf32, #tpu.memory_space<vmem>>, vector<8x512xf32>,
    %c511_i32_490 = arith.constant 511 : i32
    %392 = tpu.dynamic_rotate %366 by %c511_i32_490 dim 1 : vector<8x512xf32>, i32 -> vector<8x512xf32>
    %c104_491 = arith.constant 104 : index
    %c0_492 = arith.constant 0 : index
    %393 = vector.load %arg6[%c104_491, %c0_492] : memref<200x512xf32, #tpu.memory_space<vmem>>, vector<8x512xf32>
    tpu.vector_store %arg6[%c104_491, %c0_492], %392 {strides = array<i32>} : memref<200x512xf32, #tpu.memory_space<vmem>>, vector<8x512xf32>,
    %c510_i32_493 = arith.constant 510 : i32
    %394 = tpu.dynamic_rotate %366 by %c510_i32_493 dim 1 : vector<8x512xf32>, i32 -> vector<8x512xf32>
    %c112_494 = arith.constant 112 : index
    %c0_495 = arith.constant 0 : index
    %395 = vector.load %arg6[%c112_494, %c0_495] : memref<200x512xf32, #tpu.memory_space<vmem>>, vector<8x512xf32>
    tpu.vector_store %arg6[%c112_494, %c0_495], %394 {strides = array<i32>} : memref<200x512xf32, #tpu.memory_space<vmem>>, vector<8x512xf32>,
    %c494_i32_496 = arith.constant 494 : i32
    %396 = tpu.dynamic_rotate %366 by %c494_i32_496 dim 1 : vector<8x512xf32>, i32 -> vector<8x512xf32>
    %c120_497 = arith.constant 120 : index
    %c0_498 = arith.constant 0 : index
    %397 = vector.load %arg6[%c120_497, %c0_498] : memref<200x512xf32, #tpu.memory_space<vmem>>, vector<8x512xf32>
    tpu.vector_store %arg6[%c120_497, %c0_498], %396 {strides = array<i32>} : memref<200x512xf32, #tpu.memory_space<vmem>>, vector<8x512xf32>,
    %c493_i32_499 = arith.constant 493 : i32
    %398 = tpu.dynamic_rotate %366 by %c493_i32_499 dim 1 : vector<8x512xf32>, i32 -> vector<8x512xf32>
    %c128_500 = arith.constant 128 : index
    %c0_501 = arith.constant 0 : index
    %399 = vector.load %arg6[%c128_500, %c0_501] : memref<200x512xf32, #tpu.memory_space<vmem>>, vector<8x512xf32>
    tpu.vector_store %arg6[%c128_500, %c0_501], %398 {strides = array<i32>} : memref<200x512xf32, #tpu.memory_space<vmem>>, vector<8x512xf32>,
    %c492_i32_502 = arith.constant 492 : i32
    %400 = tpu.dynamic_rotate %366 by %c492_i32_502 dim 1 : vector<8x512xf32>, i32 -> vector<8x512xf32>
    %c136_503 = arith.constant 136 : index
    %c0_504 = arith.constant 0 : index
    %401 = vector.load %arg6[%c136_503, %c0_504] : memref<200x512xf32, #tpu.memory_space<vmem>>, vector<8x512xf32>
    tpu.vector_store %arg6[%c136_503, %c0_504], %400 {strides = array<i32>} : memref<200x512xf32, #tpu.memory_space<vmem>>, vector<8x512xf32>,
    %c491_i32_505 = arith.constant 491 : i32
    %402 = tpu.dynamic_rotate %366 by %c491_i32_505 dim 1 : vector<8x512xf32>, i32 -> vector<8x512xf32>
    %c144_506 = arith.constant 144 : index
    %c0_507 = arith.constant 0 : index
    %403 = vector.load %arg6[%c144_506, %c0_507] : memref<200x512xf32, #tpu.memory_space<vmem>>, vector<8x512xf32>
    tpu.vector_store %arg6[%c144_506, %c0_507], %402 {strides = array<i32>} : memref<200x512xf32, #tpu.memory_space<vmem>>, vector<8x512xf32>,
    %c490_i32_508 = arith.constant 490 : i32
    %404 = tpu.dynamic_rotate %366 by %c490_i32_508 dim 1 : vector<8x512xf32>, i32 -> vector<8x512xf32>
    %c152_509 = arith.constant 152 : index
    %c0_510 = arith.constant 0 : index
    %405 = vector.load %arg6[%c152_509, %c0_510] : memref<200x512xf32, #tpu.memory_space<vmem>>, vector<8x512xf32>
    tpu.vector_store %arg6[%c152_509, %c0_510], %404 {strides = array<i32>} : memref<200x512xf32, #tpu.memory_space<vmem>>, vector<8x512xf32>,
    %c474_i32_511 = arith.constant 474 : i32
    %406 = tpu.dynamic_rotate %366 by %c474_i32_511 dim 1 : vector<8x512xf32>, i32 -> vector<8x512xf32>
    %c160_512 = arith.constant 160 : index
    %c0_513 = arith.constant 0 : index
    %407 = vector.load %arg6[%c160_512, %c0_513] : memref<200x512xf32, #tpu.memory_space<vmem>>, vector<8x512xf32>
    tpu.vector_store %arg6[%c160_512, %c0_513], %406 {strides = array<i32>} : memref<200x512xf32, #tpu.memory_space<vmem>>, vector<8x512xf32>,
    %c473_i32_514 = arith.constant 473 : i32
    %408 = tpu.dynamic_rotate %366 by %c473_i32_514 dim 1 : vector<8x512xf32>, i32 -> vector<8x512xf32>
    %c168_515 = arith.constant 168 : index
    %c0_516 = arith.constant 0 : index
    %409 = vector.load %arg6[%c168_515, %c0_516] : memref<200x512xf32, #tpu.memory_space<vmem>>, vector<8x512xf32>
    tpu.vector_store %arg6[%c168_515, %c0_516], %408 {strides = array<i32>} : memref<200x512xf32, #tpu.memory_space<vmem>>, vector<8x512xf32>,
    %c472_i32_517 = arith.constant 472 : i32
    %410 = tpu.dynamic_rotate %366 by %c472_i32_517 dim 1 : vector<8x512xf32>, i32 -> vector<8x512xf32>
    %c176_518 = arith.constant 176 : index
    %c0_519 = arith.constant 0 : index
    %411 = vector.load %arg6[%c176_518, %c0_519] : memref<200x512xf32, #tpu.memory_space<vmem>>, vector<8x512xf32>
    tpu.vector_store %arg6[%c176_518, %c0_519], %410 {strides = array<i32>} : memref<200x512xf32, #tpu.memory_space<vmem>>, vector<8x512xf32>,
    %c471_i32_520 = arith.constant 471 : i32
    %412 = tpu.dynamic_rotate %366 by %c471_i32_520 dim 1 : vector<8x512xf32>, i32 -> vector<8x512xf32>
    %c184_521 = arith.constant 184 : index
    %c0_522 = arith.constant 0 : index
    %413 = vector.load %arg6[%c184_521, %c0_522] : memref<200x512xf32, #tpu.memory_space<vmem>>, vector<8x512xf32>
    tpu.vector_store %arg6[%c184_521, %c0_522], %412 {strides = array<i32>} : memref<200x512xf32, #tpu.memory_space<vmem>>, vector<8x512xf32>,
    %c470_i32_523 = arith.constant 470 : i32
    %414 = tpu.dynamic_rotate %366 by %c470_i32_523 dim 1 : vector<8x512xf32>, i32 -> vector<8x512xf32>
    %c192_524 = arith.constant 192 : index
    %c0_525 = arith.constant 0 : index
    %415 = vector.load %arg6[%c192_524, %c0_525] : memref<200x512xf32, #tpu.memory_space<vmem>>, vector<8x512xf32>
    tpu.vector_store %arg6[%c192_524, %c0_525], %414 {strides = array<i32>} : memref<200x512xf32, #tpu.memory_space<vmem>>, vector<8x512xf32>,
    %c6 = arith.constant 6 : index
    %c0_526 = arith.constant 0 : index
    %c0_527 = arith.constant 0 : index
    %416 = vector.load %arg2[%c6, %c0_526, %c0_527] : memref<7x8x200xf32, #tpu.memory_space<vmem>>, vector<1x8x200xf32>
    %417 = vector.shape_cast %416 : vector<1x8x200xf32> to vector<8x200xf32>
    %c0_528 = arith.constant 0 : index
    %c0_529 = arith.constant 0 : index
    %418 = vector.load %arg6[%c0_528, %c0_529] : memref<200x512xf32, #tpu.memory_space<vmem>>, vector<200x512xf32>
    %cst_530 = arith.constant dense<0.000000e+00> : vector<8x512xf32>
    %419 = tpu.matmul %417, %418, %cst_530 {dimension_numbers = #tpu.dot_dimension_numbers<[1], [0], [0], [1], [0, 0, 1, 1], [], []>} : vector<8x200xf32>, vector<200x512xf32>, vector<8x512xf32> -> vector<8x512xf32>
    %c6_531 = arith.constant 6 : index
    %c0_532 = arith.constant 0 : index
    %c0_533 = arith.constant 0 : index
    %420 = vector.load %arg3[%c6_531, %c0_532, %c0_533] : memref<7x8x1xf32, #tpu.memory_space<vmem>>, vector<1x8x1xf32>
    %421 = vector.shape_cast %420 : vector<1x8x1xf32> to vector<8x1xf32>
    %422 = vector.broadcast %421 : vector<8x1xf32> to vector<8x512xf32>
    %423 = arith.addf %419, %422 : vector<8x512xf32>
    %424 = arith.addf %423, %305 : vector<8x512xf32>
    %425 = vector.broadcast %0 : vector<1x512xf32> to vector<8x512xf32>
    %426 = arith.mulf %424, %425 : vector<8x512xf32>
    %c0_534 = arith.constant 0 : index
    %c0_535 = arith.constant 0 : index
    %c0_536 = arith.constant 0 : index
    %427 = vector.load %arg5[%c0_534, %c0_535, %c0_536] : memref<1x8x512xf32, #tpu.memory_space<vmem>>, vector<1x8x512xf32>
    %428 = vector.shape_cast %427 : vector<1x8x512xf32> to vector<8x512xf32>
    %429 = vector.shape_cast %426 : vector<8x512xf32> to vector<1x8x512xf32>
    tpu.vector_store %arg5[%c0_534, %c0_535, %c0_536], %429 {strides = array<i32>} : memref<1x8x512xf32, #tpu.memory_space<vmem>>, vector<1x8x512xf32>,
    return
  }
  func.func @transform_0(%arg0: i32) -> (i32, i32, i32) {
    %c0_i32 = arith.constant 0 : i32
    %c0_i32_0 = arith.constant 0 : i32
    %c0_i32_1 = arith.constant 0 : i32
    return %arg0, %c0_i32, %c0_i32_0 : i32, i32, i32
  }
  func.func @transform_1(%arg0: i32) -> (i32, i32, i32) {
    %c0_i32 = arith.constant 0 : i32
    %c0_i32_0 = arith.constant 0 : i32
    %c0_i32_1 = arith.constant 0 : i32
    %c0_i32_2 = arith.constant 0 : i32
    return %c0_i32, %c0_i32_0, %c0_i32_1 : i32, i32, i32
  }
  func.func @transform_2(%arg0: i32) -> (i32, i32, i32) {
    %c0_i32 = arith.constant 0 : i32
    %c0_i32_0 = arith.constant 0 : i32
    %c0_i32_1 = arith.constant 0 : i32
    %c0_i32_2 = arith.constant 0 : i32
    return %c0_i32, %c0_i32_0, %c0_i32_1 : i32, i32, i32
  }
  func.func @transform_3(%arg0: i32) -> (i32, i32) {
    %c0_i32 = arith.constant 0 : i32
    %c0_i32_0 = arith.constant 0 : i32
    %c0_i32_1 = arith.constant 0 : i32
    return %c0_i32, %c0_i32_0 : i32, i32
  }
  func.func @transform_4(%arg0: i32) -> (i32, i32, i32) {
    %c0_i32 = arith.constant 0 : i32
    %c0_i32_0 = arith.constant 0 : i32
    %c0_i32_1 = arith.constant 0 : i32
    return %arg0, %c0_i32, %c0_i32_0 : i32, i32, i32
  }
}

</mosaic_0001>

<bundles_post_ra>
// kernel: eblock_forward.1
= control target key start
LH: loop header
LB: loop body
LE: loop exit
PB: predicated region body
PF: predicated region fallthrough
CT: control target
= control target key end

     0   :  { %s6802_s15 = smov 0   ;;  %s12308_s0 = inlined_call_operand.vmem [shape: f32[2,8,512], index: 0, kind: input, shape index: {}]   ;;  %s12309_s1 = inlined_call_operand.vmem [shape: f32[7,8,200], index: 1, kind: input, shape index: {}]   ;;  %s12310_s2 = inlined_call_operand.vmem [shape: f32[7,8,1], index: 2, kind: input, shape index: {}]   ;;  %s12311_s3 = inlined_call_operand.vmem [shape: f32[1,512], index: 3, kind: input, shape index: {}]   ;;  %s12312_s4 = inlined_call_operand.vmem [shape: f32[2,8,512], index: 4, kind: output, shape index: {}]  }
   0x1 LB: > { %s4979_s16 = sadd.s32 4294967295, %s6750_s15   ;;  %p4983_p0 = scmp.ge.s32.totalorder %s6750_s15, 1  ;;  %s6750_s15 = sphi %s6802_s15, %s14_s15  }
   0x2   : > { %p162_p1 = scmp.lt.s32.totalorder %s6750_s15, 3 }
   0x4   : > { %p163_p2 = pnand %p4983_p0, %p162_p1 }
   0x6   : > { %166 = sbr.rel (%p163_p2) target bundleno = 2824 (0xb08), region = 36 }
   0xb   : > { %p188_p3 = scmp.lt.s32.totalorder %s4979_s16, 1  ;;  %s6752_s21 = smov 41   ;;  %v211_v35 = vlaneseq }
   0xc   : > { %s6753_s22 = smov 42   ;;  %s6754_s23 = smov 40  }
   0xd   : > { %s13631_s16 = smov (!%p188_p3, %s4979_s16), 1  ;;  %s6755_s24 = smov 39   ;;  %v6988_v36 = vand.u32 127, %v211_v35 }
   0xe   : > { %s12313_s17 = sshll.u32 %s13631_s16, 5  ;;  %s6756_s25 = smov 38  }
   0xf   : > { %s192_s20 = scalar_lea.vmem %s12308_s0, %s12313_s17  ;;  %s6757_s26 = smov 22   ;;  %vm455_vm0 = vcmp.lt.s32.totalorder %v6988_v36, 110  ;;  %vm438_vm1 = vcmp.lt.s32.totalorder %v6988_v36, 126  ;;  %vm421_vm2 = vcmp.lt.s32.totalorder %v6988_v36, 127  ;;  %vm400_vm3 = vcmp.lt.s32.totalorder %v6988_v36, 1 }
  0x10   : > { %v6818_v0 = vld [vmem:[%s192_s20] sm:$0xff]  ;;  %v6820_v1 = vld [vmem:[%s192_s20 + $0x8] sm:$0xff]  ;;  %v6830_v3 = vld [vmem:[%s192_s20 + $0x10] sm:$0xff]  ;;  %s6758_s27 = smov 21   ;;  %s12535_s28 = smov 20   ;;  %vm383_vm4 = vcmp.lt.s32.totalorder %v6988_v36, 2 }
  0x11   : > { %v6824_v2 = vpack.i.bf16 %v6820_v1, %v6818_v0  ;;  %v6832_v4 = vld [vmem:[%s192_s20 + $0x18] sm:$0xff]  ;;  %s6760_s29 = smov 19   ;;  %s6761_s30 = smov 18   ;;  %vm366_vm5 = vcmp.lt.s32.totalorder %v6988_v36, 18  ;;  %vm12365_vm6 = vcmp.lt.s32.totalorder %v6988_v36, 19  ;;  %vm12363_vm7 = vcmp.lt.s32.totalorder %v6988_v36, 20 }
  0x12   : > { %v6838_v5 = vpack.i.bf16 %v6832_v4, %v6830_v3  ;;  %s12537_s5 = smov 2   ;;  %s6763_s6 = smov 1   ;;  %vm12362_vm8 = vcmp.lt.s32.totalorder %v6988_v36, 21  ;;  %vm12361_vm9 = vcmp.lt.s32.totalorder %v6988_v36, 22  ;;  %vm12360_vm10 = vcmp.lt.s32.totalorder %v6988_v36, 38 }
  0x13   : > { %5082 = vrot.lane.b32.xlu1 %v6824_v2, %s6752_s21  ;;  %5072 = vrot.lane.b32.xlu0 %v6824_v2, %s6753_s22  ;;  %s6764_s7 = smov 127   ;;  %s12484_s8 = smov 126   ;;  %vm12359_vm11 = vcmp.lt.s32.totalorder %v6988_v36, 39  ;;  %vm12358_vm12 = vcmp.lt.s32.totalorder %v6988_v36, 40  ;;  %vm12356_vm13 = vcmp.lt.s32.totalorder %v6988_v36, 41  ;;  %vm12364_vm14 = vcmp.lt.s32.totalorder %v6988_v36, 42 }
  0x14   : > { %5092 = vrot.lane.b32.xlu2 %v6824_v2, %s6754_s23  ;;  %s6766_s9 = smov 110   ;;  %s12471_s10 = smov 109   ;;  %vm608_vm15 = vcmp.lt.s32.totalorder %v6988_v36, 86 }
  0x15   : > { %s12473_s11 = smov 108   ;;  %s12482_s12 = smov 107  }
  0x16   : > { %s12394_s13 = smov 106   ;;  %s12403_s14 = smov 90  }
  0x17   : > { %s12405_s18 = smov 89   ;;  %s12392_s19 = smov 88  }
  0x18   : > { %s12336_s20 = smov 87   ;;  %s12334_s17 = smov 86  }
  0x1b   : > { %5087 = vrot.lane.b32.xlu1 %v6838_v5, %s6752_s21  ;;  %5077 = vrot.lane.b32.xlu0 %v6838_v5, %s6753_s22 }
  0x1c   : > { %5097 = vrot.lane.b32.xlu2 %v6838_v5, %s6754_s23 }
  0x23   : > { %5107 = vrot.lane.b32.xlu1 %v6838_v5, %s6755_s24  ;;  %5102 = vrot.lane.b32.xlu0 %v6824_v2, %s6755_s24 }
  0x24   : > { %5112 = vrot.lane.b32.xlu2 %v6824_v2, %s6756_s25 }
  0x2b   : > { %5122 = vrot.lane.b32.xlu1 %v6824_v2, %s6757_s26  ;;  %5117 = vrot.lane.b32.xlu0 %v6838_v5, %s6756_s25 }
  0x2c   : > { %5127 = vrot.lane.b32.xlu2 %v6838_v5, %s6757_s26 }
  0x33   : > { %5137 = vrot.lane.b32.xlu1 %v6838_v5, %s6758_s27  ;;  %5132 = vrot.lane.b32.xlu0 %v6824_v2, %s6758_s27 }
  0x34   : > { %5142 = vrot.lane.b32.xlu2 %v6824_v2, %s12535_s28 }
  0x3b   : > { %5152 = vrot.lane.b32.xlu1 %v6824_v2, %s6760_s29  ;;  %5147 = vrot.lane.b32.xlu0 %v6838_v5, %s12535_s28 }
  0x3c   : > { %5157 = vrot.lane.b32.xlu2 %v6838_v5, %s6760_s29 }
  0x43   : > { %5167 = vrot.lane.b32.xlu1 %v6838_v5, %s6761_s30  ;;  %5162 = vrot.lane.b32.xlu0 %v6824_v2, %s6761_s30 }
  0x44   : > { %5172 = vrot.lane.b32.xlu2 %v6824_v2, %s12537_s5 }
  0x4b   : > { %5182 = vrot.lane.b32.xlu1 %v6824_v2, %s6763_s6  ;;  %5177 = vrot.lane.b32.xlu0 %v6838_v5, %s12537_s5 }
  0x4c   : > { %5187 = vrot.lane.b32.xlu2 %v6838_v5, %s6763_s6 }
  0x53   : > { %5197 = vrot.lane.b32.xlu1 %v6838_v5, %s6764_s7  ;;  %5192 = vrot.lane.b32.xlu0 %v6824_v2, %s6764_s7 }
  0x54   : > { %5202 = vrot.lane.b32.xlu2 %v6824_v2, %s12484_s8 }
  0x5b   : > { %5212 = vrot.lane.b32.xlu1 %v6824_v2, %s6766_s9  ;;  %5207 = vrot.lane.b32.xlu0 %v6838_v5, %s12484_s8 }
  0x5c   : > { %5217 = vrot.lane.b32.xlu2 %v6838_v5, %s6766_s9 }
  0x63   : > { %5227 = vrot.lane.b32.xlu1 %v6838_v5, %s12471_s10  ;;  %5222 = vrot.lane.b32.xlu0 %v6824_v2, %s12471_s10 }
  0x64   : > { %5232 = vrot.lane.b32.xlu2 %v6824_v2, %s12473_s11 }
  0x6b   : > { %5242 = vrot.lane.b32.xlu1 %v6824_v2, %s12482_s12  ;;  %5237 = vrot.lane.b32.xlu0 %v6838_v5, %s12473_s11 }
  0x6c   : > { %5247 = vrot.lane.b32.xlu2 %v6838_v5, %s12482_s12 }
  0x6e   : > { %v6906_v6 = vpop.permute.xlu2 %5092 }
  0x73   : > { %5257 = vrot.lane.b32.xlu1 %v6838_v5, %s12394_s13  ;;  %5252 = vrot.lane.b32.xlu0 %v6824_v2, %s12394_s13 }
  0x74   : > { %5262 = vrot.lane.b32.xlu2 %v6824_v2, %s12403_s14 }
  0x76   : > { %v6914_v7 = vpop.permute.xlu2 %5097 }
  0x7b   : > { %5272 = vrot.lane.b32.xlu1 %v6824_v2, %s12405_s18  ;;  %5267 = vrot.lane.b32.xlu0 %v6838_v5, %s12403_s14 }
  0x7c   : > { %5277 = vrot.lane.b32.xlu2 %v6838_v5, %s12405_s18 }
  0x7e   : > { %v6922_v8 = vpop.permute.xlu2 %5112 }
  0x83   : > { %5287 = vrot.lane.b32.xlu1 %v6838_v5, %s12392_s19  ;;  %5282 = vrot.lane.b32.xlu0 %v6824_v2, %s12392_s19 }
  0x84   : > { %5292 = vrot.lane.b32.xlu2 %v6824_v2, %s12336_s20 }
  0x85   : > { %v6930_v9 = vpop.permute.xlu1 %5082  ;;  %v6932_v10 = vpop.permute.xlu0 %5072 }
  0x86   : > { %12626 = vst [vmem:[#allocation3_spill] sm:$0xff] %v6930_v9  ;;  %v6934_v11 = vpop.permute.xlu2 %5127 }
  0x87   : > { %12627 = vst [vmem:[#allocation4_spill] sm:$0xff] %v6932_v10 }
  0x8b   : > { %5302 = vrot.lane.b32.xlu1 %v6824_v2, %s12334_s17  ;;  %5297 = vrot.lane.b32.xlu0 %v6838_v5, %s12336_s20  ;;  %s12700_s20 = smov 86  }
  0x8c   : > { %5307 = vrot.lane.b32.xlu2 %v6838_v5, %s12334_s17  ;;  %s12699_s17 = smov 87  }
  0x8d   : > { %v6942_v12 = vpop.permute.xlu1 %5087  ;;  %v6944_v13 = vpop.permute.xlu0 %5077 }
  0x8e   : > { %12628 = vst [vmem:[#allocation5_spill] sm:$0xff] %v6942_v12  ;;  %v6946_v14 = vpop.permute.xlu2 %5142 }
  0x95   : > { %v6948_v15 = vpop.permute.xlu1 %5107  ;;  %v6950_v16 = vpop.permute.xlu0 %5102 }
  0x96   : > { %v6952_v17 = vpop.permute.xlu2 %5157 }
  0x9d   : > { %v6954_v18 = vpop.permute.xlu1 %5122  ;;  %v6956_v19 = vpop.permute.xlu0 %5117 }
  0x9e   : > { %v6958_v20 = vpop.permute.xlu2 %5172 }
  0x9f   : > { %v12315_v58 = vunpack.i.h.bf16 %v6958_v20  ;;  %v5174_v59 = vunpack.i.l.bf16 %v6958_v20 }
  0xa5   : > { %v6960_v21 = vpop.permute.xlu1 %5137  ;;  %v6962_v22 = vpop.permute.xlu0 %5132 }
  0xa6   : > { %v6964_v23 = vpop.permute.xlu2 %5187 }
  0xa7   : > { %v5190_v53 = vunpack.i.h.bf16 %v6964_v23 }
  0xad   : > { %v6966_v24 = vpop.permute.xlu1 %5152  ;;  %v6968_v25 = vpop.permute.xlu0 %5147 }
  0xae   : > { %v6970_v26 = vpop.permute.xlu2 %5202 }
  0xaf   : > { %v5205_v38 = vunpack.i.h.bf16 %v6970_v26  ;;  %v5204_v41 = vunpack.i.l.bf16 %v6970_v26 }
  0xb1   : > { %v441_v51 = vsel %vm438_vm1, %v5204_v41, %v5205_v38 }
  0xb5   : > { %v6972_v27 = vpop.permute.xlu1 %5167  ;;  %v6974_v28 = vpop.permute.xlu0 %5162 }
  0xb6   : > { %v6976_v29 = vpop.permute.xlu2 %5217  ;;  %v12327_v63 = vunpack.i.h.bf16 %v6972_v27  ;;  %v5164_v2 = vunpack.i.l.bf16 %v6974_v28 }
  0xb7   : > { %v12321_v37 = vunpack.i.l.bf16 %v6976_v29 }
  0xbd   : > { %v6978_v30 = vpop.permute.xlu1 %5182  ;;  %v6980_v31 = vpop.permute.xlu0 %5177 }
  0xbe   : > { %v6986_v34 = vpop.permute.xlu2 %5232  ;;  %v12316_v54 = vunpack.i.h.bf16 %v6978_v30  ;;  %v5184_v55 = vunpack.i.l.bf16 %v6978_v30  ;;  %v5180_v62 = vunpack.i.h.bf16 %v6980_v31 }
  0xc0   : > { %v404_v5 = vsel %vm400_vm3, %v5190_v53, %v5184_v55  ;;  %v403_v35 = vsel %vm400_vm3, %v5184_v55, %v12316_v54  ;;  %v12323_v55 = vunpack.i.h.bf16 %v6968_v25  ;;  %v12322_v54 = vunpack.i.h.bf16 %v6962_v22 }
  0xc5   : > { %v6982_v32 = vpop.permute.xlu1 %5197  ;;  %v6984_v33 = vpop.permute.xlu0 %5192 }
  0xc6   : > { %v12319_v45 = vunpack.i.l.bf16 %v6982_v32  ;;  %v5195_v46 = vunpack.i.h.bf16 %v6984_v33  ;;  %v7012_v49 = vpop.permute.xlu2 %5247  ;;  %v5194_v50 = vunpack.i.l.bf16 %v6984_v33  ;;  %v12347_v33 = vunpack.i.l.bf16 %v6972_v27 }
  0xc8   : > { %v424_v56 = vsel %vm421_vm2, %v5194_v50, %v5195_v46  ;;  %v423_v57 = vsel %vm421_vm2, %v5195_v46, %v12319_v45  ;;  %v12314_v46 = vunpack.i.h.bf16 %v6974_v28 }
  0xcd   : > { %v6992_v39 = vpop.permute.xlu1 %5212  ;;  %v6994_v40 = vpop.permute.xlu0 %5207 }
  0xce   : > { %v5215_v42 = vunpack.i.h.bf16 %v6992_v39  ;;  %v5214_v43 = vunpack.i.l.bf16 %v6992_v39  ;;  %v12320_v44 = vunpack.i.l.bf16 %v6994_v40  ;;  %v12342_v39 = vunpack.i.l.bf16 %v6964_v23 }
  0xd0   : > { %v458_v47 = vsel %vm455_vm0, %v5214_v43, %v5215_v42  ;;  %v457_v48 = vsel %vm455_vm0, %v5215_v42, %v12321_v37  ;;  %v440_v52 = vsel %vm438_vm1, %v5205_v38, %v12320_v44  ;;  %v12326_v38 = vunpack.i.h.bf16 %v6952_v17 }
  0xd1   : > { %729 = vmatpush.msra.mxu0 %v458_v47  ;;  %769 = vmatpush.msra.mxu2 %v457_v48  ;;  %v5154_v42 = vunpack.i.l.bf16 %v6966_v24  ;;  %v387_v47 = vsel %vm383_vm4, %v5180_v62, %v5174_v59  ;;  %v7069_v48 = vpop.permute.xlu2 %5262 }
  0xd3   : > { %730 = vmatpush.msra.mxu0 %v441_v51  ;;  %770 = vmatpush.msra.mxu2 %v440_v52  ;;  %v12317_v51 = vunpack.i.h.bf16 %v6946_v14  ;;  %v5144_v52 = vunpack.i.l.bf16 %v6946_v14 }
  0xd5   : > { %v7037_v60 = vpop.permute.xlu1 %5227  ;;  %v7039_v61 = vpop.permute.xlu0 %5222  ;;  %731 = vmatpush.msra.mxu0 %v424_v56  ;;  %771 = vmatpush.msra.mxu2 %v423_v57  ;;  %v370_v56 = vsel %vm366_vm5, %v12327_v63, %v5164_v2  ;;  %v369_v57 = vsel %vm366_vm5, %v5164_v2, %v12314_v46  ;;  %v12333_v46 = vunpack.i.h.bf16 %v6934_v11 }
  0xd7   : > { %732 = vmatpush.msra.mxu0 %v6818_v0  ;;  %772 = vmatpush.msra.mxu2 %v6820_v1  ;;  %v386_v0 = vsel %vm383_vm4, %v5174_v59, %v12315_v58  ;;  %v12318_v1 = vunpack.i.h.bf16 %v6966_v24  ;;  %v5124_v58 = vunpack.i.l.bf16 %v6954_v18 }
  0xd9   : > { %733 = vmatpush.msra.mxu0 %v404_v5  ;;  %773 = vmatpush.msra.mxu2 %v403_v35  ;;  %v12325_v35 = vunpack.i.h.bf16 %v6960_v21  ;;  %v352_v2 = vsel %vm12365_vm6, %v5154_v42, %v12318_v1  ;;  %v302_v45 = vsel %vm12361_vm9, %v12333_v46, %v5124_v58  ;;  %v7134_v37 = vpop.permute.xlu2 %5277 }
  0xdb   : > { %734 = vmatpush.msra.mxu0 %v387_v47  ;;  %774 = vmatpush.msra.mxu2 %v386_v0  ;;  %v5134_v0 = vunpack.i.l.bf16 %v6962_v22  ;;  %v353_v47 = vsel %vm12365_vm6, %v12326_v38, %v5154_v42  ;;  %v336_v42 = vsel %vm12363_vm7, %v12323_v55, %v5144_v52  ;;  %v5100_v55 = vunpack.i.h.bf16 %v6914_v7 }
  0xdc   : > { %v5090_v38 = vunpack.i.h.bf16 %v6942_v12 }
  0xdd   : > { %v7084_v59 = vpop.permute.xlu1 %5242  ;;  %v7086_v5 = vpop.permute.xlu0 %5237  ;;  %735 = vmatpush.msra.mxu0 %v370_v56  ;;  %775 = vmatpush.msra.mxu2 %v369_v57  ;;  %v335_v56 = vsel %vm12363_vm7, %v5144_v52, %v12317_v51  ;;  %v12324_v57 = vunpack.i.h.bf16 %v6954_v18  ;;  %v12328_v51 = vunpack.i.h.bf16 %v6956_v19  ;;  %v319_v1 = vsel %vm12362_vm8, %v12325_v35, %v5134_v0 }
  0xde   : > { %v318_v52 = vsel %vm12362_vm8, %v5134_v0, %v12322_v54  ;;  %v5094_v0 = vunpack.i.l.bf16 %v6906_v6 }
  0xdf   : > { %736 = vmatpush.msra.mxu0 %v353_v47  ;;  %776 = vmatpush.msra.mxu2 %v352_v2  ;;  %v12329_v47 = vunpack.i.h.bf16 %v6922_v8  ;;  %v5114_v2 = vunpack.i.l.bf16 %v6922_v8  ;;  %v301_v44 = vsel %vm12361_vm9, %v5124_v58, %v12324_v57  ;;  %v12331_v58 = vunpack.i.h.bf16 %v6950_v16 }
  0xe1   : > { %737 = vmatpush.msra.mxu0 %v336_v42  ;;  %777 = vmatpush.msra.mxu2 %v335_v56  ;;  %v12332_v56 = vunpack.i.h.bf16 %v6948_v15  ;;  %v5104_v42 = vunpack.i.l.bf16 %v6950_v16  ;;  %v285_v57 = vsel %vm12360_vm10, %v12328_v51, %v5114_v2  ;;  %v284_v35 = vsel %vm12360_vm10, %v5114_v2, %v12329_v47 }
  0xe2   : > { %v5074_v2 = vunpack.i.l.bf16 %v6932_v10  ;;  %v12350_v47 = vunpack.i.h.bf16 %v6944_v13 }
  0xe3   : > { %738 = vmatpush.msra.mxu0 %v319_v1  ;;  %778 = vmatpush.msra.mxu2 %v318_v52  ;;  %v12330_v1 = vunpack.i.h.bf16 %v6906_v6  ;;  %v268_v63 = vsel %vm12359_vm11, %v12332_v56, %v5104_v42  ;;  %v267_v51 = vsel %vm12359_vm11, %v5104_v42, %v12331_v58  ;;  %v251_v42 = vsel %vm12358_vm12, %v5100_v55, %v5094_v0 }
  0xe4   : > { %v12341_v58 = vunpack.i.h.bf16 %v6994_v40 }
  0xe5   : > { %v7138_v52 = vpop.permute.xlu1 %5257  ;;  %v7140_v54 = vpop.permute.xlu0 %5252  ;;  %739 = vmatpush.msra.mxu0 %v302_v45  ;;  %779 = vmatpush.msra.mxu2 %v301_v44  ;;  %v12339_v44 = vunpack.i.h.bf16 %v6930_v9  ;;  %v5084_v45 = vunpack.i.l.bf16 %v6930_v9  ;;  %v12636_v9 = vunpack.i.l.bf16 %v6968_v25 }
  0xe7   : > { %740 = vmatpush.msra.mxu0 %v285_v57  ;;  %780 = vmatpush.msra.mxu2 %v284_v35  ;;  %v250_v35 = vsel %vm12358_vm12, %v5094_v0, %v12330_v1  ;;  %v12338_v57 = vunpack.i.h.bf16 %v6932_v10  ;;  %v233_v1 = vsel %vm12356_vm13, %v5084_v45, %v12339_v44  ;;  %v217_v0 = vsel %vm12364_vm14, %v12350_v47, %v5074_v2 }
  0xe8   : > { %v12634_v47 = vunpack.i.h.bf16 %v6960_v21  ;;  %v12635_v10 = vunpack.i.h.bf16 %v6968_v25 }
  0xe9   : > { %741 = vmatpush.msra.mxu0 %v268_v63  ;;  %781 = vmatpush.msra.mxu2 %v267_v51  ;;  %v12344_v63 = vunpack.i.h.bf16 %v6976_v29  ;;  %v234_v51 = vsel %vm12356_vm13, %v5090_v38, %v5084_v45  ;;  %v7201_v45 = vld [vmem:[%s12309_s1] sm:$0xff] }
  0xeb   : > { %742 = vmatpush.msra.mxu0 %v251_v42  ;;  %782 = vmatpush.msra.mxu2 %v250_v35  ;;  %v216_v35 = vsel %vm12364_vm14, %v5074_v2, %v12338_v57  ;;  %v12340_v42 = vunpack.i.h.bf16 %v6982_v32  ;;  %v442_v2 = vsel %vm438_vm1, %v12341_v58, %v5204_v41  ;;  %v12348_v41 = vunpack.i.l.bf16 %v6942_v12 }
  0xec   : > { %v12351_v57 = vunpack.i.l.bf16 %v6952_v17  ;;  %v12352_v58 = vunpack.i.l.bf16 %v6956_v19  ;;  %v333_v12 = vsel %vm12363_vm7, %v12636_v9, %v12635_v10  ;;  %v5279_v9 = vunpack.i.l.bf16 %v7134_v37 }
  0xed   : > { %v7186_v56 = vpop.permute.xlu1 %5272  ;;  %v7188_v46 = vpop.permute.xlu0 %5267  ;;  %743 = vmatpush.msra.mxu0 %v234_v51  ;;  %783 = vmatpush.msra.mxu2 %v233_v1  ;;  %v459_v1 = vsel %vm455_vm0, %v12344_v63, %v5214_v43  ;;  %v425_v43 = vsel %vm421_vm2, %v12340_v42, %v5194_v50  ;;  %v401_v50 = vsel %vm400_vm3, %v12342_v39, %v5190_v53  ;;  %v12629_v53 = vunpack.i.h.bf16 %v6934_v11 }
  0xee   : > { %v7210_v51 = vpop.permute.xlu2 %5292  ;;  %v12631_v63 = vunpack.i.h.bf16 %v6948_v15  ;;  %vm489_vm7 = vcmp.lt.s32.totalorder %v6988_v36, 108 }
  0xef   : > { %744 = vmatpush.msra.mxu0 %v217_v0  ;;  %784 = vmatpush.msra.mxu2 %v216_v35  ;;  %v12346_v35 = vunpack.i.l.bf16 %v6934_v11 }
  0xf0   : > { %785 = vmatmul.f32.vlgmr.msra.gmra.mxu2 %v7201_v45  ;;  %745 = vmatmul.f32.vlgmr.msra.gmra.mxu0 %v7201_v45 }
  0xf1   : > { %849 = vmatpush.msrb.mxu0 %v459_v1  ;;  %v12349_v1 = vunpack.i.l.bf16 %v6948_v15 }
  0xf3   : > { %850 = vmatpush.msrb.mxu0 %v442_v2  ;;  %v12343_v2 = vunpack.i.l.bf16 %v6980_v31 }
  0xf5   : > { %851 = vmatpush.msrb.mxu0 %v425_v43  ;;  %v7227_v26 = vpop.permute.xlu1 %5287  ;;  %v7229_v0 = vpop.permute.xlu0 %5282  ;;  %v12345_v43 = vunpack.i.l.bf16 %v6914_v7  ;;  %v384_v44 = vsel %vm383_vm4, %v12343_v2, %v5180_v62  ;;  %v12630_v2 = vunpack.i.h.bf16 %v6972_v27 }
  0xf6   : > { %v7252_v42 = vpop.permute.xlu2 %5307  ;;  %v5290_v10 = vunpack.i.h.bf16 %v7227_v26 }
  0xf7   : > { %852 = vmatpush.msrb.mxu0 %v6832_v4  ;;  %v12357_v4 = vunpack.i.l.bf16 %v6960_v21  ;;  %v7267_v39 = vsel %vm12358_vm12, %v12345_v43, %v5100_v55  ;;  %v7288_v55 = vsel %vm12356_vm13, %v12348_v41, %v5090_v38  ;;  %v5295_v41 = vunpack.i.h.bf16 %v7210_v51 }
  0xf8   : > { %vm591_vm13 = vcmp.lt.s32.totalorder %v6988_v36, 87  ;;  %vm574_vm12 = vcmp.lt.s32.totalorder %v6988_v36, 88 }
  0xf9   : > { %853 = vmatpush.msrb.mxu0 %v401_v50  ;;  %v299_v50 = vsel %vm12361_vm9, %v12346_v35, %v12629_v53  ;;  %v7282_v53 = vsel %vm12359_vm11, %v12349_v1, %v12631_v63  ;;  %v12633_v63 = vunpack.i.h.bf16 %v6956_v19  ;;  %vm557_vm11 = vcmp.lt.s32.totalorder %v6988_v36, 89 }
  0xfa   : > { %vm12366_vm9 = vcmp.lt.s32.totalorder %v6988_v36, 106 }
  0xfb   : > { %854 = vmatpush.msrb.mxu0 %v384_v44  ;;  %v367_v44 = vsel %vm366_vm5, %v12347_v33, %v12630_v2  ;;  %v12632_v2 = vunpack.i.h.bf16 %v6952_v17  ;;  %v282_v38 = vsel %vm12360_vm10, %v12352_v58, %v12633_v63  ;;  %v5274_v58 = vunpack.i.l.bf16 %v7186_v56 }
  0xfc   : > { %vm12402_vm10 = vcmp.lt.s32.totalorder %v6988_v36, 90 }
  0xfd   : > { %855 = vmatpush.msrb.mxu0 %v367_v44  ;;  %v350_v33 = vsel %vm12365_vm6, %v12351_v57, %v12632_v2  ;;  %v5303_v1 = vpop.permute.xlu1 %5302  ;;  %v7306_v62 = vpop.permute.xlu0 %5297  ;;  %v316_v2 = vsel %vm12362_vm8, %v12357_v4, %v12634_v47  ;;  %v5294_v57 = vunpack.i.l.bf16 %v7210_v51  ;;  %v5285_v47 = vunpack.i.h.bf16 %v7229_v0 }
  0xfe   : > { %v5305_v43 = vunpack.i.h.bf16 %v5303_v1  ;;  %v5304_v63 = vunpack.i.l.bf16 %v5303_v1  ;;  %v12637_v1 = vunpack.i.l.bf16 %v7252_v42  ;;  %v12638_v4 = vunpack.i.h.bf16 %v7252_v42 }
  0xff   : > { %856 = vmatpush.msrb.mxu0 %v350_v33  ;;  %v5284_v44 = vunpack.i.l.bf16 %v7229_v0  ;;  %v5265_v0 = vunpack.i.h.bf16 %v7069_v48  ;;  %vm12367_vm8 = vcmp.lt.s32.totalorder %v6988_v36, 107  ;;  %vm725_vm6 = vcmask 588800  }
 0x100   : > { %v611_v51 = vsel %vm608_vm15, %v5304_v63, %v5305_v43  ;;  %v610_v33 = vsel %vm608_vm15, %v5305_v43, %v12637_v1  ;;  %v612_v35 = vsel %vm608_vm15, %v12638_v4, %v5304_v63  ;;  %v594_v43 = vsel %vm591_vm13, %v5294_v57, %v5295_v41 }
 0x101   : > { %857 = vmatpush.msrb.mxu0 %v333_v12  ;;  %756 = vmatpush.msra.mxu1 %v611_v51  ;;  %v5275_v12 = vunpack.i.h.bf16 %v7186_v56  ;;  %v12639_v4 = vunpack.i.l.bf16 %v7306_v62  ;;  %v5280_v51 = vunpack.i.h.bf16 %v7134_v37  ;;  %v12640_v1 = vunpack.i.h.bf16 %v7306_v62 }
 0x102   : > { %796 = vmatpush.msra.mxu3 %v610_v33  ;;  %876 = vmatpush.msrb.mxu2 %v612_v35  ;;  %v5264_v35 = vunpack.i.l.bf16 %v7069_v48  ;;  %v12641_v33 = vunpack.i.l.bf16 %v7227_v26  ;;  %v578_v48 = vsel %vm574_vm12, %v5290_v10, %v5284_v44 }
 0x103   : > { %858 = vmatpush.msrb.mxu0 %v316_v2  ;;  %v593_v63 = vsel %vm591_vm13, %v5295_v41, %v12639_v4  ;;  %757 = vmatpush.msra.mxu1 %v594_v43  ;;  %v595_v56 = vsel %vm591_vm13, %v12640_v1, %v5294_v57  ;;  %v5269_v2 = vunpack.i.l.bf16 %v7188_v46  ;;  %v577_v41 = vsel %vm574_vm12, %v5284_v44, %v5285_v47 }
 0x104   : > { %797 = vmatpush.msra.mxu3 %v593_v63  ;;  %877 = vmatpush.msrb.mxu2 %v595_v56  ;;  %v576_v43 = vsel %vm574_vm12, %v5285_v47, %v12641_v33  ;;  %v5249_v4 = vunpack.i.l.bf16 %v7012_v49  ;;  %v5270_v57 = vunpack.i.h.bf16 %v7188_v46  ;;  %v5255_v63 = vunpack.i.h.bf16 %v7140_v54 }
 0x105   : > { %859 = vmatpush.msrb.mxu0 %v299_v50  ;;  %758 = vmatpush.msra.mxu1 %v577_v41  ;;  %v5259_v50 = vunpack.i.l.bf16 %v7138_v52  ;;  %v560_v47 = vsel %vm557_vm11, %v5274_v58, %v5275_v12  ;;  %v559_v1 = vsel %vm557_vm11, %v5275_v12, %v5279_v9  ;;  %v5260_v56 = vunpack.i.h.bf16 %v7138_v52 }
 0x106   : > { %798 = vmatpush.msra.mxu3 %v576_v43  ;;  %878 = vmatpush.msrb.mxu2 %v578_v48  ;;  %v5254_v44 = vunpack.i.l.bf16 %v7140_v54  ;;  %v561_v41 = vsel %vm557_vm11, %v5280_v51, %v5274_v58  ;;  %v5244_v33 = vunpack.i.l.bf16 %v7084_v59  ;;  %v543_v12 = vsel %vm12402_vm10, %v5264_v35, %v5265_v0 }
 0x107   : > { %860 = vmatpush.msrb.mxu0 %v282_v38  ;;  %759 = vmatpush.msra.mxu1 %v560_v47  ;;  %v5245_v38 = vunpack.i.h.bf16 %v7084_v59  ;;  %v542_v54 = vsel %vm12402_vm10, %v5265_v0, %v5269_v2  ;;  %v5235_v43 = vunpack.i.h.bf16 %v6986_v34  ;;  %v5250_v58 = vunpack.i.h.bf16 %v7012_v49 }
 0x108   : > { %799 = vmatpush.msra.mxu3 %v559_v1  ;;  %879 = vmatpush.msrb.mxu2 %v561_v41  ;;  %v544_v59 = vsel %vm12402_vm10, %v5270_v57, %v5264_v35  ;;  %v5239_v48 = vunpack.i.l.bf16 %v7086_v5  ;;  %v526_v0 = vsel %vm12366_vm9, %v5254_v44, %v5255_v63  ;;  %v525_v47 = vsel %vm12366_vm9, %v5255_v63, %v5259_v50 }
 0x109   : > { %861 = vmatpush.msrb.mxu0 %v7282_v53  ;;  %760 = vmatpush.msra.mxu1 %v543_v12  ;;  %v5234_v53 = vunpack.i.l.bf16 %v6986_v34  ;;  %v5240_v1 = vunpack.i.h.bf16 %v7086_v5  ;;  %v527_v34 = vsel %vm12366_vm9, %v5260_v56, %v5254_v44  ;;  %v12642_v35 = vunpack.i.h.bf16 %v6944_v13 }
 0x10a   : > { %800 = vmatpush.msra.mxu3 %v542_v54  ;;  %880 = vmatpush.msrb.mxu2 %v544_v59  ;;  %v5229_v63 = vunpack.i.l.bf16 %v7037_v60  ;;  %v5225_v12 = vunpack.i.h.bf16 %v7039_v61  ;;  %v509_v54 = vsel %vm12367_vm8, %v5244_v33, %v5245_v38  ;;  %v508_v44 = vsel %vm12367_vm8, %v5245_v38, %v5249_v4 }
 0x10b   : > { %862 = vmatpush.msrb.mxu0 %v7267_v39  ;;  %761 = vmatpush.msra.mxu1 %v526_v0  ;;  %v12643_v39 = vunpack.i.l.bf16 %v6944_v13  ;;  %v5230_v59 = vunpack.i.h.bf16 %v7037_v60  ;;  %v5224_v0 = vunpack.i.l.bf16 %v7039_v61  ;;  %v491_v38 = vsel %vm489_vm7, %v5235_v43, %v5239_v48 }
 0x10c   : > { %801 = vmatpush.msra.mxu3 %v525_v47  ;;  %881 = vmatpush.msrb.mxu2 %v527_v34  ;;  %v510_v47 = vsel %vm12367_vm8, %v5250_v58, %v5244_v33  ;;  %v493_v61 = vsel %vm489_vm7, %v5240_v1, %v5234_v53  ;;  %v618_v33 = vld [vmem:[%s12309_s1 + $0x8] sm:$0xff]  ;;  %v541_v37 = vsel %vm12402_vm10, %v5269_v2, %v5270_v57  ;;  %v12659_v46 = vunpack.i.l.bf16 %v6972_v27 }
 0x10d   : > { %v214_v41 = vsel %vm12364_vm14, %v12643_v39, %v12642_v35  ;;  %863 = vmatpush.msrb.mxu0 %v7288_v55  ;;  %762 = vmatpush.msra.mxu1 %v509_v54  ;;  %vm12368_vm14 = vcmp.lt.s32.totalorder %v6988_v36, 109  ;;  %v492_v55 = vsel %vm489_vm7, %v5234_v53, %v5235_v43  ;;  %v12644_v35 = vunpack.i.h.bf16 %v6976_v29 }
 0x10e   : > { %802 = vmatpush.msra.mxu3 %v508_v44  ;;  %882 = vmatpush.msrb.mxu2 %v510_v47  ;;  %v475_v34 = vsel %vm12368_vm14, %v5224_v0, %v5225_v12  ;;  %v474_v43 = vsel %vm12368_vm14, %v5225_v12, %v5229_v63  ;;  %v476_v53 = vsel %vm12368_vm14, %v5230_v59, %v5224_v0  ;;  %v12645_v39 = vunpack.i.l.bf16 %v6976_v29 }
 0x10f   : > { %864 = vmatpush.msrb.mxu0 %v214_v41  ;;  %763 = vmatpush.msra.mxu1 %v492_v55  ;;  %v12646_v12 = vunpack.i.h.bf16 %v7252_v42  ;;  %v12647_v54 = vunpack.i.l.bf16 %v7252_v42  ;;  %v12648_v0 = vunpack.i.h.bf16 %v6994_v40  ;;  %v12649_v47 = vunpack.i.l.bf16 %v6994_v40 }
 0x110   : > { %803 = vmatpush.msra.mxu3 %v491_v38  ;;  %883 = vmatpush.msrb.mxu2 %v493_v61  ;;  %v456_v41 = vsel %vm455_vm0, %v12645_v39, %v12644_v35  ;;  %v12650_v55 = vunpack.i.h.bf16 %v7306_v62  ;;  %v12651_v38 = vunpack.i.l.bf16 %v7306_v62  ;;  %v719_v61 = vld [vmem:[%s12310_s2] sm:$0xff]  ;;  %v12652_v40 = vunpack.i.h.bf16 %v6982_v32 }
 0x111   : > { %865 = vmatmul.f32.vlgmr.msrb.gmra.mxu0 %v7201_v45  ;;  %764 = vmatpush.msra.mxu1 %v475_v34  ;;  %v609_v44 = vsel %vm608_vm15, %v12647_v54, %v12646_v12  ;;  %v439_v29 = vsel %vm438_vm1, %v12649_v47, %v12648_v0  ;;  %v12653_v34 = vunpack.i.l.bf16 %v6982_v32  ;;  %v12654_v62 = vunpack.i.l.bf16 %v7227_v26  ;;  %v198_v47 = vld [vmem:[%s12311_s3] sm:$0xf] }
 0x112   : > { %804 = vmatpush.msra.mxu3 %v474_v43  ;;  %884 = vmatpush.msrb.mxu2 %v476_v53  ;;  %v592_v42 = vsel %vm591_vm13, %v12651_v38, %v12650_v55  ;;  %v6776_v35 = vmov 0   ;;  %v558_v32 = vsel %vm557_vm11, %v5279_v9, %v5280_v51  ;;  %v12655_v26 = vunpack.i.l.bf16 %v6964_v23 }
 0x113   : > { %4989 = vmatmul.msk.f32.vlgmr.msra.gmra.mxu3 %vm725_vm6, %v618_v33  ;;  %809 = vmatpush.msrb.mxu1 %v456_v41  ;;  %v422_v43 = vsel %vm421_vm2, %v12653_v34, %v12652_v40  ;;  %v575_v53 = vsel %vm574_vm12, %v12654_v62, %v5290_v10  ;;  %v12656_v10 = vunpack.i.h.bf16 %v6978_v30  ;;  %v12657_v9 = vunpack.i.l.bf16 %v6980_v31  ;;  %v12688_v41 = vld [vmem:[#allocation4_spill] sm:$0xff] }
 0x114   : > { %836 = vmatpush.msrb.mxu3 %v609_v44  ;;  %4991 = vmatmul.msk.f32.vlgmr.msrb.gmra.mxu2 %vm725_vm6, %v618_v33  ;;  %v524_v30 = vsel %vm12366_vm9, %v5259_v50, %v5260_v56  ;;  %v12660_v51 = vunpack.i.h.bf16 %v6974_v28  ;;  %v12661_v52 = vunpack.i.l.bf16 %v6952_v17  ;;  %v12662_v2 = vunpack.i.h.bf16 %v6966_v24 }
 0x115   : > { %4988 = vmatmul.msk.f32.vlgmr.msra.gmra.mxu1 %vm725_vm6, %v618_v33  ;;  %5311 = vset.pattern.permute.xlu0 %v6776_v35  ;;  %v402_v39 = vsel %vm400_vm3, %v12656_v10, %v12655_v26  ;;  %vm12663_vm9 = vcmp.lt.s32.totalorder %v6988_v36, 19  ;;  %v490_v28 = vsel %vm489_vm7, %v5239_v48, %v5240_v1  ;;  %v12664_v49 = vunpack.i.l.bf16 %v6968_v25 }
 0x116   : > { %810 = vmatpush.msrb.mxu1 %v439_v29  ;;  %837 = vmatpush.msrb.mxu3 %v592_v42  ;;  %v368_v31 = vsel %vm366_vm5, %v12660_v51, %v12659_v46  ;;  %v351_v27 = vsel %vm12663_vm9, %v12662_v2, %v12661_v52  ;;  %v473_v24 = vsel %vm12368_vm14, %v5229_v63, %v5230_v59  ;;  %v12667_v5 = vunpack.i.l.bf16 %v6960_v21  ;;  %v12684_v59 = vld [vmem:[#allocation3_spill] sm:$0xff] }
 0x117   : > { %5552 = vset.pattern.permute.xlu2 %v6776_v35  ;;  %722 = vperm.xlu0 %5311, %v719_v61   ;;  %v12668_v57 = vunpack.i.h.bf16 %v6962_v22  ;;  %vm12669_vm9 = vcmp.lt.s32.totalorder %v6988_v36, 21  ;;  %v12671_v50 = vunpack.i.h.bf16 %v6954_v18  ;;  %v12673_v56 = vunpack.i.l.bf16 %v6956_v19 }
 0x118   : > { %811 = vmatpush.msrb.mxu1 %v422_v43  ;;  %838 = vmatpush.msrb.mxu3 %v575_v53  ;;  %v12674_v21 = vunpack.i.h.bf16 %v6922_v8  ;;  %vm12675_vm14 = vcmp.lt.s32.totalorder %v6988_v36, 38  ;;  %v12677_v48 = vunpack.i.h.bf16 %v6950_v16  ;;  %v12679_v18 = vunpack.i.l.bf16 %v6914_v7  ;;  %v12682_v8 = vld [vmem:[#allocation5_spill] sm:$0xff] }
 0x119   : > { %6033 = vset.pattern.permute.xlu1 %v6776_v35  ;;  %v317_v25 = vsel %vm12669_vm9, %v12668_v57, %v12667_v5  ;;  %vm12678_vm9 = vcmp.lt.s32.totalorder %v6988_v36, 39  ;;  %v12680_v1 = vunpack.i.h.bf16 %v6906_v6  ;;  %v12683_v63 = vunpack.i.l.bf16 %v12682_v8 }
 0x11a   : > { %812 = vmatpush.msrb.mxu1 %v6830_v3  ;;  %839 = vmatpush.msrb.mxu3 %v558_v32  ;;  %v12658_v3 = vunpack.i.h.bf16 %v6958_v20  ;;  %v507_v20 = vsel %vm12367_vm8, %v5249_v4, %v5250_v58  ;;  %v12665_v4 = vunpack.i.h.bf16 %v6946_v14  ;;  %vm12666_vm8 = vcmp.lt.s32.totalorder %v6988_v36, 20 }
 0x11b   : > { %v12670_v14 = vunpack.i.l.bf16 %v6934_v11  ;;  %v283_v22 = vsel %vm12675_vm14, %v12674_v21, %v12673_v56  ;;  %v12676_v58 = vunpack.i.l.bf16 %v6948_v15  ;;  %vm12686_vm14 = vcmp.lt.s32.totalorder %v6988_v36, 41 }
 0x11c   : > { %813 = vmatpush.msrb.mxu1 %v402_v39  ;;  %840 = vmatpush.msrb.mxu3 %v541_v37  ;;  %v385_v23 = vsel %vm383_vm4, %v12658_v3, %v12657_v9  ;;  %v334_v17 = vsel %vm12666_vm8, %v12665_v4, %v12664_v49  ;;  %vm12672_vm8 = vcmp.lt.s32.totalorder %v6988_v36, 22  ;;  %v12687_v16 = vunpack.i.l.bf16 %v6944_v13 }
 0x11d   : > { %v300_v60 = vsel %vm12672_vm8, %v12671_v50, %v12670_v14  ;;  %v266_v11 = vsel %vm12678_vm9, %v12677_v48, %v12676_v58  ;;  %vm12681_vm8 = vcmp.lt.s32.totalorder %v6988_v36, 40  ;;  %v12689_v12 = vunpack.i.h.bf16 %v12688_v41 }
 0x11e   : > { %814 = vmatpush.msrb.mxu1 %v385_v23  ;;  %841 = vmatpush.msrb.mxu3 %v524_v30  ;;  %v249_v19 = vsel %vm12681_vm8, %v12680_v1, %v12679_v18  ;;  %vm12690_vm9 = vcmp.lt.s32.totalorder %v6988_v36, 42  ;;  %v7619_v42 = vperm.slane %v198_v47, 0  ;;  %v7621_v34 = vperm.slane %v198_v47, 1 }
 0x11f   : > { %v215_v7 = vsel %vm12690_vm9, %v12689_v12, %v12687_v16  ;;  %v7649_v30 = vperm.slane %v198_v47, 2  ;;  %v7651_v51 = vperm.slane %v198_v47, 3  ;;  %vm12701_vm8 = vcmp.lt.s32.totalorder %v6988_v36, 19 }
 0x120   : > { %815 = vmatpush.msrb.mxu1 %v368_v31  ;;  %842 = vmatpush.msrb.mxu3 %v507_v20  ;;  %12691 = vst [vmem:[#allocation5_spill] sm:$0xff] %v7619_v42  ;;  %vm12707_vm9 = vcmp.lt.s32.totalorder %v6988_v36, 21 }
 0x121   : > { %12692 = vst [vmem:[#allocation3_spill] sm:$0xff] %v7621_v34 }
 0x122   : > { %816 = vmatpush.msrb.mxu1 %v351_v27  ;;  %843 = vmatpush.msrb.mxu3 %v490_v28  ;;  %12695 = vst [vmem:[#allocation7_spill] sm:$0xff] %v7649_v30 }
 0x123   : > { %12696 = vst [vmem:[#allocation8_spill] sm:$0xff] %v7651_v51 }
 0x124   : > { %817 = vmatpush.msrb.mxu1 %v334_v17  ;;  %844 = vmatpush.msrb.mxu3 %v473_v24 }
 0x125   : > { %4990 = vmatmul.msk.f32.vlgmr.msrb.gmra.mxu3 %vm725_vm6, %v618_v33  ;;  %v12685_v33 = vunpack.i.h.bf16 %v12684_v59 }
 0x126   : > { %818 = vmatpush.msrb.mxu1 %v317_v25 }
 0x127   : > { %v232_v15 = vsel %vm12686_vm14, %v12685_v33, %v12683_v63  ;;  %vm12702_vm14 = vcmp.lt.s32.totalorder %v6988_v36, 20 }
 0x128   : > { %819 = vmatpush.msrb.mxu1 %v300_v60 }
 0x12a   : > { %820 = vmatpush.msrb.mxu1 %v283_v22 }
 0x12c   : > { %821 = vmatpush.msrb.mxu1 %v266_v11 }
 0x12e   : > { %822 = vmatpush.msrb.mxu1 %v249_v19 }
 0x130   : > { %823 = vmatpush.msrb.mxu1 %v232_v15 }
 0x132   : > { %824 = vmatpush.msrb.mxu1 %v215_v7 }
 0x133   : > { %825 = vmatmul.f32.vlgmr.msrb.gmra.mxu1 %v7201_v45 }
 0x16d   : > { %v746_v54 = vpop.f32.mrf.mxu0 }
 0x173   : > { %v786_v0 = vpop.f32.mrf.mxu2 }
 0x189   : > { %v723_v6 = vpop.permute.xlu0 %722 }
 0x18a   : > { %v747_v44 = vadd.f32 %v746_v54, %v723_v6  ;;  %v787_v38 = vadd.f32 %v786_v0, %v723_v6 }
 0x18e   : > { %v866_v32 = vpop.f32.mrf.mxu0 }
 0x18f   : > { %v867_v39 = vadd.f32 %v866_v32, %v723_v6 }
 0x192   : > { %v766_v29 = vpop.f32.mrf.mxu1 }
 0x193   : > { %v767_v55 = vadd.f32 %v766_v29, %v747_v44 }
 0x195   : > { %v889_v13 = vmax.f32 %v767_v55, 0.0 }
 0x196   : > { %v806_v61 = vpop.f32.mrf.mxu3 }
 0x197   : > { %v807_v40 = vadd.f32 %v806_v61, %v787_v38  ;;  %v7624_v45 = vmul.f32 %v7619_v42, %v889_v13  ;;  %v886_v37 = vpop.f32.mrf.mxu2 }
 0x198   : > { %v887_v3 = vadd.f32 %v886_v37, %v867_v39 }
 0x199   : > { %12693 = vst [vmem:[#allocation4_spill] sm:$0xff] %v7624_v45  ;;  %v890_v43 = vmax.f32 %v807_v40, 0.0 }
 0x19a   : > { %v892_v46 = vmax.f32 %v887_v3, 0.0 }
 0x19b   : > { %v7627_v62 = vmul.f32 %v7621_v34, %v890_v43 }
 0x19c   : > { %v7660_v20 = vmul.f32 %v7651_v51, %v892_v46 }
 0x19d   : > { %12694 = vst [vmem:[#allocation6_spill] sm:$0xff] %v7627_v62  ;;  %v5327_v53 = vpack.i.bf16 %v7627_v62, %v7624_v45 }
 0x19e   : > { %12698 = vst [vmem:[#allocation10_spill] sm:$0xff] %v7660_v20 }
 0x19f   : > { %5328 = vrot.lane.b32.xlu2 %v5327_v53, %s6755_s24  ;;  %5323 = vrot.lane.b32.xlu0 %v5327_v53, %s6754_s23 }
 0x1a0   : > { %5313 = vrot.lane.b32.xlu1 %v5327_v53, %s6753_s22 }
 0x1a7   : > { %5343 = vrot.lane.b32.xlu2 %v5327_v53, %s6758_s27  ;;  %5338 = vrot.lane.b32.xlu0 %v5327_v53, %s6757_s26 }
 0x1a8   : > { %5318 = vrot.lane.b32.xlu1 %v5327_v53, %s6752_s21  ;;  %v846_v10 = vpop.f32.mrf.mxu3 }
 0x1af   : > { %5358 = vrot.lane.b32.xlu2 %v5327_v53, %s6761_s30  ;;  %5353 = vrot.lane.b32.xlu0 %v5327_v53, %s6760_s29 }
 0x1b0   : > { %5333 = vrot.lane.b32.xlu1 %v5327_v53, %s6756_s25  ;;  %v826_v35 = vpop.f32.mrf.mxu1 }
 0x1b1   : > { %v827_v26 = vadd.f32 %v826_v35, %v723_v6 }
 0x1b3   : > { %v847_v9 = vadd.f32 %v846_v10, %v827_v26 }
 0x1b5   : > { %v891_v23 = vmax.f32 %v847_v9, 0.0 }
 0x1b7   : > { %5373 = vrot.lane.b32.xlu2 %v5327_v53, %s6764_s7  ;;  %5368 = vrot.lane.b32.xlu0 %v5327_v53, %s6763_s6  ;;  %v7657_v31 = vmul.f32 %v7649_v30, %v891_v23 }
 0x1b8   : > { %5348 = vrot.lane.b32.xlu1 %v5327_v53, %s12535_s28 }
 0x1b9   : > { %12697 = vst [vmem:[#allocation9_spill] sm:$0xff] %v7657_v31  ;;  %v5427_v52 = vpack.i.bf16 %v7660_v20, %v7657_v31 }
 0x1bf   : > { %5388 = vrot.lane.b32.xlu2 %v5327_v53, %s12471_s10  ;;  %5383 = vrot.lane.b32.xlu0 %v5327_v53, %s6766_s9 }
 0x1c0   : > { %5363 = vrot.lane.b32.xlu1 %v5327_v53, %s12537_s5 }
 0x1c7   : > { %5403 = vrot.lane.b32.xlu2 %v5327_v53, %s12394_s13  ;;  %5398 = vrot.lane.b32.xlu0 %v5327_v53, %s12482_s12 }
 0x1c8   : > { %5378 = vrot.lane.b32.xlu1 %v5327_v53, %s12484_s8 }
 0x1cf   : > { %5418 = vrot.lane.b32.xlu2 %v5327_v53, %s12392_s19  ;;  %5413 = vrot.lane.b32.xlu0 %v5327_v53, %s12405_s18 }
 0x1d0   : > { %5393 = vrot.lane.b32.xlu1 %v5327_v53, %s12473_s11 }
 0x1d7   : > { %5428 = vrot.lane.b32.xlu2 %v5427_v52, %s6753_s22  ;;  %5443 = vrot.lane.b32.xlu0 %v5427_v52, %s6755_s24 }
 0x1d8   : > { %5408 = vrot.lane.b32.xlu1 %v5327_v53, %s12403_s14 }
 0x1df   : > { %5433 = vrot.lane.b32.xlu2 %v5427_v52, %s6752_s21  ;;  %5458 = vrot.lane.b32.xlu0 %v5427_v52, %s6758_s27 }
 0x1e0   : > { %5423 = vrot.lane.b32.xlu1 %v5327_v53, %s12699_s17 }
 0x1e7   : > { %5448 = vrot.lane.b32.xlu2 %v5427_v52, %s6756_s25  ;;  %5473 = vrot.lane.b32.xlu0 %v5427_v52, %s6761_s30 }
 0x1e8   : > { %5438 = vrot.lane.b32.xlu1 %v5427_v52, %s6754_s23 }
 0x1ef   : > { %5463 = vrot.lane.b32.xlu2 %v5427_v52, %s12535_s28  ;;  %5488 = vrot.lane.b32.xlu0 %v5427_v52, %s6764_s7 }
 0x1f0   : > { %5453 = vrot.lane.b32.xlu1 %v5427_v52, %s6757_s26 }
 0x1f7   : > { %5478 = vrot.lane.b32.xlu2 %v5427_v52, %s12537_s5  ;;  %5503 = vrot.lane.b32.xlu0 %v5427_v52, %s12471_s10 }
 0x1f8   : > { %5468 = vrot.lane.b32.xlu1 %v5427_v52, %s6760_s29 }
 0x1f9   : > { %v7679_v2 = vpop.permute.xlu2 %5328 }
 0x1ff   : > { %5493 = vrot.lane.b32.xlu2 %v5427_v52, %s12484_s8  ;;  %5518 = vrot.lane.b32.xlu0 %v5427_v52, %s12394_s13  ;;  %s12886_s13 = smov 106  }
 0x200   : > { %5483 = vrot.lane.b32.xlu1 %v5427_v52, %s6763_s6 }
 0x201   : > { %v7684_v27 = vpop.permute.xlu2 %5343 }
 0x207   : > { %5508 = vrot.lane.b32.xlu2 %v5427_v52, %s12473_s11  ;;  %5533 = vrot.lane.b32.xlu0 %v5427_v52, %s12392_s19  ;;  %s12887_s19 = smov 88  }
 0x208   : > { %5498 = vrot.lane.b32.xlu1 %v5427_v52, %s6766_s9 }
 0x209   : > { %v7689_v28 = vpop.permute.xlu2 %5358 }
 0x20f   : > { %5523 = vrot.lane.b32.xlu2 %v5427_v52, %s12403_s14  ;;  %5543 = vrot.lane.b32.xlu0 %v5327_v53, %s12700_s20 }
 0x210   : > { %5513 = vrot.lane.b32.xlu1 %v5427_v52, %s12482_s12 }
 0x211   : > { %v7694_v49 = vpop.permute.xlu0 %5323  ;;  %v7699_v17 = vpop.permute.xlu2 %5373 }
 0x212   : > { %v7696_v4 = vpop.permute.xlu1 %5313  ;;  %v12370_v8 = vunpack.i.h.bf16 %v7699_v17  ;;  %v12369_v63 = vunpack.i.l.bf16 %v7699_v17 }
 0x214   : > { %v1112_v16 = vsel %vm421_vm2, %v12369_v63, %v12370_v8 }
 0x217   : > { %5538 = vrot.lane.b32.xlu2 %v5427_v52, %s12699_s17 }
 0x218   : > { %5528 = vrot.lane.b32.xlu1 %v5427_v52, %s12405_s18 }
 0x219   : > { %v7702_v24 = vpop.permute.xlu0 %5338  ;;  %v7709_v25 = vpop.permute.xlu2 %5388 }
 0x21a   : > { %v7704_v5 = vpop.permute.xlu1 %5318 }
 0x220   : > { %5548 = vrot.lane.b32.xlu1 %v5427_v52, %s12700_s20  ;;  %v5360_v52 = vunpack.i.l.bf16 %v7689_v28 }
 0x221   : > { %v7707_v57 = vpop.permute.xlu0 %5353  ;;  %v7717_v56 = vpop.permute.xlu2 %5403 }
 0x222   : > { %v7711_v14 = vpop.permute.xlu1 %5333  ;;  %v12381_v8 = vunpack.i.l.bf16 %v7707_v57 }
 0x229   : > { %v7713_v50 = vpop.permute.xlu0 %5368  ;;  %v7731_v18 = vpop.permute.xlu2 %5418 }
 0x22a   : > { %v7715_v60 = vpop.permute.xlu1 %5348  ;;  %v12372_v39 = vunpack.i.l.bf16 %v7713_v50 }
 0x231   : > { %v7719_v21 = vpop.permute.xlu0 %5383  ;;  %v7753_v41 = vpop.permute.xlu2 %5428 }
 0x232   : > { %v12379_v22 = vunpack.i.h.bf16 %v7719_v21  ;;  %v12377_v58 = vunpack.i.l.bf16 %v7719_v21  ;;  %v7723_v48 = vpop.permute.xlu1 %5363 }
 0x233   : > { %v12375_v3 = vunpack.i.l.bf16 %v7723_v48 }
 0x234   : > { %v1144_v11 = vsel %vm455_vm0, %v12377_v58, %v12379_v22 }
 0x235   : > { %1407 = vmatpush.msra.mxu3 %v1144_v11 }
 0x239   : > { %v7733_v1 = vpop.permute.xlu0 %5398  ;;  %v7762_v54 = vpop.permute.xlu2 %5433 }
 0x23a   : > { %v7735_v19 = vpop.permute.xlu1 %5378 }
 0x23b   : > { %v12376_v59 = vunpack.i.h.bf16 %v7735_v19  ;;  %v12373_v33 = vunpack.i.l.bf16 %v7735_v19 }
 0x23d   : > { %v1128_v15 = vsel %vm438_vm1, %v12373_v33, %v12376_v59  ;;  %v12384_v33 = vunpack.i.l.bf16 %v7715_v60 }
 0x23e   : > { %1408 = vmatpush.msra.mxu3 %v1128_v15 }
 0x240   : > { %1409 = vmatpush.msra.mxu3 %v1112_v16  ;;  %v12383_v16 = vunpack.i.h.bf16 %v7689_v28 }
 0x241   : > { %v7755_v12 = vpop.permute.xlu0 %5413  ;;  %v7770_v29 = vpop.permute.xlu2 %5448 }
 0x242   : > { %v7757_v7 = vpop.permute.xlu1 %5393  ;;  %1410 = vmatpush.msra.mxu3 %v7624_v45 }
 0x249   : > { %v7760_v6 = vpop.permute.xlu0 %5443  ;;  %v7776_v13 = vpop.permute.xlu2 %5463 }
 0x24a   : > { %v7764_v44 = vpop.permute.xlu1 %5408  ;;  %v12382_v63 = vunpack.i.h.bf16 %v7776_v13 }
 0x251   : > { %v7766_v0 = vpop.permute.xlu0 %5458  ;;  %v7782_v43 = vpop.permute.xlu2 %5478 }
 0x252   : > { %v7768_v47 = vpop.permute.xlu1 %5423  ;;  %v12374_v37 = vunpack.i.h.bf16 %v7782_v43 }
 0x254   : > { %v1077_v15 = vsel %vm383_vm4, %v12374_v37, %v12375_v3 }
 0x259   : > { %v7772_v55 = vpop.permute.xlu0 %5473  ;;  %v7790_v26 = vpop.permute.xlu2 %5493 }
 0x25a   : > { %v7774_v38 = vpop.permute.xlu1 %5438  ;;  %v12378_v23 = vunpack.i.h.bf16 %v7772_v55 }
 0x261   : > { %v7778_v61 = vpop.permute.xlu0 %5488  ;;  %v7838_v22 = vpop.permute.xlu2 %5508 }
 0x262   : > { %v7780_v40 = vpop.permute.xlu1 %5453 }
 0x269   : > { %v7784_v53 = vpop.permute.xlu0 %5503 }
 0x26a   : > { %v7786_v35 = vpop.permute.xlu1 %5468 }
 0x26b   : > { %v12380_v11 = vunpack.i.h.bf16 %v7786_v35 }
 0x271   : > { %v7788_v32 = vpop.permute.xlu0 %5518 }
 0x272   : > { %v7792_v10 = vpop.permute.xlu1 %5483 }
 0x273   : > { %v12371_v9 = vunpack.i.h.bf16 %v7792_v10 }
 0x275   : > { %v1093_v46 = vsel %vm400_vm3, %v12371_v9, %v12372_v39  ;;  %v12704_v39 = vunpack.i.l.bf16 %v7719_v21 }
 0x276   : > { %1411 = vmatpush.msra.mxu3 %v1093_v46  ;;  %v1061_v46 = vsel %vm366_vm5, %v12378_v23, %v5360_v52  ;;  %v1045_v23 = vsel %vm12701_vm8, %v12380_v11, %v12381_v8  ;;  %v12711_v8 = vunpack.i.h.bf16 %v7790_v26  ;;  %vm12713_vm8 = vcmp.lt.s32.totalorder %v6988_v36, 22 }
 0x278   : > { %1412 = vmatpush.msra.mxu3 %v1077_v15  ;;  %v7850_v15 = vsel %vm366_vm5, %v5360_v52, %v12383_v16  ;;  %v12709_v16 = vunpack.i.h.bf16 %v7735_v19  ;;  %v12726_v52 = vunpack.i.h.bf16 %v7792_v10 }
 0x279   : > { %v7816_v9 = vpop.permute.xlu0 %5533 }
 0x27a   : > { %v7825_v3 = vpop.permute.xlu1 %5498  ;;  %1413 = vmatpush.msra.mxu3 %v1061_v46  ;;  %v1029_v46 = vsel %vm12702_vm14, %v12382_v63, %v12384_v33  ;;  %v12387_v33 = vunpack.i.l.bf16 %v7702_v24  ;;  %vm12720_vm14 = vcmp.lt.s32.totalorder %v6988_v36, 38 }
 0x27b   : > { %v12386_v59 = vunpack.i.h.bf16 %v7825_v3  ;;  %v12385_v58 = vunpack.i.l.bf16 %v7825_v3 }
 0x27c   : > { %1414 = vmatpush.msra.mxu3 %v1045_v23  ;;  %v12703_v23 = vunpack.i.h.bf16 %v7719_v21  ;;  %v12705_v21 = vunpack.i.l.bf16 %v7684_v27 }
 0x27d   : > { %v1145_v63 = vsel %vm455_vm0, %v12386_v59, %v12704_v39  ;;  %v12708_v59 = vunpack.i.l.bf16 %v7790_v26 }
 0x27e   : > { %v1143_v37 = vsel %vm455_vm0, %v12703_v23, %v12385_v58  ;;  %1415 = vmatpush.msra.mxu3 %v1029_v46  ;;  %1527 = vmatpush.msra.mxu0 %v1145_v63  ;;  %v12706_v58 = vunpack.i.h.bf16 %v7766_v0  ;;  %v12710_v23 = vunpack.i.l.bf16 %v7735_v19  ;;  %v12714_v19 = vunpack.i.l.bf16 %v7778_v61 }
 0x27f   : > { %1447 = vmatpush.msra.mxu2 %v1143_v37  ;;  %v1127_v46 = vsel %vm438_vm1, %v12709_v16, %v12708_v59  ;;  %v12712_v16 = vunpack.i.h.bf16 %v7780_v40  ;;  %v12719_v63 = vunpack.i.h.bf16 %v7770_v29 }
 0x280   : > { %v1013_v39 = vsel %vm12707_vm9, %v12706_v58, %v12705_v21  ;;  %v1129_v58 = vsel %vm438_vm1, %v12711_v8, %v12710_v23  ;;  %v12716_v21 = vunpack.i.l.bf16 %v7699_v17  ;;  %v12718_v23 = vunpack.i.l.bf16 %v7711_v14 }
 0x281   : > { %1416 = vmatpush.msra.mxu3 %v1013_v39  ;;  %1448 = vmatpush.msra.mxu2 %v1127_v46  ;;  %v7895_v59 = vpop.permute.xlu0 %5543  ;;  %v997_v39 = vsel %vm12713_vm8, %v12712_v16, %v12387_v33  ;;  %v12715_v46 = vunpack.i.h.bf16 %v7699_v17  ;;  %v12717_v16 = vunpack.i.h.bf16 %v7778_v61  ;;  %vm12723_vm9 = vcmp.lt.s32.totalorder %v6988_v36, 39 }
 0x282   : > { %1528 = vmatpush.msra.mxu0 %v1129_v58  ;;  %v12389_v58 = vunpack.i.h.bf16 %v7895_v59  ;;  %v12388_v37 = vunpack.i.l.bf16 %v7895_v59  ;;  %v7912_v11 = vpop.permute.xlu1 %5513  ;;  %v12724_v17 = vunpack.i.h.bf16 %v7713_v50  ;;  %vm12731_vm8 = vcmp.lt.s32.totalorder %v6988_v36, 40 }
 0x283   : > { %v1111_v8 = vsel %vm421_vm2, %v12715_v46, %v12714_v19  ;;  %1417 = vmatpush.msra.mxu3 %v997_v39  ;;  %v1113_v33 = vsel %vm421_vm2, %v12717_v16, %v12716_v21  ;;  %v12390_v46 = vunpack.i.h.bf16 %v7774_v38  ;;  %v981_v39 = vsel %vm12720_vm14, %v12719_v63, %v12718_v23  ;;  %v7956_v16 = vpop.permute.xlu2 %5523 }
 0x284   : > { %1449 = vmatpush.msra.mxu2 %v1111_v8  ;;  %1529 = vmatpush.msra.mxu0 %v1113_v33  ;;  %v1288_v33 = vsel %vm608_vm15, %v12388_v37, %v12389_v58  ;;  %v12721_v23 = vunpack.i.l.bf16 %v7679_v2  ;;  %v12722_v8 = vunpack.i.h.bf16 %v7760_v6  ;;  %v12725_v21 = vunpack.i.l.bf16 %v7713_v50 }
 0x285   : > { %1418 = vmatpush.msra.mxu3 %v981_v39  ;;  %1434 = vmatpush.msra.mxu1 %v1288_v33  ;;  %v12729_v19 = vunpack.i.l.bf16 %v7768_v47  ;;  %v12739_v63 = vunpack.i.h.bf16 %v7762_v54  ;;  %vm12740_vm14 = vcmp.lt.s32.totalorder %v6988_v36, 41 }
 0x286   : > { %1450 = vmatpush.msra.mxu2 %v7627_v62  ;;  %1530 = vmatpush.msra.mxu0 %v7660_v20  ;;  %v965_v39 = vsel %vm12723_vm9, %v12722_v8, %v12721_v23  ;;  %v1092_v37 = vsel %vm400_vm3, %v12725_v21, %v12724_v17  ;;  %v12727_v8 = vunpack.i.l.bf16 %v7792_v10  ;;  %v12728_v23 = vunpack.i.h.bf16 %v7768_v47 }
 0x287   : > { %1419 = vmatpush.msra.mxu3 %v965_v39  ;;  %v12730_v39 = vunpack.i.l.bf16 %v7694_v49  ;;  %v12743_v20 = vunpack.i.h.bf16 %v7755_v12  ;;  %vm12747_vm9 = vcmp.lt.s32.totalorder %v6988_v36, 42  ;;  %v12780_v62 = vunpack.i.l.bf16 %v7711_v14 }
 0x288   : > { %1451 = vmatpush.msra.mxu2 %v1092_v37  ;;  %v1090_v33 = vsel %vm400_vm3, %v12727_v8, %v12726_v52  ;;  %v1272_v17 = vsel %vm591_vm13, %v12729_v19, %v12728_v23  ;;  %v12732_v52 = vunpack.i.h.bf16 %v7723_v48  ;;  %v12733_v8 = vunpack.i.l.bf16 %v7723_v48 }
 0x289   : > { %1531 = vmatpush.msra.mxu0 %v1090_v33  ;;  %v949_v37 = vsel %vm12731_vm8, %v12390_v46, %v12730_v39  ;;  %1435 = vmatpush.msra.mxu1 %v1272_v17  ;;  %v12734_v19 = vunpack.i.h.bf16 %v7731_v18  ;;  %v12735_v23 = vunpack.i.l.bf16 %v7731_v18  ;;  %v12396_v17 = vunpack.i.l.bf16 %v7786_v35 }
 0x28a   : > { %v1076_v58 = vsel %vm383_vm4, %v12733_v8, %v12732_v52  ;;  %1420 = vmatpush.msra.mxu3 %v949_v37  ;;  %v12736_v39 = vunpack.i.h.bf16 %v7782_v43  ;;  %v12737_v46 = vunpack.i.l.bf16 %v7782_v43  ;;  %v8008_v21 = vpop.permute.xlu1 %5528  ;;  %v12744_v8 = vunpack.i.l.bf16 %v7755_v12 }
 0x28b   : > { %v1256_v33 = vsel %vm574_vm12, %v12735_v23, %v12734_v19  ;;  %1452 = vmatpush.msra.mxu2 %v1076_v58  ;;  %v12397_v19 = vunpack.i.h.bf16 %v7715_v60  ;;  %v12738_v23 = vunpack.i.l.bf16 %v7704_v5  ;;  %vm12750_vm8 = vcmp.lt.s32.totalorder %v6988_v36, 19 }
 0x28c   : > { %v1074_v52 = vsel %vm383_vm4, %v12737_v46, %v12736_v39  ;;  %1436 = vmatpush.msra.mxu1 %v1256_v33  ;;  %v12741_v46 = vunpack.i.h.bf16 %v7772_v55  ;;  %v12742_v39 = vunpack.i.l.bf16 %v7772_v55  ;;  %v12398_v33 = vunpack.i.h.bf16 %v7684_v27 }
 0x28d   : > { %1532 = vmatpush.msra.mxu0 %v1074_v52  ;;  %v933_v58 = vsel %vm12740_vm14, %v12739_v63, %v12738_v23  ;;  %1453 = vmatpush.msra.mxu2 %v7850_v15  ;;  %v1240_v63 = vsel %vm557_vm11, %v12744_v8, %v12743_v20  ;;  %v12745_v15 = vunpack.i.l.bf16 %v7696_v4  ;;  %v8040_v8 = vld [vmem:[%s12309_s1 + $0x10] sm:$0xff]  ;;  %vm12752_vm14 = vmmov %vm12750_vm8 }
 0x28e   : > { %1421 = vmatpush.msra.mxu3 %v933_v58  ;;  %v1058_v52 = vsel %vm366_vm5, %v12742_v39, %v12741_v46  ;;  %v12746_v58 = vunpack.i.h.bf16 %v7753_v41  ;;  %1437 = vmatpush.msra.mxu1 %v1240_v63  ;;  %v12748_v46 = vunpack.i.h.bf16 %v7707_v57  ;;  %v12749_v39 = vunpack.i.l.bf16 %v7707_v57 }
 0x28f   : > { %1533 = vmatpush.msra.mxu0 %v1058_v52  ;;  %v12751_v63 = vunpack.i.h.bf16 %v7786_v35  ;;  %v12761_v52 = vunpack.i.l.bf16 %v7776_v13 }
 0x290   : > { %v917_v37 = vsel %vm12747_vm9, %v12746_v58, %v12745_v15  ;;  %v1044_v20 = vsel %vm12750_vm8, %v12749_v39, %v12748_v46  ;;  %v12753_v58 = vunpack.i.h.bf16 %v7764_v44  ;;  %v12754_v46 = vunpack.i.l.bf16 %v7764_v44 }
 0x291   : > { %1422 = vmatpush.msra.mxu3 %v917_v37  ;;  %1454 = vmatpush.msra.mxu2 %v1044_v20  ;;  %v1042_v15 = vsel %vm12752_vm14, %v12396_v17, %v12751_v63  ;;  %v12755_v37 = vunpack.i.l.bf16 %v7715_v60  ;;  %vm12756_vm9 = vcmp.lt.s32.totalorder %v6988_v36, 20  ;;  %v12757_v63 = vunpack.i.h.bf16 %v7717_v56 }
 0x292   : > { %v1224_v39 = vsel %vm12402_vm10, %v12754_v46, %v12753_v58  ;;  %1534 = vmatpush.msra.mxu0 %v1042_v15  ;;  %v12758_v17 = vunpack.i.l.bf16 %v7717_v56  ;;  %vm12759_vm8 = vcmp.lt.s32.totalorder %v6988_v36, 106  ;;  %vm12762_vm14 = vmmov %vm12756_vm9  ;;  %1423 = vmatmul.f32.vlgmr.msra.gmra.mxu3 %v8040_v8  ;;  %v12772_v46 = vunpack.i.l.bf16 %v7702_v24 }
 0x293   : > { %1438 = vmatpush.msra.mxu1 %v1224_v39  ;;  %v1028_v20 = vsel %vm12756_vm9, %v12755_v37, %v12397_v19  ;;  %v12760_v39 = vunpack.i.h.bf16 %v7776_v13  ;;  %vm12764_vm9 = vcmp.lt.s32.totalorder %v6988_v36, 21  ;;  %v12766_v19 = vunpack.i.l.bf16 %v7766_v0 }
 0x294   : > { %v1208_v23 = vsel %vm12759_vm8, %v12758_v17, %v12757_v63  ;;  %1455 = vmatpush.msra.mxu2 %v1028_v20  ;;  %v12763_v63 = vunpack.i.l.bf16 %v7684_v27  ;;  %vm12767_vm8 = vmmov %vm12764_vm9  ;;  %v12769_v17 = vunpack.i.l.bf16 %v7733_v1  ;;  %v12774_v15 = vunpack.i.h.bf16 %v7780_v40 }
 0x295   : > { %v1026_v37 = vsel %vm12762_vm14, %v12761_v52, %v12760_v39  ;;  %1439 = vmatpush.msra.mxu1 %v1208_v23  ;;  %v8089_v52 = vpop.permute.xlu2 %5538  ;;  %v12765_v39 = vunpack.i.h.bf16 %v7766_v0  ;;  %vm12770_vm14 = vcmp.lt.s32.totalorder %v6988_v36, 107 }
 0x296   : > { %1535 = vmatpush.msra.mxu0 %v1026_v37  ;;  %v1012_v20 = vsel %vm12764_vm9, %v12763_v63, %v12398_v33  ;;  %v12768_v37 = vunpack.i.h.bf16 %v7733_v1  ;;  %vm12773_vm9 = vcmp.lt.s32.totalorder %v6988_v36, 22 }
 0x297   : > { %1456 = vmatpush.msra.mxu2 %v1012_v20  ;;  %v1010_v23 = vsel %vm12767_vm8, %v12766_v19, %v12765_v39  ;;  %v12771_v20 = vunpack.i.h.bf16 %v7702_v24  ;;  %v8111_v39 = vpop.permute.xlu1 %5548  ;;  %vm12776_vm8 = vmmov %vm12773_vm9  ;;  %v12779_v19 = vunpack.i.h.bf16 %v7711_v14 }
 0x298   : > { %v1192_v63 = vsel %vm12770_vm14, %v12769_v17, %v12768_v37  ;;  %1536 = vmatpush.msra.mxu0 %v1010_v23  ;;  %v12775_v17 = vunpack.i.l.bf16 %v7780_v40  ;;  %v12777_v37 = vunpack.i.h.bf16 %v7757_v7  ;;  %vm12781_vm14 = vcmp.lt.s32.totalorder %v6988_v36, 38 }
 0x299   : > { %1440 = vmatpush.msra.mxu1 %v1192_v63  ;;  %v996_v58 = vsel %vm12773_vm9, %v12772_v46, %v12771_v20  ;;  %v12778_v63 = vunpack.i.l.bf16 %v7757_v7  ;;  %vm12784_vm9 = vmmov %vm12781_vm14 }
 0x29a   : > { %1457 = vmatpush.msra.mxu2 %v996_v58  ;;  %v994_v23 = vsel %vm12776_vm8, %v12775_v17, %v12774_v15  ;;  %v980_v15 = vsel %vm12781_vm14, %v12780_v62, %v12779_v19  ;;  %vm12787_vm8 = vcmp.lt.s32.totalorder %v6988_v36, 109  ;;  %v12788_v19 = vunpack.i.h.bf16 %v7679_v2 }
 0x29b   : > { %v1176_v33 = vsel %vm489_vm7, %v12778_v63, %v12777_v37  ;;  %1537 = vmatpush.msra.mxu0 %v994_v23  ;;  %v12782_v37 = vunpack.i.h.bf16 %v7770_v29  ;;  %v12783_v63 = vunpack.i.l.bf16 %v7770_v29  ;;  %v12785_v23 = vunpack.i.h.bf16 %v7709_v25 }
 0x29c   : > { %1441 = vmatpush.msra.mxu1 %v1176_v33  ;;  %1458 = vmatpush.msra.mxu2 %v980_v15  ;;  %v12786_v33 = vunpack.i.l.bf16 %v7709_v25  ;;  %v12789_v15 = vunpack.i.l.bf16 %v7679_v2  ;;  %vm12790_vm14 = vcmp.lt.s32.totalorder %v6988_v36, 39  ;;  %v12792_v17 = vunpack.i.h.bf16 %v7895_v59 }
 0x29d   : > { %v978_v20 = vsel %vm12784_vm9, %v12783_v63, %v12782_v37  ;;  %v12791_v63 = vunpack.i.l.bf16 %v8111_v39  ;;  %vm12795_vm9 = vmmov %vm12790_vm14 }
 0x29e   : > { %v1160_v46 = vsel %vm12787_vm8, %v12786_v33, %v12785_v23  ;;  %1538 = vmatpush.msra.mxu0 %v978_v20  ;;  %v964_v37 = vsel %vm12790_vm14, %v12789_v15, %v12788_v19  ;;  %v12401_v33 = vunpack.i.l.bf16 %v7762_v54  ;;  %v12794_v20 = vunpack.i.l.bf16 %v7760_v6 }
 0x29f   : > { %1442 = vmatpush.msra.mxu1 %v1160_v46  ;;  %v1287_v23 = vsel %vm608_vm15, %v12792_v17, %v12791_v63  ;;  %1459 = vmatpush.msra.mxu2 %v964_v37  ;;  %v12793_v46 = vunpack.i.h.bf16 %v7760_v6  ;;  %v12796_v19 = vunpack.i.h.bf16 %v7825_v3  ;;  %v12797_v15 = vunpack.i.l.bf16 %v7825_v3 }
 0x2a0   : > { %1474 = vmatpush.msrb.mxu3 %v1287_v23  ;;  %v12798_v37 = vunpack.i.h.bf16 %v7694_v49  ;;  %v12799_v23 = vunpack.i.l.bf16 %v7694_v49  ;;  %vm12800_vm8 = vcmp.lt.s32.totalorder %v6988_v36, 40  ;;  %v12802_v3 = vunpack.i.h.bf16 %v7768_v47 }
 0x2a1   : > { %v962_v62 = vsel %vm12795_vm9, %v12794_v20, %v12793_v46  ;;  %v1142_v58 = vsel %vm455_vm0, %v12797_v15, %v12796_v19  ;;  %v12801_v20 = vunpack.i.l.bf16 %v8089_v52  ;;  %v12400_v15 = vunpack.i.l.bf16 %v7753_v41  ;;  %vm12805_vm14 = vmmov %vm12800_vm8 }
 0x2a2   : > { %1539 = vmatpush.msra.mxu0 %v962_v62  ;;  %1487 = vmatpush.msrb.mxu1 %v1142_v58  ;;  %v948_v46 = vsel %vm12800_vm8, %v12799_v23, %v12798_v37  ;;  %v12803_v58 = vunpack.i.h.bf16 %v7774_v38  ;;  %v12804_v62 = vunpack.i.l.bf16 %v7774_v38  ;;  %v12806_v37 = vunpack.i.h.bf16 %v7790_v26 }
 0x2a3   : > { %v1271_v19 = vsel %vm591_vm13, %v12802_v3, %v12801_v20  ;;  %1460 = vmatpush.msra.mxu2 %v948_v46  ;;  %v12807_v23 = vunpack.i.l.bf16 %v7790_v26  ;;  %v5551_v3 = vunpack.i.h.bf16 %v8111_v39  ;;  %v12808_v46 = vunpack.i.h.bf16 %v7704_v5 }
 0x2a4   : > { %1475 = vmatpush.msrb.mxu3 %v1271_v19  ;;  %v946_v63 = vsel %vm12805_vm14, %v12804_v62, %v12803_v58  ;;  %v12809_v19 = vunpack.i.l.bf16 %v7704_v5  ;;  %vm12810_vm9 = vcmp.lt.s32.totalorder %v6988_v36, 41  ;;  %v12811_v62 = vunpack.i.l.bf16 %v7816_v9 }
 0x2a5   : > { %v1126_v17 = vsel %vm438_vm1, %v12807_v23, %v12806_v37  ;;  %1540 = vmatpush.msra.mxu0 %v946_v63  ;;  %v12812_v26 = vunpack.i.h.bf16 %v7731_v18  ;;  %v12813_v23 = vunpack.i.h.bf16 %v7762_v54  ;;  %vm12814_vm8 = vmmov %vm12810_vm9  ;;  %v12815_v63 = vunpack.i.h.bf16 %v7778_v61 }
 0x2a6   : > { %1488 = vmatpush.msrb.mxu1 %v1126_v17  ;;  %v932_v58 = vsel %vm12810_vm9, %v12809_v19, %v12808_v46  ;;  %v12816_v46 = vunpack.i.l.bf16 %v7778_v61  ;;  %v5541_v20 = vunpack.i.h.bf16 %v8089_v52  ;;  %vm12819_vm14 = vcmp.lt.s32.totalorder %v6988_v36, 42 }
 0x2a7   : > { %v1255_v37 = vsel %vm574_vm12, %v12812_v26, %v12811_v62  ;;  %1461 = vmatpush.msra.mxu2 %v932_v58  ;;  %v930_v17 = vsel %vm12814_vm8, %v12401_v33, %v12813_v23  ;;  %v5520_v62 = vunpack.i.l.bf16 %v7788_v32  ;;  %v12817_v58 = vunpack.i.h.bf16 %v7696_v4  ;;  %vm12823_vm9 = vmmov %vm12819_vm14 }
 0x2a8   : > { %1476 = vmatpush.msrb.mxu3 %v1255_v37  ;;  %v1110_v19 = vsel %vm421_vm2, %v12816_v46, %v12815_v63  ;;  %1541 = vmatpush.msra.mxu0 %v930_v17  ;;  %v12818_v26 = vunpack.i.l.bf16 %v7696_v4  ;;  %v12820_v23 = vunpack.i.l.bf16 %v8008_v21  ;;  %v12821_v61 = vunpack.i.h.bf16 %v7755_v12 }
 0x2a9   : > { %1489 = vmatpush.msrb.mxu1 %v1110_v19  ;;  %v12822_v46 = vunpack.i.h.bf16 %v7753_v41  ;;  %v5536_v19 = vunpack.i.h.bf16 %v7816_v9  ;;  %v12829_v33 = vunpack.i.l.bf16 %v7768_v47  ;;  %vm12831_vm8 = vcmp.lt.s32.totalorder %v6988_v36, 106 }
 0x2aa   : > { %v916_v37 = vsel %vm12819_vm14, %v12818_v26, %v12817_v58  ;;  %v1239_v63 = vsel %vm557_vm11, %v12821_v61, %v12820_v23  ;;  %v5515_v58 = vunpack.i.l.bf16 %v7912_v11  ;;  %v12824_v26 = vunpack.i.l.bf16 %v7895_v59 }
 0x2ab   : > { %1462 = vmatpush.msra.mxu2 %v916_v37  ;;  %1477 = vmatpush.msrb.mxu3 %v1239_v63  ;;  %v914_v17 = vsel %vm12823_vm9, %v12400_v15, %v12822_v46  ;;  %v12825_v23 = vunpack.i.l.bf16 %v7956_v16  ;;  %v12826_v61 = vunpack.i.h.bf16 %v7764_v44  ;;  %v12827_v46 = vunpack.i.l.bf16 %v7792_v10 }
 0x2ac   : > { %1542 = vmatpush.msra.mxu0 %v914_v17  ;;  %1490 = vmatpush.msrb.mxu1 %v7657_v31  ;;  %v1289_v37 = vsel %vm608_vm15, %v5551_v3, %v12824_v26  ;;  %v12828_v17 = vunpack.i.h.bf16 %v7713_v50  ;;  %v5510_v15 = vunpack.i.l.bf16 %v7838_v22  ;;  %v5531_v26 = vunpack.i.h.bf16 %v8008_v21 }
 0x2ad   : > { %v1223_v63 = vsel %vm12402_vm10, %v12826_v61, %v12825_v23  ;;  %1554 = vmatpush.msrb.mxu2 %v1289_v37  ;;  %v1273_v37 = vsel %vm591_vm13, %v5541_v20, %v12829_v33  ;;  %v12830_v10 = vunpack.i.h.bf16 %v7717_v56  ;;  %v12832_v23 = vunpack.i.l.bf16 %v7782_v43  ;;  %v4994_v33 = vld [vmem:[%s12310_s2 + $0x8] sm:$0xff]  ;;  %1543 = vmatmul.f32.vlgmr.msra.gmra.mxu0 %v8040_v8 }
 0x2ae   : > { %1478 = vmatpush.msrb.mxu3 %v1223_v63  ;;  %v1091_v59 = vsel %vm400_vm3, %v12828_v17, %v12827_v46  ;;  %1463 = vmatmul.f32.vlgmr.msra.gmra.mxu2 %v8040_v8  ;;  %v12833_v47 = vunpack.i.h.bf16 %v7723_v48  ;;  %v5526_v63 = vunpack.i.h.bf16 %v7956_v16  ;;  %v5505_v46 = vunpack.i.l.bf16 %v7784_v53 }
 0x2af   : > { %1491 = vmatpush.msrb.mxu1 %v1091_v59  ;;  %v1207_v50 = vsel %vm12831_vm8, %v12830_v10, %v5520_v62  ;;  %1555 = vmatpush.msrb.mxu2 %v1273_v37  ;;  %v12834_v17 = vunpack.i.l.bf16 %v7731_v18  ;;  %v12835_v48 = vunpack.i.h.bf16 %v7733_v1  ;;  %vm12836_vm14 = vcmp.lt.s32.totalorder %v6988_v36, 107 }
 0x2b0   : > { %1479 = vmatpush.msrb.mxu3 %v1207_v50  ;;  %v1075_v61 = vsel %vm383_vm4, %v12833_v47, %v12832_v23  ;;  %v12837_v37 = vunpack.i.l.bf16 %v7772_v55  ;;  %v12838_v10 = vunpack.i.h.bf16 %v7689_v28  ;;  %v12839_v50 = vunpack.i.l.bf16 %v7755_v12  ;;  %1401 = vperm.xlu2 %5552, %v4994_v33  }
 0x2b1   : > { %1492 = vmatpush.msrb.mxu1 %v1075_v61  ;;  %v1257_v59 = vsel %vm574_vm12, %v5536_v19, %v12834_v17  ;;  %v1191_v43 = vsel %vm12836_vm14, %v12835_v48, %v5515_v58  ;;  %v12840_v47 = vunpack.i.h.bf16 %v7757_v7  ;;  %v5521_v55 = vunpack.i.h.bf16 %v7788_v32 }
 0x2b2   : > { %1556 = vmatpush.msrb.mxu2 %v1257_v59  ;;  %1480 = vmatpush.msrb.mxu3 %v1191_v43  ;;  %v1059_v18 = vsel %vm366_vm5, %v12838_v10, %v12837_v37  ;;  %v1241_v23 = vsel %vm557_vm11, %v5531_v26, %v12839_v50  ;;  %v12841_v28 = vunpack.i.l.bf16 %v7786_v35  ;;  %v12842_v17 = vunpack.i.h.bf16 %v7707_v57  ;;  %v4993_v59 = vld [vmem:[%s12309_s1 + $0x18] sm:$0xff] }
 0x2b3   : > { %1493 = vmatpush.msrb.mxu1 %v1059_v18  ;;  %v1175_v61 = vsel %vm489_vm7, %v12840_v47, %v5510_v15  ;;  %vm12843_vm9 = vcmp.lt.s32.totalorder %v6988_v36, 19  ;;  %v12844_v48 = vunpack.i.l.bf16 %v7764_v44  ;;  %v12845_v43 = vunpack.i.h.bf16 %v7709_v25 }
 0x2b4   : > { %1557 = vmatpush.msrb.mxu2 %v1241_v23  ;;  %1481 = vmatpush.msrb.mxu3 %v1175_v61  ;;  %v1043_v12 = vsel %vm12843_vm9, %v12842_v17, %v12841_v28  ;;  %vm12846_vm8 = vcmp.lt.s32.totalorder %v6988_v36, 109  ;;  %v5516_v35 = vunpack.i.h.bf16 %v7912_v11  ;;  %v12847_v44 = vunpack.i.l.bf16 %v7776_v13 }
 0x2b5   : > { %1494 = vmatpush.msrb.mxu1 %v1043_v12  ;;  %v1225_v33 = vsel %vm12402_vm10, %v5526_v63, %v12844_v48  ;;  %v1159_v57 = vsel %vm12846_vm8, %v12845_v43, %v5505_v46  ;;  %v12848_v37 = vunpack.i.h.bf16 %v7715_v60  ;;  %vm12849_vm14 = vcmp.lt.s32.totalorder %v6988_v36, 20 }
 0x2b6   : > { %1558 = vmatpush.msrb.mxu2 %v1225_v33  ;;  %1482 = vmatpush.msrb.mxu3 %v1159_v57  ;;  %v12850_v18 = vunpack.i.l.bf16 %v8111_v39  ;;  %v5511_v23 = vunpack.i.h.bf16 %v7838_v22  ;;  %v12851_v47 = vunpack.i.l.bf16 %v7717_v56  ;;  %vm12852_vm9 = vcmp.lt.s32.totalorder %v6988_v36, 106 }
 0x2b7   : > { %4995 = vmatmul.msk.f32.vlgmr.msra.gmra.mxu1 %vm725_vm6, %v4993_v59  ;;  %4996 = vmatmul.msk.f32.vlgmr.msrb.gmra.mxu3 %vm725_vm6, %v4993_v59  ;;  %v1027_v10 = vsel %vm12849_vm14, %v12848_v37, %v12847_v44  ;;  %v12853_v60 = vunpack.i.l.bf16 %v7766_v0  ;;  %v12854_v61 = vunpack.i.h.bf16 %v7684_v27  ;;  %vm12855_vm8 = vcmp.lt.s32.totalorder %v6988_v36, 21 }
 0x2b8   : > { %v1286_v50 = vsel %vm608_vm15, %v12850_v18, %v5551_v3  ;;  %1495 = vmatpush.msrb.mxu1 %v1027_v10  ;;  %v1209_v13 = vsel %vm12852_vm9, %v5521_v55, %v12851_v47  ;;  %v12856_v3 = vunpack.i.l.bf16 %v8089_v52  ;;  %v5506_v56 = vunpack.i.h.bf16 %v7784_v53 }
 0x2b9   : > { %1514 = vmatpush.msra.mxu3 %v1286_v50  ;;  %1559 = vmatpush.msrb.mxu2 %v1209_v13  ;;  %v1011_v39 = vsel %vm12855_vm8, %v12854_v61, %v12853_v60  ;;  %v12857_v17 = vunpack.i.l.bf16 %v7733_v1  ;;  %vm12858_vm14 = vcmp.lt.s32.totalorder %v6988_v36, 107  ;;  %v12859_v27 = vunpack.i.l.bf16 %v7780_v40 }
 0x2ba   : > { %v1270_v28 = vsel %vm591_vm13, %v12856_v3, %v5541_v20  ;;  %1496 = vmatpush.msrb.mxu1 %v1011_v39  ;;  %v12860_v12 = vunpack.i.h.bf16 %v7702_v24  ;;  %vm12861_vm9 = vcmp.lt.s32.totalorder %v6988_v36, 22  ;;  %v12862_v48 = vunpack.i.l.bf16 %v7816_v9 }
 0x2bb   : > { %1515 = vmatpush.msra.mxu3 %v1270_v28  ;;  %v1193_v0 = vsel %vm12858_vm14, %v5516_v35, %v12857_v17  ;;  %v12863_v1 = vunpack.i.l.bf16 %v7757_v7  ;;  %v12864_v40 = vunpack.i.l.bf16 %v7770_v29  ;;  %v12865_v24 = vunpack.i.h.bf16 %v7711_v14 }
 0x2bc   : > { %1560 = vmatpush.msrb.mxu2 %v1193_v0  ;;  %v995_v52 = vsel %vm12861_vm9, %v12860_v12, %v12859_v27  ;;  %v1254_v20 = vsel %vm574_vm12, %v12862_v48, %v5536_v19  ;;  %vm12866_vm8 = vcmp.lt.s32.totalorder %v6988_v36, 38  ;;  %v12867_v9 = vunpack.i.l.bf16 %v8008_v21 }
 0x2bd   : > { %1497 = vmatpush.msrb.mxu1 %v995_v52  ;;  %1516 = vmatpush.msra.mxu3 %v1254_v20  ;;  %v1177_v33 = vsel %vm489_vm7, %v5511_v23, %v12863_v1  ;;  %v979_v43 = vsel %vm12866_vm8, %v12865_v24, %v12864_v40  ;;  %v12868_v7 = vunpack.i.l.bf16 %v7709_v25  ;;  %vm12869_vm14 = vcmp.lt.s32.totalorder %v6988_v36, 109 }
 0x2be   : > { %1561 = vmatpush.msrb.mxu2 %v1177_v33  ;;  %v1238_v19 = vsel %vm557_vm11, %v12867_v9, %v5531_v26  ;;  %v12870_v29 = vunpack.i.l.bf16 %v7760_v6  ;;  %v12871_v14 = vunpack.i.h.bf16 %v7679_v2  ;;  %vm12872_vm9 = vcmp.lt.s32.totalorder %v6988_v36, 39 }
 0x2bf   : > { %1498 = vmatpush.msrb.mxu1 %v979_v43  ;;  %1517 = vmatpush.msra.mxu3 %v1238_v19  ;;  %v1161_v57 = vsel %vm12869_vm14, %v5506_v56, %v12868_v7  ;;  %v12873_v21 = vunpack.i.l.bf16 %v7956_v16  ;;  %v12874_v25 = vunpack.i.l.bf16 %v7774_v38  ;;  %v12875_v37 = vunpack.i.h.bf16 %v7694_v49  ;;  %v5001_v19 = vld [vmem:[%s12310_s2 + $0x10] sm:$0xff] }
 0x2c0   : > { %1562 = vmatpush.msrb.mxu2 %v1161_v57  ;;  %v963_v44 = vsel %vm12872_vm9, %v12871_v14, %v12870_v29  ;;  %vm12876_vm8 = vcmp.lt.s32.totalorder %v6988_v36, 40  ;;  %vm12877_vm14 = vcmp.lt.s32.totalorder %v6988_v36, 106  ;;  %v12878_v16 = vunpack.i.l.bf16 %v7762_v54 }
 0x2c1   : > { %4998 = vmatmul.msk.f32.vlgmr.msrb.gmra.mxu2 %vm725_vm6, %v4993_v59  ;;  %1499 = vmatpush.msrb.mxu1 %v963_v44  ;;  %v1222_v26 = vsel %vm12402_vm10, %v12873_v21, %v5526_v63  ;;  %v947_v6 = vsel %vm12876_vm8, %v12875_v37, %v12874_v25  ;;  %v1206_v2 = vsel %vm12877_vm14, %v5520_v62, %v5521_v55  ;;  %v12879_v10 = vunpack.i.h.bf16 %v7704_v5 }
 0x2c2   : > { %1518 = vmatpush.msra.mxu3 %v1222_v26  ;;  %vm12880_vm9 = vcmp.lt.s32.totalorder %v6988_v36, 41  ;;  %vm12881_vm10 = vcmp.lt.s32.totalorder %v6988_v36, 107  ;;  %v12882_v38 = vunpack.i.l.bf16 %v7753_v41  ;;  %v12883_v32 = vunpack.i.h.bf16 %v7696_v4 }
 0x2c3   : > { %1500 = vmatpush.msrb.mxu1 %v947_v6  ;;  %v931_v63 = vsel %vm12880_vm9, %v12879_v10, %v12878_v16  ;;  %v1190_v49 = vsel %vm12881_vm10, %v5515_v58, %v5516_v35  ;;  %vm12884_vm8 = vcmp.lt.s32.totalorder %v6988_v36, 42  ;;  %v1174_v5 = vsel %vm489_vm7, %v5510_v15, %v5511_v23 }
 0x2c4   : > { %1519 = vmatpush.msra.mxu3 %v1206_v2  ;;  %v915_v62 = vsel %vm12884_vm8, %v12883_v32, %v12882_v38  ;;  %vm12885_vm10 = vcmp.lt.s32.totalorder %v6988_v36, 109  ;;  %vm12892_vm14 = vcmp.lt.s32.totalorder %v6988_v36, 19  ;;  %vm12893_vm9 = vcmp.lt.s32.totalorder %v6988_v36, 20 }
 0x2c5   : > { %1501 = vmatpush.msrb.mxu1 %v931_v63  ;;  %v1158_v54 = vsel %vm12885_vm10, %v5505_v46, %v5506_v56  ;;  %vm12894_vm8 = vcmp.lt.s32.totalorder %v6988_v36, 21  ;;  %vm12895_vm10 = vcmp.lt.s32.totalorder %v6988_v36, 22 }
 0x2c6   : > { %1520 = vmatpush.msra.mxu3 %v1190_v49 }
 0x2c7   : > { %1502 = vmatpush.msrb.mxu1 %v915_v62 }
 0x2c8   : > { %1521 = vmatpush.msra.mxu3 %v1174_v5  ;;  %1503 = vmatmul.f32.vlgmr.msrb.gmra.mxu1 %v8040_v8 }
 0x2ca   : > { %1522 = vmatpush.msra.mxu3 %v1158_v54 }
 0x2cb   : > { %4997 = vmatmul.msk.f32.vlgmr.msra.gmra.mxu3 %vm725_vm6, %v4993_v59 }
 0x30a   : > { %v1402_v4 = vpop.permute.xlu2 %1401 }
 0x315   : > { %v1424_v41 = vpop.f32.mrf.mxu3 }
 0x316   : > { %v1425_v11 = vadd.f32 %v1424_v41, %v1402_v4 }
 0x32a   : > { %v1544_v47 = vpop.f32.mrf.mxu0 }
 0x32b   : > { %v1545_v39 = vadd.f32 %v1544_v47, %v1402_v4 }
 0x331   : > { %v1464_v55 = vpop.f32.mrf.mxu2 }
 0x332   : > { %v1465_v35 = vadd.f32 %v1464_v55, %v1402_v4 }
 0x334   : > { %v1444_v58 = vpop.f32.mrf.mxu1 }
 0x335   : > { %v1445_v22 = vadd.f32 %v1444_v58, %v1425_v11 }
 0x337   : > { %v1567_v15 = vmax.f32 %v1445_v22, 0.0 }
 0x339   : > { %v8454_v8 = vmul.f32 %v1567_v15, %v7619_v42 }
 0x33a   : > { %v1484_v18 = vpop.f32.mrf.mxu3 }
 0x33b   : > { %v1485_v50 = vadd.f32 %v1484_v18, %v1465_v35 }
 0x33d   : > { %v1568_v23 = vmax.f32 %v1485_v50, 0.0 }
 0x33f   : > { %v8457_v53 = vmul.f32 %v1568_v23, %v7621_v34 }
 0x341   : > { %v8461_v46 = vpack.i.bf16 %v8457_v53, %v8454_v8 }
 0x343   : > { %5564 = vrot.lane.b32.xlu1 %v8461_v46, %s6754_s23  ;;  %5559 = vrot.lane.b32.xlu2 %v8461_v46, %s6752_s21 }
 0x344   : > { %5554 = vrot.lane.b32.xlu0 %v8461_v46, %s6753_s22  ;;  %v1564_v61 = vpop.f32.mrf.mxu2 }
 0x345   : > { %v1504_v59 = vpop.f32.mrf.mxu1  ;;  %v1565_v28 = vadd.f32 %v1564_v61, %v1545_v39 }
 0x346   : > { %v1505_v60 = vadd.f32 %v1504_v59, %v1402_v4 }
 0x347   : > { %v1570_v17 = vmax.f32 %v1565_v28, 0.0 }
 0x349   : > { %v8509_v27 = vmul.f32 %v1570_v17, %v7651_v51 }
 0x34b   : > { %5579 = vrot.lane.b32.xlu1 %v8461_v46, %s6757_s26  ;;  %5574 = vrot.lane.b32.xlu2 %v8461_v46, %s6756_s25 }
 0x34c   : > { %5569 = vrot.lane.b32.xlu0 %v8461_v46, %s6755_s24 }
 0x34e   : > { %v1524_v13 = vpop.f32.mrf.mxu3 }
 0x34f   : > { %v1525_v3 = vadd.f32 %v1524_v13, %v1505_v60 }
 0x351   : > { %v1569_v56 = vmax.f32 %v1525_v3, 0.0 }
 0x353   : > { %5594 = vrot.lane.b32.xlu1 %v8461_v46, %s6760_s29  ;;  %5589 = vrot.lane.b32.xlu2 %v8461_v46, %s12535_s28  ;;  %v8506_v0 = vmul.f32 %v1569_v56, %v7649_v30 }
 0x354   : > { %5584 = vrot.lane.b32.xlu0 %v8461_v46, %s6758_s27 }
 0x355   : > { %v5668_v12 = vpack.i.bf16 %v8509_v27, %v8506_v0 }
 0x35b   : > { %5609 = vrot.lane.b32.xlu1 %v8461_v46, %s6763_s6  ;;  %5604 = vrot.lane.b32.xlu2 %v8461_v46, %s12537_s5 }
 0x35c   : > { %5599 = vrot.lane.b32.xlu0 %v8461_v46, %s6761_s30 }
 0x363   : > { %5624 = vrot.lane.b32.xlu1 %v8461_v46, %s6766_s9  ;;  %5619 = vrot.lane.b32.xlu2 %v8461_v46, %s12484_s8 }
 0x364   : > { %5614 = vrot.lane.b32.xlu0 %v8461_v46, %s6764_s7 }
 0x36b   : > { %5639 = vrot.lane.b32.xlu1 %v8461_v46, %s12482_s12  ;;  %5634 = vrot.lane.b32.xlu2 %v8461_v46, %s12473_s11 }
 0x36c   : > { %5629 = vrot.lane.b32.xlu0 %v8461_v46, %s12471_s10 }
 0x373   : > { %5654 = vrot.lane.b32.xlu1 %v8461_v46, %s12405_s18  ;;  %5649 = vrot.lane.b32.xlu2 %v8461_v46, %s12403_s14 }
 0x374   : > { %5644 = vrot.lane.b32.xlu0 %v8461_v46, %s12886_s13 }
 0x37b   : > { %5669 = vrot.lane.b32.xlu1 %v5668_v12, %s6753_s22  ;;  %5664 = vrot.lane.b32.xlu2 %v8461_v46, %s12699_s17 }
 0x37c   : > { %5659 = vrot.lane.b32.xlu0 %v8461_v46, %s12887_s19 }
 0x383   : > { %5684 = vrot.lane.b32.xlu1 %v5668_v12, %s6755_s24  ;;  %5679 = vrot.lane.b32.xlu2 %v5668_v12, %s6754_s23 }
 0x384   : > { %5674 = vrot.lane.b32.xlu0 %v5668_v12, %s6752_s21 }
 0x38b   : > { %5699 = vrot.lane.b32.xlu1 %v5668_v12, %s6758_s27  ;;  %5694 = vrot.lane.b32.xlu2 %v5668_v12, %s6757_s26 }
 0x38c   : > { %5689 = vrot.lane.b32.xlu0 %v5668_v12, %s6756_s25 }
 0x393   : > { %5714 = vrot.lane.b32.xlu1 %v5668_v12, %s6761_s30  ;;  %5709 = vrot.lane.b32.xlu2 %v5668_v12, %s6760_s29 }
 0x394   : > { %5704 = vrot.lane.b32.xlu0 %v5668_v12, %s12535_s28 }
 0x39b   : > { %5729 = vrot.lane.b32.xlu1 %v5668_v12, %s6764_s7  ;;  %5724 = vrot.lane.b32.xlu2 %v5668_v12, %s6763_s6 }
 0x39c   : > { %5719 = vrot.lane.b32.xlu0 %v5668_v12, %s12537_s5 }
 0x39d   : > { %v8530_v52 = vpop.permute.xlu2 %5559 }
 0x3a3   : > { %5744 = vrot.lane.b32.xlu1 %v5668_v12, %s12471_s10  ;;  %5739 = vrot.lane.b32.xlu2 %v5668_v12, %s6766_s9 }
 0x3a4   : > { %5734 = vrot.lane.b32.xlu0 %v5668_v12, %s12484_s8 }
 0x3a5   : > { %v8535_v48 = vpop.permute.xlu2 %5574 }
 0x3ab   : > { %5759 = vrot.lane.b32.xlu1 %v5668_v12, %s12886_s13  ;;  %5754 = vrot.lane.b32.xlu2 %v5668_v12, %s12482_s12 }
 0x3ac   : > { %5749 = vrot.lane.b32.xlu0 %v5668_v12, %s12473_s11 }
 0x3ad   : > { %v8540_v20 = vpop.permute.xlu2 %5589 }
 0x3ae   : > { %v12918_v31 = vunpack.i.l.bf16 %v8540_v20 }
 0x3b3   : > { %5774 = vrot.lane.b32.xlu1 %v5668_v12, %s12887_s19  ;;  %5769 = vrot.lane.b32.xlu2 %v5668_v12, %s12405_s18  ;;  %s13031_s18 = smov 90  }
 0x3b4   : > { %5764 = vrot.lane.b32.xlu0 %v5668_v12, %s12403_s14  ;;  %s13030_s14 = smov 89  }
 0x3b5   : > { %v8545_v1 = vpop.permute.xlu1 %5564  ;;  %v8547_v33 = vpop.permute.xlu2 %5604 }
 0x3b6   : > { %12888 = vst [vmem:[#allocation11_spill] sm:$0xff] %v8545_v1  ;;  %v8549_v40 = vpop.permute.xlu0 %5554  ;;  %v12907_v30 = vunpack.i.h.bf16 %v8547_v33 }
 0x3bb   : > { %5784 = vrot.lane.b32.xlu1 %v8461_v46, %s12700_s20  ;;  %5789 = vrot.lane.b32.xlu2 %v5668_v12, %s12700_s20 }
 0x3bc   : > { %5779 = vrot.lane.b32.xlu0 %v5668_v12, %s12699_s17  ;;  %v5606_v12 = vunpack.i.l.bf16 %v8547_v33 }
 0x3bd   : > { %v8555_v24 = vpop.permute.xlu1 %5579  ;;  %v8557_v43 = vpop.permute.xlu2 %5619 }
 0x3be   : > { %v8559_v9 = vpop.permute.xlu0 %5569  ;;  %v5622_v37 = vunpack.i.h.bf16 %v8557_v43  ;;  %v12409_v6 = vunpack.i.l.bf16 %v8557_v43  ;;  %v12923_v34 = vunpack.i.h.bf16 %v8555_v24  ;;  %v12924_v42 = vunpack.i.l.bf16 %v8555_v24 }
 0x3bf   : > { %12889 = vst [vmem:[#allocation12_spill] sm:$0xff] %v8559_v9 }
 0x3c0   : > { %v1797_v32 = vsel %vm438_vm1, %v12409_v6, %v5622_v37 }
 0x3c4   : > { %2070 = vperm.xlu0 %5311, %v5001_v19  }
 0x3c5   : > { %v8564_v7 = vpop.permute.xlu1 %5594  ;;  %v8566_v57 = vpop.permute.xlu2 %5634 }
 0x3c6   : > { %v8568_v29 = vpop.permute.xlu0 %5584 }
 0x3cd   : > { %v8570_v14 = vpop.permute.xlu1 %5609  ;;  %v8572_v44 = vpop.permute.xlu2 %5649 }
 0x3ce   : > { %v8574_v21 = vpop.permute.xlu0 %5599  ;;  %v12413_v50 = vunpack.i.l.bf16 %v8570_v14 }
 0x3d5   : > { %v8576_v26 = vpop.permute.xlu1 %5624  ;;  %v8578_v25 = vpop.permute.xlu2 %5664 }
 0x3d6   : > { %v5627_v2 = vunpack.i.h.bf16 %v8576_v26  ;;  %v12410_v16 = vunpack.i.l.bf16 %v8576_v26  ;;  %v8584_v10 = vpop.permute.xlu0 %5614 }
 0x3d7   : > { %v12418_v63 = vunpack.i.h.bf16 %v8584_v10  ;;  %v12408_v49 = vunpack.i.l.bf16 %v8584_v10 }
 0x3d8   : > { %v1813_v38 = vsel %vm455_vm0, %v12410_v16, %v5627_v2 }
 0x3d9   : > { %2076 = vmatpush.msrb.mxu3 %v1813_v38  ;;  %v1781_v62 = vsel %vm421_vm2, %v12408_v49, %v12418_v63  ;;  %v12420_v49 = vunpack.i.l.bf16 %v8540_v20  ;;  %v12897_v63 = vunpack.i.h.bf16 %v8584_v10 }
 0x3db   : > { %2077 = vmatpush.msrb.mxu3 %v1797_v32  ;;  %v12415_v32 = vunpack.i.l.bf16 %v8574_v21 }
 0x3dd   : > { %v8604_v5 = vpop.permute.xlu1 %5639  ;;  %v8606_v54 = vpop.permute.xlu2 %5679  ;;  %2078 = vmatpush.msrb.mxu3 %v1781_v62 }
 0x3de   : > { %v8608_v4 = vpop.permute.xlu0 %5629 }
 0x3df   : > { %2079 = vmatpush.msrb.mxu3 %v8454_v8 }
 0x3e5   : > { %v8611_v41 = vpop.permute.xlu1 %5654  ;;  %v8613_v11 = vpop.permute.xlu2 %5694 }
 0x3e6   : > { %v8615_v58 = vpop.permute.xlu0 %5644 }
 0x3ed   : > { %v8617_v55 = vpop.permute.xlu1 %5669  ;;  %v8619_v22 = vpop.permute.xlu2 %5709 }
 0x3ee   : > { %12890 = vst [vmem:[#allocation13_spill] sm:$0xff] %v8617_v55  ;;  %v8621_v35 = vpop.permute.xlu0 %5659 }
 0x3f5   : > { %v8623_v18 = vpop.permute.xlu1 %5684  ;;  %v8625_v15 = vpop.permute.xlu2 %5724 }
 0x3f6   : > { %v12407_v23 = vunpack.i.h.bf16 %v8625_v15  ;;  %v8629_v8 = vpop.permute.xlu0 %5674 }
 0x3f7   : > { %12891 = vst [vmem:[#allocation14_spill] sm:$0xff] %v8629_v8 }
 0x3f8   : > { %v1762_v46 = vsel %vm400_vm3, %v12407_v23, %v12413_v50 }
 0x3f9   : > { %2080 = vmatpush.msrb.mxu3 %v1762_v46  ;;  %v12417_v46 = vunpack.i.l.bf16 %v8564_v7 }
 0x3fd   : > { %v8637_v59 = vpop.permute.xlu1 %5699  ;;  %v8639_v47 = vpop.permute.xlu2 %5739 }
 0x3fe   : > { %v12412_v13 = vunpack.i.l.bf16 %v8639_v47  ;;  %v8642_v60 = vpop.permute.xlu0 %5689  ;;  %v12421_v6 = vunpack.i.h.bf16 %v8637_v59 }
 0x400   : > { %v1812_v61 = vsel %vm455_vm0, %v5627_v2, %v12412_v13  ;;  %v12416_v2 = vunpack.i.h.bf16 %v8619_v22 }
 0x401   : > { %2116 = vmatpush.msra.mxu2 %v1812_v61 }
 0x405   : > { %v8648_v39 = vpop.permute.xlu1 %5714  ;;  %v8652_v28 = vpop.permute.xlu2 %5754 }
 0x406   : > { %v8650_v3 = vpop.permute.xlu0 %5704  ;;  %v12414_v19 = vunpack.i.h.bf16 %v8648_v39 }
 0x407   : > { %v12419_v61 = vunpack.i.h.bf16 %v8650_v3 }
 0x408   : > { %v1730_v23 = vsel %vm366_vm5, %v12414_v19, %v12415_v32 }
 0x40d   : > { %v8654_v56 = vpop.permute.xlu1 %5729  ;;  %v8686_v13 = vpop.permute.xlu2 %5769 }
 0x40e   : > { %v8656_v17 = vpop.permute.xlu0 %5719  ;;  %v5771_v45 = vunpack.i.l.bf16 %v8686_v13 }
 0x40f   : > { %v12411_v38 = vunpack.i.h.bf16 %v8656_v17 }
 0x411   : > { %v1746_v62 = vsel %vm383_vm4, %v12411_v38, %v5606_v12  ;;  %v12422_v38 = vunpack.i.l.bf16 %v8568_v29 }
 0x412   : > { %2081 = vmatpush.msrb.mxu3 %v1746_v62  ;;  %v1714_v62 = vsel %vm12892_vm14, %v12416_v2, %v12417_v46  ;;  %v1698_v2 = vsel %vm12893_vm9, %v12419_v61, %v12420_v49  ;;  %v12425_v46 = vunpack.i.l.bf16 %v8555_v24  ;;  %vm12899_vm14 = vcmp.lt.s32.totalorder %v6988_v36, 38 }
 0x413   : > { %vm12901_vm9 = vcmp.lt.s32.totalorder %v6988_v36, 39 }
 0x414   : > { %2082 = vmatpush.msrb.mxu3 %v1730_v23  ;;  %v12424_v23 = vunpack.i.h.bf16 %v8613_v11 }
 0x415   : > { %v8677_v16 = vpop.permute.xlu1 %5744  ;;  %v8756_v49 = vpop.permute.xlu2 %5789 }
 0x416   : > { %v8688_v50 = vpop.permute.xlu0 %5734  ;;  %2083 = vmatpush.msrb.mxu3 %v1714_v62  ;;  %v1682_v62 = vsel %vm12894_vm8, %v12421_v6, %v12422_v38  ;;  %v1666_v6 = vsel %vm12895_vm10, %v12424_v23, %v12425_v46  ;;  %v12896_v38 = vunpack.i.l.bf16 %v8654_v56  ;;  %v12898_v23 = vunpack.i.h.bf16 %v8642_v60 }
 0x417   : > { %v12423_v32 = vunpack.i.l.bf16 %v8688_v50  ;;  %vm12906_vm8 = vcmp.lt.s32.totalorder %v6988_v36, 40  ;;  %vm12909_vm10 = vcmp.lt.s32.totalorder %v6988_v36, 41 }
 0x418   : > { %2084 = vmatpush.msrb.mxu3 %v1698_v2  ;;  %v12426_v2 = vunpack.i.l.bf16 %v8535_v48 }
 0x419   : > { %v1796_v19 = vsel %vm438_vm1, %v5622_v37, %v12423_v32  ;;  %v1780_v37 = vsel %vm421_vm2, %v12897_v63, %v12896_v38  ;;  %v12902_v32 = vunpack.i.h.bf16 %v8570_v14  ;;  %v12904_v38 = vunpack.i.l.bf16 %v8545_v1 }
 0x41a   : > { %2085 = vmatpush.msrb.mxu3 %v1682_v62  ;;  %2117 = vmatpush.msra.mxu2 %v1796_v19  ;;  %v5571_v62 = vunpack.i.l.bf16 %v8559_v9  ;;  %v1650_v46 = vsel %vm12899_vm14, %v12898_v23, %v12426_v2  ;;  %v12903_v23 = vunpack.i.l.bf16 %v8570_v14  ;;  %vm12913_vm14 = vcmp.lt.s32.totalorder %v6988_v36, 42 }
 0x41c   : > { %2086 = vmatpush.msrb.mxu3 %v1666_v6  ;;  %2118 = vmatpush.msra.mxu2 %v1780_v37  ;;  %v12900_v37 = vunpack.i.h.bf16 %v8623_v18  ;;  %v1761_v2 = vsel %vm400_vm3, %v12903_v23, %v12902_v32  ;;  %v1745_v32 = vsel %vm383_vm4, %v5606_v12, %v12907_v30  ;;  %v12908_v6 = vunpack.i.h.bf16 %v8629_v8 }
 0x41d   : > { %v8731_v61 = vpop.permute.xlu1 %5759  ;;  %v12911_v30 = vunpack.i.l.bf16 %v8574_v21 }
 0x41e   : > { %v8740_v63 = vpop.permute.xlu0 %5749  ;;  %2087 = vmatpush.msrb.mxu3 %v1650_v46  ;;  %2119 = vmatpush.msra.mxu2 %v8457_v53  ;;  %v1634_v19 = vsel %vm12901_vm9, %v12900_v37, %v5571_v62  ;;  %v12431_v46 = vunpack.i.l.bf16 %v8530_v52  ;;  %v12905_v37 = vunpack.i.h.bf16 %v8606_v54  ;;  %v5791_v53 = vunpack.i.l.bf16 %v8756_v49 }
 0x41f   : > { %vm12916_vm9 = vcmp.lt.s32.totalorder %v6988_v36, 19 }
 0x420   : > { %2088 = vmatpush.msrb.mxu3 %v1634_v19  ;;  %2120 = vmatpush.msra.mxu2 %v1761_v2  ;;  %v1618_v51 = vsel %vm12906_vm8, %v12905_v37, %v12904_v38  ;;  %v12432_v2 = vunpack.i.l.bf16 %v8549_v40  ;;  %v12434_v19 = vunpack.i.h.bf16 %v8756_v49  ;;  %v1602_v38 = vsel %vm12909_vm10, %v12908_v6, %v12431_v46 }
 0x421   : > { %v12910_v37 = vunpack.i.h.bf16 %v8574_v21  ;;  %v12912_v6 = vunpack.i.h.bf16 %v8617_v55  ;;  %vm12919_vm8 = vcmp.lt.s32.totalorder %v6988_v36, 20  ;;  %vm12922_vm10 = vcmp.lt.s32.totalorder %v6988_v36, 21 }
 0x422   : > { %2089 = vmatpush.msrb.mxu3 %v1618_v51  ;;  %2121 = vmatpush.msra.mxu2 %v1745_v32  ;;  %v8789_v51 = vld [vmem:[%s12309_s1 + $0x20] sm:$0xff]  ;;  %v12921_v32 = vunpack.i.l.bf16 %v8568_v29 }
 0x423   : > { %v1729_v12 = vsel %vm366_vm5, %v12911_v30, %v12910_v37  ;;  %v1586_v46 = vsel %vm12913_vm14, %v12912_v6, %v12432_v2  ;;  %v12914_v37 = vunpack.i.h.bf16 %v8564_v7  ;;  %v1955_v6 = vsel %vm608_vm15, %v5791_v53, %v12434_v19 }
 0x424   : > { %2090 = vmatpush.msrb.mxu3 %v1602_v38  ;;  %2122 = vmatpush.msra.mxu2 %v1729_v12  ;;  %v12915_v38 = vunpack.i.l.bf16 %v8564_v7  ;;  %v12917_v2 = vunpack.i.h.bf16 %v8540_v20  ;;  %vm12925_vm14 = vcmp.lt.s32.totalorder %v6988_v36, 22 }
 0x425   : > { %v8792_v23 = vpop.permute.xlu1 %5774 }
 0x426   : > { %v1713_v30 = vsel %vm12916_vm9, %v12915_v38, %v12914_v37  ;;  %v8806_v12 = vpop.permute.xlu0 %5764  ;;  %2091 = vmatpush.msrb.mxu3 %v1586_v46  ;;  %v1697_v37 = vsel %vm12919_vm8, %v12918_v31, %v12917_v2  ;;  %v12442_v46 = vunpack.i.h.bf16 %v8535_v48  ;;  %v1665_v31 = vsel %vm12925_vm14, %v12924_v42, %v12923_v34 }
 0x427   : > { %2123 = vmatpush.msra.mxu2 %v1713_v30  ;;  %2092 = vmatmul.f32.vlgmr.msrb.gmra.mxu3 %v8789_v51  ;;  %v12920_v30 = vunpack.i.h.bf16 %v8568_v29  ;;  %vm12927_vm9 = vcmp.lt.s32.totalorder %v6988_v36, 38  ;;  %vm12929_vm8 = vcmp.lt.s32.totalorder %v6988_v36, 39  ;;  %v5667_v34 = vunpack.i.h.bf16 %v8578_v25 }
 0x428   : > { %2183 = vmatpush.msra.mxu3 %v1955_v6  ;;  %v5776_v55 = vunpack.i.l.bf16 %v8792_v23  ;;  %vm12936_vm14 = vcmp.lt.s32.totalorder %v6988_v36, 41 }
 0x429   : > { %2124 = vmatpush.msra.mxu2 %v1697_v37  ;;  %v1681_v19 = vsel %vm12922_vm10, %v12921_v32, %v12920_v30  ;;  %v12926_v32 = vunpack.i.l.bf16 %v8535_v48  ;;  %v12928_v30 = vunpack.i.h.bf16 %v8559_v9  ;;  %v5662_v9 = vunpack.i.h.bf16 %v8621_v35 }
 0x42a   : > { %vm12932_vm10 = vcmp.lt.s32.totalorder %v6988_v36, 40 }
 0x42b   : > { %2125 = vmatpush.msra.mxu2 %v1681_v19  ;;  %v1649_v19 = vsel %vm12927_vm9, %v12926_v32, %v12442_v46  ;;  %v1633_v42 = vsel %vm12929_vm8, %v5571_v62, %v12928_v30  ;;  %v5657_v62 = vunpack.i.h.bf16 %v8611_v41  ;;  %vm12941_vm9 = vcmp.lt.s32.totalorder %v6988_v36, 42 }
 0x42c   : > { %vm12945_vm8 = vcmp.lt.s32.totalorder %v6988_v36, 90 }
 0x42d   : > { %2126 = vmatpush.msra.mxu2 %v1665_v31  ;;  %v5785_v38 = vpop.permute.xlu1 %5784  ;;  %v12930_v31 = vunpack.i.h.bf16 %v8545_v1 }
 0x42e   : > { %v5787_v2 = vunpack.i.h.bf16 %v5785_v38  ;;  %v5786_v6 = vunpack.i.l.bf16 %v5785_v38  ;;  %v8849_v37 = vpop.permute.xlu0 %5779 }
 0x42f   : > { %2127 = vmatpush.msra.mxu2 %v1649_v19  ;;  %v5782_v32 = vunpack.i.h.bf16 %v8849_v37  ;;  %v5781_v46 = vunpack.i.l.bf16 %v8849_v37  ;;  %v12931_v37 = vunpack.i.l.bf16 %v8545_v1  ;;  %v12935_v1 = vunpack.i.l.bf16 %v8530_v52 }
 0x430   : > { %v1957_v30 = vsel %vm608_vm15, %v5786_v6, %v5787_v2  ;;  %v1956_v38 = vsel %vm608_vm15, %v5787_v2, %v5791_v53  ;;  %v12447_v53 = vunpack.i.l.bf16 %v8611_v41  ;;  %v12933_v2 = vunpack.i.l.bf16 %v8578_v25 }
 0x431   : > { %2128 = vmatpush.msra.mxu2 %v1633_v42  ;;  %2103 = vmatpush.msra.mxu1 %v1957_v30  ;;  %v1617_v8 = vsel %vm12932_vm10, %v12931_v37, %v12930_v31  ;;  %v1939_v42 = vsel %vm591_vm13, %v5781_v46, %v5782_v32  ;;  %v1940_v19 = vsel %vm591_vm13, %v5667_v34, %v5781_v46  ;;  %v5652_v31 = vunpack.i.h.bf16 %v8572_v44  ;;  %vm12947_vm10 = vmmov %vm12945_vm8 }
 0x432   : > { %2143 = vmatpush.msrb.mxu0 %v1956_v38  ;;  %2184 = vmatpush.msra.mxu3 %v1939_v42  ;;  %v1941_v30 = vsel %vm591_vm13, %v12933_v2, %v5667_v34  ;;  %v12934_v37 = vunpack.i.h.bf16 %v8530_v52  ;;  %v12937_v42 = vunpack.i.h.bf16 %v8792_v23  ;;  %v5766_v34 = vunpack.i.l.bf16 %v8806_v12 }
 0x433   : > { %2129 = vmatpush.msra.mxu2 %v1617_v8  ;;  %2104 = vmatpush.msra.mxu1 %v1941_v30  ;;  %v12938_v30 = vunpack.i.l.bf16 %v8621_v35 }
 0x434   : > { %v1601_v8 = vsel %vm12936_vm14, %v12935_v1, %v12934_v37  ;;  %2144 = vmatpush.msrb.mxu0 %v1940_v19  ;;  %v1923_v2 = vsel %vm574_vm12, %v5776_v55, %v12937_v42  ;;  %v1924_v1 = vsel %vm574_vm12, %v5662_v9, %v5776_v55  ;;  %v5647_v19 = vunpack.i.h.bf16 %v8615_v58  ;;  %vm12949_vm14 = vmmov %vm12945_vm8 }
 0x435   : > { %2130 = vmatpush.msra.mxu2 %v1601_v8  ;;  %2185 = vmatpush.msra.mxu3 %v1923_v2  ;;  %v1925_v38 = vsel %vm574_vm12, %v12938_v30, %v5662_v9  ;;  %v12939_v37 = vunpack.i.h.bf16 %v8549_v40  ;;  %v12940_v42 = vunpack.i.l.bf16 %v8549_v40  ;;  %v12942_v8 = vunpack.i.h.bf16 %v8686_v13 }
 0x436   : > { %2105 = vmatpush.msra.mxu1 %v1925_v38  ;;  %2145 = vmatpush.msrb.mxu0 %v1924_v1  ;;  %v5762_v9 = vunpack.i.h.bf16 %v8731_v61  ;;  %v5761_v55 = vunpack.i.l.bf16 %v8731_v61  ;;  %v1909_v38 = vsel %vm557_vm11, %v12447_v53, %v5657_v62  ;;  %v5642_v1 = vunpack.i.h.bf16 %v8604_v5 }
 0x437   : > { %v1585_v46 = vsel %vm12941_vm9, %v12940_v42, %v12939_v37  ;;  %v1907_v2 = vsel %vm557_vm11, %v5771_v45, %v12942_v8  ;;  %v12943_v37 = vunpack.i.h.bf16 %v8756_v49  ;;  %v1908_v61 = vsel %vm557_vm11, %v5657_v62, %v5771_v45 }
 0x438   : > { %2131 = vmatpush.msra.mxu2 %v1585_v46  ;;  %2186 = vmatpush.msra.mxu3 %v1907_v2  ;;  %v12944_v46 = vunpack.i.l.bf16 %v8572_v44  ;;  %v5641_v2 = vunpack.i.l.bf16 %v8604_v5  ;;  %v5757_v53 = vunpack.i.h.bf16 %v8652_v28  ;;  %v5756_v30 = vunpack.i.l.bf16 %v8652_v28 }
 0x439   : > { %2132 = vmatmul.f32.vlgmr.msra.gmra.mxu2 %v8789_v51  ;;  %v1958_v42 = vsel %vm608_vm15, %v12943_v37, %v5786_v6  ;;  %2106 = vmatpush.msra.mxu1 %v1909_v38  ;;  %v12946_v49 = vunpack.i.h.bf16 %v8806_v12  ;;  %v5637_v45 = vunpack.i.h.bf16 %v8566_v57  ;;  %v5636_v62 = vunpack.i.l.bf16 %v8566_v57 }
 0x43a   : > { %v1893_v8 = vsel %vm12945_vm8, %v12944_v46, %v5652_v31  ;;  %2223 = vmatpush.msrb.mxu2 %v1958_v42  ;;  %2146 = vmatpush.msrb.mxu0 %v1908_v61  ;;  %v12948_v38 = vunpack.i.l.bf16 %v8578_v25  ;;  %v1892_v28 = vsel %vm12949_vm14, %v5652_v31, %v5766_v34  ;;  %v5752_v42 = vunpack.i.h.bf16 %v8740_v63 }
 0x43b   : > { %v1891_v6 = vsel %vm12947_vm10, %v5766_v34, %v12946_v49  ;;  %2107 = vmatpush.msra.mxu1 %v1893_v8  ;;  %v5751_v61 = vunpack.i.l.bf16 %v8740_v63  ;;  %vm12950_vm9 = vcmp.lt.s32.totalorder %v6988_v36, 106  ;;  %v12951_v49 = vunpack.i.l.bf16 %v8615_v58 }
 0x43c   : > { %2187 = vmatpush.msra.mxu3 %v1891_v6  ;;  %v1942_v37 = vsel %vm591_vm13, %v5782_v32, %v12948_v38  ;;  %2147 = vmatpush.msrb.mxu0 %v1892_v28  ;;  %v1875_v46 = vsel %vm12950_vm9, %v5761_v55, %v5762_v9  ;;  %vm12952_vm8 = vmmov %vm12950_vm9  ;;  %v5632_v32 = vunpack.i.h.bf16 %v8608_v4  ;;  %v5631_v8 = vunpack.i.l.bf16 %v8608_v4 }
 0x43d   : > { %2224 = vmatpush.msrb.mxu2 %v1942_v37  ;;  %v1877_v25 = vsel %vm12952_vm8, %v12951_v49, %v5647_v19  ;;  %v12953_v31 = vunpack.i.l.bf16 %v8621_v35  ;;  %v12954_v34 = vunpack.i.h.bf16 %v8792_v23  ;;  %vm12955_vm10 = vmmov %vm12952_vm8  ;;  %v5747_v38 = vunpack.i.h.bf16 %v8677_v16 }
 0x43e   : > { %2188 = vmatpush.msra.mxu3 %v1875_v46  ;;  %2108 = vmatpush.msra.mxu1 %v1877_v25  ;;  %v1876_v6 = vsel %vm12955_vm10, %v5647_v19, %v5761_v55  ;;  %v5746_v37 = vunpack.i.l.bf16 %v8677_v16  ;;  %vm12956_vm14 = vcmp.lt.s32.totalorder %v6988_v36, 107  ;;  %v12958_v23 = vunpack.i.l.bf16 %v8611_v41 }
 0x43f   : > { %v1926_v63 = vsel %vm574_vm12, %v12954_v34, %v12953_v31  ;;  %2148 = vmatpush.msrb.mxu0 %v1876_v6  ;;  %v1859_v4 = vsel %vm12956_vm14, %v5756_v30, %v5757_v53  ;;  %vm12957_vm9 = vmmov %vm12956_vm14  ;;  %v12959_v28 = vunpack.i.h.bf16 %v8686_v13  ;;  %v1843_v55 = vsel %vm489_vm7, %v5751_v61, %v5752_v42 }
 0x440   : > { %2225 = vmatpush.msrb.mxu2 %v1926_v63  ;;  %v1861_v35 = vsel %vm12957_vm9, %v5641_v2, %v5642_v1  ;;  %2189 = vmatpush.msra.mxu3 %v1859_v4  ;;  %vm12960_vm8 = vmmov %vm12957_vm9  ;;  %v1845_v46 = vsel %vm489_vm7, %v5636_v62, %v5637_v45  ;;  %v5742_v41 = vunpack.i.h.bf16 %v8639_v47  ;;  %v12961_v13 = vunpack.i.l.bf16 %v8572_v44  ;;  %v5000_v44 = vld [vmem:[%s12309_s1 + $0x28] sm:$0xff] }
 0x441   : > { %v1910_v19 = vsel %vm557_vm11, %v12959_v28, %v12958_v23  ;;  %2109 = vmatpush.msra.mxu1 %v1861_v35  ;;  %v1860_v16 = vsel %vm12960_vm8, %v5642_v1, %v5756_v30  ;;  %v12962_v49 = vunpack.i.h.bf16 %v8806_v12  ;;  %vm12963_vm10 = vcmp.lt.s32.totalorder %v6988_v36, 90 }
 0x442   : > { %2226 = vmatpush.msrb.mxu2 %v1910_v19  ;;  %2149 = vmatpush.msrb.mxu0 %v1860_v16  ;;  %v1844_v1 = vsel %vm489_vm7, %v5637_v45, %v5751_v61  ;;  %vm12964_vm14 = vcmp.lt.s32.totalorder %v6988_v36, 109  ;;  %v5737_v12 = vunpack.i.h.bf16 %v8688_v50  ;;  %v12966_v34 = vunpack.i.l.bf16 %v8615_v58 }
 0x443   : > { %2190 = vmatpush.msra.mxu3 %v1843_v55  ;;  %v1894_v30 = vsel %vm12963_vm10, %v12962_v49, %v12961_v13  ;;  %2110 = vmatpush.msra.mxu1 %v1845_v46  ;;  %v1827_v25 = vsel %vm12964_vm14, %v5746_v37, %v5747_v38  ;;  %vm12965_vm9 = vmmov %vm12964_vm14  ;;  %vm12967_vm8 = vcmp.lt.s32.totalorder %v6988_v36, 106  ;;  %v5732_v63 = vunpack.i.h.bf16 %v8654_v56 }
 0x444   : > { %2227 = vmatpush.msrb.mxu2 %v1894_v30  ;;  %2150 = vmatpush.msrb.mxu0 %v1844_v1  ;;  %v1829_v31 = vsel %vm12965_vm9, %v5631_v8, %v5632_v32  ;;  %v1878_v45 = vsel %vm12967_vm8, %v5762_v9, %v12966_v34  ;;  %vm12968_vm10 = vmmov %vm12965_vm9  ;;  %v12969_v6 = vunpack.i.l.bf16 %v8639_v47  ;;  %v12970_v4 = vunpack.i.l.bf16 %v8576_v26 }
 0x445   : > { %2191 = vmatpush.msra.mxu3 %v1827_v25  ;;  %2111 = vmatpush.msra.mxu1 %v1829_v31  ;;  %v1828_v61 = vsel %vm12968_vm10, %v5632_v32, %v5746_v37  ;;  %vm12971_vm14 = vcmp.lt.s32.totalorder %v6988_v36, 107  ;;  %v12972_v37 = vunpack.i.l.bf16 %v8688_v50  ;;  %v12973_v35 = vunpack.i.l.bf16 %v8557_v43 }
 0x446   : > { %2228 = vmatpush.msrb.mxu2 %v1878_v45  ;;  %2151 = vmatpush.msrb.mxu0 %v1828_v61  ;;  %v1811_v58 = vsel %vm455_vm0, %v12969_v6, %v5742_v41  ;;  %v1814_v9 = vsel %vm455_vm0, %v5742_v41, %v12970_v4  ;;  %v1862_v32 = vsel %vm12971_vm14, %v5757_v53, %v5641_v2  ;;  %v5726_v53 = vunpack.i.l.bf16 %v8625_v15 }
 0x447   : > { %5002 = vmatmul.msk.f32.vlgmr.msra.gmra.mxu1 %vm725_vm6, %v5000_v44  ;;  %5003 = vmatmul.msk.f32.vlgmr.msrb.gmra.mxu0 %vm725_vm6, %v5000_v44  ;;  %v1795_v47 = vsel %vm438_vm1, %v12972_v37, %v5737_v12  ;;  %v1798_v26 = vsel %vm438_vm1, %v5737_v12, %v12973_v35  ;;  %v1846_v5 = vsel %vm489_vm7, %v5752_v42, %v5636_v62  ;;  %v12974_v50 = vunpack.i.l.bf16 %v8654_v56 }
 0x448   : > { %2156 = vmatpush.msrb.mxu1 %v1811_v58  ;;  %2196 = vmatpush.msra.mxu0 %v1814_v9  ;;  %v12975_v2 = vunpack.i.l.bf16 %v8584_v10  ;;  %v1830_v57 = vsel %vm12965_vm9, %v5747_v38, %v5631_v8  ;;  %v5721_v62 = vunpack.i.l.bf16 %v8656_v17  ;;  %v5716_v56 = vunpack.i.l.bf16 %v8648_v39  ;;  %v13003_v9 = vld [vmem:[#allocation12_spill] sm:$0xff] }
 0x449   : > { %2229 = vmatpush.msrb.mxu2 %v1862_v32  ;;  %5004 = vmatmul.msk.f32.vlgmr.msra.gmra.mxu3 %vm725_vm6, %v5000_v44  ;;  %v1779_v43 = vsel %vm421_vm2, %v12974_v50, %v5732_v63  ;;  %v12976_v42 = vunpack.i.h.bf16 %v8570_v14  ;;  %v12977_v28 = vunpack.i.h.bf16 %v8625_v15  ;;  %v12979_v14 = vunpack.i.h.bf16 %v8656_v17 }
 0x44a   : > { %2157 = vmatpush.msrb.mxu1 %v1795_v47  ;;  %2197 = vmatpush.msra.mxu0 %v1798_v26  ;;  %v1782_v23 = vsel %vm421_vm2, %v5732_v63, %v12975_v2  ;;  %v5706_v15 = vunpack.i.l.bf16 %v8650_v3  ;;  %v12980_v16 = vunpack.i.h.bf16 %v8574_v21  ;;  %v12981_v46 = vunpack.i.h.bf16 %v8648_v39  ;;  %v13009_v26 = vld [vmem:[#allocation11_spill] sm:$0xff] }
 0x44b   : > { %2230 = vmatpush.msrb.mxu2 %v1846_v5  ;;  %v1760_v10 = vsel %vm400_vm3, %v12976_v42, %v5726_v53  ;;  %v1759_v19 = vsel %vm400_vm3, %v5726_v53, %v12977_v28  ;;  %v1743_v38 = vsel %vm383_vm4, %v5721_v62, %v12979_v14  ;;  %v5701_v17 = vunpack.i.l.bf16 %v8637_v59  ;;  %v2071_v28 = vpop.permute.xlu0 %2070 }
 0x44c   : > { %2158 = vmatpush.msrb.mxu1 %v1779_v43  ;;  %2198 = vmatpush.msra.mxu0 %v1782_v23  ;;  %v1728_v55 = vsel %vm366_vm5, %v12980_v16, %v5716_v56  ;;  %v12982_v41 = vunpack.i.h.bf16 %v8564_v7  ;;  %vm12983_vm8 = vcmp.lt.s32.totalorder %v6988_v36, 19  ;;  %v12984_v49 = vunpack.i.h.bf16 %v8619_v22  ;;  %v13023_v16 = vld [vmem:[#allocation6_spill] sm:$0xff] }
 0x44d   : > { %2231 = vmatpush.msrb.mxu2 %v1830_v57  ;;  %vm12985_vm10 = vmmov %vm12983_vm8  ;;  %v5696_v39 = vunpack.i.l.bf16 %v8613_v11  ;;  %v12986_v30 = vunpack.i.h.bf16 %v8540_v20  ;;  %vm12987_vm14 = vcmp.lt.s32.totalorder %v6988_v36, 20  ;;  %v12988_v25 = vunpack.i.h.bf16 %v8650_v3 }
 0x44e   : > { %2159 = vmatpush.msrb.mxu1 %v8506_v0  ;;  %2199 = vmatpush.msra.mxu0 %v8509_v27  ;;  %v5711_v0 = vunpack.i.l.bf16 %v8619_v22  ;;  %v12978_v27 = vunpack.i.h.bf16 %v8547_v33  ;;  %v1727_v33 = vsel %vm366_vm5, %v5716_v56, %v12981_v46  ;;  %vm12989_vm9 = vmmov %vm12987_vm14  ;;  %v5691_v22 = vunpack.i.l.bf16 %v8642_v60  ;;  %v13024_v46 = vld [vmem:[#allocation5_spill] sm:$0xff] }
 0x44f   : > { %5005 = vmatmul.msk.f32.vlgmr.msrb.gmra.mxu2 %vm725_vm6, %v5000_v44  ;;  %v1696_v1 = vsel %vm12987_vm14, %v12986_v30, %v5706_v15  ;;  %v1695_v7 = vsel %vm12989_vm9, %v5706_v15, %v12988_v25  ;;  %v12990_v31 = vunpack.i.h.bf16 %v8568_v29  ;;  %v12992_v12 = vunpack.i.h.bf16 %v8637_v59 }
 0x450   : > { %2160 = vmatpush.msrb.mxu1 %v1760_v10  ;;  %2200 = vmatpush.msra.mxu0 %v1759_v19  ;;  %v1744_v8 = vsel %vm383_vm4, %v12978_v27, %v5721_v62  ;;  %v1712_v13 = vsel %vm12983_vm8, %v12982_v41, %v5711_v0  ;;  %v1711_v21 = vsel %vm12985_vm10, %v5711_v0, %v12984_v49  ;;  %vm12991_vm8 = vcmp.lt.s32.totalorder %v6988_v36, 21 }
 0x451   : > { %v1680_v44 = vsel %vm12991_vm8, %v12990_v31, %v5701_v17  ;;  %vm12993_vm10 = vmmov %vm12991_vm8  ;;  %v5686_v3 = vunpack.i.l.bf16 %v8623_v18  ;;  %v12994_v34 = vunpack.i.h.bf16 %v8555_v24  ;;  %vm12995_vm14 = vcmp.lt.s32.totalorder %v6988_v36, 22 }
 0x452   : > { %2161 = vmatpush.msrb.mxu1 %v1744_v8  ;;  %2201 = vmatpush.msra.mxu0 %v1743_v38  ;;  %v1679_v20 = vsel %vm12993_vm10, %v5701_v17, %v12992_v12  ;;  %v12996_v61 = vunpack.i.h.bf16 %v8613_v11  ;;  %vm12997_vm9 = vmmov %vm12995_vm14  ;;  %v5681_v59 = vunpack.i.l.bf16 %v8606_v54  ;;  %v12998_v63 = vunpack.i.h.bf16 %v8535_v48  ;;  %v13002_v11 = vld [vmem:[#allocation14_spill] sm:$0xff]  ;;  %v13022_v38 = vld [vmem:[#allocation4_spill] sm:$0xff] }
 0x453   : > { %v1664_v45 = vsel %vm12995_vm14, %v12994_v34, %v5696_v39  ;;  %vm12999_vm8 = vcmp.lt.s32.totalorder %v6988_v36, 38  ;;  %v13000_v58 = vunpack.i.h.bf16 %v8642_v60  ;;  %v5676_v4 = vunpack.i.l.bf16 %v13002_v11  ;;  %v13008_v60 = vld [vmem:[#allocation13_spill] sm:$0xff]  ;;  %v13026_v17 = vld [vmem:[#allocation3_spill] sm:$0xff]  ;;  %v13034_v34 = vld [vmem:[#allocation8_spill] sm:$0xff] }
 0x454   : > { %2162 = vmatpush.msrb.mxu1 %v1728_v55  ;;  %2202 = vmatpush.msra.mxu0 %v1727_v33  ;;  %v1663_v29 = vsel %vm12997_vm9, %v5696_v39, %v12996_v61  ;;  %v1648_v6 = vsel %vm12999_vm8, %v12998_v63, %v5691_v22  ;;  %vm13001_vm10 = vmmov %vm12999_vm8  ;;  %v13004_v32 = vunpack.i.h.bf16 %v13003_v9  ;;  %vm13005_vm14 = vcmp.lt.s32.totalorder %v6988_v36, 39 }
 0x455   : > { %v1647_v24 = vsel %vm13001_vm10, %v5691_v22, %v13000_v58  ;;  %v13006_v47 = vunpack.i.h.bf16 %v8623_v18  ;;  %vm13007_vm9 = vmmov %vm13005_vm14  ;;  %v5671_v35 = vunpack.i.l.bf16 %v13008_v60  ;;  %v13010_v5 = vunpack.i.h.bf16 %v13009_v26  ;;  %v13028_v22 = vld [vmem:[#allocation9_spill] sm:$0xff] }
 0x456   : > { %2163 = vmatpush.msrb.mxu1 %v1712_v13  ;;  %2203 = vmatpush.msra.mxu0 %v1711_v21  ;;  %v1632_v37 = vsel %vm13005_vm14, %v13004_v32, %v5686_v3  ;;  %vm13011_vm8 = vcmp.lt.s32.totalorder %v6988_v36, 40  ;;  %v13012_v50 = vunpack.i.h.bf16 %v8606_v54  ;;  %v13014_v18 = vunpack.i.h.bf16 %v8530_v52 }
 0x457   : > { %v1631_v48 = vsel %vm13007_vm9, %v5686_v3, %v13006_v47  ;;  %v1616_v53 = vsel %vm13011_vm8, %v13010_v5, %v5681_v59  ;;  %vm13013_vm10 = vmmov %vm13011_vm8  ;;  %vm13015_vm14 = vcmp.lt.s32.totalorder %v6988_v36, 41  ;;  %v13016_v23 = vunpack.i.h.bf16 %v13002_v11 }
 0x458   : > { %2164 = vmatpush.msrb.mxu1 %v1696_v1  ;;  %2204 = vmatpush.msra.mxu0 %v1695_v7  ;;  %v1615_v43 = vsel %vm13013_vm10, %v5681_v59, %v13012_v50  ;;  %v1600_v2 = vsel %vm13015_vm14, %v13014_v18, %v5676_v4  ;;  %vm13017_vm9 = vmmov %vm13015_vm14  ;;  %v13018_v62 = vunpack.i.h.bf16 %v8549_v40  ;;  %vm13019_vm8 = vcmp.lt.s32.totalorder %v6988_v36, 42 }
 0x459   : > { %v1599_v57 = vsel %vm13017_vm9, %v5676_v4, %v13016_v23  ;;  %v13020_v56 = vunpack.i.h.bf16 %v13008_v60  ;;  %vm13021_vm10 = vmmov %vm13019_vm8  ;;  %vm13036_vm14 = vcmp.lt.s32.totalorder %v6988_v36, 19  ;;  %vm13037_vm9 = vcmp.lt.s32.totalorder %v6988_v36, 20 }
 0x45a   : > { %2165 = vmatpush.msrb.mxu1 %v1680_v44  ;;  %2205 = vmatpush.msra.mxu0 %v1679_v20  ;;  %v1584_v54 = vsel %vm13019_vm8, %v13018_v62, %v5671_v35  ;;  %v13029_v44 = vld [vmem:[#allocation10_spill] sm:$0xff]  ;;  %v13032_v20 = vld [vmem:[#allocation7_spill] sm:$0xff]  ;;  %vm13041_vm8 = vcmp.lt.s32.totalorder %v6988_v36, 21 }
 0x45b   : > { %v1583_v52 = vsel %vm13021_vm10, %v5671_v35, %v13020_v56  ;;  %vm13047_vm10 = vcmp.lt.s32.totalorder %v6988_v36, 22 }
 0x45c   : > { %2166 = vmatpush.msrb.mxu1 %v1664_v45  ;;  %2206 = vmatpush.msra.mxu0 %v1663_v29 }
 0x45e   : > { %2167 = vmatpush.msrb.mxu1 %v1648_v6  ;;  %2207 = vmatpush.msra.mxu0 %v1647_v24 }
 0x460   : > { %2168 = vmatpush.msrb.mxu1 %v1632_v37  ;;  %2208 = vmatpush.msra.mxu0 %v1631_v48 }
 0x462   : > { %2169 = vmatpush.msrb.mxu1 %v1616_v53  ;;  %2209 = vmatpush.msra.mxu0 %v1615_v43 }
 0x464   : > { %2170 = vmatpush.msrb.mxu1 %v1600_v2  ;;  %2210 = vmatpush.msra.mxu0 %v1599_v57 }
 0x466   : > { %2171 = vmatpush.msrb.mxu1 %v1584_v54  ;;  %2211 = vmatpush.msra.mxu0 %v1583_v52 }
 0x467   : > { %2172 = vmatmul.f32.vlgmr.msrb.gmra.mxu1 %v8789_v51  ;;  %2212 = vmatmul.f32.vlgmr.msra.gmra.mxu0 %v8789_v51 }
 0x4aa   : > { %v2093_v42 = vpop.f32.mrf.mxu3 }
 0x4ab   : > { %v2094_v19 = vadd.f32 %v2093_v42, %v2071_v28 }
 0x4bc   : > { %v2133_v10 = vpop.f32.mrf.mxu2 }
 0x4bd   : > { %v2134_v0 = vadd.f32 %v2133_v10, %v2071_v28 }
 0x4c4   : > { %v2113_v40 = vpop.f32.mrf.mxu1  ;;  %v2153_v27 = vpop.f32.mrf.mxu0 }
 0x4c5   : > { %v2114_v8 = vadd.f32 %v2113_v40, %v2094_v19  ;;  %v2154_v14 = vadd.f32 %v2153_v27, %v2134_v0 }
 0x4c7   : > { %v2236_v15 = vadd.f32 %v2114_v8, %v13022_v38  ;;  %v2237_v55 = vadd.f32 %v2154_v14, %v13023_v16 }
 0x4c9   : > { %v9161_v33 = vmul.f32 %v2236_v15, %v13024_v46  ;;  %v9164_v41 = vmul.f32 %v2237_v55, %v13026_v17 }
 0x4cb   : > { %13025 = vst [vmem:[#allocation14_spill] sm:$0xff] %v9161_v33  ;;  %v9168_v51 = vpack.i.bf16 %v9164_v41, %v9161_v33 }
 0x4cc   : > { %13027 = vst [vmem:[#allocation12_spill] sm:$0xff] %v9164_v41  ;;  %v2193_v30 = vpop.f32.mrf.mxu3 }
 0x4cd   : > { %5804 = vrot.lane.b32.xlu2 %v9168_v51, %s6754_s23  ;;  %5799 = vrot.lane.b32.xlu0 %v9168_v51, %s6752_s21 }
 0x4ce   : > { %5794 = vrot.lane.b32.xlu1 %v9168_v51, %s6753_s22 }
 0x4d2   : > { %v2233_v1 = vpop.f32.mrf.mxu2 }
 0x4d5   : > { %5819 = vrot.lane.b32.xlu2 %v9168_v51, %s6757_s26  ;;  %5814 = vrot.lane.b32.xlu0 %v9168_v51, %s6756_s25 }
 0x4d6   : > { %5809 = vrot.lane.b32.xlu1 %v9168_v51, %s6755_s24 }
 0x4dd   : > { %5834 = vrot.lane.b32.xlu2 %v9168_v51, %s6760_s29  ;;  %5829 = vrot.lane.b32.xlu0 %v9168_v51, %s12535_s28 }
 0x4de   : > { %5824 = vrot.lane.b32.xlu1 %v9168_v51, %s6758_s27 }
 0x4e4   : > { %v2173_v13 = vpop.f32.mrf.mxu1  ;;  %v2213_v49 = vpop.f32.mrf.mxu0 }
 0x4e5   : > { %5849 = vrot.lane.b32.xlu2 %v9168_v51, %s6763_s6  ;;  %5844 = vrot.lane.b32.xlu0 %v9168_v51, %s12537_s5  ;;  %v2174_v21 = vadd.f32 %v2173_v13, %v2071_v28  ;;  %v2214_v39 = vadd.f32 %v2213_v49, %v2071_v28 }
 0x4e6   : > { %5839 = vrot.lane.b32.xlu1 %v9168_v51, %s6761_s30 }
 0x4e7   : > { %v2194_v25 = vadd.f32 %v2193_v30, %v2174_v21  ;;  %v2234_v7 = vadd.f32 %v2233_v1, %v2214_v39 }
 0x4e9   : > { %v2238_v31 = vadd.f32 %v2194_v25, %v13028_v22  ;;  %v2239_v12 = vadd.f32 %v2234_v7, %v13029_v44 }
 0x4eb   : > { %v9215_v3 = vmul.f32 %v2238_v31, %v13032_v20  ;;  %v9218_v45 = vmul.f32 %v2239_v12, %v13034_v34 }
 0x4ed   : > { %5864 = vrot.lane.b32.xlu2 %v9168_v51, %s6766_s9  ;;  %5859 = vrot.lane.b32.xlu0 %v9168_v51, %s12484_s8  ;;  %13033 = vst [vmem:[#allocation13_spill] sm:$0xff] %v9215_v3  ;;  %v5908_v61 = vpack.i.bf16 %v9218_v45, %v9215_v3 }
 0x4ee   : > { %5854 = vrot.lane.b32.xlu1 %v9168_v51, %s6764_s7  ;;  %13035 = vst [vmem:[#allocation11_spill] sm:$0xff] %v9218_v45 }
 0x4f5   : > { %5879 = vrot.lane.b32.xlu2 %v9168_v51, %s12482_s12  ;;  %5874 = vrot.lane.b32.xlu0 %v9168_v51, %s12473_s11 }
 0x4f6   : > { %5869 = vrot.lane.b32.xlu1 %v9168_v51, %s12471_s10 }
 0x4fd   : > { %5894 = vrot.lane.b32.xlu2 %v9168_v51, %s13030_s14  ;;  %5889 = vrot.lane.b32.xlu0 %v9168_v51, %s13031_s18 }
 0x4fe   : > { %5884 = vrot.lane.b32.xlu1 %v9168_v51, %s12886_s13 }
 0x505   : > { %5909 = vrot.lane.b32.xlu2 %v5908_v61, %s6753_s22  ;;  %5904 = vrot.lane.b32.xlu0 %v9168_v51, %s12699_s17 }
 0x506   : > { %5899 = vrot.lane.b32.xlu1 %v9168_v51, %s12887_s19 }
 0x50d   : > { %5924 = vrot.lane.b32.xlu2 %v5908_v61, %s6755_s24  ;;  %5919 = vrot.lane.b32.xlu0 %v5908_v61, %s6754_s23 }
 0x50e   : > { %5914 = vrot.lane.b32.xlu1 %v5908_v61, %s6752_s21 }
 0x515   : > { %5939 = vrot.lane.b32.xlu2 %v5908_v61, %s6758_s27  ;;  %5934 = vrot.lane.b32.xlu0 %v5908_v61, %s6757_s26 }
 0x516   : > { %5929 = vrot.lane.b32.xlu1 %v5908_v61, %s6756_s25 }
 0x51d   : > { %5954 = vrot.lane.b32.xlu2 %v5908_v61, %s6761_s30  ;;  %5949 = vrot.lane.b32.xlu0 %v5908_v61, %s6760_s29 }
 0x51e   : > { %5944 = vrot.lane.b32.xlu1 %v5908_v61, %s12535_s28 }
 0x525   : > { %5969 = vrot.lane.b32.xlu2 %v5908_v61, %s6764_s7  ;;  %5964 = vrot.lane.b32.xlu0 %v5908_v61, %s6763_s6 }
 0x526   : > { %5959 = vrot.lane.b32.xlu1 %v5908_v61, %s12537_s5 }
 0x527   : > { %v9239_v29 = vpop.permute.xlu2 %5804 }
 0x52d   : > { %5984 = vrot.lane.b32.xlu2 %v5908_v61, %s12471_s10  ;;  %5979 = vrot.lane.b32.xlu0 %v5908_v61, %s6766_s9  ;;  %s13210_s10 = smov 108  }
 0x52e   : > { %5974 = vrot.lane.b32.xlu1 %v5908_v61, %s12484_s8 }
 0x52f   : > { %v9244_v59 = vpop.permute.xlu2 %5819 }
 0x535   : > { %5999 = vrot.lane.b32.xlu2 %v5908_v61, %s12886_s13  ;;  %5994 = vrot.lane.b32.xlu0 %v5908_v61, %s12482_s12 }
 0x536   : > { %5989 = vrot.lane.b32.xlu1 %v5908_v61, %s12473_s11  ;;  %s13211_s11 = smov 109  }
 0x537   : > { %v9249_v63 = vpop.permute.xlu2 %5834 }
 0x53d   : > { %6014 = vrot.lane.b32.xlu2 %v5908_v61, %s12887_s19  ;;  %6009 = vrot.lane.b32.xlu0 %v5908_v61, %s13030_s14 }
 0x53e   : > { %6004 = vrot.lane.b32.xlu1 %v5908_v61, %s13031_s18 }
 0x53f   : > { %v9254_v6 = vpop.permute.xlu2 %5849  ;;  %v9256_v58 = vpop.permute.xlu0 %5799 }
 0x540   : > { %v9258_v24 = vpop.permute.xlu1 %5794  ;;  %v12454_v1 = vunpack.i.l.bf16 %v9254_v6 }
 0x545   : > { %6024 = vrot.lane.b32.xlu2 %v9168_v51, %s12700_s20  ;;  %6029 = vrot.lane.b32.xlu0 %v5908_v61, %s12700_s20 }
 0x546   : > { %6019 = vrot.lane.b32.xlu1 %v5908_v61, %s12699_s17 }
 0x547   : > { %v9264_v11 = vpop.permute.xlu2 %5864  ;;  %v9266_v4 = vpop.permute.xlu0 %5814 }
 0x548   : > { %v12459_v9 = vunpack.i.h.bf16 %v9264_v11  ;;  %v12451_v32 = vunpack.i.l.bf16 %v9264_v11  ;;  %v9270_v37 = vpop.permute.xlu1 %5809  ;;  %v13102_v45 = vunpack.i.h.bf16 %v9266_v4 }
 0x54a   : > { %v2482_v47 = vsel %vm455_vm0, %v12451_v32, %v12459_v9 }
 0x54b   : > { %2745 = vmatpush.msrb.mxu3 %v2482_v47 }
 0x54f   : > { %v9278_v48 = vpop.permute.xlu2 %5879  ;;  %v9280_v60 = vpop.permute.xlu0 %5829 }
 0x550   : > { %v9282_v35 = vpop.permute.xlu1 %5824 }
 0x557   : > { %v9284_v26 = vpop.permute.xlu2 %5894  ;;  %v9286_v5 = vpop.permute.xlu0 %5844 }
 0x558   : > { %v9288_v53 = vpop.permute.xlu1 %5839  ;;  %v12453_v31 = vunpack.i.l.bf16 %v9286_v5 }
 0x559   : > { %v12458_v61 = vunpack.i.l.bf16 %v9288_v53 }
 0x55f   : > { %v9290_v50 = vpop.permute.xlu2 %5909  ;;  %v9292_v43 = vpop.permute.xlu0 %5859 }
 0x560   : > { %v12456_v18 = vunpack.i.h.bf16 %v9292_v43  ;;  %v12450_v2 = vunpack.i.l.bf16 %v9292_v43  ;;  %v9296_v23 = vpop.permute.xlu1 %5854 }
 0x561   : > { %v12455_v57 = vunpack.i.h.bf16 %v9296_v23  ;;  %v12448_v62 = vunpack.i.l.bf16 %v9296_v23 }
 0x562   : > { %v2466_v54 = vsel %vm438_vm1, %v12450_v2, %v12456_v18  ;;  %v13045_v2 = vunpack.i.h.bf16 %v9292_v43 }
 0x563   : > { %2746 = vmatpush.msrb.mxu3 %v2466_v54  ;;  %v2450_v56 = vsel %vm421_vm2, %v12448_v62, %v12455_v57 }
 0x565   : > { %2747 = vmatpush.msrb.mxu3 %v2450_v56  ;;  %v12461_v56 = vunpack.i.l.bf16 %v9249_v63 }
 0x567   : > { %v9312_v52 = vpop.permute.xlu2 %5924  ;;  %v9314_v42 = vpop.permute.xlu0 %5874  ;;  %2748 = vmatpush.msrb.mxu3 %v9161_v33  ;;  %v13083_v33 = vunpack.i.l.bf16 %v9249_v63 }
 0x568   : > { %v9317_v10 = vpop.permute.xlu1 %5869 }
 0x569   : > { %v13086_v20 = vunpack.i.l.bf16 %v9317_v10 }
 0x56f   : > { %v9319_v28 = vpop.permute.xlu2 %5939  ;;  %v9321_v19 = vpop.permute.xlu0 %5889 }
 0x570   : > { %v9323_v0 = vpop.permute.xlu1 %5884 }
 0x577   : > { %v9325_v40 = vpop.permute.xlu2 %5954  ;;  %v9327_v27 = vpop.permute.xlu0 %5904 }
 0x578   : > { %v9329_v8 = vpop.permute.xlu1 %5899  ;;  %v12457_v44 = vunpack.i.h.bf16 %v9325_v40 }
 0x57f   : > { %v9331_v14 = vpop.permute.xlu2 %5969  ;;  %v9333_v38 = vpop.permute.xlu0 %5919 }
 0x580   : > { %v9335_v15 = vpop.permute.xlu1 %5914 }
 0x587   : > { %v9337_v16 = vpop.permute.xlu2 %5984  ;;  %v9339_v55 = vpop.permute.xlu0 %5934 }
 0x588   : > { %v9341_v51 = vpop.permute.xlu1 %5929 }
 0x58f   : > { %v9343_v13 = vpop.permute.xlu2 %5999  ;;  %v9345_v49 = vpop.permute.xlu0 %5949 }
 0x590   : > { %v9347_v21 = vpop.permute.xlu1 %5944  ;;  %v12460_v47 = vunpack.i.h.bf16 %v9345_v49 }
 0x591   : > { %v12462_v62 = vunpack.i.h.bf16 %v9347_v21 }
 0x597   : > { %v9349_v39 = vpop.permute.xlu2 %6014  ;;  %v9351_v30 = vpop.permute.xlu0 %5964 }
 0x598   : > { %v12449_v25 = vunpack.i.h.bf16 %v9351_v30  ;;  %v9355_v7 = vpop.permute.xlu1 %5959 }
 0x599   : > { %v12452_v22 = vunpack.i.h.bf16 %v9355_v7 }
 0x59a   : > { %v2431_v12 = vsel %vm400_vm3, %v12449_v25, %v12454_v1  ;;  %v12463_v25 = vunpack.i.l.bf16 %v9280_v60 }
 0x59b   : > { %2749 = vmatpush.msrb.mxu3 %v2431_v12  ;;  %v2415_v54 = vsel %vm383_vm4, %v12452_v22, %v12453_v31  ;;  %v2399_v12 = vsel %vm366_vm5, %v12457_v44, %v12458_v61  ;;  %v2383_v61 = vsel %vm13036_vm14, %v12460_v47, %v12461_v56  ;;  %v12466_v22 = vunpack.i.l.bf16 %v9282_v35 }
 0x59c   : > { %v2367_v18 = vsel %vm13037_vm9, %v12462_v62, %v12463_v25  ;;  %v12468_v62 = vunpack.i.l.bf16 %v9331_v14  ;;  %v12467_v25 = vunpack.i.l.bf16 %v9244_v59  ;;  %vm13054_vm14 = vcmp.lt.s32.totalorder %v6988_v36, 38 }
 0x59d   : > { %2750 = vmatpush.msrb.mxu3 %v2415_v54  ;;  %vm13057_vm9 = vcmp.lt.s32.totalorder %v6988_v36, 39 }
 0x59f   : > { %v9386_v54 = vpop.permute.xlu2 %6024  ;;  %v9388_v31 = vpop.permute.xlu0 %5979  ;;  %2751 = vmatpush.msrb.mxu3 %v2399_v12 }
 0x5a0   : > { %v12465_v1 = vunpack.i.h.bf16 %v9386_v54  ;;  %v12464_v57 = vunpack.i.l.bf16 %v9386_v54  ;;  %v9393_v44 = vpop.permute.xlu1 %5974  ;;  %v13038_v56 = vunpack.i.l.bf16 %v9388_v31 }
 0x5a1   : > { %2752 = vmatpush.msrb.mxu3 %v2383_v61  ;;  %v13039_v61 = vunpack.i.h.bf16 %v9264_v11 }
 0x5a2   : > { %v2626_v47 = vsel %vm608_vm15, %v12464_v57, %v12465_v1  ;;  %v13040_v57 = vunpack.i.h.bf16 %v9319_v28  ;;  %v13043_v1 = vunpack.i.l.bf16 %v9327_v27 }
 0x5a3   : > { %v2481_v12 = vsel %vm455_vm0, %v13039_v61, %v13038_v56  ;;  %2753 = vmatpush.msrb.mxu3 %v2367_v18  ;;  %2772 = vmatpush.msra.mxu1 %v2626_v47  ;;  %v13042_v61 = vunpack.i.h.bf16 %v9327_v27  ;;  %v12469_v47 = vunpack.i.l.bf16 %v9266_v4 }
 0x5a4   : > { %2785 = vmatpush.msra.mxu2 %v2481_v12  ;;  %v2351_v56 = vsel %vm13041_vm8, %v13040_v57, %v12466_v22  ;;  %v13044_v12 = vunpack.i.l.bf16 %v9393_v44  ;;  %v13052_v22 = vunpack.i.l.bf16 %v9284_v26  ;;  %vm13060_vm8 = vcmp.lt.s32.totalorder %v6988_v36, 90 }
 0x5a5   : > { %v2610_v18 = vsel %vm591_vm13, %v13043_v1, %v13042_v61  ;;  %2754 = vmatpush.msrb.mxu3 %v2351_v56  ;;  %v13046_v1 = vunpack.i.h.bf16 %v9339_v55  ;;  %v13048_v61 = vunpack.i.h.bf16 %v9329_v8 }
 0x5a6   : > { %2773 = vmatpush.msra.mxu1 %v2610_v18  ;;  %v2465_v57 = vsel %vm438_vm1, %v13045_v2, %v13044_v12  ;;  %v13049_v18 = vunpack.i.l.bf16 %v9329_v8  ;;  %v13062_v12 = vunpack.i.l.bf16 %v9254_v6 }
 0x5a7   : > { %2786 = vmatpush.msra.mxu2 %v2465_v57  ;;  %v2335_v56 = vsel %vm13047_vm10, %v13046_v1, %v12467_v25  ;;  %v9465_v32 = vpop.permute.xlu0 %5994  ;;  %v13050_v57 = vunpack.i.h.bf16 %v9296_v23  ;;  %v13051_v25 = vunpack.i.h.bf16 %v9284_v26  ;;  %vm13065_vm10 = vcmp.lt.s32.totalorder %v6988_v36, 40 }
 0x5a8   : > { %v2594_v9 = vsel %vm574_vm12, %v13049_v18, %v13048_v61  ;;  %2755 = vmatpush.msrb.mxu3 %v2335_v56  ;;  %v9482_v56 = vpop.permute.xlu1 %5989  ;;  %v13067_v18 = vunpack.i.l.bf16 %v9323_v0 }
 0x5a9   : > { %2774 = vmatpush.msra.mxu1 %v2594_v9  ;;  %v2449_v1 = vsel %vm421_vm2, %v13050_v57, %v12468_v62  ;;  %v2578_v61 = vsel %vm557_vm11, %v13052_v22, %v13051_v25  ;;  %v13053_v57 = vunpack.i.h.bf16 %v9341_v51  ;;  %v13056_v9 = vunpack.i.h.bf16 %v9312_v52 }
 0x5aa   : > { %2787 = vmatpush.msra.mxu2 %v2449_v1  ;;  %v13055_v1 = vunpack.i.l.bf16 %v9270_v37  ;;  %v13059_v25 = vunpack.i.l.bf16 %v9321_v19  ;;  %v13061_v22 = vunpack.i.h.bf16 %v9254_v6 }
 0x5ab   : > { %v2319_v62 = vsel %vm13054_vm14, %v13053_v57, %v12469_v47  ;;  %2775 = vmatpush.msra.mxu1 %v2578_v61  ;;  %v13058_v47 = vunpack.i.h.bf16 %v9321_v19  ;;  %v12475_v61 = vunpack.i.l.bf16 %v9256_v58  ;;  %vm13068_vm14 = vcmp.lt.s32.totalorder %v6988_v36, 106 }
 0x5ac   : > { %2756 = vmatpush.msrb.mxu3 %v2319_v62  ;;  %2788 = vmatpush.msra.mxu2 %v9164_v41  ;;  %v2303_v57 = vsel %vm13057_vm9, %v13056_v9, %v13055_v1  ;;  %v2430_v9 = vsel %vm400_vm3, %v13062_v12, %v13061_v22  ;;  %v12477_v22 = vunpack.i.l.bf16 %v9258_v24  ;;  %v13070_v41 = vunpack.i.l.bf16 %v9286_v5 }
 0x5ad   : > { %v2562_v62 = vsel %vm13060_vm8, %v13059_v25, %v13058_v47  ;;  %v13063_v47 = vunpack.i.l.bf16 %v9239_v29  ;;  %v13064_v25 = vunpack.i.h.bf16 %v9333_v38  ;;  %vm13072_vm9 = vcmp.lt.s32.totalorder %v6988_v36, 41 }
 0x5ae   : > { %2757 = vmatpush.msrb.mxu3 %v2303_v57  ;;  %2776 = vmatpush.msra.mxu1 %v2562_v62  ;;  %v13066_v62 = vunpack.i.h.bf16 %v9323_v0  ;;  %vm13075_vm8 = vcmp.lt.s32.totalorder %v6988_v36, 107 }
 0x5af   : > { %2789 = vmatpush.msra.mxu2 %v2430_v9  ;;  %v2287_v57 = vsel %vm13065_vm10, %v13064_v25, %v13063_v47  ;;  %v13069_v9 = vunpack.i.h.bf16 %v9286_v5  ;;  %v9555_v1 = vpop.permute.xlu0 %6009  ;;  %v13077_v25 = vunpack.i.l.bf16 %v9288_v53  ;;  %vm13079_vm10 = vcmp.lt.s32.totalorder %v6988_v36, 42 }
 0x5b0   : > { %v2546_v2 = vsel %vm13068_vm14, %v13067_v18, %v13066_v62  ;;  %2758 = vmatpush.msrb.mxu3 %v2287_v57  ;;  %v13071_v18 = vunpack.i.h.bf16 %v9335_v15  ;;  %v13074_v62 = vunpack.i.l.bf16 %v9278_v48  ;;  %vm13084_vm14 = vcmp.lt.s32.totalorder %v6988_v36, 19 }
 0x5b1   : > { %2777 = vmatpush.msra.mxu1 %v2546_v2  ;;  %v2414_v47 = vsel %vm383_vm4, %v13070_v41, %v13069_v9  ;;  %v13073_v2 = vunpack.i.h.bf16 %v9278_v48  ;;  %v13081_v9 = vunpack.i.l.bf16 %v9314_v42 }
 0x5b2   : > { %2790 = vmatpush.msra.mxu2 %v2414_v47  ;;  %v2271_v57 = vsel %vm13072_vm9, %v13071_v18, %v12475_v61  ;;  %v13076_v47 = vunpack.i.h.bf16 %v9288_v53  ;;  %v9566_v61 = vld [vmem:[%s12309_s1 + $0x30] sm:$0xff]  ;;  %vm13087_vm9 = vcmp.lt.s32.totalorder %v6988_v36, 109 }
 0x5b3   : > { %v2530_v12 = vsel %vm13075_vm8, %v13074_v62, %v13073_v2  ;;  %2759 = vmatpush.msrb.mxu3 %v2271_v57  ;;  %v9568_v2 = vpop.permute.xlu1 %6004  ;;  %v13078_v57 = vunpack.i.h.bf16 %v9290_v50  ;;  %v13080_v62 = vunpack.i.h.bf16 %v9314_v42  ;;  %vm13090_vm8 = vcmp.lt.s32.totalorder %v6988_v36, 20 }
 0x5b4   : > { %2778 = vmatpush.msra.mxu1 %v2530_v12  ;;  %v2398_v18 = vsel %vm366_vm5, %v13077_v25, %v13076_v47  ;;  %v12478_v47 = vunpack.i.h.bf16 %v9282_v35 }
 0x5b5   : > { %2791 = vmatpush.msra.mxu2 %v2398_v18  ;;  %v2255_v12 = vsel %vm13079_vm10, %v13078_v57, %v12477_v22  ;;  %v2514_v25 = vsel %vm489_vm7, %v13081_v9, %v13080_v62  ;;  %v13082_v18 = vunpack.i.h.bf16 %v9249_v63  ;;  %v13085_v22 = vunpack.i.h.bf16 %v9317_v10 }
 0x5b6   : > { %2760 = vmatpush.msrb.mxu3 %v2255_v12  ;;  %2779 = vmatpush.msra.mxu1 %v2514_v25  ;;  %v9600_v12 = vld [vmem:[%s12309_s1 + $0x38] sm:$0xff]  ;;  %vm13094_vm10 = vcmp.lt.s32.totalorder %v6988_v36, 21 }
 0x5b7   : > { %v2382_v57 = vsel %vm13084_vm14, %v13083_v33, %v13082_v18  ;;  %v2498_v9 = vsel %vm13087_vm9, %v13086_v20, %v13085_v22  ;;  %2761 = vmatmul.f32.vlgmr.msrb.gmra.mxu3 %v9566_v61  ;;  %v13088_v33 = vunpack.i.h.bf16 %v9280_v60  ;;  %v13089_v18 = vunpack.i.l.bf16 %v9280_v60 }
 0x5b8   : > { %2792 = vmatpush.msra.mxu2 %v2382_v57  ;;  %2780 = vmatpush.msra.mxu1 %v2498_v9  ;;  %v13091_v20 = vunpack.i.h.bf16 %v9388_v31  ;;  %v13092_v22 = vunpack.i.l.bf16 %v9388_v31  ;;  %v13093_v9 = vunpack.i.l.bf16 %v9282_v35  ;;  %vm13099_vm14 = vcmp.lt.s32.totalorder %v6988_v36, 22 }
 0x5b9   : > { %v2366_v57 = vsel %vm13090_vm8, %v13089_v18, %v13088_v33  ;;  %v13095_v33 = vunpack.i.h.bf16 %v9393_v44  ;;  %v13096_v18 = vunpack.i.l.bf16 %v9393_v44  ;;  %5009 = vmatmul.msk.f32.vlgmr.msra.gmra.mxu1 %vm725_vm6, %v9600_v12  ;;  %vm13104_vm9 = vcmp.lt.s32.totalorder %v6988_v36, 38 }
 0x5ba   : > { %v2480_v41 = vsel %vm455_vm0, %v13092_v22, %v13091_v20  ;;  %2793 = vmatpush.msra.mxu2 %v2366_v57  ;;  %v2350_v25 = vsel %vm13094_vm10, %v13093_v9, %v12478_v47  ;;  %v9636_v22 = vpop.permute.xlu0 %6029  ;;  %v13097_v9 = vunpack.i.h.bf16 %v9244_v59  ;;  %v13098_v47 = vunpack.i.l.bf16 %v9244_v59 }
 0x5bb   : > { %2825 = vmatpush.msrb.mxu1 %v2480_v41  ;;  %v2464_v34 = vsel %vm438_vm1, %v13096_v18, %v13095_v33  ;;  %v5008_v41 = vld [vmem:[%s12310_s2 + $0x18] sm:$0xff]  ;;  %v6032_v20 = vunpack.i.h.bf16 %v9636_v22  ;;  %v6031_v62 = vunpack.i.l.bf16 %v9636_v22  ;;  %v9653_v17 = vpop.permute.xlu1 %6019  ;;  %v6016_v22 = vunpack.i.l.bf16 %v9349_v39 }
 0x5bc   : > { %2794 = vmatpush.msra.mxu2 %v2350_v25  ;;  %v2334_v33 = vsel %vm13099_vm14, %v13098_v47, %v13097_v9  ;;  %v13100_v25 = vunpack.i.h.bf16 %v9331_v14  ;;  %2739 = vperm.xlu1 %6033, %v5008_v41   ;;  %v6021_v46 = vunpack.i.l.bf16 %v9653_v17  ;;  %v13103_v41 = vunpack.i.l.bf16 %v9266_v4 }
 0x5bd   : > { %2826 = vmatpush.msrb.mxu1 %v2464_v34  ;;  %v13101_v34 = vunpack.i.l.bf16 %v9331_v14  ;;  %v2624_v47 = vsel %vm608_vm15, %v6031_v62, %v6032_v20  ;;  %vm13108_vm8 = vcmp.lt.s32.totalorder %v6988_v36, 39  ;;  %v6012_v57 = vunpack.i.h.bf16 %v9555_v1 }
 0x5be   : > { %2795 = vmatpush.msra.mxu2 %v2334_v33  ;;  %v13105_v33 = vunpack.i.h.bf16 %v9386_v54  ;;  %2852 = vmatpush.msra.mxu3 %v2624_v47  ;;  %v6011_v9 = vunpack.i.l.bf16 %v9555_v1  ;;  %v13112_v47 = vunpack.i.h.bf16 %v9653_v17  ;;  %vm13115_vm10 = vcmp.lt.s32.totalorder %v6988_v36, 40 }
 0x5bf   : > { %v2448_v18 = vsel %vm421_vm2, %v13101_v34, %v13100_v25  ;;  %v2318_v25 = vsel %vm13104_vm9, %v13103_v41, %v13102_v45  ;;  %v13106_v45 = vunpack.i.h.bf16 %v9270_v37  ;;  %v13107_v41 = vunpack.i.l.bf16 %v9270_v37 }
 0x5c0   : > { %2827 = vmatpush.msrb.mxu1 %v2448_v18  ;;  %2796 = vmatpush.msra.mxu2 %v2318_v25  ;;  %v2625_v18 = vsel %vm608_vm15, %v13105_v33, %v6031_v62  ;;  %v13109_v34 = vunpack.i.l.bf16 %v9351_v30  ;;  %v13110_v33 = vunpack.i.h.bf16 %v9254_v6  ;;  %vm13122_vm14 = vcmp.lt.s32.totalorder %v6988_v36, 41 }
 0x5c1   : > { %v2302_v25 = vsel %vm13108_vm8, %v13107_v41, %v13106_v45  ;;  %2812 = vmatpush.msrb.mxu0 %v2625_v18  ;;  %v2608_v18 = vsel %vm591_vm13, %v6021_v46, %v13112_v47  ;;  %v13113_v41 = vunpack.i.h.bf16 %v9239_v29  ;;  %v6006_v47 = vunpack.i.l.bf16 %v9568_v2 }
 0x5c2   : > { %2828 = vmatpush.msrb.mxu1 %v9215_v3  ;;  %v2429_v62 = vsel %vm400_vm3, %v13110_v33, %v13109_v34  ;;  %2797 = vmatpush.msra.mxu2 %v2302_v25  ;;  %v13111_v3 = vunpack.i.h.bf16 %v9327_v27  ;;  %v13114_v33 = vunpack.i.l.bf16 %v9239_v29  ;;  %v13118_v34 = vunpack.i.h.bf16 %v9329_v8 }
 0x5c3   : > { %2853 = vmatpush.msra.mxu3 %v2608_v18  ;;  %v6007_v18 = vunpack.i.h.bf16 %v9568_v2  ;;  %v13125_v2 = vunpack.i.h.bf16 %v9284_v26  ;;  %vm13128_vm9 = vcmp.lt.s32.totalorder %v6988_v36, 42  ;;  %vm13131_vm8 = vcmp.lt.s32.totalorder %v6988_v36, 19 }
 0x5c4   : > { %2829 = vmatpush.msrb.mxu1 %v2429_v62  ;;  %v2609_v45 = vsel %vm591_vm13, %v13111_v3, %v6021_v46  ;;  %v2286_v25 = vsel %vm13115_vm10, %v13114_v33, %v13113_v41  ;;  %v13116_v3 = vunpack.i.l.bf16 %v9355_v7  ;;  %v13117_v62 = vunpack.i.h.bf16 %v9286_v5 }
 0x5c5   : > { %2813 = vmatpush.msrb.mxu0 %v2609_v45  ;;  %2798 = vmatpush.msra.mxu2 %v2286_v25  ;;  %v2593_v6 = vsel %vm574_vm12, %v13118_v34, %v6016_v22  ;;  %v13119_v41 = vunpack.i.h.bf16 %v9349_v39  ;;  %v13120_v5 = vunpack.i.h.bf16 %v9256_v58  ;;  %v13121_v33 = vunpack.i.l.bf16 %v9256_v58 }
 0x5c6   : > { %v2413_v46 = vsel %vm383_vm4, %v13117_v62, %v13116_v3  ;;  %v13123_v3 = vunpack.i.l.bf16 %v9325_v40  ;;  %v13124_v34 = vunpack.i.h.bf16 %v9288_v53  ;;  %v6001_v53 = vunpack.i.l.bf16 %v9343_v13 }
 0x5c7   : > { %2830 = vmatpush.msrb.mxu1 %v2413_v46  ;;  %v2592_v45 = vsel %vm574_vm12, %v6016_v22, %v13119_v41  ;;  %v2270_v25 = vsel %vm13122_vm14, %v13121_v33, %v13120_v5  ;;  %2814 = vmatpush.msrb.mxu0 %v2593_v6  ;;  %v5946_v22 = vunpack.i.l.bf16 %v9347_v21  ;;  %v2577_v46 = vsel %vm557_vm11, %v13125_v2, %v6011_v9 }
 0x5c8   : > { %2854 = vmatpush.msra.mxu3 %v2592_v45  ;;  %v2397_v62 = vsel %vm366_vm5, %v13124_v34, %v13123_v3  ;;  %2799 = vmatpush.msra.mxu2 %v2270_v25  ;;  %v2576_v6 = vsel %vm557_vm11, %v6011_v9, %v6012_v57  ;;  %v6002_v41 = vunpack.i.h.bf16 %v9343_v13  ;;  %v13126_v45 = vunpack.i.h.bf16 %v9258_v24 }
 0x5c9   : > { %2831 = vmatpush.msrb.mxu1 %v2397_v62  ;;  %v13127_v5 = vunpack.i.l.bf16 %v9258_v24  ;;  %2815 = vmatpush.msrb.mxu0 %v2577_v46  ;;  %v13129_v25 = vunpack.i.l.bf16 %v9345_v49  ;;  %v13130_v3 = vunpack.i.h.bf16 %v9249_v63  ;;  %v5941_v34 = vunpack.i.l.bf16 %v9319_v28 }
 0x5ca   : > { %2855 = vmatpush.msra.mxu3 %v2576_v6  ;;  %v13132_v62 = vunpack.i.l.bf16 %v9386_v54  ;;  %vm13134_vm10 = vcmp.lt.s32.totalorder %v6988_v36, 90  ;;  %v5997_v6 = vunpack.i.h.bf16 %v9465_v32  ;;  %v5996_v63 = vunpack.i.l.bf16 %v9465_v32 }
 0x5cb   : > { %v2254_v33 = vsel %vm13128_vm9, %v13127_v5, %v13126_v45  ;;  %v2381_v9 = vsel %vm13131_vm8, %v13130_v3, %v13129_v25  ;;  %v13133_v45 = vunpack.i.h.bf16 %v9321_v19  ;;  %vm13135_vm14 = vmmov %vm13134_vm10  ;;  %v13136_v54 = vunpack.i.h.bf16 %v9280_v60 }
 0x5cc   : > { %2800 = vmatpush.msra.mxu2 %v2254_v33  ;;  %2832 = vmatpush.msrb.mxu1 %v2381_v9  ;;  %v2627_v2 = vsel %vm608_vm15, %v6032_v20, %v13132_v62  ;;  %v2560_v5 = vsel %vm13135_vm14, %v6006_v47, %v6007_v18  ;;  %v5936_v33 = vunpack.i.l.bf16 %v9339_v55  ;;  %vm13137_vm9 = vcmp.lt.s32.totalorder %v6988_v36, 20 }
 0x5cd   : > { %v2561_v46 = vsel %vm13134_vm10, %v13133_v45, %v6006_v47  ;;  %2856 = vmatpush.msra.mxu3 %v2560_v5  ;;  %2801 = vmatmul.f32.vlgmr.msra.gmra.mxu2 %v9566_v61  ;;  %v2365_v20 = vsel %vm13137_vm9, %v13136_v54, %v5946_v22  ;;  %v13138_v25 = vunpack.i.l.bf16 %v9327_v27  ;;  %v13139_v32 = vunpack.i.h.bf16 %v9653_v17 }
 0x5ce   : > { %2892 = vmatpush.msrb.mxu2 %v2627_v2  ;;  %2816 = vmatpush.msrb.mxu0 %v2561_v46  ;;  %v5992_v47 = vunpack.i.h.bf16 %v9482_v56  ;;  %v5991_v9 = vunpack.i.l.bf16 %v9482_v56  ;;  %v13140_v62 = vunpack.i.h.bf16 %v9323_v0  ;;  %vm13141_vm8 = vcmp.lt.s32.totalorder %v6988_v36, 106 }
 0x5cf   : > { %v2611_v3 = vsel %vm591_vm13, %v13139_v32, %v13138_v25  ;;  %2833 = vmatpush.msrb.mxu1 %v2365_v20  ;;  %vm13142_vm10 = vmmov %vm13141_vm8  ;;  %v5931_v17 = vunpack.i.l.bf16 %v9341_v51  ;;  %v13143_v56 = vunpack.i.h.bf16 %v9282_v35  ;;  %vm13144_vm14 = vcmp.lt.s32.totalorder %v6988_v36, 21 }
 0x5d0   : > { %2893 = vmatpush.msrb.mxu2 %v2611_v3  ;;  %v2545_v60 = vsel %vm13141_vm8, %v13140_v62, %v6001_v53  ;;  %v2544_v27 = vsel %vm13142_vm10, %v6001_v53, %v6002_v41  ;;  %v13145_v45 = vunpack.i.l.bf16 %v9329_v8  ;;  %v13146_v46 = vunpack.i.h.bf16 %v9349_v39 }
 0x5d1   : > { %2817 = vmatpush.msrb.mxu0 %v2545_v60  ;;  %2857 = vmatpush.msra.mxu3 %v2544_v27  ;;  %v2349_v2 = vsel %vm13144_vm14, %v13143_v56, %v5941_v34  ;;  %v5987_v53 = vunpack.i.h.bf16 %v9337_v16  ;;  %v5986_v54 = vunpack.i.l.bf16 %v9337_v16  ;;  %v13147_v20 = vunpack.i.h.bf16 %v9278_v48 }
 0x5d2   : > { %v2595_v5 = vsel %vm574_vm12, %v13146_v46, %v13145_v45  ;;  %2834 = vmatpush.msrb.mxu1 %v2349_v2  ;;  %vm13148_vm9 = vcmp.lt.s32.totalorder %v6988_v36, 107  ;;  %v5926_v8 = vunpack.i.l.bf16 %v9312_v52  ;;  %v13150_v39 = vunpack.i.h.bf16 %v9244_v59 }
 0x5d3   : > { %2894 = vmatpush.msrb.mxu2 %v2595_v5  ;;  %v2529_v35 = vsel %vm13148_vm9, %v13147_v20, %v5996_v63  ;;  %vm13149_vm8 = vmmov %vm13148_vm9  ;;  %vm13151_vm10 = vcmp.lt.s32.totalorder %v6988_v36, 22  ;;  %v13152_v32 = vunpack.i.l.bf16 %v9284_v26  ;;  %v2512_v59 = vsel %vm489_vm7, %v5991_v9, %v5992_v47 }
 0x5d4   : > { %v2528_v25 = vsel %vm13149_vm8, %v5996_v63, %v5997_v6  ;;  %2818 = vmatpush.msrb.mxu0 %v2529_v35  ;;  %v2333_v16 = vsel %vm13151_vm10, %v13150_v39, %v5936_v33  ;;  %v13153_v63 = vunpack.i.h.bf16 %v9314_v42  ;;  %v5921_v60 = vunpack.i.l.bf16 %v9333_v38 }
 0x5d5   : > { %2858 = vmatpush.msra.mxu3 %v2528_v25  ;;  %v2579_v3 = vsel %vm557_vm11, %v6012_v57, %v13152_v32  ;;  %2835 = vmatpush.msrb.mxu1 %v2333_v16  ;;  %v13154_v26 = vunpack.i.h.bf16 %v9266_v4  ;;  %vm13155_vm14 = vcmp.lt.s32.totalorder %v6988_v36, 38  ;;  %v13156_v57 = vunpack.i.l.bf16 %v9321_v19 }
 0x5d6   : > { %2895 = vmatpush.msrb.mxu2 %v2579_v3  ;;  %v2513_v62 = vsel %vm489_vm7, %v13153_v63, %v5991_v9  ;;  %vm13157_vm9 = vcmp.lt.s32.totalorder %v6988_v36, 90  ;;  %v13158_v9 = vunpack.i.h.bf16 %v9317_v10  ;;  %vm13159_vm8 = vcmp.lt.s32.totalorder %v6988_v36, 109  ;;  %v13182_v3 = vld [vmem:[#allocation11_spill] sm:$0xff] }
 0x5d7   : > { %2819 = vmatpush.msrb.mxu0 %v2513_v62  ;;  %2859 = vmatpush.msra.mxu3 %v2512_v59  ;;  %v2317_v1 = vsel %vm13155_vm14, %v13154_v26, %v5931_v17  ;;  %v2563_v27 = vsel %vm13157_vm9, %v6007_v18, %v13156_v57  ;;  %vm13160_vm10 = vmmov %vm13159_vm8  ;;  %v5916_v4 = vunpack.i.l.bf16 %v9335_v15  ;;  %v13161_v19 = vunpack.i.h.bf16 %v9270_v37 }
 0x5d8   : > { %2836 = vmatpush.msrb.mxu1 %v2317_v1  ;;  %2896 = vmatpush.msrb.mxu2 %v2563_v27  ;;  %v2497_v56 = vsel %vm13159_vm8, %v13158_v9, %v5986_v54  ;;  %v2496_v2 = vsel %vm13160_vm10, %v5986_v54, %v5987_v53  ;;  %vm13162_vm14 = vcmp.lt.s32.totalorder %v6988_v36, 39  ;;  %v13163_v45 = vunpack.i.l.bf16 %v9264_v11 }
 0x5d9   : > { %2820 = vmatpush.msrb.mxu0 %v2497_v56  ;;  %2860 = vmatpush.msra.mxu3 %v2496_v2  ;;  %v2301_v18 = vsel %vm13162_vm14, %v13161_v19, %v5926_v8  ;;  %v13164_v46 = vunpack.i.h.bf16 %v9388_v31  ;;  %v13165_v54 = vunpack.i.l.bf16 %v9323_v0  ;;  %vm13166_vm9 = vcmp.lt.s32.totalorder %v6988_v36, 106 }
 0x5da   : > { %5010 = vmatmul.msk.f32.vlgmr.msrb.gmra.mxu0 %vm725_vm6, %v9600_v12  ;;  %2837 = vmatpush.msrb.mxu1 %v2301_v18  ;;  %v5911_v20 = vunpack.i.l.bf16 %v9290_v50  ;;  %v13167_v35 = vunpack.i.h.bf16 %v9239_v29  ;;  %vm13168_vm8 = vcmp.lt.s32.totalorder %v6988_v36, 40  ;;  %v13169_v31 = vunpack.i.l.bf16 %v9292_v43 }
 0x5db   : > { %v2483_v5 = vsel %vm455_vm0, %v13164_v46, %v13163_v45  ;;  %v2547_v37 = vsel %vm13166_vm9, %v6002_v41, %v13165_v54  ;;  %v13170_v25 = vunpack.i.h.bf16 %v9393_v44  ;;  %v13171_v13 = vunpack.i.l.bf16 %v9278_v48  ;;  %5011 = vmatmul.msk.f32.vlgmr.msra.gmra.mxu3 %vm725_vm6, %v9600_v12 }
 0x5dc   : > { %2865 = vmatpush.msra.mxu0 %v2483_v5  ;;  %2897 = vmatpush.msrb.mxu2 %v2547_v37  ;;  %v2285_v11 = vsel %vm13168_vm8, %v13167_v35, %v5921_v60  ;;  %vm13172_vm10 = vcmp.lt.s32.totalorder %v6988_v36, 107  ;;  %v13173_v29 = vunpack.i.h.bf16 %v9256_v58  ;;  %vm13174_vm14 = vcmp.lt.s32.totalorder %v6988_v36, 41  ;;  %v13209_v37 = vld [vmem:[#allocation3_spill] sm:$0xff] }
 0x5dd   : > { %2838 = vmatpush.msrb.mxu1 %v2285_v11  ;;  %v2467_v0 = vsel %vm438_vm1, %v13170_v25, %v13169_v31  ;;  %v2531_v41 = vsel %vm13172_vm10, %v5997_v6, %v13171_v13  ;;  %v13175_v44 = vunpack.i.l.bf16 %v9296_v23  ;;  %v13176_v39 = vunpack.i.h.bf16 %v9331_v14 }
 0x5de   : > { %2866 = vmatpush.msra.mxu0 %v2467_v0  ;;  %2898 = vmatpush.msrb.mxu2 %v2531_v41  ;;  %v2269_v43 = vsel %vm13174_vm14, %v13173_v29, %v5916_v4  ;;  %v13177_v6 = vunpack.i.l.bf16 %v9314_v42  ;;  %v13178_v58 = vunpack.i.h.bf16 %v9258_v24  ;;  %vm13179_vm9 = vcmp.lt.s32.totalorder %v6988_v36, 42 }
 0x5df   : > { %2839 = vmatpush.msrb.mxu1 %v2269_v43  ;;  %v2451_v48 = vsel %vm421_vm2, %v13176_v39, %v13175_v44  ;;  %v13180_v23 = vunpack.i.l.bf16 %v9317_v10  ;;  %vm13181_vm8 = vcmp.lt.s32.totalorder %v6988_v36, 109  ;;  %v13183_v42 = vunpack.i.h.bf16 %v9351_v30  ;;  %v13212_v39 = vld [vmem:[#allocation8_spill] sm:$0xff] }
 0x5e0   : > { %v2515_v16 = vsel %vm489_vm7, %v5992_v47, %v13177_v6  ;;  %2867 = vmatpush.msra.mxu0 %v2451_v48  ;;  %v2253_v32 = vsel %vm13179_vm9, %v13178_v58, %v5911_v20  ;;  %v13184_v47 = vunpack.i.l.bf16 %v9351_v30  ;;  %v13185_v10 = vunpack.i.h.bf16 %v9355_v7  ;;  %v13213_v6 = vld [vmem:[#allocation7_spill] sm:$0xff] }
 0x5e1   : > { %2899 = vmatpush.msrb.mxu2 %v2515_v16  ;;  %2840 = vmatpush.msrb.mxu1 %v2253_v32  ;;  %v2499_v14 = vsel %vm13181_vm8, %v5987_v53, %v13180_v23  ;;  %v13186_v53 = vunpack.i.l.bf16 %v9355_v7  ;;  %v13187_v62 = vunpack.i.h.bf16 %v9325_v40  ;;  %v13188_v59 = vunpack.i.l.bf16 %v9325_v40 }
 0x5e2   : > { %2868 = vmatpush.msra.mxu0 %v13182_v3  ;;  %2841 = vmatmul.f32.vlgmr.msrb.gmra.mxu1 %v9566_v61  ;;  %v2428_v24 = vsel %vm400_vm3, %v13184_v47, %v13183_v42  ;;  %v13189_v26 = vunpack.i.h.bf16 %v9345_v49  ;;  %vm13191_vm10 = vcmp.lt.s32.totalorder %v6988_v36, 19  ;;  %v13192_v7 = vunpack.i.h.bf16 %v9347_v21 }
 0x5e3   : > { %2900 = vmatpush.msrb.mxu2 %v2499_v14  ;;  %v2412_v63 = vsel %vm383_vm4, %v13186_v53, %v13185_v10  ;;  %v2396_v30 = vsel %vm366_vm5, %v13188_v59, %v13187_v62  ;;  %vm13193_vm14 = vcmp.lt.s32.totalorder %v6988_v36, 20  ;;  %v13194_v40 = vunpack.i.h.bf16 %v9319_v28  ;;  %v5015_v62 = vld [vmem:[%s12310_s2 + $0x20] sm:$0xff] }
 0x5e4   : > { %5012 = vmatmul.msk.f32.vlgmr.msrb.gmra.mxu2 %vm725_vm6, %v9600_v12  ;;  %2869 = vmatpush.msra.mxu0 %v2428_v24  ;;  %v13190_v12 = vunpack.i.l.bf16 %v9345_v49  ;;  %v2364_v57 = vsel %vm13193_vm14, %v5946_v22, %v13192_v7  ;;  %vm13195_vm9 = vcmp.lt.s32.totalorder %v6988_v36, 21  ;;  %v13196_v49 = vunpack.i.h.bf16 %v9339_v55 }
 0x5e5   : > { %v2348_v27 = vsel %vm13195_vm9, %v5941_v34, %v13194_v40  ;;  %vm13197_vm8 = vcmp.lt.s32.totalorder %v6988_v36, 22  ;;  %v13198_v21 = vunpack.i.h.bf16 %v9341_v51  ;;  %v13200_v28 = vunpack.i.h.bf16 %v9312_v52 }
 0x5e6   : > { %2870 = vmatpush.msra.mxu0 %v2412_v63  ;;  %v2380_v1 = vsel %vm13191_vm10, %v13190_v12, %v13189_v26  ;;  %v2332_v9 = vsel %vm13197_vm8, %v5936_v33, %v13196_v49  ;;  %vm13199_vm10 = vcmp.lt.s32.totalorder %v6988_v36, 38  ;;  %vm13201_vm14 = vcmp.lt.s32.totalorder %v6988_v36, 39 }
 0x5e7   : > { %v2316_v22 = vsel %vm13199_vm10, %v5931_v17, %v13198_v21  ;;  %v2300_v34 = vsel %vm13201_vm14, %v5926_v8, %v13200_v28  ;;  %v13202_v55 = vunpack.i.h.bf16 %v9333_v38  ;;  %vm13203_vm9 = vcmp.lt.s32.totalorder %v6988_v36, 40 }
 0x5e8   : > { %2871 = vmatpush.msra.mxu0 %v2396_v30  ;;  %v13204_v51 = vunpack.i.h.bf16 %v9335_v15  ;;  %vm13205_vm8 = vcmp.lt.s32.totalorder %v6988_v36, 41  ;;  %v13206_v56 = vunpack.i.h.bf16 %v9290_v50  ;;  %vm13207_vm10 = vcmp.lt.s32.totalorder %v6988_v36, 42 }
 0x5e9   : > { %v2284_v33 = vsel %vm13203_vm9, %v5921_v60, %v13202_v55  ;;  %vm13214_vm14 = vmmov %vm13205_vm8 }
 0x5ea   : > { %2872 = vmatpush.msra.mxu0 %v2380_v1  ;;  %v2268_v17 = vsel %vm13205_vm8, %v5916_v4, %v13204_v51  ;;  %v2252_v52 = vsel %vm13207_vm10, %v5911_v20, %v13206_v56  ;;  %v13208_v4 = vld [vmem:[#allocation5_spill] sm:$0xff]  ;;  %vm13215_vm9 = vmmov %vm13205_vm8  ;;  %vm13216_vm8 = vcmp.lt.s32.totalorder %v6988_v36, 38  ;;  %vm13217_vm10 = vcmp.lt.s32.totalorder %v6988_v36, 90 }
 0x5ec   : > { %2873 = vmatpush.msra.mxu0 %v2364_v57 }
 0x5ee   : > { %2874 = vmatpush.msra.mxu0 %v2348_v27 }
 0x5f0   : > { %2875 = vmatpush.msra.mxu0 %v2332_v9 }
 0x5f2   : > { %2876 = vmatpush.msra.mxu0 %v2316_v22 }
 0x5f4   : > { %2877 = vmatpush.msra.mxu0 %v2300_v34 }
 0x5f6   : > { %2878 = vmatpush.msra.mxu0 %v2284_v33 }
 0x5f8   : > { %2879 = vmatpush.msra.mxu0 %v2268_v17 }
 0x5fa   : > { %2880 = vmatpush.msra.mxu0 %v2252_v52 }
 0x5fb   : > { %2881 = vmatmul.f32.vlgmr.msra.gmra.mxu0 %v9566_v61 }
 0x62e   : > { %v2740_v8 = vpop.permute.xlu1 %2739 }
 0x636   : > { %v2782_v19 = vpop.f32.mrf.mxu1 }
 0x63a   : > { %v2762_v38 = vpop.f32.mrf.mxu3 }
 0x63b   : > { %v2763_v2 = vadd.f32 %v2762_v38, %v2740_v8 }
 0x63d   : > { %v2783_v60 = vadd.f32 %v2782_v19, %v2763_v2 }
 0x63f   : > { %v2905_v15 = vmax.f32 %v2783_v60, 0.0 }
 0x641   : > { %v9982_v54 = vmul.f32 %v2905_v15, %v13208_v4 }
 0x650   : > { %v2802_v18 = vpop.f32.mrf.mxu2 }
 0x651   : > { %v2803_v45 = vadd.f32 %v2802_v18, %v2740_v8 }
 0x657   : > { %v2822_v46 = vpop.f32.mrf.mxu0 }
 0x658   : > { %v2823_v5 = vadd.f32 %v2822_v46, %v2803_v45 }
 0x65a   : > { %v2906_v50 = vmax.f32 %v2823_v5, 0.0 }
 0x65c   : > { %v9985_v35 = vmul.f32 %v2906_v50, %v13209_v37 }
 0x65e   : > { %v6044_v61 = vpack.i.bf16 %v9985_v35, %v9982_v54  ;;  %v2862_v13 = vpop.f32.mrf.mxu3 }
 0x65f   : > { %v2842_v11 = vpop.f32.mrf.mxu1 }
 0x660   : > { %6045 = vrot.lane.b32.xlu0 %v6044_v61, %s6754_s23  ;;  %6040 = vrot.lane.b32.xlu1 %v6044_v61, %s6752_s21  ;;  %v2843_v0 = vadd.f32 %v2842_v11, %v2740_v8 }
 0x661   : > { %6035 = vrot.lane.b32.xlu2 %v6044_v61, %s6753_s22 }
 0x662   : > { %v2863_v29 = vadd.f32 %v2862_v13, %v2843_v0 }
 0x664   : > { %v2907_v44 = vmax.f32 %v2863_v29, 0.0 }
 0x666   : > { %v10017_v16 = vmul.f32 %v2907_v44, %v13213_v6 }
 0x667   : > { %v2902_v25 = vpop.f32.mrf.mxu2 }
 0x668   : > { %6060 = vrot.lane.b32.xlu0 %v6044_v61, %s6757_s26  ;;  %6055 = vrot.lane.b32.xlu1 %v6044_v61, %s6756_s25 }
 0x669   : > { %6050 = vrot.lane.b32.xlu2 %v6044_v61, %s6755_s24 }
 0x670   : > { %6075 = vrot.lane.b32.xlu0 %v6044_v61, %s6760_s29  ;;  %6070 = vrot.lane.b32.xlu1 %v6044_v61, %s12535_s28 }
 0x671   : > { %6065 = vrot.lane.b32.xlu2 %v6044_v61, %s6758_s27 }
 0x678   : > { %6090 = vrot.lane.b32.xlu0 %v6044_v61, %s6763_s6  ;;  %6085 = vrot.lane.b32.xlu1 %v6044_v61, %s12537_s5  ;;  %v2882_v20 = vpop.f32.mrf.mxu0 }
 0x679   : > { %6080 = vrot.lane.b32.xlu2 %v6044_v61, %s6761_s30  ;;  %v2883_v31 = vadd.f32 %v2882_v20, %v2740_v8 }
 0x67b   : > { %v2903_v41 = vadd.f32 %v2902_v25, %v2883_v31 }
 0x67d   : > { %v2908_v43 = vmax.f32 %v2903_v41, 0.0 }
 0x67f   : > { %v10014_v48 = vmul.f32 %v2908_v43, %v13212_v39 }
 0x680   : > { %6105 = vrot.lane.b32.xlu0 %v6044_v61, %s6766_s9  ;;  %6100 = vrot.lane.b32.xlu1 %v6044_v61, %s12484_s8 }
 0x681   : > { %6095 = vrot.lane.b32.xlu2 %v6044_v61, %s6764_s7  ;;  %v6154_v58 = vpack.i.bf16 %v10014_v48, %v10017_v16 }
 0x688   : > { %6120 = vrot.lane.b32.xlu0 %v6044_v61, %s12482_s12  ;;  %6115 = vrot.lane.b32.xlu1 %v6044_v61, %s13210_s10 }
 0x689   : > { %6110 = vrot.lane.b32.xlu2 %v6044_v61, %s13211_s11 }
 0x690   : > { %6135 = vrot.lane.b32.xlu0 %v6044_v61, %s13030_s14  ;;  %6130 = vrot.lane.b32.xlu1 %v6044_v61, %s13031_s18 }
 0x691   : > { %6125 = vrot.lane.b32.xlu2 %v6044_v61, %s12886_s13 }
 0x698   : > { %6145 = vrot.lane.b32.xlu0 %v6044_v61, %s12700_s20  ;;  %6150 = vrot.lane.b32.xlu1 %v6044_v61, %s12699_s17 }
 0x699   : > { %6140 = vrot.lane.b32.xlu2 %v6044_v61, %s12887_s19 }
 0x6a0   : > { %6155 = vrot.lane.b32.xlu0 %v6154_v58, %s6753_s22  ;;  %6165 = vrot.lane.b32.xlu1 %v6154_v58, %s6754_s23 }
 0x6a1   : > { %6160 = vrot.lane.b32.xlu2 %v6154_v58, %s6752_s21 }
 0x6a8   : > { %6170 = vrot.lane.b32.xlu0 %v6154_v58, %s6755_s24  ;;  %6180 = vrot.lane.b32.xlu1 %v6154_v58, %s6757_s26 }
 0x6a9   : > { %6175 = vrot.lane.b32.xlu2 %v6154_v58, %s6756_s25 }
 0x6b0   : > { %6185 = vrot.lane.b32.xlu0 %v6154_v58, %s6758_s27  ;;  %6195 = vrot.lane.b32.xlu1 %v6154_v58, %s6760_s29 }
 0x6b1   : > { %6190 = vrot.lane.b32.xlu2 %v6154_v58, %s12535_s28 }
 0x6b8   : > { %6200 = vrot.lane.b32.xlu0 %v6154_v58, %s6761_s30  ;;  %6210 = vrot.lane.b32.xlu1 %v6154_v58, %s6763_s6 }
 0x6b9   : > { %6205 = vrot.lane.b32.xlu2 %v6154_v58, %s12537_s5 }
 0x6bb   : > { %v10033_v32 = vpop.permute.xlu2 %6035 }
 0x6c0   : > { %6215 = vrot.lane.b32.xlu0 %v6154_v58, %s6764_s7  ;;  %6225 = vrot.lane.b32.xlu1 %v6154_v58, %s6766_s9 }
 0x6c1   : > { %6220 = vrot.lane.b32.xlu2 %v6154_v58, %s12484_s8  ;;  %s13346_s8 = smov 126  }
 0x6c3   : > { %v10038_v23 = vpop.permute.xlu2 %6050 }
 0x6c8   : > { %6230 = vrot.lane.b32.xlu0 %v6154_v58, %s13211_s11  ;;  %6240 = vrot.lane.b32.xlu1 %v6154_v58, %s12482_s12  ;;  %s13350_s12 = smov 107  }
 0x6c9   : > { %6235 = vrot.lane.b32.xlu2 %v6154_v58, %s13210_s10 }
 0x6cb   : > { %v10043_v14 = vpop.permute.xlu2 %6065 }
 0x6cc   : > { %v13229_v4 = vunpack.i.l.bf16 %v10043_v14 }
 0x6d0   : > { %6245 = vrot.lane.b32.xlu0 %v6154_v58, %s12886_s13  ;;  %6255 = vrot.lane.b32.xlu1 %v6154_v58, %s13030_s14 }
 0x6d1   : > { %6250 = vrot.lane.b32.xlu2 %v6154_v58, %s13031_s18 }
 0x6d2   : > { %v10048_v42 = vpop.permute.xlu0 %6045  ;;  %v10050_v47 = vpop.permute.xlu1 %6040 }
 0x6d3   : > { %v10052_v24 = vpop.permute.xlu2 %6080  ;;  %v12506_v8 = vunpack.i.h.bf16 %v10050_v47  ;;  %v12503_v38 = vunpack.i.l.bf16 %v10050_v47 }
 0x6d8   : > { %6265 = vrot.lane.b32.xlu0 %v6154_v58, %s12699_s17  ;;  %6270 = vrot.lane.b32.xlu1 %v6154_v58, %s12887_s19 }
 0x6d9   : > { %6260 = vrot.lane.b32.xlu2 %v6154_v58, %s12700_s20 }
 0x6da   : > { %v10057_v10 = vpop.permute.xlu0 %6060  ;;  %v10059_v53 = vpop.permute.xlu1 %6055 }
 0x6db   : > { %v10061_v63 = vpop.permute.xlu2 %6095  ;;  %v12511_v5 = vunpack.i.h.bf16 %v10059_v53  ;;  %v12524_v3 = vunpack.i.l.bf16 %v10057_v10 }
 0x6dc   : > { %v12514_v28 = vunpack.i.h.bf16 %v10061_v63  ;;  %v12489_v34 = vunpack.i.l.bf16 %v10061_v63 }
 0x6de   : > { %v3119_v51 = vsel %vm421_vm2, %v12489_v34, %v12514_v28 }
 0x6e1   : > { %3408 = vperm.xlu2 %5552, %v5015_v62  }
 0x6e2   : > { %v10066_v59 = vpop.permute.xlu0 %6075  ;;  %v10068_v30 = vpop.permute.xlu1 %6070 }
 0x6e3   : > { %v10070_v26 = vpop.permute.xlu2 %6110  ;;  %v12522_v28 = vunpack.i.l.bf16 %v10066_v59 }
 0x6ea   : > { %v10072_v12 = vpop.permute.xlu0 %6090  ;;  %v10074_v1 = vpop.permute.xlu1 %6085 }
 0x6eb   : > { %v10076_v7 = vpop.permute.xlu2 %6125 }
 0x6f2   : > { %v10078_v57 = vpop.permute.xlu0 %6105  ;;  %v10080_v40 = vpop.permute.xlu1 %6100 }
 0x6f3   : > { %v12517_v27 = vunpack.i.h.bf16 %v10078_v57  ;;  %v12491_v49 = vunpack.i.l.bf16 %v10078_v57  ;;  %v12515_v9 = vunpack.i.h.bf16 %v10080_v40  ;;  %v12490_v21 = vunpack.i.l.bf16 %v10080_v40  ;;  %v10086_v22 = vpop.permute.xlu2 %6140 }
 0x6f4   : > { %v12509_v41 = vunpack.i.h.bf16 %v10086_v22  ;;  %v12492_v29 = vunpack.i.l.bf16 %v10086_v22 }
 0x6f5   : > { %v3151_v55 = vsel %vm455_vm0, %v12491_v49, %v12517_v27  ;;  %v3135_v33 = vsel %vm438_vm1, %v12490_v21, %v12515_v9 }
 0x6f6   : > { %3414 = vmatpush.msrb.mxu3 %v3151_v55 }
 0x6f8   : > { %3415 = vmatpush.msrb.mxu3 %v3135_v33 }
 0x6fa   : > { %v10108_v17 = vpop.permute.xlu0 %6120  ;;  %v10110_v56 = vpop.permute.xlu1 %6115  ;;  %3416 = vmatpush.msrb.mxu3 %v3119_v51  ;;  %v3263_v51 = vsel %vm574_vm12, %v12492_v29, %v12509_v41  ;;  %v10267_v41 = vld [vmem:[%s12309_s1 + $0x48] sm:$0xff] }
 0x6fb   : > { %v10112_v52 = vpop.permute.xlu2 %6160  ;;  %v12501_v21 = vunpack.i.h.bf16 %v10108_v17  ;;  %v12499_v49 = vunpack.i.l.bf16 %v10108_v17  ;;  %v12505_v29 = vunpack.i.h.bf16 %v10110_v56 }
 0x6fc   : > { %v12487_v2 = vunpack.i.h.bf16 %v10112_v52  ;;  %v12486_v19 = vunpack.i.l.bf16 %v10112_v52  ;;  %3417 = vmatpush.msrb.mxu3 %v9982_v54 }
 0x6fe   : > { %v10125_v60 = vsel %vm13214_vm14, %v12487_v2, %v12503_v38  ;;  %v10133_v18 = vsel %vm13215_vm9, %v12506_v8, %v12486_v19  ;;  %v12502_v2 = vunpack.i.h.bf16 %v10076_v7  ;;  %vm13218_vm14 = vcmp.lt.s32.totalorder %v6988_v36, 106 }
 0x6ff   : > { %vm13219_vm9 = vcmp.lt.s32.totalorder %v6988_v36, 107 }
 0x702   : > { %v10135_v45 = vpop.permute.xlu0 %6135  ;;  %v10137_v15 = vpop.permute.xlu1 %6130 }
 0x703   : > { %v10139_v46 = vpop.permute.xlu2 %6175  ;;  %v12498_v44 = vunpack.i.h.bf16 %v10135_v45  ;;  %v12494_v58 = vunpack.i.l.bf16 %v10135_v45  ;;  %v12497_v55 = vunpack.i.h.bf16 %v10137_v15  ;;  %v12496_v33 = vunpack.i.l.bf16 %v10137_v15 }
 0x704   : > { %v12488_v54 = vunpack.i.l.bf16 %v10139_v46 }
 0x705   : > { %v3247_v34 = vsel %vm557_vm11, %v12494_v58, %v12498_v44  ;;  %v12508_v58 = vunpack.i.h.bf16 %v10070_v26 }
 0x706   : > { %v10149_v50 = vsel %vm13216_vm8, %v12511_v5, %v12488_v54  ;;  %vm13220_vm8 = vcmp.lt.s32.totalorder %v6988_v36, 109 }
 0x70a   : > { %v10151_v61 = vpop.permute.xlu0 %6145  ;;  %v10153_v20 = vpop.permute.xlu1 %6150 }
 0x70b   : > { %v12516_v11 = vunpack.i.h.bf16 %v10151_v61  ;;  %v12495_v31 = vunpack.i.l.bf16 %v10151_v61  ;;  %v12510_v25 = vunpack.i.h.bf16 %v10153_v20  ;;  %v12493_v0 = vunpack.i.l.bf16 %v10153_v20  ;;  %v10159_v13 = vpop.permute.xlu2 %6190 }
 0x70d   : > { %v3295_v43 = vsel %vm608_vm15, %v12495_v31, %v12516_v11  ;;  %v3279_v62 = vsel %vm591_vm13, %v12493_v0, %v12510_v25  ;;  %v12504_v0 = vunpack.i.l.bf16 %v10110_v56  ;;  %v12507_v31 = vunpack.i.l.bf16 %v10070_v26 }
 0x70e   : > { %3441 = vmatpush.msra.mxu1 %v3295_v43  ;;  %v12521_v25 = vunpack.i.l.bf16 %v10052_v24 }
 0x710   : > { %3442 = vmatpush.msra.mxu1 %v3279_v62  ;;  %v12500_v62 = vunpack.i.l.bf16 %v10076_v7 }
 0x712   : > { %v10185_v43 = vpop.permute.xlu0 %6155  ;;  %v10187_v19 = vpop.permute.xlu1 %6165  ;;  %3443 = vmatpush.msra.mxu1 %v3263_v51  ;;  %v3231_v51 = vsel %vm13217_vm10, %v12496_v33, %v12497_v55  ;;  %vm13222_vm10 = vcmp.lt.s32.totalorder %v6988_v36, 19 }
 0x713   : > { %v10191_v54 = vpop.permute.xlu2 %6205 }
 0x714   : > { %3444 = vmatpush.msra.mxu1 %v3247_v34  ;;  %v3215_v34 = vsel %vm13218_vm14, %v12500_v62, %v12502_v2  ;;  %vm13225_vm14 = vcmp.lt.s32.totalorder %v6988_v36, 20 }
 0x716   : > { %3445 = vmatpush.msra.mxu1 %v3231_v51  ;;  %v3199_v51 = vsel %vm13219_vm9, %v12499_v49, %v12501_v21  ;;  %v3167_v49 = vsel %vm13220_vm8, %v12507_v31, %v12508_v58  ;;  %vm13231_vm9 = vcmp.lt.s32.totalorder %v6988_v36, 21  ;;  %vm13235_vm8 = vcmp.lt.s32.totalorder %v6988_v36, 22 }
 0x718   : > { %3446 = vmatpush.msra.mxu1 %v3215_v34  ;;  %v3183_v34 = vsel %vm489_vm7, %v12504_v0, %v12505_v29  ;;  %v12518_v0 = vunpack.i.h.bf16 %v10191_v54 }
 0x71a   : > { %v10223_v33 = vpop.permute.xlu0 %6170  ;;  %v10225_v55 = vpop.permute.xlu1 %6180  ;;  %3447 = vmatpush.msra.mxu1 %v3199_v51 }
 0x71b   : > { %v10227_v44 = vpop.permute.xlu2 %6220 }
 0x71c   : > { %3448 = vmatpush.msra.mxu1 %v3183_v34  ;;  %v12513_v34 = vunpack.i.l.bf16 %v10072_v12  ;;  %v6222_v11 = vunpack.i.l.bf16 %v10227_v44 }
 0x71e   : > { %3449 = vmatpush.msra.mxu1 %v3167_v49  ;;  %v12519_v49 = vunpack.i.l.bf16 %v10074_v1 }
 0x71f   : > { %5016 = vmatmul.msk.f32.vlgmr.msra.gmra.mxu1 %vm725_vm6, %v10267_v41 }
 0x722   : > { %v10241_v62 = vpop.permute.xlu0 %6185  ;;  %v10243_v51 = vpop.permute.xlu1 %6195 }
 0x723   : > { %v10245_v21 = vpop.permute.xlu2 %6235 }
 0x72a   : > { %v10247_v2 = vpop.permute.xlu0 %6200  ;;  %v10249_v38 = vpop.permute.xlu1 %6210 }
 0x72b   : > { %v12512_v29 = vunpack.i.h.bf16 %v10249_v38  ;;  %v10254_v8 = vpop.permute.xlu2 %6250  ;;  %v12520_v31 = vunpack.i.h.bf16 %v10247_v2 }
 0x72d   : > { %v3100_v58 = vsel %vm400_vm3, %v12512_v29, %v12513_v34  ;;  %v3084_v29 = vsel %vm383_vm4, %v12518_v0, %v12519_v49  ;;  %v13224_v0 = vunpack.i.h.bf16 %v10159_v13 }
 0x72e   : > { %3418 = vmatpush.msrb.mxu3 %v3100_v58  ;;  %v3068_v58 = vsel %vm366_vm5, %v12520_v31, %v12521_v25  ;;  %v13221_v31 = vunpack.i.h.bf16 %v10243_v51 }
 0x730   : > { %3419 = vmatpush.msrb.mxu3 %v3084_v29  ;;  %v3052_v25 = vsel %vm13222_vm10, %v13221_v31, %v12522_v28  ;;  %v13223_v29 = vunpack.i.l.bf16 %v10068_v30  ;;  %v13226_v31 = vunpack.i.h.bf16 %v10078_v57  ;;  %vm13238_vm10 = vcmp.lt.s32.totalorder %v6988_v36, 38 }
 0x732   : > { %v10289_v27 = vpop.permute.xlu0 %6215  ;;  %v10291_v5 = vpop.permute.xlu1 %6225  ;;  %3420 = vmatpush.msrb.mxu3 %v3068_v58  ;;  %v3036_v39 = vsel %vm13225_vm14, %v13224_v0, %v13223_v29  ;;  %v13228_v0 = vunpack.i.h.bf16 %v10151_v61  ;;  %vm13240_vm14 = vcmp.lt.s32.totalorder %v6988_v36, 39 }
 0x733   : > { %v6227_v49 = vunpack.i.l.bf16 %v10291_v5  ;;  %v10296_v34 = vpop.permute.xlu2 %6260  ;;  %v6217_v37 = vunpack.i.l.bf16 %v10289_v27  ;;  %v13227_v6 = vunpack.i.h.bf16 %v10291_v5  ;;  %v12525_v9 = vunpack.i.h.bf16 %v10289_v27 }
 0x734   : > { %v12523_v58 = vunpack.i.l.bf16 %v10296_v34  ;;  %3421 = vmatpush.msrb.mxu3 %v3052_v25 }
 0x735   : > { %v3150_v28 = vsel %vm455_vm0, %v13226_v31, %v6227_v49  ;;  %v3149_v25 = vsel %vm455_vm0, %v6227_v49, %v13227_v6  ;;  %v13230_v6 = vunpack.i.h.bf16 %v10241_v62 }
 0x736   : > { %3422 = vmatpush.msrb.mxu3 %v3036_v39  ;;  %3454 = vmatpush.msra.mxu2 %v3150_v28  ;;  %v3294_v29 = vsel %vm608_vm15, %v13228_v0, %v12523_v58  ;;  %v13232_v28 = vunpack.i.h.bf16 %v10080_v40  ;;  %v12526_v0 = vunpack.i.l.bf16 %v10059_v53  ;;  %v13233_v58 = vunpack.i.h.bf16 %v10227_v44 }
 0x737   : > { %3481 = vmatpush.msrb.mxu0 %v3294_v29  ;;  %3494 = vmatpush.msrb.mxu1 %v3149_v25  ;;  %v3020_v39 = vsel %vm13231_vm9, %v13230_v6, %v13229_v4  ;;  %v6093_v29 = vunpack.i.h.bf16 %v10072_v12  ;;  %v13234_v4 = vunpack.i.h.bf16 %v10225_v55  ;;  %vm13243_vm9 = vcmp.lt.s32.totalorder %v6988_v36, 40 }
 0x738   : > { %v3134_v49 = vsel %vm438_vm1, %v13232_v28, %v6222_v11  ;;  %3423 = vmatpush.msrb.mxu3 %v3020_v39  ;;  %v3133_v25 = vsel %vm438_vm1, %v6222_v11, %v13233_v58  ;;  %v13236_v39 = vunpack.i.h.bf16 %v10061_v63 }
 0x739   : > { %3455 = vmatpush.msra.mxu2 %v3134_v49  ;;  %3495 = vmatpush.msrb.mxu1 %v3133_v25  ;;  %v3004_v6 = vsel %vm13235_vm8, %v13234_v4, %v12524_v3  ;;  %v12527_v49 = vunpack.i.l.bf16 %v10249_v38  ;;  %v3117_v25 = vsel %vm421_vm2, %v6217_v37, %v12525_v9  ;;  %v12528_v4 = vunpack.i.l.bf16 %v10038_v23 }
 0x73a   : > { %v3118_v28 = vsel %vm421_vm2, %v13236_v39, %v6217_v37  ;;  %v10360_v11 = vpop.permute.xlu0 %6230  ;;  %v10362_v58 = vpop.permute.xlu1 %6240  ;;  %3424 = vmatpush.msrb.mxu3 %v3004_v6  ;;  %v6088_v3 = vunpack.i.h.bf16 %v10074_v1  ;;  %v13237_v39 = vunpack.i.h.bf16 %v10139_v46  ;;  %v12529_v37 = vunpack.i.l.bf16 %v10048_v42 }
 0x73b   : > { %3456 = vmatpush.msra.mxu2 %v3118_v28  ;;  %3496 = vmatpush.msrb.mxu1 %v3117_v25  ;;  %v6083_v9 = vunpack.i.h.bf16 %v10052_v24  ;;  %v13239_v25 = vunpack.i.h.bf16 %v10223_v33  ;;  %v12530_v28 = vunpack.i.h.bf16 %v10185_v43  ;;  %vm13247_vm8 = vcmp.lt.s32.totalorder %v6988_v36, 42 }
 0x73c   : > { %v2988_v6 = vsel %vm13238_vm10, %v13237_v39, %v12526_v0  ;;  %v13241_v39 = vunpack.i.l.bf16 %v10072_v12  ;;  %v6078_v0 = vunpack.i.h.bf16 %v10066_v59  ;;  %v13242_v12 = vunpack.i.h.bf16 %v10187_v19 }
 0x73d   : > { %3425 = vmatpush.msrb.mxu3 %v2988_v6  ;;  %3457 = vmatpush.msra.mxu2 %v9985_v35  ;;  %v2972_v31 = vsel %vm13240_vm14, %v13239_v25, %v12528_v4  ;;  %v6202_v35 = vunpack.i.l.bf16 %v10247_v2  ;;  %v6073_v4 = vunpack.i.h.bf16 %v10068_v30  ;;  %vm13249_vm10 = vcmp.lt.s32.totalorder %v6988_v36, 19 }
 0x73e   : > { %3497 = vmatpush.msrb.mxu1 %v10017_v16  ;;  %v3099_v6 = vsel %vm400_vm3, %v13241_v39, %v6093_v29  ;;  %v3098_v16 = vsel %vm400_vm3, %v6093_v29, %v12527_v49  ;;  %v2956_v25 = vsel %vm13243_vm9, %v13242_v12, %v12529_v37  ;;  %v13245_v29 = vunpack.i.l.bf16 %v10191_v54  ;;  %vm13250_vm14 = vmmov %vm13249_vm10 }
 0x73f   : > { %3426 = vmatpush.msrb.mxu3 %v2972_v31  ;;  %3458 = vmatpush.msra.mxu2 %v3099_v6  ;;  %v13244_v31 = vunpack.i.l.bf16 %v10074_v1  ;;  %v12533_v6 = vunpack.i.l.bf16 %v10243_v51  ;;  %v6037_v49 = vunpack.i.l.bf16 %v10033_v32  ;;  %v6263_v12 = vunpack.i.h.bf16 %v10296_v34 }
 0x740   : > { %3498 = vmatpush.msrb.mxu1 %v3098_v16  ;;  %v3082_v16 = vsel %vm383_vm4, %v6088_v3, %v13245_v29  ;;  %v13246_v1 = vunpack.i.l.bf16 %v10052_v24  ;;  %v10434_v24 = vld [vmem:[%s12309_s1 + $0x40] sm:$0xff]  ;;  %v6068_v29 = vunpack.i.h.bf16 %v10043_v14  ;;  %vm13253_vm9 = vcmp.lt.s32.totalorder %v6988_v36, 20 }
 0x741   : > { %v3083_v39 = vsel %vm383_vm4, %v13244_v31, %v6088_v3  ;;  %3427 = vmatpush.msrb.mxu3 %v2956_v25  ;;  %v12532_v25 = vunpack.i.l.bf16 %v10159_v13  ;;  %v3066_v3 = vsel %vm366_vm5, %v6083_v9, %v6202_v35 }
 0x742   : > { %3459 = vmatpush.msra.mxu2 %v3083_v39  ;;  %3499 = vmatpush.msrb.mxu1 %v3082_v16  ;;  %v3067_v31 = vsel %vm366_vm5, %v13246_v1, %v6083_v9  ;;  %v10422_v39 = vpop.permute.xlu0 %6245  ;;  %v10424_v37 = vpop.permute.xlu1 %6255  ;;  %v13248_v16 = vunpack.i.l.bf16 %v10066_v59  ;;  %v12531_v1 = vunpack.i.l.bf16 %v10241_v62  ;;  %v13251_v59 = vunpack.i.l.bf16 %v10296_v34 }
 0x743   : > { %3428 = vmatpush.msrb.mxu3 %v10125_v60  ;;  %v2924_v60 = vsel %vm13247_vm8, %v12530_v28, %v6037_v49  ;;  %v12534_v28 = vunpack.i.l.bf16 %v10225_v55  ;;  %vm13254_vm8 = vmmov %vm13253_vm9 }
 0x744   : > { %3460 = vmatpush.msra.mxu2 %v3067_v31  ;;  %3500 = vmatpush.msrb.mxu1 %v3066_v3  ;;  %v3051_v9 = vsel %vm13249_vm10, %v13248_v16, %v6078_v0  ;;  %v3050_v31 = vsel %vm13250_vm14, %v6078_v0, %v12533_v6  ;;  %v6063_v3 = vunpack.i.h.bf16 %v10057_v10  ;;  %v3293_v16 = vsel %vm608_vm15, %v13251_v59, %v6263_v12 }
 0x745   : > { %3429 = vmatpush.msrb.mxu3 %v2924_v60  ;;  %v13252_v60 = vunpack.i.l.bf16 %v10068_v30  ;;  %v3034_v0 = vsel %vm13254_vm8, %v6073_v4, %v12532_v25  ;;  %vm13256_vm10 = vcmp.lt.s32.totalorder %v6988_v36, 21 }
 0x746   : > { %3461 = vmatpush.msra.mxu2 %v3051_v9  ;;  %3501 = vmatpush.msrb.mxu1 %v3050_v31  ;;  %v13255_v31 = vunpack.i.l.bf16 %v10043_v14  ;;  %vm13257_vm14 = vmmov %vm13256_vm10  ;;  %v6172_v14 = vunpack.i.l.bf16 %v10223_v33 }
 0x747   : > { %3430 = vmatmul.f32.vlgmr.msrb.gmra.mxu3 %v10434_v24  ;;  %v3035_v9 = vsel %vm13253_vm9, %v13252_v60, %v6073_v4  ;;  %v3018_v30 = vsel %vm13257_vm14, %v6068_v29, %v12531_v1  ;;  %v13258_v60 = vunpack.i.l.bf16 %v10057_v10  ;;  %vm13259_vm9 = vcmp.lt.s32.totalorder %v6988_v36, 22 }
 0x748   : > { %3521 = vmatpush.msra.mxu3 %v3293_v16  ;;  %3462 = vmatpush.msra.mxu2 %v3035_v9  ;;  %v3019_v59 = vsel %vm13256_vm10, %v13255_v31, %v6068_v29  ;;  %v6053_v16 = vunpack.i.h.bf16 %v10038_v23  ;;  %v6048_v9 = vunpack.i.h.bf16 %v10048_v42  ;;  %vm13260_vm8 = vmmov %vm13259_vm9  ;;  %v13262_v1 = vunpack.i.l.bf16 %v10059_v53 }
 0x749   : > { %3502 = vmatpush.msrb.mxu1 %v3034_v0  ;;  %v3003_v4 = vsel %vm13259_vm9, %v13258_v60, %v6063_v3  ;;  %v3002_v29 = vsel %vm13260_vm8, %v6063_v3, %v12534_v28  ;;  %v13261_v60 = vunpack.i.h.bf16 %v10059_v53  ;;  %vm13263_vm10 = vcmp.lt.s32.totalorder %v6988_v36, 38 }
 0x74a   : > { %3463 = vmatpush.msra.mxu2 %v3019_v59  ;;  %v10484_v0 = vpop.permute.xlu0 %6265  ;;  %v10486_v31 = vpop.permute.xlu1 %6270  ;;  %v6257_v3 = vunpack.i.l.bf16 %v10424_v37  ;;  %vm13265_vm14 = vcmp.lt.s32.totalorder %v6988_v36, 39  ;;  %v13266_v28 = vunpack.i.h.bf16 %v10153_v20  ;;  %vm13269_vm8 = vcmp.lt.s32.totalorder %v6988_v36, 40 }
 0x74b   : > { %3503 = vmatpush.msrb.mxu1 %v3018_v30  ;;  %v6268_v59 = vunpack.i.h.bf16 %v10484_v0  ;;  %v6267_v10 = vunpack.i.l.bf16 %v10484_v0  ;;  %v6272_v30 = vunpack.i.l.bf16 %v10486_v31  ;;  %v2987_v25 = vsel %vm13263_vm10, %v13262_v1, %v13261_v60  ;;  %vm13267_vm9 = vmmov %vm13265_vm14 }
 0x74c   : > { %3464 = vmatpush.msra.mxu2 %v3003_v4  ;;  %v6167_v4 = vunpack.i.l.bf16 %v10187_v19  ;;  %v6273_v6 = vunpack.i.h.bf16 %v10486_v31  ;;  %v13264_v0 = vunpack.i.l.bf16 %v10038_v23  ;;  %v6258_v60 = vunpack.i.h.bf16 %v10424_v37  ;;  %vm13271_vm10 = vmmov %vm13269_vm8 }
 0x74d   : > { %3504 = vmatpush.msrb.mxu1 %v3002_v29  ;;  %v3278_v53 = vsel %vm591_vm13, %v13266_v28, %v6267_v10  ;;  %v3277_v1 = vsel %vm591_vm13, %v6267_v10, %v6268_v59  ;;  %v2970_v23 = vsel %vm13267_vm9, %v6053_v16, %v6172_v14  ;;  %v13268_v28 = vunpack.i.l.bf16 %v10048_v42 }
 0x74e   : > { %3465 = vmatpush.msra.mxu2 %v2987_v25  ;;  %v2971_v29 = vsel %vm13265_vm14, %v13264_v0, %v6053_v16  ;;  %3482 = vmatpush.msrb.mxu0 %v3278_v53  ;;  %v6252_v25 = vunpack.i.l.bf16 %v10254_v8  ;;  %v13270_v37 = vunpack.i.h.bf16 %v10086_v22  ;;  %v6253_v16 = vunpack.i.h.bf16 %v10254_v8 }
 0x74f   : > { %3505 = vmatpush.msrb.mxu1 %v10149_v50  ;;  %v6038_v50 = vunpack.i.h.bf16 %v10033_v32  ;;  %3522 = vmatpush.msra.mxu3 %v3277_v1  ;;  %v2955_v10 = vsel %vm13269_vm8, %v13268_v28, %v6048_v9  ;;  %v2954_v53 = vsel %vm13271_vm10, %v6048_v9, %v6167_v4  ;;  %v3261_v42 = vsel %vm574_vm12, %v6272_v30, %v6273_v6 }
 0x750   : > { %3466 = vmatpush.msra.mxu2 %v2971_v29  ;;  %v3262_v0 = vsel %vm574_vm12, %v13270_v37, %v6272_v30  ;;  %v6157_v29 = vunpack.i.l.bf16 %v10185_v43  ;;  %v13272_v1 = vunpack.i.h.bf16 %v10050_v47  ;;  %vm13274_vm14 = vcmp.lt.s32.totalorder %v6988_v36, 41 }
 0x751   : > { %3506 = vmatpush.msrb.mxu1 %v2970_v23  ;;  %3483 = vmatpush.msrb.mxu0 %v3262_v0  ;;  %v13273_v23 = vunpack.i.l.bf16 %v10050_v47  ;;  %v13275_v28 = vunpack.i.h.bf16 %v10135_v45  ;;  %v6247_v9 = vunpack.i.l.bf16 %v10422_v39  ;;  %v3245_v30 = vsel %vm557_vm11, %v6257_v3, %v6258_v60 }
 0x752   : > { %3467 = vmatpush.msra.mxu2 %v2955_v10  ;;  %3523 = vmatpush.msra.mxu3 %v3261_v42  ;;  %v6248_v37 = vunpack.i.h.bf16 %v10422_v39  ;;  %vm13276_vm9 = vcmp.lt.s32.totalorder %v6988_v36, 42  ;;  %v13277_v0 = vunpack.i.h.bf16 %v10137_v15  ;;  %vm13278_vm8 = vcmp.lt.s32.totalorder %v6988_v36, 90 }
 0x753   : > { %3507 = vmatpush.msrb.mxu1 %v2954_v53  ;;  %v2939_v8 = vsel %vm13274_vm14, %v13273_v23, %v13272_v1  ;;  %v3246_v10 = vsel %vm557_vm11, %v13275_v28, %v6257_v3  ;;  %v2923_v47 = vsel %vm13276_vm9, %v6037_v49, %v6038_v50  ;;  %v6242_v42 = vunpack.i.l.bf16 %v10362_v58  ;;  %vm13279_vm10 = vmmov %vm13276_vm9 }
 0x754   : > { %3468 = vmatpush.msra.mxu2 %v2939_v8  ;;  %3484 = vmatpush.msrb.mxu0 %v3246_v10  ;;  %v3230_v53 = vsel %vm13278_vm8, %v13277_v0, %v6252_v25  ;;  %vm13280_vm14 = vmmov %vm13278_vm8  ;;  %v6243_v39 = vunpack.i.h.bf16 %v10362_v58  ;;  %v6237_v49 = vunpack.i.l.bf16 %v10245_v21  ;;  %v13281_v3 = vunpack.i.l.bf16 %v10151_v61 }
 0x755   : > { %3508 = vmatpush.msrb.mxu1 %v10133_v18  ;;  %3524 = vmatpush.msra.mxu3 %v3245_v30  ;;  %v2922_v18 = vsel %vm13279_vm10, %v6038_v50, %v6157_v29  ;;  %v3229_v32 = vsel %vm13280_vm14, %v6252_v25, %v6253_v16  ;;  %v13282_v1 = vunpack.i.h.bf16 %v10076_v7  ;;  %vm13283_vm9 = vcmp.lt.s32.totalorder %v6988_v36, 106 }
 0x756   : > { %3469 = vmatpush.msra.mxu2 %v2923_v47  ;;  %3485 = vmatpush.msrb.mxu0 %v3230_v53  ;;  %v3296_v50 = vsel %vm608_vm15, %v6263_v12, %v13281_v3  ;;  %v6238_v25 = vunpack.i.h.bf16 %v10245_v21  ;;  %vm13284_vm8 = vmmov %vm13283_vm9  ;;  %v6232_v8 = vunpack.i.l.bf16 %v10360_v11  ;;  %v13285_v61 = vunpack.i.l.bf16 %v10153_v20 }
 0x757   : > { %3509 = vmatpush.msrb.mxu1 %v2922_v18  ;;  %3525 = vmatpush.msra.mxu3 %v3229_v32  ;;  %v3214_v58 = vsel %vm13283_vm9, %v13282_v1, %v6247_v9  ;;  %v3213_v23 = vsel %vm13284_vm8, %v6247_v9, %v6248_v37  ;;  %v13286_v12 = vunpack.i.h.bf16 %v10108_v17  ;;  %vm13287_vm10 = vcmp.lt.s32.totalorder %v6988_v36, 107 }
 0x758   : > { %3470 = vmatmul.f32.vlgmr.msra.gmra.mxu2 %v10434_v24  ;;  %3510 = vmatmul.f32.vlgmr.msrb.gmra.mxu1 %v10434_v24  ;;  %v3280_v34 = vsel %vm591_vm13, %v6268_v59, %v13285_v61  ;;  %v6233_v21 = vunpack.i.h.bf16 %v10360_v11  ;;  %vm13288_vm14 = vmmov %vm13287_vm10  ;;  %v13289_v9 = vunpack.i.l.bf16 %v10086_v22  ;;  %v13290_v59 = vunpack.i.h.bf16 %v10110_v56 }
 0x759   : > { %3561 = vmatpush.msrb.mxu2 %v3296_v50  ;;  %3486 = vmatpush.msrb.mxu0 %v3214_v58  ;;  %v3198_v28 = vsel %vm13287_vm10, %v13286_v12, %v6242_v42  ;;  %v3197_v10 = vsel %vm13288_vm14, %v6242_v42, %v6243_v39  ;;  %v3181_v11 = vsel %vm489_vm7, %v6237_v49, %v6238_v25  ;;  %v13291_v47 = vunpack.i.l.bf16 %v10135_v45 }
 0x75a   : > { %3526 = vmatpush.msra.mxu3 %v3213_v23  ;;  %v3264_v20 = vsel %vm574_vm12, %v6273_v6, %v13289_v9  ;;  %v3182_v30 = vsel %vm489_vm7, %v13290_v59, %v6237_v49  ;;  %v13292_v31 = vunpack.i.h.bf16 %v10070_v26  ;;  %vm13293_vm9 = vcmp.lt.s32.totalorder %v6988_v36, 109 }
 0x75b   : > { %3562 = vmatpush.msrb.mxu2 %v3280_v34  ;;  %3487 = vmatpush.msrb.mxu0 %v3198_v28  ;;  %v3248_v22 = vsel %vm557_vm11, %v6258_v60, %v13291_v47  ;;  %vm13294_vm8 = vmmov %vm13293_vm9  ;;  %v13295_v53 = vunpack.i.l.bf16 %v10078_v57  ;;  %v13296_v45 = vunpack.i.h.bf16 %v10291_v5  ;;  %v13297_v42 = vunpack.i.l.bf16 %v10137_v15 }
 0x75c   : > { %3527 = vmatpush.msra.mxu3 %v3197_v10  ;;  %v3166_v6 = vsel %vm13293_vm9, %v13292_v31, %v6232_v8  ;;  %v3165_v0 = vsel %vm13294_vm8, %v6232_v8, %v6233_v21  ;;  %vm13298_vm10 = vcmp.lt.s32.totalorder %v6988_v36, 90  ;;  %v13299_v32 = vunpack.i.l.bf16 %v10080_v40 }
 0x75d   : > { %3563 = vmatpush.msrb.mxu2 %v3264_v20  ;;  %3488 = vmatpush.msrb.mxu0 %v3182_v30  ;;  %v3152_v60 = vsel %vm455_vm0, %v13296_v45, %v13295_v53  ;;  %v3232_v18 = vsel %vm13298_vm10, %v6253_v16, %v13297_v42  ;;  %v13300_v49 = vunpack.i.h.bf16 %v10227_v44  ;;  %v13301_v5 = vunpack.i.l.bf16 %v10076_v7 }
 0x75e   : > { %3528 = vmatpush.msra.mxu3 %v3181_v11  ;;  %vm13302_vm14 = vcmp.lt.s32.totalorder %v6988_v36, 106  ;;  %v13303_v15 = vunpack.i.l.bf16 %v10061_v63  ;;  %v13304_v50 = vunpack.i.h.bf16 %v10289_v27  ;;  %v13305_v40 = vunpack.i.l.bf16 %v10108_v17 }
 0x75f   : > { %3564 = vmatpush.msrb.mxu2 %v3248_v22  ;;  %3489 = vmatpush.msrb.mxu0 %v3166_v6  ;;  %v3136_v57 = vsel %vm438_vm1, %v13300_v49, %v13299_v32  ;;  %v3216_v3 = vsel %vm13302_vm14, %v6248_v37, %v13301_v5  ;;  %vm13306_vm9 = vcmp.lt.s32.totalorder %v6988_v36, 107  ;;  %v13307_v7 = vunpack.i.l.bf16 %v10110_v56 }
 0x760   : > { %3529 = vmatpush.msra.mxu3 %v3165_v0  ;;  %5017 = vmatmul.msk.f32.vlgmr.msrb.gmra.mxu0 %vm725_vm6, %v10267_v41  ;;  %v3120_v16 = vsel %vm421_vm2, %v13304_v50, %v13303_v15  ;;  %v3200_v44 = vsel %vm13306_vm9, %v6243_v39, %v13305_v40  ;;  %v13308_v63 = vunpack.i.h.bf16 %v10249_v38  ;;  %v13309_v27 = vunpack.i.l.bf16 %v10249_v38  ;;  %v13338_v0 = vld [vmem:[#allocation14_spill] sm:$0xff] }
 0x761   : > { %5018 = vmatmul.msk.f32.vlgmr.msra.gmra.mxu3 %vm725_vm6, %v10267_v41  ;;  %3534 = vmatpush.msra.mxu0 %v3152_v60  ;;  %v3184_v37 = vsel %vm489_vm7, %v6238_v25, %v13307_v7  ;;  %v13310_v17 = vunpack.i.l.bf16 %v10070_v26  ;;  %v13312_v56 = vunpack.i.l.bf16 %v10191_v54  ;;  %v13313_v38 = vunpack.i.h.bf16 %v10247_v2  ;;  %v13339_v60 = vld [vmem:[#allocation12_spill] sm:$0xff] }
 0x762   : > { %3565 = vmatpush.msrb.mxu2 %v3232_v18  ;;  %v3097_v1 = vsel %vm400_vm3, %v13309_v27, %v13308_v63  ;;  %v13314_v25 = vunpack.i.h.bf16 %v10243_v51  ;;  %v13315_v23 = vunpack.i.l.bf16 %v10243_v51  ;;  %vm13316_vm10 = vcmp.lt.s32.totalorder %v6988_v36, 19  ;;  %v13347_v27 = vld [vmem:[#allocation8_spill] sm:$0xff] }
 0x763   : > { %3535 = vmatpush.msra.mxu0 %v3136_v57  ;;  %v3168_v39 = vsel %vm13294_vm8, %v6233_v21, %v13310_v17  ;;  %v3065_v26 = vsel %vm366_vm5, %v6202_v35, %v13313_v38  ;;  %v13317_v8 = vunpack.i.h.bf16 %v10159_v13  ;;  %vm13319_vm14 = vcmp.lt.s32.totalorder %v6988_v36, 20  ;;  %v13348_v17 = vld [vmem:[#allocation7_spill] sm:$0xff] }
 0x764   : > { %3566 = vmatpush.msrb.mxu2 %v3216_v3  ;;  %v13320_v2 = vunpack.i.h.bf16 %v10241_v62  ;;  %v13321_v35 = vunpack.i.l.bf16 %v10241_v62  ;;  %vm13322_vm9 = vcmp.lt.s32.totalorder %v6988_v36, 21  ;;  %v13323_v51 = vunpack.i.h.bf16 %v10225_v55 }
 0x765   : > { %3536 = vmatpush.msra.mxu0 %v3120_v16  ;;  %v13324_v12 = vunpack.i.l.bf16 %v10225_v55  ;;  %vm13325_vm8 = vcmp.lt.s32.totalorder %v6988_v36, 22  ;;  %v13327_v21 = vunpack.i.l.bf16 %v10139_v46  ;;  %v13329_v62 = vunpack.i.h.bf16 %v10223_v33 }
 0x766   : > { %3567 = vmatpush.msrb.mxu2 %v3200_v44  ;;  %v3017_v34 = vsel %vm13322_vm9, %v13321_v35, %v13320_v2  ;;  %v13331_v55 = vunpack.i.h.bf16 %v10187_v19  ;;  %vm13332_vm9 = vcmp.lt.s32.totalorder %v6988_v36, 40  ;;  %v13334_v59 = vunpack.i.l.bf16 %v10112_v52  ;;  %v13344_v44 = vld [vmem:[#allocation11_spill] sm:$0xff] }
 0x767   : > { %3537 = vmatpush.msra.mxu0 %v10014_v48  ;;  %v13311_v48 = vunpack.i.h.bf16 %v10191_v54  ;;  %v3049_v54 = vsel %vm13316_vm10, %v13315_v23, %v13314_v25  ;;  %v3001_v28 = vsel %vm13325_vm8, %v13324_v12, %v13323_v51  ;;  %vm13328_vm10 = vcmp.lt.s32.totalorder %v6988_v36, 38 }
 0x768   : > { %3568 = vmatpush.msrb.mxu2 %v3184_v37  ;;  %v2953_v20 = vsel %vm13332_vm9, %v6167_v4, %v13331_v55  ;;  %vm13335_vm8 = vcmp.lt.s32.totalorder %v6988_v36, 41  ;;  %v13336_v33 = vunpack.i.h.bf16 %v10185_v43  ;;  %v3409_v4 = vpop.permute.xlu2 %3408  ;;  %v13340_v43 = vld [vmem:[#allocation5_spill] sm:$0xff] }
 0x769   : > { %3538 = vmatpush.msra.mxu0 %v3097_v1  ;;  %v3081_v58 = vsel %vm383_vm4, %v13312_v56, %v13311_v48  ;;  %v13345_v37 = vld [vmem:[#allocation13_spill] sm:$0xff] }
 0x76a   : > { %3569 = vmatpush.msrb.mxu2 %v3168_v39 }
 0x76b   : > { %3539 = vmatpush.msra.mxu0 %v3081_v58  ;;  %5019 = vmatmul.msk.f32.vlgmr.msrb.gmra.mxu2 %vm725_vm6, %v10267_v41  ;;  %v13318_v41 = vunpack.i.l.bf16 %v10159_v13  ;;  %v13326_v13 = vunpack.i.h.bf16 %v10139_v46  ;;  %v13333_v46 = vunpack.i.h.bf16 %v10112_v52 }
 0x76d   : > { %3540 = vmatpush.msra.mxu0 %v3065_v26  ;;  %v3033_v61 = vsel %vm13319_vm14, %v13318_v41, %v13317_v8  ;;  %v2985_v10 = vsel %vm13328_vm10, %v13327_v21, %v13326_v13  ;;  %vm13330_vm14 = vcmp.lt.s32.totalorder %v6988_v36, 39  ;;  %v2937_v30 = vsel %vm13335_vm8, %v13334_v59, %v13333_v46 }
 0x76e   : > { %v2969_v9 = vsel %vm13330_vm14, %v6172_v14, %v13329_v62  ;;  %vm13337_vm10 = vcmp.lt.s32.totalorder %v6988_v36, 42  ;;  %vm13352_vm14 = vmmov %vm13332_vm9  ;;  %vm13353_vm8 = vcmp.lt.s32.totalorder %v6988_v36, 22 }
 0x76f   : > { %3541 = vmatpush.msra.mxu0 %v3049_v54  ;;  %v2921_v14 = vsel %vm13337_vm10, %v6157_v29, %v13336_v33  ;;  %v13342_v29 = vld [vmem:[#allocation3_spill] sm:$0xff]  ;;  %vm13355_vm10 = vcmp.lt.s32.totalorder %v6988_v36, 19 }
 0x771   : > { %3542 = vmatpush.msra.mxu0 %v3033_v61 }
 0x773   : > { %3543 = vmatpush.msra.mxu0 %v3017_v34  ;;  %v5022_v34 = vld [vmem:[%s12310_s2 + $0x28] sm:$0xff] }
 0x775   : > { %3544 = vmatpush.msra.mxu0 %v3001_v28 }
 0x777   : > { %3545 = vmatpush.msra.mxu0 %v2985_v10 }
 0x779   : > { %3546 = vmatpush.msra.mxu0 %v2969_v9 }
 0x77b   : > { %3547 = vmatpush.msra.mxu0 %v2953_v20 }
 0x77d   : > { %3548 = vmatpush.msra.mxu0 %v2937_v30 }
 0x77f   : > { %3549 = vmatpush.msra.mxu0 %v2921_v14 }
 0x780   : > { %3550 = vmatmul.f32.vlgmr.msra.gmra.mxu0 %v10434_v24 }
 0x79c   : > { %v3451_v47 = vpop.f32.mrf.mxu1 }
 0x7ca   : > { %v3431_v19 = vpop.f32.mrf.mxu3 }
 0x7cb   : > { %v3432_v11 = vadd.f32 %v3431_v19, %v3409_v4 }
 0x7cd   : > { %v3452_v22 = vadd.f32 %v3451_v47, %v3432_v11 }
 0x7cf   : > { %v3574_v53 = vadd.f32 %v3452_v22, %v13338_v0 }
 0x7d1   : > { %v10742_v18 = vmul.f32 %v3574_v53, %v13340_v43 }
 0x7d3   : > { %13341 = vst [vmem:[#allocation4_spill] sm:$0xff] %v10742_v18 }
 0x7d5   : > { %v3511_v5 = vpop.f32.mrf.mxu1 }
 0x7d6   : > { %v3512_v50 = vadd.f32 %v3511_v5, %v3409_v4 }
 0x7db   : > { %v3471_v52 = vpop.f32.mrf.mxu2 }
 0x7dc   : > { %v3472_v31 = vadd.f32 %v3471_v52, %v3409_v4 }
 0x7dd   : > { %v3491_v6 = vpop.f32.mrf.mxu0 }
 0x7de   : > { %v3492_v45 = vadd.f32 %v3491_v6, %v3472_v31 }
 0x7e0   : > { %v3575_v42 = vadd.f32 %v3492_v45, %v13339_v60 }
 0x7e2   : > { %v10745_v32 = vmul.f32 %v3575_v42, %v13342_v29 }
 0x7e4   : > { %13343 = vst [vmem:[#allocation6_spill] sm:$0xff] %v10745_v32  ;;  %v6284_v24 = vpack.i.bf16 %v10745_v32, %v10742_v18  ;;  %v3531_v15 = vpop.f32.mrf.mxu3 }
 0x7e5   : > { %v3532_v40 = vadd.f32 %v3531_v15, %v3512_v50 }
 0x7e6   : > { %6285 = vrot.lane.b32.xlu1 %v6284_v24, %s6754_s23  ;;  %6280 = vrot.lane.b32.xlu2 %v6284_v24, %s6752_s21 }
 0x7e7   : > { %6275 = vrot.lane.b32.xlu0 %v6284_v24, %s6753_s22  ;;  %v3576_v63 = vadd.f32 %v3532_v40, %v13345_v37 }
 0x7e9   : > { %v10773_v39 = vmul.f32 %v3576_v63, %v13348_v17 }
 0x7eb   : > { %13349 = vst [vmem:[#allocation9_spill] sm:$0xff] %v10773_v39 }
 0x7ee   : > { %6300 = vrot.lane.b32.xlu1 %v6284_v24, %s6757_s26  ;;  %6295 = vrot.lane.b32.xlu2 %v6284_v24, %s6756_s25  ;;  %v3571_v3 = vpop.f32.mrf.mxu2 }
 0x7ef   : > { %6290 = vrot.lane.b32.xlu0 %v6284_v24, %s6755_s24 }
 0x7f6   : > { %6315 = vrot.lane.b32.xlu1 %v6284_v24, %s6760_s29  ;;  %6310 = vrot.lane.b32.xlu2 %v6284_v24, %s12535_s28 }
 0x7f7   : > { %6305 = vrot.lane.b32.xlu0 %v6284_v24, %s6758_s27 }
 0x7fd   : > { %v3551_v49 = vpop.f32.mrf.mxu0 }
 0x7fe   : > { %6330 = vrot.lane.b32.xlu1 %v6284_v24, %s6763_s6  ;;  %6325 = vrot.lane.b32.xlu2 %v6284_v24, %s12537_s5  ;;  %v3552_v57 = vadd.f32 %v3551_v49, %v3409_v4 }
 0x7ff   : > { %6320 = vrot.lane.b32.xlu0 %v6284_v24, %s6761_s30 }
 0x800   : > { %v3572_v16 = vadd.f32 %v3571_v3, %v3552_v57 }
 0x802   : > { %v3577_v7 = vadd.f32 %v3572_v16, %v13344_v44 }
 0x804   : > { %v10770_v1 = vmul.f32 %v3577_v7, %v13347_v27 }
 0x806   : > { %6355 = vrot.lane.b32.xlu1 %v6284_v24, %s12699_s17  ;;  %6340 = vrot.lane.b32.xlu2 %v6284_v24, %s6766_s9  ;;  %v6379_v48 = vpack.i.bf16 %v10770_v1, %v10773_v39 }
 0x807   : > { %6335 = vrot.lane.b32.xlu0 %v6284_v24, %s6764_s7 }
 0x80e   : > { %6365 = vrot.lane.b32.xlu1 %v6284_v24, %s13030_s14  ;;  %6360 = vrot.lane.b32.xlu2 %v6284_v24, %s12887_s19 }
 0x80f   : > { %6345 = vrot.lane.b32.xlu0 %v6284_v24, %s13346_s8 }
 0x816   : > { %6380 = vrot.lane.b32.xlu1 %v6379_v48, %s6753_s22  ;;  %6375 = vrot.lane.b32.xlu2 %v6284_v24, %s12886_s13 }
 0x817   : > { %6350 = vrot.lane.b32.xlu0 %v6284_v24, %s12700_s20 }
 0x81e   : > { %6395 = vrot.lane.b32.xlu1 %v6379_v48, %s6755_s24  ;;  %6390 = vrot.lane.b32.xlu2 %v6379_v48, %s6754_s23 }
 0x81f   : > { %6370 = vrot.lane.b32.xlu0 %v6284_v24, %s13031_s18 }
 0x826   : > { %6410 = vrot.lane.b32.xlu1 %v6379_v48, %s6758_s27  ;;  %6405 = vrot.lane.b32.xlu2 %v6379_v48, %s6757_s26 }
 0x827   : > { %6385 = vrot.lane.b32.xlu0 %v6379_v48, %s6752_s21 }
 0x82e   : > { %6425 = vrot.lane.b32.xlu1 %v6379_v48, %s6761_s30  ;;  %6420 = vrot.lane.b32.xlu2 %v6379_v48, %s6760_s29 }
 0x82f   : > { %6400 = vrot.lane.b32.xlu0 %v6379_v48, %s6756_s25 }
 0x836   : > { %6440 = vrot.lane.b32.xlu1 %v6379_v48, %s6764_s7  ;;  %6435 = vrot.lane.b32.xlu2 %v6379_v48, %s6763_s6 }
 0x837   : > { %6415 = vrot.lane.b32.xlu0 %v6379_v48, %s12535_s28  ;;  %s13516_s28 = smov 2  }
 0x83e   : > { %6445 = vrot.lane.b32.xlu1 %v6379_v48, %s6766_s9  ;;  %6460 = vrot.lane.b32.xlu2 %v6379_v48, %s13346_s8 }
 0x83f   : > { %6430 = vrot.lane.b32.xlu0 %v6379_v48, %s12537_s5  ;;  %s13517_s5 = smov 20  }
 0x840   : > { %v10795_v56 = vpop.permute.xlu2 %6280 }
 0x846   : > { %6450 = vrot.lane.b32.xlu1 %v6284_v24, %s13350_s12  ;;  %6465 = vrot.lane.b32.xlu2 %v6284_v24, %s13211_s11 }
 0x847   : > { %6455 = vrot.lane.b32.xlu0 %v6284_v24, %s13210_s10 }
 0x848   : > { %v10800_v58 = vpop.permute.xlu2 %6295 }
 0x84e   : > { %6480 = vrot.lane.b32.xlu1 %v6379_v48, %s12887_s19  ;;  %6475 = vrot.lane.b32.xlu2 %v6379_v48, %s12699_s17 }
 0x84f   : > { %6470 = vrot.lane.b32.xlu0 %v6379_v48, %s12700_s20 }
 0x850   : > { %v10805_v38 = vpop.permute.xlu2 %6310 }
 0x856   : > { %6495 = vrot.lane.b32.xlu1 %v6379_v48, %s12886_s13  ;;  %6490 = vrot.lane.b32.xlu2 %v6379_v48, %s13031_s18 }
 0x857   : > { %6485 = vrot.lane.b32.xlu0 %v6379_v48, %s13030_s14 }
 0x858   : > { %v10810_v26 = vpop.permute.xlu1 %6285  ;;  %v10812_v25 = vpop.permute.xlu2 %6325 }
 0x859   : > { %v10814_v23 = vpop.permute.xlu0 %6275  ;;  %v12559_v55 = vunpack.i.h.bf16 %v10810_v26  ;;  %v12554_v20 = vunpack.i.l.bf16 %v10810_v26 }
 0x85a   : > { %v12550_v49 = vunpack.i.h.bf16 %v10814_v23 }
 0x85e   : > { %6505 = vrot.lane.b32.xlu1 %v6379_v48, %s13210_s10  ;;  %6510 = vrot.lane.b32.xlu2 %v6379_v48, %s13211_s11 }
 0x85f   : > { %6500 = vrot.lane.b32.xlu0 %v6379_v48, %s13350_s12 }
 0x860   : > { %v10819_v54 = vpop.permute.xlu1 %6300  ;;  %v10821_v8 = vpop.permute.xlu2 %6340 }
 0x861   : > { %v6343_v41 = vunpack.i.h.bf16 %v10821_v8  ;;  %v12546_v61 = vunpack.i.l.bf16 %v10821_v8  ;;  %v10825_v2 = vpop.permute.xlu0 %6290  ;;  %v12565_v11 = vunpack.i.h.bf16 %v10819_v54 }
 0x862   : > { %v13391_v43 = vunpack.i.l.bf16 %v10825_v2 }
 0x863   : > { %v3820_v35 = vsel %vm455_vm0, %v12546_v61, %v6343_v41 }
 0x864   : > { %4083 = vmatpush.msrb.mxu3 %v3820_v35 }
 0x867   : > { %4077 = vperm.xlu0 %5311, %v5022_v34  }
 0x868   : > { %v10836_v51 = vpop.permute.xlu1 %6315  ;;  %v10838_v12 = vpop.permute.xlu2 %6360 }
 0x869   : > { %v10840_v28 = vpop.permute.xlu0 %6305  ;;  %v12568_v57 = vunpack.i.h.bf16 %v10836_v51  ;;  %v12562_v63 = vunpack.i.h.bf16 %v10838_v12  ;;  %v12549_v48 = vunpack.i.l.bf16 %v10838_v12 }
 0x870   : > { %v10842_v13 = vpop.permute.xlu1 %6330  ;;  %v10844_v21 = vpop.permute.xlu2 %6375 }
 0x871   : > { %v10846_v10 = vpop.permute.xlu0 %6320  ;;  %v12556_v61 = vunpack.i.l.bf16 %v10844_v21  ;;  %v13372_v29 = vunpack.i.l.bf16 %v10842_v13 }
 0x878   : > { %v10848_v62 = vpop.permute.xlu1 %6355  ;;  %v10850_v9 = vpop.permute.xlu2 %6390 }
 0x879   : > { %13351 = vst [vmem:[#allocation10_spill] sm:$0xff] %v10850_v9  ;;  %v12541_v46 = vunpack.i.h.bf16 %v10850_v9  ;;  %v12540_v59 = vunpack.i.l.bf16 %v10850_v9  ;;  %v10856_v30 = vpop.permute.xlu0 %6335  ;;  %v12566_v50 = vunpack.i.h.bf16 %v10848_v62  ;;  %v12547_v16 = vunpack.i.l.bf16 %v10848_v62 }
 0x87a   : > { %v12570_v52 = vunpack.i.h.bf16 %v10856_v30  ;;  %v12544_v31 = vunpack.i.l.bf16 %v10856_v30 }
 0x87b   : > { %v10864_v33 = vsel %vm13352_vm14, %v12541_v46, %v12554_v20  ;;  %v10872_v14 = vsel %vm13332_vm9, %v12559_v55, %v12540_v59  ;;  %vm13356_vm14 = vcmp.lt.s32.totalorder %v6988_v36, 42  ;;  %vm13357_vm9 = vcmp.lt.s32.totalorder %v6988_v36, 39 }
 0x87c   : > { %v3788_v60 = vsel %vm421_vm2, %v12544_v31, %v12570_v52 }
 0x880   : > { %v10874_v19 = vpop.permute.xlu1 %6365  ;;  %v10876_v4 = vpop.permute.xlu2 %6405 }
 0x881   : > { %v12542_v47 = vunpack.i.l.bf16 %v10876_v4  ;;  %v10880_v22 = vpop.permute.xlu0 %6345  ;;  %v12560_v34 = vunpack.i.h.bf16 %v10874_v19 }
 0x882   : > { %v6348_v6 = vunpack.i.h.bf16 %v10880_v22  ;;  %v12545_v0 = vunpack.i.l.bf16 %v10880_v22 }
 0x883   : > { %v10892_v53 = vsel %vm13353_vm8, %v12565_v11, %v12542_v47  ;;  %v12569_v47 = vunpack.i.l.bf16 %v10842_v13  ;;  %vm13358_vm8 = vcmp.lt.s32.totalorder %v6988_v36, 90 }
 0x884   : > { %v3804_v45 = vsel %vm438_vm1, %v12545_v0, %v6348_v6 }
 0x885   : > { %4084 = vmatpush.msrb.mxu3 %v3804_v45  ;;  %v12552_v45 = vunpack.i.l.bf16 %v10874_v19 }
 0x887   : > { %4085 = vmatpush.msrb.mxu3 %v3788_v60  ;;  %v3948_v60 = vsel %vm591_vm13, %v12547_v16, %v12566_v50 }
 0x888   : > { %v10906_v42 = vpop.permute.xlu1 %6380  ;;  %v10908_v24 = vpop.permute.xlu2 %6420 }
 0x889   : > { %13354 = vst [vmem:[#allocation14_spill] sm:$0xff] %v10906_v42  ;;  %v12539_v5 = vunpack.i.l.bf16 %v10906_v42  ;;  %v12543_v3 = vunpack.i.l.bf16 %v10908_v24  ;;  %v10914_v15 = vpop.permute.xlu0 %6350  ;;  %4086 = vmatpush.msrb.mxu3 %v10742_v18 }
 0x88a   : > { %v12567_v40 = vunpack.i.h.bf16 %v10914_v15  ;;  %v12548_v44 = vunpack.i.l.bf16 %v10914_v15 }
 0x88b   : > { %v10927_v7 = vsel %vm13355_vm10, %v12568_v57, %v12543_v3  ;;  %v10935_v37 = vsel %vm13356_vm14, %v12550_v49, %v12539_v5  ;;  %v12561_v5 = vunpack.i.h.bf16 %v10825_v2  ;;  %v12557_v3 = vunpack.i.h.bf16 %v10844_v21 }
 0x88c   : > { %v3964_v35 = vsel %vm608_vm15, %v12548_v44, %v12567_v40  ;;  %vm13359_vm10 = vcmp.lt.s32.totalorder %v6988_v36, 106  ;;  %vm13360_vm14 = vcmp.lt.s32.totalorder %v6988_v36, 41  ;;  %v6322_v57 = vunpack.i.l.bf16 %v10846_v10 }
 0x88d   : > { %4110 = vmatpush.msra.mxu1 %v3964_v35  ;;  %v3932_v35 = vsel %vm574_vm12, %v12549_v48, %v12562_v63  ;;  %v3916_v48 = vsel %vm557_vm11, %v12552_v45, %v12560_v34 }
 0x88f   : > { %4111 = vmatpush.msra.mxu1 %v3948_v60 }
 0x890   : > { %v10954_v59 = vpop.permute.xlu1 %6395  ;;  %v10956_v46 = vpop.permute.xlu2 %6435 }
 0x891   : > { %v12553_v31 = vunpack.i.l.bf16 %v10954_v59  ;;  %v12551_v60 = vunpack.i.h.bf16 %v10956_v46  ;;  %v10968_v0 = vpop.permute.xlu0 %6370  ;;  %4112 = vmatpush.msra.mxu1 %v3932_v35 }
 0x892   : > { %v12558_v16 = vunpack.i.h.bf16 %v10968_v0  ;;  %v12555_v44 = vunpack.i.l.bf16 %v10968_v0 }
 0x893   : > { %4113 = vmatpush.msra.mxu1 %v3916_v48  ;;  %v3769_v35 = vsel %vm400_vm3, %v12551_v60, %v12569_v47  ;;  %v10991_v49 = vsel %vm13357_vm9, %v12561_v5, %v12553_v31  ;;  %v3884_v60 = vsel %vm13359_vm10, %v12556_v61, %v12557_v3  ;;  %vm13366_vm9 = vcmp.lt.s32.totalorder %v6988_v36, 19 }
 0x894   : > { %4087 = vmatpush.msrb.mxu3 %v3769_v35  ;;  %v3900_v48 = vsel %vm13358_vm8, %v12555_v44, %v12558_v16  ;;  %v12564_v35 = vunpack.i.h.bf16 %v10795_v56  ;;  %vm13369_vm8 = vcmp.lt.s32.totalorder %v6988_v36, 20  ;;  %vm13370_vm10 = vcmp.lt.s32.totalorder %v6988_v36, 107 }
 0x895   : > { %4114 = vmatpush.msra.mxu1 %v3900_v48 }
 0x897   : > { %4115 = vmatpush.msra.mxu1 %v3884_v60 }
 0x898   : > { %v11005_v45 = vpop.permute.xlu1 %6410  ;;  %v11027_v16 = vpop.permute.xlu2 %6460 }
 0x899   : > { %v11007_v31 = vpop.permute.xlu0 %6385  ;;  %v12574_v34 = vunpack.i.l.bf16 %v11027_v16  ;;  %v13374_v27 = vunpack.i.h.bf16 %v11005_v45 }
 0x89a   : > { %v12563_v20 = vunpack.i.l.bf16 %v11007_v31 }
 0x89c   : > { %v11017_v48 = vsel %vm13360_vm14, %v12564_v35, %v12563_v20  ;;  %v6327_v20 = vunpack.i.l.bf16 %v10812_v25  ;;  %vm13375_vm14 = vcmp.lt.s32.totalorder %v6988_v36, 21 }
 0x8a0   : > { %v11019_v44 = vpop.permute.xlu1 %6425  ;;  %v11047_v52 = vpop.permute.xlu2 %6465 }
 0x8a1   : > { %v11021_v61 = vpop.permute.xlu0 %6400  ;;  %v13361_v50 = vunpack.i.h.bf16 %v11019_v44 }
 0x8a3   : > { %v3737_v18 = vsel %vm366_vm5, %v13361_v50, %v6322_v57  ;;  %v13364_v50 = vunpack.i.l.bf16 %v10836_v51 }
 0x8a8   : > { %v11023_v60 = vpop.permute.xlu1 %6440 }
 0x8a9   : > { %v11025_v3 = vpop.permute.xlu0 %6415 }
 0x8b0   : > { %v11029_v55 = vpop.permute.xlu1 %6445 }
 0x8b1   : > { %v12571_v5 = vunpack.i.l.bf16 %v11029_v55  ;;  %v11033_v63 = vpop.permute.xlu0 %6430 }
 0x8b2   : > { %v12573_v11 = vunpack.i.h.bf16 %v11033_v63 }
 0x8b3   : > { %v3819_v40 = vsel %vm455_vm0, %v6343_v41, %v12571_v5  ;;  %v3803_v41 = vsel %vm438_vm1, %v6348_v6, %v12574_v34  ;;  %v13371_v5 = vunpack.i.h.bf16 %v10842_v13 }
 0x8b4   : > { %v3753_v35 = vsel %vm383_vm4, %v12573_v11, %v6327_v20  ;;  %4123 = vmatpush.msra.mxu2 %v3819_v40  ;;  %v13363_v11 = vunpack.i.h.bf16 %v10856_v30  ;;  %v13373_v40 = vunpack.i.l.bf16 %v10840_v28 }
 0x8b5   : > { %4088 = vmatpush.msrb.mxu3 %v3753_v35  ;;  %v13362_v35 = vunpack.i.l.bf16 %v11023_v60 }
 0x8b6   : > { %4124 = vmatpush.msra.mxu2 %v3803_v41  ;;  %v13365_v41 = vunpack.i.h.bf16 %v10908_v24 }
 0x8b7   : > { %4089 = vmatpush.msrb.mxu3 %v3737_v18  ;;  %v3787_v6 = vsel %vm421_vm2, %v13363_v11, %v13362_v35 }
 0x8b8   : > { %v11075_v17 = vpop.permute.xlu1 %6450  ;;  %v3721_v18 = vsel %vm13366_vm9, %v13365_v41, %v13364_v50  ;;  %4125 = vmatpush.msra.mxu2 %v3787_v6  ;;  %v13367_v50 = vunpack.i.l.bf16 %v10805_v38  ;;  %v13368_v6 = vunpack.i.h.bf16 %v11025_v3  ;;  %vm13381_vm9 = vcmp.lt.s32.totalorder %v6988_v36, 22 }
 0x8b9   : > { %v12576_v35 = vunpack.i.h.bf16 %v11075_v17  ;;  %v12575_v47 = vunpack.i.l.bf16 %v11075_v17  ;;  %v11087_v34 = vpop.permute.xlu0 %6455  ;;  %4090 = vmatpush.msrb.mxu3 %v3721_v18 }
 0x8ba   : > { %v3705_v41 = vsel %vm13369_vm8, %v13368_v6, %v13367_v50  ;;  %4126 = vmatpush.msra.mxu2 %v10745_v32  ;;  %v3768_v50 = vsel %vm400_vm3, %v13372_v29, %v13371_v5  ;;  %v13376_v29 = vunpack.i.h.bf16 %v11087_v34  ;;  %v13377_v5 = vunpack.i.l.bf16 %v11087_v34 }
 0x8bb   : > { %4091 = vmatpush.msrb.mxu3 %v3705_v41  ;;  %v3868_v18 = vsel %vm13370_vm10, %v12575_v47, %v12576_v35  ;;  %v3689_v47 = vsel %vm13375_vm14, %v13374_v27, %v13373_v40  ;;  %v13378_v41 = vunpack.i.h.bf16 %v10812_v25  ;;  %v11135_v40 = vpop.permute.xlu2 %6475  ;;  %vm13384_vm8 = vcmp.lt.s32.totalorder %v6988_v36, 109 }
 0x8bc   : > { %4116 = vmatpush.msra.mxu1 %v3868_v18  ;;  %4127 = vmatpush.msra.mxu2 %v3768_v50  ;;  %v3852_v11 = vsel %vm489_vm7, %v13377_v5, %v13376_v29  ;;  %v13380_v18 = vunpack.i.h.bf16 %v10876_v4  ;;  %v13385_v35 = vunpack.i.h.bf16 %v10846_v10  ;;  %vm13388_vm10 = vcmp.lt.s32.totalorder %v6988_v36, 38 }
 0x8bd   : > { %4092 = vmatpush.msrb.mxu3 %v3689_v47  ;;  %v3752_v6 = vsel %vm383_vm4, %v6327_v20, %v13378_v41  ;;  %v13379_v47 = vunpack.i.l.bf16 %v10819_v54  ;;  %v13382_v20 = vunpack.i.h.bf16 %v11047_v52  ;;  %v13383_v41 = vunpack.i.l.bf16 %v11047_v52 }
 0x8be   : > { %4117 = vmatpush.msra.mxu1 %v3852_v11  ;;  %4128 = vmatpush.msra.mxu2 %v3752_v6  ;;  %v3736_v32 = vsel %vm366_vm5, %v6322_v57, %v13385_v35  ;;  %v11158_v11 = vld [vmem:[%s12309_s1 + $0x58] sm:$0xff]  ;;  %v13390_v57 = vunpack.i.l.bf16 %v11029_v55  ;;  %vm13393_vm14 = vcmp.lt.s32.totalorder %v6988_v36, 39  ;;  %v13398_v29 = vunpack.i.l.bf16 %v11027_v16 }
 0x8bf   : > { %v3673_v50 = vsel %vm13381_vm9, %v13380_v18, %v13379_v47  ;;  %v3836_v27 = vsel %vm13384_vm8, %v13383_v41, %v13382_v20  ;;  %v13386_v47 = vunpack.i.l.bf16 %v10800_v58  ;;  %v13387_v18 = vunpack.i.h.bf16 %v11021_v61 }
 0x8c0   : > { %4093 = vmatpush.msrb.mxu3 %v3673_v50  ;;  %v11160_v6 = vpop.permute.xlu1 %6480  ;;  %4118 = vmatpush.msra.mxu1 %v3836_v27  ;;  %v13389_v20 = vunpack.i.h.bf16 %v11029_v55  ;;  %v13392_v27 = vunpack.i.h.bf16 %v10954_v59  ;;  %vm13396_vm9 = vcmp.lt.s32.totalorder %v6988_v36, 19  ;;  %v6477_v41 = vunpack.i.l.bf16 %v11135_v40 }
 0x8c1   : > { %v3657_v50 = vsel %vm13388_vm10, %v13387_v18, %v13386_v47  ;;  %4129 = vmatpush.msra.mxu2 %v3736_v32  ;;  %v11176_v5 = vpop.permute.xlu0 %6470  ;;  %v13394_v47 = vunpack.i.h.bf16 %v10836_v51  ;;  %v13395_v18 = vunpack.i.l.bf16 %v10836_v51  ;;  %5023 = vmatmul.msk.f32.vlgmr.msra.gmra.mxu1 %vm725_vm6, %v11158_v11  ;;  %v13399_v51 = vunpack.i.h.bf16 %v10805_v38 }
 0x8c2   : > { %v3818_v35 = vsel %vm455_vm0, %v13390_v57, %v13389_v20  ;;  %4094 = vmatpush.msrb.mxu3 %v3657_v50  ;;  %v3641_v32 = vsel %vm13393_vm14, %v13392_v27, %v13391_v43  ;;  %v6472_v50 = vunpack.i.l.bf16 %v11176_v5  ;;  %v13400_v27 = vunpack.i.l.bf16 %v10805_v38 }
 0x8c3   : > { %4163 = vmatpush.msrb.mxu1 %v3818_v35  ;;  %v3720_v20 = vsel %vm13396_vm9, %v13395_v18, %v13394_v47  ;;  %v13397_v35 = vunpack.i.h.bf16 %v11027_v16  ;;  %vm13401_vm8 = vcmp.lt.s32.totalorder %v6988_v36, 20  ;;  %v6482_v57 = vunpack.i.l.bf16 %v11160_v6 }
 0x8c4   : > { %4130 = vmatpush.msra.mxu2 %v3720_v20  ;;  %4095 = vmatpush.msrb.mxu3 %v3641_v32  ;;  %v3704_v47 = vsel %vm13401_vm8, %v13400_v27, %v13399_v51  ;;  %v13403_v51 = vunpack.i.h.bf16 %v11023_v60  ;;  %v13404_v27 = vunpack.i.l.bf16 %v11023_v60  ;;  %v13406_v18 = vunpack.i.l.bf16 %v10840_v28 }
 0x8c5   : > { %v3802_v43 = vsel %vm438_vm1, %v13398_v29, %v13397_v35  ;;  %v13402_v29 = vunpack.i.h.bf16 %v10914_v15  ;;  %vm13407_vm10 = vcmp.lt.s32.totalorder %v6988_v36, 21  ;;  %v12583_v35 = vunpack.i.l.bf16 %v10814_v23 }
 0x8c6   : > { %4164 = vmatpush.msrb.mxu1 %v3802_v43  ;;  %4131 = vmatpush.msra.mxu2 %v3704_v47  ;;  %v3786_v20 = vsel %vm421_vm2, %v13404_v27, %v13403_v51  ;;  %v13405_v47 = vunpack.i.h.bf16 %v10840_v28  ;;  %vm13410_vm14 = vcmp.lt.s32.totalorder %v6988_v36, 41  ;;  %v13411_v51 = vunpack.i.h.bf16 %v10848_v62 }
 0x8c7   : > { %v3963_v32 = vsel %vm608_vm15, %v13402_v29, %v6472_v50  ;;  %4096 = vmatpush.msrb.mxu3 %v10864_v33  ;;  %v13408_v33 = vunpack.i.l.bf16 %v10795_v56  ;;  %vm13414_vm9 = vcmp.lt.s32.totalorder %v6988_v36, 22  ;;  %vm13416_vm8 = vcmp.lt.s32.totalorder %v6988_v36, 42 }
 0x8c8   : > { %4150 = vmatpush.msrb.mxu0 %v3963_v32  ;;  %v3688_v29 = vsel %vm13407_vm10, %v13406_v18, %v13405_v47  ;;  %4165 = vmatpush.msrb.mxu1 %v3786_v20  ;;  %v13409_v32 = vunpack.i.h.bf16 %v11007_v31  ;;  %v3947_v27 = vsel %vm591_vm13, %v13411_v51, %v6477_v41  ;;  %v13412_v47 = vunpack.i.h.bf16 %v10819_v54 }
 0x8c9   : > { %4132 = vmatpush.msra.mxu2 %v3688_v29  ;;  %v13413_v20 = vunpack.i.l.bf16 %v10819_v54  ;;  %v11251_v29 = vld [vmem:[%s12309_s1 + $0x50] sm:$0xff]  ;;  %v13415_v54 = vunpack.i.h.bf16 %v10906_v42  ;;  %v13418_v18 = vunpack.i.l.bf16 %v10956_v46  ;;  %vm13423_vm10 = vcmp.lt.s32.totalorder %v6988_v36, 38 }
 0x8ca   : > { %v3609_v9 = vsel %vm13410_vm14, %v13409_v32, %v13408_v33  ;;  %4151 = vmatpush.msrb.mxu0 %v3947_v27  ;;  %v11254_v32 = vpop.permute.xlu2 %6490  ;;  %4166 = vmatpush.msrb.mxu1 %v10773_v39  ;;  %v13417_v27 = vunpack.i.h.bf16 %v10838_v12  ;;  %v11270_v33 = vpop.permute.xlu0 %6485  ;;  %v13419_v39 = vunpack.i.h.bf16 %v10842_v13  ;;  %vm13429_vm14 = vcmp.lt.s32.totalorder %v6988_v36, 39 }
 0x8cb   : > { %4097 = vmatpush.msrb.mxu3 %v3609_v9  ;;  %v3672_v43 = vsel %vm13414_vm9, %v13413_v20, %v13412_v47  ;;  %v11257_v9 = vpop.permute.xlu1 %6495  ;;  %v3593_v51 = vsel %vm13416_vm8, %v13415_v54, %v12583_v35  ;;  %v6487_v54 = vunpack.i.l.bf16 %v11270_v33  ;;  %v13422_v35 = vunpack.i.l.bf16 %v10800_v58 }
 0x8cc   : > { %4133 = vmatpush.msra.mxu2 %v3672_v43  ;;  %v3931_v47 = vsel %vm574_vm12, %v13417_v27, %v6482_v57  ;;  %v3767_v42 = vsel %vm400_vm3, %v13419_v39, %v13418_v18  ;;  %v13420_v27 = vunpack.i.h.bf16 %v11176_v5  ;;  %v6492_v39 = vunpack.i.l.bf16 %v11254_v32 }
 0x8cd   : > { %4098 = vmatpush.msrb.mxu3 %v3593_v51  ;;  %4152 = vmatpush.msrb.mxu0 %v3931_v47  ;;  %v13421_v47 = vunpack.i.h.bf16 %v10800_v58  ;;  %v13424_v18 = vunpack.i.l.bf16 %v11033_v63  ;;  %vm13436_vm9 = vcmp.lt.s32.totalorder %v6988_v36, 40  ;;  %vm13438_vm8 = vcmp.lt.s32.totalorder %v6988_v36, 90 }
 0x8ce   : > { %4099 = vmatmul.f32.vlgmr.msrb.gmra.mxu3 %v11251_v29  ;;  %4167 = vmatpush.msrb.mxu1 %v3767_v42  ;;  %v3962_v51 = vsel %vm608_vm15, %v6472_v50, %v13420_v27  ;;  %v13425_v42 = vunpack.i.h.bf16 %v10812_v25  ;;  %v6488_v50 = vunpack.i.h.bf16 %v11270_v33  ;;  %v13426_v27 = vunpack.i.h.bf16 %v11135_v40 }
 0x8cf   : > { %v3656_v13 = vsel %vm13423_vm10, %v13422_v35, %v13421_v47  ;;  %4190 = vmatpush.msra.mxu3 %v3962_v51  ;;  %v13427_v35 = vunpack.i.h.bf16 %v10825_v2  ;;  %v13428_v51 = vunpack.i.l.bf16 %v10825_v2  ;;  %v13430_v25 = vunpack.i.h.bf16 %v10874_v19 }
 0x8d0   : > { %4134 = vmatpush.msra.mxu2 %v3656_v13  ;;  %v3751_v43 = vsel %vm383_vm4, %v13425_v42, %v13424_v18  ;;  %v3946_v20 = vsel %vm591_vm13, %v6477_v41, %v13426_v27  ;;  %v6417_v18 = vunpack.i.l.bf16 %v11025_v3  ;;  %v13431_v41 = vunpack.i.l.bf16 %v11019_v44 }
 0x8d1   : > { %4168 = vmatpush.msrb.mxu1 %v3751_v43  ;;  %v3640_v47 = vsel %vm13429_vm14, %v13428_v51, %v13427_v35  ;;  %v3915_v13 = vsel %vm557_vm11, %v13430_v25, %v6487_v54  ;;  %v6497_v43 = vunpack.i.l.bf16 %v11257_v9  ;;  %4191 = vmatpush.msra.mxu3 %v3946_v20  ;;  %v13432_v42 = vunpack.i.h.bf16 %v10846_v10 }
 0x8d2   : > { %4135 = vmatpush.msra.mxu2 %v3640_v47  ;;  %v6493_v27 = vunpack.i.h.bf16 %v11254_v32  ;;  %4153 = vmatpush.msrb.mxu0 %v3915_v13  ;;  %v13433_v35 = vunpack.i.h.bf16 %v11160_v6  ;;  %v13434_v25 = vunpack.i.h.bf16 %v10810_v26  ;;  %v13435_v20 = vunpack.i.l.bf16 %v10810_v26 }
 0x8d3   : > { %v3735_v2 = vsel %vm366_vm5, %v13432_v42, %v13431_v41  ;;  %v6412_v10 = vunpack.i.l.bf16 %v11005_v45  ;;  %v13437_v41 = vunpack.i.h.bf16 %v10968_v0  ;;  %v6498_v42 = vunpack.i.h.bf16 %v11257_v9 }
 0x8d4   : > { %4169 = vmatpush.msrb.mxu1 %v3735_v2  ;;  %v3930_v51 = vsel %vm574_vm12, %v6482_v57, %v13433_v35  ;;  %v3624_v47 = vsel %vm13436_vm9, %v13435_v20, %v13434_v25  ;;  %v3914_v26 = vsel %vm557_vm11, %v6487_v54, %v6488_v50  ;;  %v11343_v57 = vpop.permute.xlu1 %6505  ;;  %v13439_v2 = vunpack.i.h.bf16 %v10795_v56  ;;  %v11351_v25 = vpop.permute.xlu0 %6500 }
 0x8d5   : > { %4192 = vmatpush.msra.mxu3 %v3930_v51  ;;  %4136 = vmatpush.msra.mxu2 %v3624_v47  ;;  %v3899_v13 = vsel %vm13438_vm8, %v13437_v41, %v6492_v39  ;;  %v13440_v35 = vunpack.i.l.bf16 %v10795_v56  ;;  %vm13441_vm10 = vcmp.lt.s32.totalorder %v6988_v36, 41  ;;  %vm13443_vm14 = vcmp.lt.s32.totalorder %v6988_v36, 106  ;;  %v11363_v56 = vpop.permute.xlu2 %6510 }
 0x8d6   : > { %4154 = vmatpush.msrb.mxu0 %v3899_v13  ;;  %4170 = vmatpush.msrb.mxu1 %v10927_v7  ;;  %v13442_v7 = vunpack.i.h.bf16 %v10844_v21  ;;  %v13444_v54 = vunpack.i.h.bf16 %v10805_v38  ;;  %vm13445_vm9 = vcmp.lt.s32.totalorder %v6988_v36, 20  ;;  %v6503_v41 = vunpack.i.h.bf16 %v11351_v25 }
 0x8d7   : > { %v3608_v51 = vsel %vm13441_vm10, %v13440_v35, %v13439_v2  ;;  %4193 = vmatpush.msra.mxu3 %v3914_v26  ;;  %v6502_v13 = vunpack.i.l.bf16 %v11351_v25  ;;  %v3898_v26 = vsel %vm13438_vm8, %v6492_v39, %v6493_v27  ;;  %v13446_v2 = vunpack.i.h.bf16 %v10814_v23 }
 0x8d8   : > { %4137 = vmatpush.msra.mxu2 %v3608_v51  ;;  %v3883_v20 = vsel %vm13443_vm14, %v13442_v7, %v6497_v43  ;;  %v3703_v47 = vsel %vm13445_vm9, %v13444_v54, %v6417_v18  ;;  %v13447_v38 = vunpack.i.l.bf16 %v10814_v23  ;;  %vm13448_vm10 = vcmp.lt.s32.totalorder %v6988_v36, 42 }
 0x8d9   : > { %4155 = vmatpush.msrb.mxu0 %v3883_v20  ;;  %4171 = vmatpush.msrb.mxu1 %v3703_v47  ;;  %v6402_v51 = vunpack.i.l.bf16 %v11021_v61  ;;  %v6507_v7 = vunpack.i.l.bf16 %v11343_v57  ;;  %v13449_v25 = vunpack.i.h.bf16 %v10840_v28  ;;  %vm13450_vm14 = vcmp.lt.s32.totalorder %v6988_v36, 21 }
 0x8da   : > { %v3592_v35 = vsel %vm13448_vm10, %v13447_v38, %v13446_v2  ;;  %4194 = vmatpush.msra.mxu3 %v3898_v26  ;;  %v13451_v20 = vunpack.i.l.bf16 %v10914_v15  ;;  %v13452_v23 = vunpack.i.h.bf16 %v11176_v5  ;;  %v6508_v47 = vunpack.i.h.bf16 %v11343_v57 }
 0x8db   : > { %4138 = vmatpush.msra.mxu2 %v3592_v35  ;;  %v3687_v39 = vsel %vm13450_vm14, %v13449_v25, %v6412_v10  ;;  %vm13453_vm9 = vcmp.lt.s32.totalorder %v6988_v36, 106  ;;  %v13454_v26 = vunpack.i.h.bf16 %v11075_v17  ;;  %vm13455_vm8 = vcmp.lt.s32.totalorder %v6988_v36, 107 }
 0x8dc   : > { %v3965_v54 = vsel %vm608_vm15, %v13452_v23, %v13451_v20  ;;  %4139 = vmatmul.f32.vlgmr.msra.gmra.mxu2 %v11251_v29  ;;  %4172 = vmatpush.msrb.mxu1 %v3687_v39  ;;  %v3882_v28 = vsel %vm13453_vm9, %v6497_v43, %v6498_v42  ;;  %vm13456_vm10 = vmmov %vm13455_vm8  ;;  %v6512_v2 = vunpack.i.l.bf16 %v11363_v56  ;;  %v6513_v57 = vunpack.i.h.bf16 %v11363_v56 }
 0x8dd   : > { %v3867_v15 = vsel %vm13455_vm8, %v13454_v26, %v6502_v13  ;;  %v3866_v5 = vsel %vm13456_vm10, %v6502_v13, %v6503_v41  ;;  %4195 = vmatpush.msra.mxu3 %v3882_v28  ;;  %4230 = vmatpush.msrb.mxu2 %v3965_v54  ;;  %v13457_v38 = vunpack.i.l.bf16 %v10848_v62  ;;  %v13458_v43 = vunpack.i.h.bf16 %v11135_v40 }
 0x8de   : > { %4156 = vmatpush.msrb.mxu0 %v3867_v15  ;;  %4173 = vmatpush.msrb.mxu1 %v10892_v53  ;;  %v13459_v13 = vunpack.i.h.bf16 %v11087_v34  ;;  %v13460_v56 = vunpack.i.h.bf16 %v10800_v58  ;;  %vm13461_vm14 = vcmp.lt.s32.totalorder %v6988_v36, 38  ;;  %v3850_v62 = vsel %vm489_vm7, %v6507_v7, %v6508_v47 }
 0x8df   : > { %v3949_v35 = vsel %vm591_vm13, %v13458_v43, %v13457_v38  ;;  %4196 = vmatpush.msra.mxu3 %v3866_v5  ;;  %v13462_v40 = vunpack.i.l.bf16 %v10838_v12  ;;  %v13463_v39 = vunpack.i.h.bf16 %v11160_v6  ;;  %v13464_v23 = vunpack.i.h.bf16 %v11047_v52 }
 0x8e0   : > { %4231 = vmatpush.msrb.mxu2 %v3949_v35  ;;  %v3851_v25 = vsel %vm489_vm7, %v13459_v13, %v6507_v7  ;;  %v3655_v53 = vsel %vm13461_vm14, %v13460_v56, %v6402_v51  ;;  %vm13465_vm9 = vcmp.lt.s32.totalorder %v6988_v36, 109  ;;  %v13467_v12 = vunpack.i.l.bf16 %v10821_v8 }
 0x8e1   : > { %4157 = vmatpush.msrb.mxu0 %v3851_v25  ;;  %4174 = vmatpush.msrb.mxu1 %v3655_v53  ;;  %v3933_v20 = vsel %vm574_vm12, %v13463_v39, %v13462_v40  ;;  %v3835_v58 = vsel %vm13465_vm9, %v13464_v23, %v6512_v2  ;;  %vm13466_vm8 = vmmov %vm13465_vm9  ;;  %v13468_v6 = vunpack.i.h.bf16 %v11029_v55  ;;  %v13469_v28 = vunpack.i.l.bf16 %v10874_v19  ;;  %v4078_v23 = vpop.permute.xlu0 %4077 }
 0x8e2   : > { %4197 = vmatpush.msra.mxu3 %v3850_v62  ;;  %4232 = vmatpush.msrb.mxu2 %v3933_v20  ;;  %v3834_v7 = vsel %vm13466_vm8, %v6512_v2, %v6513_v57  ;;  %v13470_v8 = vunpack.i.l.bf16 %v10880_v22  ;;  %v13471_v55 = vunpack.i.h.bf16 %v11027_v16  ;;  %v13472_v19 = vunpack.i.l.bf16 %v10968_v0 }
 0x8e3   : > { %4158 = vmatpush.msrb.mxu0 %v3835_v58  ;;  %4175 = vmatpush.msrb.mxu1 %v10991_v49  ;;  %v3821_v54 = vsel %vm455_vm0, %v13468_v6, %v13467_v12  ;;  %v3917_v26 = vsel %vm557_vm11, %v6488_v50, %v13469_v28  ;;  %vm13473_vm10 = vcmp.lt.s32.totalorder %v6988_v36, 90  ;;  %v13474_v22 = vunpack.i.l.bf16 %v10856_v30 }
 0x8e4   : > { %4198 = vmatpush.msra.mxu3 %v3834_v7  ;;  %4233 = vmatpush.msrb.mxu2 %v3917_v26  ;;  %v3805_v49 = vsel %vm438_vm1, %v13471_v55, %v13470_v8  ;;  %v3901_v33 = vsel %vm13473_vm10, %v6493_v27, %v13472_v19  ;;  %v13475_v16 = vunpack.i.h.bf16 %v11023_v60  ;;  %vm13477_vm14 = vcmp.lt.s32.totalorder %v6988_v36, 106  ;;  %v13514_v55 = vld [vmem:[#allocation5_spill] sm:$0xff]  ;;  %v13515_v19 = vld [vmem:[#allocation3_spill] sm:$0xff] }
 0x8e5   : > { %4203 = vmatpush.msra.mxu0 %v3821_v54  ;;  %4176 = vmatpush.msrb.mxu1 %v10872_v14  ;;  %v13476_v14 = vunpack.i.l.bf16 %v10844_v21  ;;  %v13478_v30 = vunpack.i.l.bf16 %v11075_v17  ;;  %vm13479_vm9 = vcmp.lt.s32.totalorder %v6988_v36, 107  ;;  %v13480_v21 = vunpack.i.h.bf16 %v10956_v46 }
 0x8e6   : > { %5024 = vmatmul.msk.f32.vlgmr.msrb.gmra.mxu0 %vm725_vm6, %v11158_v11  ;;  %4234 = vmatpush.msrb.mxu2 %v3901_v33  ;;  %v3789_v50 = vsel %vm421_vm2, %v13475_v16, %v13474_v22  ;;  %v13483_v17 = vunpack.i.h.bf16 %v11033_v63  ;;  %v13484_v27 = vunpack.i.l.bf16 %v11033_v63  ;;  %v13487_v15 = vunpack.i.l.bf16 %v11019_v44 }
 0x8e7   : > { %4204 = vmatpush.msra.mxu0 %v3805_v49  ;;  %5025 = vmatmul.msk.f32.vlgmr.msra.gmra.mxu3 %vm725_vm6, %v11158_v11  ;;  %v3885_v0 = vsel %vm13477_vm14, %v6498_v42, %v13476_v14  ;;  %v3869_v60 = vsel %vm13479_vm9, %v6503_v41, %v13478_v30  ;;  %v13488_v63 = vunpack.i.h.bf16 %v10908_v24  ;;  %v13489_v5 = vunpack.i.l.bf16 %v10908_v24 }
 0x8e8   : > { %4177 = vmatpush.msrb.mxu1 %v11017_v48  ;;  %4235 = vmatpush.msrb.mxu2 %v3885_v0  ;;  %v13481_v48 = vunpack.i.l.bf16 %v10956_v46  ;;  %v3750_v42 = vsel %vm383_vm4, %v13484_v27, %v13483_v17  ;;  %v13485_v46 = vunpack.i.l.bf16 %v11047_v52  ;;  %vm13490_vm10 = vcmp.lt.s32.totalorder %v6988_v36, 19  ;;  %v13519_v17 = vld [vmem:[#allocation7_spill] sm:$0xff] }
 0x8e9   : > { %4205 = vmatpush.msra.mxu0 %v3789_v50  ;;  %v3718_v52 = vsel %vm13490_vm10, %v13489_v5, %v13488_v63  ;;  %v13491_v2 = vunpack.i.h.bf16 %v11025_v3  ;;  %vm13492_vm14 = vcmp.lt.s32.totalorder %v6988_v36, 20  ;;  %vm13494_vm9 = vcmp.lt.s32.totalorder %v6988_v36, 21 }
 0x8ea   : > { %4178 = vmatpush.msrb.mxu1 %v10935_v37  ;;  %4236 = vmatpush.msrb.mxu2 %v3869_v60  ;;  %v3766_v32 = vsel %vm400_vm3, %v13481_v48, %v13480_v21  ;;  %v13482_v37 = vunpack.i.l.bf16 %v11087_v34  ;;  %v3837_v41 = vsel %vm13466_vm8, %v6513_v57, %v13485_v46  ;;  %v13486_v34 = vunpack.i.h.bf16 %v11019_v44 }
 0x8eb   : > { %4206 = vmatpush.msra.mxu0 %v10770_v1  ;;  %4179 = vmatmul.f32.vlgmr.msrb.gmra.mxu1 %v11251_v29  ;;  %v3702_v44 = vsel %vm13492_vm14, %v6417_v18, %v13491_v2  ;;  %v13493_v57 = vunpack.i.h.bf16 %v11005_v45  ;;  %v13495_v24 = vunpack.i.h.bf16 %v10876_v4  ;;  %v13496_v38 = vunpack.i.l.bf16 %v10876_v4  ;;  %v13503_v4 = vld [vmem:[#allocation10_spill] sm:$0xff] }
 0x8ec   : > { %v3853_v9 = vsel %vm489_vm7, %v6508_v47, %v13482_v37  ;;  %v3734_v47 = vsel %vm366_vm5, %v13487_v15, %v13486_v34  ;;  %vm13497_vm8 = vcmp.lt.s32.totalorder %v6988_v36, 22  ;;  %v13498_v3 = vunpack.i.h.bf16 %v11021_v61  ;;  %v13518_v37 = vld [vmem:[#allocation8_spill] sm:$0xff] }
 0x8ed   : > { %4207 = vmatpush.msra.mxu0 %v3766_v32  ;;  %4237 = vmatpush.msrb.mxu2 %v3853_v9  ;;  %v3670_v43 = vsel %vm13497_vm8, %v13496_v38, %v13495_v24  ;;  %vm13499_vm10 = vcmp.lt.s32.totalorder %v6988_v36, 38  ;;  %v13500_v45 = vunpack.i.h.bf16 %v10954_v59  ;;  %vm13502_vm14 = vcmp.lt.s32.totalorder %v6988_v36, 39  ;;  %v5029_v38 = vld [vmem:[%s12310_s2 + $0x30] sm:$0xff] }
 0x8ee   : > { %v3654_v18 = vsel %vm13499_vm10, %v6402_v51, %v13498_v3  ;;  %v13504_v13 = vunpack.i.h.bf16 %v13503_v4  ;;  %v13505_v25 = vunpack.i.l.bf16 %v13503_v4  ;;  %v13507_v61 = vunpack.i.h.bf16 %v11007_v31 }
 0x8ef   : > { %4208 = vmatpush.msra.mxu0 %v3750_v42  ;;  %4238 = vmatpush.msrb.mxu2 %v3837_v41  ;;  %v13508_v51 = vunpack.i.l.bf16 %v11007_v31  ;;  %vm13509_vm8 = vcmp.lt.s32.totalorder %v6988_v36, 41  ;;  %vm13513_vm10 = vcmp.lt.s32.totalorder %v6988_v36, 42 }
 0x8f0   : > { %5026 = vmatmul.msk.f32.vlgmr.msrb.gmra.mxu2 %vm725_vm6, %v11158_v11  ;;  %v3686_v11 = vsel %vm13494_vm9, %v6412_v10, %v13493_v57  ;;  %v13501_v10 = vunpack.i.l.bf16 %v10954_v59  ;;  %vm13506_vm9 = vcmp.lt.s32.totalorder %v6988_v36, 40  ;;  %v13510_v59 = vld [vmem:[#allocation14_spill] sm:$0xff] }
 0x8f1   : > { %4209 = vmatpush.msra.mxu0 %v3734_v47  ;;  %v3622_v56 = vsel %vm13506_vm9, %v13505_v25, %v13504_v13  ;;  %v3606_v53 = vsel %vm13509_vm8, %v13508_v51, %v13507_v61  ;;  %v13511_v62 = vunpack.i.h.bf16 %v13510_v59  ;;  %v13512_v40 = vunpack.i.l.bf16 %v13510_v59  ;;  %vm13521_vm9 = vmmov %vm13513_vm10 }
 0x8f2   : > { %v3638_v35 = vsel %vm13502_vm14, %v13501_v10, %v13500_v45  ;;  %vm13520_vm14 = vmmov %vm13513_vm10  ;;  %vm13522_vm8 = vcmp.lt.s32.totalorder %v6988_v36, 90 }
 0x8f3   : > { %4210 = vmatpush.msra.mxu0 %v3718_v52  ;;  %v3590_v39 = vsel %vm13513_vm10, %v13512_v40, %v13511_v62  ;;  %vm13523_vm10 = vcmp.lt.s32.totalorder %v6988_v36, 106 }
 0x8f5   : > { %4211 = vmatpush.msra.mxu0 %v3702_v44 }
 0x8f7   : > { %4212 = vmatpush.msra.mxu0 %v3686_v11 }
 0x8f9   : > { %4213 = vmatpush.msra.mxu0 %v3670_v43 }
 0x8fb   : > { %4214 = vmatpush.msra.mxu0 %v3654_v18 }
 0x8fd   : > { %4215 = vmatpush.msra.mxu0 %v3638_v35 }
 0x8ff   : > { %4216 = vmatpush.msra.mxu0 %v3622_v56 }
 0x901   : > { %4217 = vmatpush.msra.mxu0 %v3606_v53 }
 0x903   : > { %4218 = vmatpush.msra.mxu0 %v3590_v39 }
 0x904   : > { %4219 = vmatmul.f32.vlgmr.msra.gmra.mxu0 %v11251_v29 }
 0x93e   : > { %v4120_v7 = vpop.f32.mrf.mxu1 }
 0x951   : > { %v4100_v20 = vpop.f32.mrf.mxu3 }
 0x952   : > { %v4101_v58 = vadd.f32 %v4100_v20, %v4078_v23 }
 0x954   : > { %v4121_v12 = vadd.f32 %v4120_v7, %v4101_v58 }
 0x956   : > { %v4243_v28 = vmax.f32 %v4121_v12, 0.0 }
 0x958   : > { %v11570_v49 = vmul.f32 %v4243_v28, %v13514_v55 }
 0x95f   : > { %v4140_v31 = vpop.f32.mrf.mxu2 }
 0x960   : > { %v4141_v6 = vadd.f32 %v4140_v31, %v4078_v23 }
 0x963   : > { %v4160_v54 = vpop.f32.mrf.mxu0 }
 0x964   : > { %v4161_v26 = vadd.f32 %v4160_v54, %v4141_v6 }
 0x966   : > { %v4244_v8 = vmax.f32 %v4161_v26, 0.0 }
 0x968   : > { %v11573_v33 = vmul.f32 %v4244_v8, %v13515_v19  ;;  %v4180_v16 = vpop.f32.mrf.mxu1 }
 0x969   : > { %v4181_v0 = vadd.f32 %v4180_v16, %v4078_v23 }
 0x96a   : > { %v6524_v29 = vpack.i.bf16 %v11573_v33, %v11570_v49  ;;  %v4200_v30 = vpop.f32.mrf.mxu3 }
 0x96b   : > { %v4201_v21 = vadd.f32 %v4200_v30, %v4181_v0 }
 0x96c   : > { %6525 = vrot.lane.b32.xlu2 %v6524_v29, %s6754_s23  ;;  %6520 = vrot.lane.b32.xlu0 %v6524_v29, %s6752_s21 }
 0x96d   : > { %6515 = vrot.lane.b32.xlu1 %v6524_v29, %s6753_s22  ;;  %v4245_v32 = vmax.f32 %v4201_v21, 0.0 }
 0x96f   : > { %v11602_v27 = vmul.f32 %v4245_v32, %v13519_v17 }
 0x973   : > { %v4240_v14 = vpop.f32.mrf.mxu2 }
 0x974   : > { %6540 = vrot.lane.b32.xlu2 %v6524_v29, %s6757_s26  ;;  %6535 = vrot.lane.b32.xlu0 %v6524_v29, %s6756_s25 }
 0x975   : > { %6530 = vrot.lane.b32.xlu1 %v6524_v29, %s6755_s24 }
 0x97c   : > { %6550 = vrot.lane.b32.xlu2 %v6524_v29, %s6766_s9  ;;  %6560 = vrot.lane.b32.xlu0 %v6524_v29, %s6764_s7 }
 0x97d   : > { %6545 = vrot.lane.b32.xlu1 %v6524_v29, %s6758_s27 }
 0x981   : > { %v4220_v22 = vpop.f32.mrf.mxu0 }
 0x982   : > { %v4221_v50 = vadd.f32 %v4220_v22, %v4078_v23 }
 0x984   : > { %6565 = vrot.lane.b32.xlu2 %v6524_v29, %s6763_s6  ;;  %6575 = vrot.lane.b32.xlu0 %v6524_v29, %s6761_s30  ;;  %v4241_v60 = vadd.f32 %v4240_v14, %v4221_v50 }
 0x985   : > { %6555 = vrot.lane.b32.xlu1 %v6524_v29, %s13346_s8 }
 0x986   : > { %v4246_v48 = vmax.f32 %v4241_v60, 0.0 }
 0x988   : > { %v11599_v9 = vmul.f32 %v4246_v48, %v13518_v37 }
 0x98a   : > { %v6644_v42 = vpack.i.bf16 %v11599_v9, %v11602_v27  ;;  %v6679_v46 = vpack.i.bf16 %v11602_v27, %v11599_v9 }
 0x98c   : > { %6580 = vrot.lane.b32.xlu2 %v6524_v29, %s6760_s29  ;;  %6595 = vrot.lane.b32.xlu0 %v6524_v29, %s12699_s17 }
 0x98d   : > { %6570 = vrot.lane.b32.xlu1 %v6524_v29, %s13516_s28 }
 0x994   : > { %6600 = vrot.lane.b32.xlu2 %v6524_v29, %s12887_s19  ;;  %6610 = vrot.lane.b32.xlu0 %v6524_v29, %s13031_s18 }
 0x995   : > { %6585 = vrot.lane.b32.xlu1 %v6524_v29, %s13517_s5 }
 0x99c   : > { %6615 = vrot.lane.b32.xlu2 %v6524_v29, %s12886_s13  ;;  %6625 = vrot.lane.b32.xlu0 %v6524_v29, %s13210_s10 }
 0x99d   : > { %6590 = vrot.lane.b32.xlu1 %v6524_v29, %s12700_s20 }
 0x9a4   : > { %6630 = vrot.lane.b32.xlu2 %v6524_v29, %s13211_s11  ;;  %6645 = vrot.lane.b32.xlu0 %v6644_v42, %s6754_s23 }
 0x9a5   : > { %6605 = vrot.lane.b32.xlu1 %v6524_v29, %s13030_s14 }
 0x9ac   : > { %6635 = vrot.lane.b32.xlu2 %v6644_v42, %s6753_s22  ;;  %6660 = vrot.lane.b32.xlu0 %v6644_v42, %s6757_s26 }
 0x9ad   : > { %6620 = vrot.lane.b32.xlu1 %v6524_v29, %s13350_s12 }
 0x9b4   : > { %6650 = vrot.lane.b32.xlu2 %v6644_v42, %s6755_s24  ;;  %6665 = vrot.lane.b32.xlu0 %v6644_v42, %s6766_s9 }
 0x9b5   : > { %6640 = vrot.lane.b32.xlu1 %v6644_v42, %s6752_s21 }
 0x9bc   : > { %6670 = vrot.lane.b32.xlu2 %v6644_v42, %s13346_s8  ;;  %6680 = vrot.lane.b32.xlu0 %v6679_v46, %s6763_s6 }
 0x9bd   : > { %6655 = vrot.lane.b32.xlu1 %v6644_v42, %s6756_s25 }
 0x9c4   : > { %6685 = vrot.lane.b32.xlu2 %v6679_v46, %s13516_s28  ;;  %6695 = vrot.lane.b32.xlu0 %v6679_v46, %s6760_s29 }
 0x9c5   : > { %6675 = vrot.lane.b32.xlu1 %v6644_v42, %s6764_s7 }
 0x9c6   : > { %v11623_v41 = vpop.permute.xlu2 %6525 }
 0x9cc   : > { %6700 = vrot.lane.b32.xlu2 %v6679_v46, %s13517_s5  ;;  %6705 = vrot.lane.b32.xlu0 %v6679_v46, %s6758_s27  ;;  %s13628_s27 = sshll.u32 %s13631_s16, 5 }
 0x9cd   : > { %6690 = vrot.lane.b32.xlu1 %v6679_v46, %s6761_s30  ;;  %s197_s6 = scalar_lea.vmem %s12312_s4, %s13628_s27 }
 0x9ce   : > { %v11628_v34 = vpop.permute.xlu2 %6540 }
 0x9d4   : > { %6710 = vrot.lane.b32.xlu2 %v6644_v42, %s12700_s20  ;;  %6720 = vrot.lane.b32.xlu0 %v6644_v42, %s12887_s19 }
 0x9d5   : > { %6715 = vrot.lane.b32.xlu1 %v6644_v42, %s12699_s17 }
 0x9d6   : > { %v11633_v15 = vpop.permute.xlu2 %6550 }
 0x9d7   : > { %v6553_v47 = vunpack.i.h.bf16 %v11633_v15  ;;  %v12591_v63 = vunpack.i.l.bf16 %v11633_v15 }
 0x9d9   : > { %v4489_v5 = vsel %vm455_vm0, %v12591_v63, %v6553_v47 }
 0x9da   : > { %4752 = vmatpush.msrb.mxu3 %v4489_v5 }
 0x9dc   : > { %6725 = vrot.lane.b32.xlu2 %v6644_v42, %s13030_s14  ;;  %6735 = vrot.lane.b32.xlu0 %v6644_v42, %s12886_s13 }
 0x9dd   : > { %6730 = vrot.lane.b32.xlu1 %v6644_v42, %s13031_s18 }
 0x9de   : > { %v11646_v52 = vpop.permute.xlu2 %6565  ;;  %v11648_v2 = vpop.permute.xlu0 %6520 }
 0x9df   : > { %v11650_v44 = vpop.permute.xlu1 %6515 }
 0x9e0   : > { %v12605_v20 = vunpack.i.h.bf16 %v11650_v44  ;;  %v12604_v23 = vunpack.i.l.bf16 %v11650_v44 }
 0x9e4   : > { %6740 = vrot.lane.b32.xlu2 %v6644_v42, %s13350_s12  ;;  %4499 = vrot.lane.b32.xlu0 %v11602_v27, %s13211_s11 }
 0x9e5   : > { %4515 = vrot.lane.b32.xlu1 %v11602_v27, %s13210_s10 }
 0x9e6   : > { %v11657_v57 = vpop.permute.xlu2 %6580  ;;  %v11659_v11 = vpop.permute.xlu0 %6535 }
 0x9e7   : > { %v11661_v24 = vpop.permute.xlu1 %6530 }
 0x9ec   : > { %4501 = vrot.lane.b32.xlu2 %v11599_v9, %s13211_s11  ;;  %4746 = vperm.xlu0 %5311, %v5029_v38  }
 0x9ed   : > { %4517 = vrot.lane.b32.xlu1 %v11599_v9, %s13210_s10 }
 0x9ee   : > { %v11670_v43 = vpop.permute.xlu2 %6600  ;;  %v11672_v3 = vpop.permute.xlu0 %6560 }
 0x9ef   : > { %v11674_v18 = vpop.permute.xlu1 %6545  ;;  %v6563_v4 = vunpack.i.h.bf16 %v11672_v3  ;;  %v12586_v13 = vunpack.i.l.bf16 %v11672_v3  ;;  %v12611_v16 = vunpack.i.h.bf16 %v11670_v43  ;;  %v12592_v50 = vunpack.i.l.bf16 %v11670_v43 }
 0x9f1   : > { %v4457_v51 = vsel %vm421_vm2, %v12586_v13, %v6563_v4  ;;  %v4601_v21 = vsel %vm574_vm12, %v12592_v50, %v12611_v16 }
 0x9f6   : > { %v11676_v45 = vpop.permute.xlu2 %6615  ;;  %v11678_v10 = vpop.permute.xlu0 %6575 }
 0x9f7   : > { %v11680_v35 = vpop.permute.xlu1 %6555  ;;  %v12603_v38 = vunpack.i.h.bf16 %v11676_v45 }
 0x9f8   : > { %v6558_v25 = vunpack.i.h.bf16 %v11680_v35  ;;  %v12588_v56 = vunpack.i.l.bf16 %v11680_v35 }
 0x9fa   : > { %v4473_v61 = vsel %vm438_vm1, %v12588_v56, %v6558_v25 }
 0x9fb   : > { %4753 = vmatpush.msrb.mxu3 %v4473_v61  ;;  %v12590_v61 = vunpack.i.l.bf16 %v11676_v45 }
 0x9fd   : > { %4754 = vmatpush.msrb.mxu3 %v4457_v51 }
 0x9fe   : > { %v11698_v53 = vpop.permute.xlu2 %6630  ;;  %v11700_v59 = vpop.permute.xlu0 %6595 }
 0x9ff   : > { %v11702_v62 = vpop.permute.xlu1 %6570  ;;  %4755 = vmatpush.msrb.mxu3 %v11570_v49  ;;  %v12614_v8 = vunpack.i.h.bf16 %v11700_v59  ;;  %v12594_v49 = vunpack.i.l.bf16 %v11700_v59  ;;  %v12599_v56 = vunpack.i.h.bf16 %v11698_v53 }
 0xa01   : > { %v4617_v0 = vsel %vm591_vm13, %v12594_v49, %v12614_v8 }
 0xa06   : > { %v11705_v40 = vpop.permute.xlu2 %6635  ;;  %v11707_v39 = vpop.permute.xlu0 %6610 }
 0xa07   : > { %v12585_v58 = vunpack.i.h.bf16 %v11705_v40  ;;  %v12584_v7 = vunpack.i.l.bf16 %v11705_v40  ;;  %v11713_v12 = vpop.permute.xlu1 %6585  ;;  %v12607_v32 = vunpack.i.h.bf16 %v11707_v39  ;;  %v12587_v42 = vunpack.i.l.bf16 %v11707_v39 }
 0xa09   : > { %v11721_v31 = vsel %vm13520_vm14, %v12585_v58, %v12604_v23  ;;  %v11729_v6 = vsel %vm13521_vm9, %v12605_v20, %v12584_v7  ;;  %v4553_v7 = vsel %vm13523_vm10, %v12590_v61, %v12603_v38  ;;  %vm13524_vm14 = vcmp.lt.s32.totalorder %v6988_v36, 107 }
 0xa0a   : > { %vm13525_vm9 = vcmp.lt.s32.totalorder %v6988_v36, 109 }
 0xa0e   : > { %v11731_v54 = vpop.permute.xlu2 %6650  ;;  %v11733_v28 = vpop.permute.xlu0 %6625 }
 0xa0f   : > { %v11735_v26 = vpop.permute.xlu1 %6590  ;;  %v12597_v58 = vunpack.i.h.bf16 %v11733_v28  ;;  %v12596_v13 = vunpack.i.l.bf16 %v11733_v28 }
 0xa10   : > { %v6593_v29 = vunpack.i.h.bf16 %v11735_v26  ;;  %v12600_v22 = vunpack.i.l.bf16 %v11735_v26 }
 0xa12   : > { %v4633_v14 = vsel %vm608_vm15, %v12600_v22, %v6593_v29 }
 0xa13   : > { %4779 = vmatpush.msra.mxu1 %v4633_v14  ;;  %v4569_v14 = vsel %vm13522_vm8, %v12587_v42, %v12607_v32  ;;  %vm13526_vm8 = vcmp.lt.s32.totalorder %v6988_v36, 19 }
 0xa14   : > { %vm13527_vm10 = vmmov %vm13526_vm8 }
 0xa15   : > { %4780 = vmatpush.msra.mxu1 %v4617_v0 }
 0xa16   : > { %v11755_v30 = vpop.permute.xlu2 %6670  ;;  %v11757_v60 = vpop.permute.xlu0 %6645 }
 0xa17   : > { %v11765_v48 = vpop.permute.xlu1 %6605  ;;  %4781 = vmatpush.msra.mxu1 %v4601_v21  ;;  %v6672_v49 = vunpack.i.l.bf16 %v11755_v30 }
 0xa18   : > { %v12608_v46 = vunpack.i.h.bf16 %v11765_v48  ;;  %v12589_v5 = vunpack.i.l.bf16 %v11765_v48 }
 0xa1a   : > { %v4585_v51 = vsel %vm557_vm11, %v12589_v5, %v12608_v46  ;;  %v12598_v5 = vunpack.i.l.bf16 %v11698_v53  ;;  %v6568_v46 = vunpack.i.h.bf16 %v11646_v52 }
 0xa1b   : > { %4782 = vmatpush.msra.mxu1 %v4585_v51 }
 0xa1d   : > { %4783 = vmatpush.msra.mxu1 %v4569_v14 }
 0xa1e   : > { %v11785_v0 = vpop.permute.xlu2 %6685  ;;  %v11787_v21 = vpop.permute.xlu0 %6660 }
 0xa1f   : > { %v11795_v51 = vpop.permute.xlu1 %6620  ;;  %4784 = vmatpush.msra.mxu1 %v4553_v7  ;;  %v4521_v7 = vsel %vm489_vm7, %v12596_v13, %v12597_v58 }
 0xa20   : > { %v12595_v14 = vunpack.i.h.bf16 %v11795_v51  ;;  %v12593_v42 = vunpack.i.l.bf16 %v11795_v51 }
 0xa22   : > { %v4537_v61 = vsel %vm13524_vm14, %v12593_v42, %v12595_v14  ;;  %v4505_v42 = vsel %vm13525_vm9, %v12598_v5, %v12599_v56  ;;  %v4472_v56 = vsel %vm438_vm1, %v6558_v25, %v6672_v49  ;;  %v12609_v25 = vunpack.i.l.bf16 %v11785_v0  ;;  %vm13528_vm14 = vmmov %vm13526_vm8 }
 0xa23   : > { %4785 = vmatpush.msra.mxu1 %v4537_v61  ;;  %v12602_v61 = vunpack.i.h.bf16 %v11755_v30  ;;  %vm13530_vm9 = vcmp.lt.s32.totalorder %v6988_v36, 20 }
 0xa25   : > { %4786 = vmatpush.msra.mxu1 %v4521_v7 }
 0xa26   : > { %v11815_v63 = vpop.permute.xlu2 %6700  ;;  %v11817_v50 = vpop.permute.xlu0 %6665 }
 0xa27   : > { %v12601_v14 = vunpack.i.h.bf16 %v11817_v50  ;;  %v6667_v13 = vunpack.i.l.bf16 %v11817_v50  ;;  %v11829_v7 = vpop.permute.xlu1 %6640  ;;  %4787 = vmatpush.msra.mxu1 %v4505_v42  ;;  %v4471_v42 = vsel %vm438_vm1, %v6672_v49, %v12602_v61 }
 0xa29   : > { %v4488_v58 = vsel %vm455_vm0, %v6553_v47, %v6667_v13  ;;  %v4487_v5 = vsel %vm455_vm0, %v6667_v13, %v12601_v14  ;;  %v11854_v13 = vld [vmem:[%s12309_s1 + $0x68] sm:$0xff] }
 0xa2a   : > { %4792 = vmatpush.msra.mxu2 %v4488_v58  ;;  %4832 = vmatpush.msrb.mxu1 %v4487_v5  ;;  %v6567_v58 = vunpack.i.l.bf16 %v11646_v52  ;;  %v6578_v52 = vunpack.i.h.bf16 %v11678_v10 }
 0xa2b   : > { %5030 = vmatmul.msk.f32.vlgmr.msra.gmra.mxu1 %vm725_vm6, %v11854_v13 }
 0xa2c   : > { %4793 = vmatpush.msra.mxu2 %v4472_v56  ;;  %4833 = vmatpush.msrb.mxu1 %v4471_v42  ;;  %v6572_v56 = vunpack.i.l.bf16 %v11702_v62  ;;  %v4437_v16 = vsel %vm400_vm3, %v6567_v58, %v6568_v46 }
 0xa2e   : > { %v11847_v47 = vpop.permute.xlu2 %6710  ;;  %v11849_v22 = vpop.permute.xlu0 %6680  ;;  %v4422_v38 = vsel %vm383_vm4, %v12609_v25, %v6572_v56  ;;  %v12615_v25 = vunpack.i.h.bf16 %v11785_v0 }
 0xa2f   : > { %v12610_v5 = vunpack.i.l.bf16 %v11847_v47  ;;  %v12606_v14 = vunpack.i.l.bf16 %v11849_v22  ;;  %v11860_v49 = vpop.permute.xlu1 %6655 }
 0xa31   : > { %v4438_v42 = vsel %vm400_vm3, %v12606_v14, %v6567_v58  ;;  %v4632_v61 = vsel %vm608_vm15, %v6593_v29, %v12610_v5  ;;  %v12613_v29 = vunpack.i.h.bf16 %v11849_v22  ;;  %v6577_v5 = vunpack.i.l.bf16 %v11678_v10 }
 0xa32   : > { %4756 = vmatpush.msrb.mxu3 %v4438_v42  ;;  %4819 = vmatpush.msrb.mxu0 %v4632_v61  ;;  %v6573_v42 = vunpack.i.h.bf16 %v11702_v62  ;;  %v6582_v10 = vunpack.i.l.bf16 %v11657_v57 }
 0xa33   : > { %v4436_v62 = vsel %vm400_vm3, %v6568_v46, %v12613_v29  ;;  %v6588_v29 = vunpack.i.h.bf16 %v11713_v12 }
 0xa34   : > { %4757 = vmatpush.msrb.mxu3 %v4422_v38  ;;  %v4420_v46 = vsel %vm383_vm4, %v6573_v42, %v12615_v25 }
 0xa36   : > { %v11879_v23 = vpop.permute.xlu0 %6695 }
 0xa37   : > { %v11881_v20 = vpop.permute.xlu1 %6675 }
 0xa38   : > { %v12612_v14 = vunpack.i.h.bf16 %v11881_v20  ;;  %v6677_v32 = vunpack.i.l.bf16 %v11881_v20 }
 0xa3a   : > { %v4456_v61 = vsel %vm421_vm2, %v6563_v4, %v6677_v32  ;;  %v4455_v38 = vsel %vm421_vm2, %v6677_v32, %v12612_v14  ;;  %v6547_v32 = vunpack.i.l.bf16 %v11674_v18 }
 0xa3b   : > { %4794 = vmatpush.msra.mxu2 %v4456_v61  ;;  %4834 = vmatpush.msrb.mxu1 %v4455_v38  ;;  %v6583_v61 = vunpack.i.h.bf16 %v11657_v57  ;;  %v6542_v57 = vunpack.i.l.bf16 %v11628_v34 }
 0xa3d   : > { %4795 = vmatpush.msra.mxu2 %v11573_v33  ;;  %4835 = vmatpush.msrb.mxu1 %v11602_v27  ;;  %v4421_v33 = vsel %vm383_vm4, %v6572_v56, %v6573_v42  ;;  %v12618_v27 = vunpack.i.l.bf16 %v11879_v23  ;;  %v4405_v56 = vsel %vm366_vm5, %v6577_v5, %v6578_v52 }
 0xa3e   : > { %v11901_v4 = vpop.permute.xlu0 %6705 }
 0xa3f   : > { %v11912_v38 = vpop.permute.xlu1 %6690  ;;  %4796 = vmatpush.msra.mxu2 %v4437_v16  ;;  %4836 = vmatpush.msrb.mxu1 %v4436_v62  ;;  %v12617_v16 = vunpack.i.h.bf16 %v11879_v23  ;;  %v6587_v62 = vunpack.i.l.bf16 %v11713_v12  ;;  %v6548_v12 = vunpack.i.h.bf16 %v11674_v18  ;;  %v12620_v8 = vunpack.i.l.bf16 %v11901_v4 }
 0xa40   : > { %v12616_v58 = vunpack.i.h.bf16 %v11912_v38  ;;  %v12619_v14 = vunpack.i.l.bf16 %v11912_v38 }
 0xa41   : > { %4797 = vmatpush.msra.mxu2 %v4421_v33  ;;  %4837 = vmatpush.msrb.mxu1 %v4420_v46  ;;  %v12621_v33 = vunpack.i.h.bf16 %v11815_v63  ;;  %v4389_v46 = vsel %vm13526_vm8, %v6582_v10, %v6583_v61  ;;  %vm13531_vm8 = vmmov %vm13530_vm9 }
 0xa42   : > { %v4406_v42 = vsel %vm366_vm5, %v12619_v14, %v6577_v5  ;;  %v4404_v25 = vsel %vm366_vm5, %v6578_v52, %v12616_v58  ;;  %v4390_v5 = vsel %vm13527_vm10, %v12618_v27, %v6582_v10  ;;  %v12622_v52 = vunpack.i.h.bf16 %v11901_v4  ;;  %v11969_v27 = vpop.permute.xlu2 %6725 }
 0xa43   : > { %4758 = vmatpush.msrb.mxu3 %v4406_v42  ;;  %4798 = vmatpush.msra.mxu2 %v4405_v56  ;;  %v4388_v56 = vsel %vm13528_vm14, %v6583_v61, %v12617_v16  ;;  %v4373_v10 = vsel %vm13531_vm8, %v6587_v62, %v6588_v29  ;;  %vm13533_vm10 = vcmp.lt.s32.totalorder %v6988_v36, 22  ;;  %v6538_v61 = vunpack.i.h.bf16 %v11659_v11  ;;  %vm13534_vm14 = vmmov %vm13531_vm8 }
 0xa44   : > { %4838 = vmatpush.msrb.mxu1 %v4404_v25  ;;  %v13529_v25 = vunpack.i.l.bf16 %v11815_v63  ;;  %v6537_v16 = vunpack.i.l.bf16 %v11659_v11 }
 0xa45   : > { %4759 = vmatpush.msrb.mxu3 %v4390_v5  ;;  %4799 = vmatpush.msra.mxu2 %v4389_v46  ;;  %v13532_v46 = vunpack.i.h.bf16 %v11628_v34 }
 0xa46   : > { %4839 = vmatpush.msrb.mxu1 %v4388_v56  ;;  %v11954_v18 = vpop.permute.xlu0 %6720  ;;  %v4374_v58 = vsel %vm13530_vm9, %v13529_v25, %v6587_v62  ;;  %v4372_v62 = vsel %vm13534_vm14, %v6588_v29, %v12621_v33  ;;  %v12623_v25 = vunpack.i.h.bf16 %v11860_v49  ;;  %vm13535_vm9 = vcmp.lt.s32.totalorder %v6988_v36, 21 }
 0xa47   : > { %v4341_v5 = vsel %vm13533_vm10, %v6542_v57, %v13532_v46  ;;  %v11971_v14 = vpop.permute.xlu1 %6715  ;;  %4760 = vmatpush.msrb.mxu3 %v4374_v58  ;;  %4800 = vmatpush.msra.mxu2 %v4373_v10  ;;  %v4358_v11 = vsel %vm13535_vm9, %v12620_v8, %v6547_v32  ;;  %vm13536_vm8 = vmmov %vm13535_vm9  ;;  %v6533_v58 = vunpack.i.h.bf16 %v11661_v24  ;;  %v12624_v42 = vunpack.i.l.bf16 %v11954_v18 }
 0xa48   : > { %v12625_v46 = vunpack.i.l.bf16 %v11971_v14  ;;  %4840 = vmatpush.msrb.mxu1 %v4372_v62  ;;  %v4357_v56 = vsel %vm13536_vm8, %v6547_v32, %v6548_v12  ;;  %vm13537_vm10 = vmmov %vm13536_vm8  ;;  %v6532_v62 = vunpack.i.l.bf16 %v11661_v24  ;;  %v13538_v32 = vunpack.i.h.bf16 %v11787_v21 }
 0xa49   : > { %4761 = vmatpush.msrb.mxu3 %v4358_v11  ;;  %4801 = vmatpush.msra.mxu2 %v4357_v56  ;;  %v4356_v29 = vsel %vm13537_vm10, %v6548_v12, %v12622_v52  ;;  %vm13539_vm14 = vcmp.lt.s32.totalorder %v6988_v36, 22  ;;  %v13540_v11 = vunpack.i.h.bf16 %v11700_v59  ;;  %v6528_v10 = vunpack.i.h.bf16 %v11623_v41 }
 0xa4a   : > { %4841 = vmatpush.msrb.mxu1 %v4356_v29  ;;  %v4342_v33 = vsel %vm13539_vm14, %v13538_v32, %v6542_v57  ;;  %v6652_v12 = vunpack.i.l.bf16 %v11731_v54  ;;  %v6727_v24 = vunpack.i.l.bf16 %v11969_v27  ;;  %v13541_v29 = vunpack.i.l.bf16 %v11787_v21  ;;  %vm13543_vm9 = vmmov %vm13539_vm14 }
 0xa4b   : > { %v4616_v56 = vsel %vm591_vm13, %v13540_v11, %v12625_v46  ;;  %4762 = vmatpush.msrb.mxu3 %v4342_v33  ;;  %4802 = vmatpush.msra.mxu2 %v4341_v5  ;;  %v13542_v52 = vunpack.i.h.bf16 %v11628_v34  ;;  %v6527_v32 = vunpack.i.l.bf16 %v11623_v41  ;;  %v6648_v8 = vunpack.i.h.bf16 %v11757_v60 }
 0xa4c   : > { %4820 = vmatpush.msrb.mxu0 %v4616_v56  ;;  %vm13544_vm8 = vcmp.lt.s32.totalorder %v6988_v36, 38  ;;  %v6523_v5 = vunpack.i.h.bf16 %v11648_v2  ;;  %v6647_v34 = vunpack.i.l.bf16 %v11757_v60  ;;  %v13546_v41 = vunpack.i.h.bf16 %v11670_v43 }
 0xa4d   : > { %v4340_v57 = vsel %vm13543_vm9, %v13542_v52, %v13541_v29  ;;  %v4326_v11 = vsel %vm13544_vm8, %v12623_v25, %v6537_v16  ;;  %vm13545_vm10 = vmmov %vm13544_vm8  ;;  %v13547_v56 = vunpack.i.l.bf16 %v11860_v49  ;;  %vm13550_vm9 = vcmp.lt.s32.totalorder %v6988_v36, 39 }
 0xa4e   : > { %4842 = vmatpush.msrb.mxu1 %v4340_v57  ;;  %v4325_v33 = vsel %vm13545_vm10, %v6537_v16, %v6538_v61  ;;  %4763 = vmatpush.msrb.mxu3 %v4326_v11  ;;  %v4600_v52 = vsel %vm574_vm12, %v13546_v41, %v12624_v42  ;;  %vm13548_vm14 = vmmov %vm13544_vm8  ;;  %v6522_v16 = vunpack.i.l.bf16 %v11648_v2  ;;  %v6643_v57 = vunpack.i.h.bf16 %v11829_v7  ;;  %v12035_v11 = vpop.permute.xlu0 %6735 }
 0xa4f   : > { %4803 = vmatpush.msra.mxu2 %v4325_v33  ;;  %v4324_v29 = vsel %vm13548_vm14, %v6538_v61, %v13547_v56  ;;  %4821 = vmatpush.msrb.mxu0 %v4600_v52  ;;  %v13549_v33 = vunpack.i.h.bf16 %v11731_v54  ;;  %vm13551_vm8 = vmmov %vm13550_vm9  ;;  %v6642_v42 = vunpack.i.l.bf16 %v11829_v7  ;;  %v12044_v46 = vpop.permute.xlu1 %6730  ;;  %v13552_v2 = vunpack.i.h.bf16 %v11765_v48 }
 0xa50   : > { %4843 = vmatpush.msrb.mxu1 %v4324_v29  ;;  %v4309_v41 = vsel %vm13551_vm8, %v6532_v62, %v6533_v58  ;;  %vm13553_vm10 = vmmov %vm13551_vm8  ;;  %vm13554_vm14 = vcmp.lt.s32.totalorder %v6988_v36, 40  ;;  %v12063_v29 = vpop.permute.xlu2 %6740 }
 0xa51   : > { %v4310_v25 = vsel %vm13550_vm9, %v13549_v33, %v6532_v62  ;;  %4804 = vmatpush.msra.mxu2 %v4309_v41  ;;  %v4584_v61 = vsel %vm557_vm11, %v13552_v2, %v6727_v24  ;;  %v4308_v52 = vsel %vm13553_vm10, %v6533_v58, %v6652_v12  ;;  %v6732_v62 = vunpack.i.l.bf16 %v12044_v46  ;;  %vm13555_vm9 = vmmov %vm13554_vm14 }
 0xa52   : > { %4764 = vmatpush.msrb.mxu3 %v4310_v25  ;;  %4822 = vmatpush.msrb.mxu0 %v4584_v61  ;;  %v4294_v25 = vsel %vm13554_vm14, %v6648_v8, %v6527_v32  ;;  %v4293_v56 = vsel %vm13555_vm9, %v6527_v32, %v6528_v10  ;;  %v6737_v33 = vunpack.i.l.bf16 %v12035_v11  ;;  %vm13556_vm8 = vmmov %vm13555_vm9  ;;  %vm13557_vm10 = vcmp.lt.s32.totalorder %v6988_v36, 41 }
 0xa53   : > { %4844 = vmatpush.msrb.mxu1 %v4308_v52  ;;  %4805 = vmatpush.msra.mxu2 %v4293_v56  ;;  %v4292_v58 = vsel %vm13556_vm8, %v6528_v10, %v6647_v34  ;;  %v4278_v41 = vsel %vm13557_vm10, %v6643_v57, %v6522_v16  ;;  %vm13558_vm14 = vmmov %vm13557_vm10  ;;  %v13559_v2 = vunpack.i.h.bf16 %v11707_v39  ;;  %vm13560_vm9 = vcmp.lt.s32.totalorder %v6988_v36, 90 }
 0xa54   : > { %4765 = vmatpush.msrb.mxu3 %v4294_v25  ;;  %v4277_v32 = vsel %vm13558_vm14, %v6522_v16, %v6523_v5  ;;  %v6713_v52 = vunpack.i.h.bf16 %v11847_v47  ;;  %vm13561_vm8 = vmmov %vm13557_vm10  ;;  %v6742_v25 = vunpack.i.l.bf16 %v12063_v29  ;;  %v13562_v16 = vunpack.i.h.bf16 %v11650_v44 }
 0xa55   : > { %4845 = vmatpush.msrb.mxu1 %v4292_v58  ;;  %v4568_v61 = vsel %vm13560_vm9, %v13559_v2, %v6732_v62  ;;  %4806 = vmatpush.msra.mxu2 %v4277_v32  ;;  %v4276_v10 = vsel %vm13561_vm8, %v6523_v5, %v6642_v42  ;;  %v13563_v56 = vunpack.i.l.bf16 %v11650_v44  ;;  %vm13564_vm10 = vcmp.lt.s32.totalorder %v6988_v36, 42 }
 0xa56   : > { %4766 = vmatpush.msrb.mxu3 %v4278_v41  ;;  %4823 = vmatpush.msrb.mxu0 %v4568_v61  ;;  %v12097_v41 = vld [vmem:[%s12309_s1 + $0x60] sm:$0xff]  ;;  %v6718_v32 = vunpack.i.h.bf16 %v11971_v14  ;;  %v13565_v5 = vunpack.i.h.bf16 %v11676_v45  ;;  %vm13566_vm14 = vcmp.lt.s32.totalorder %v6988_v36, 106  ;;  %v6723_v2 = vunpack.i.h.bf16 %v11954_v18 }
 0xa57   : > { %4846 = vmatpush.msrb.mxu1 %v4276_v10  ;;  %v4261_v58 = vsel %vm13564_vm10, %v13563_v56, %v13562_v16  ;;  %v13567_v61 = vunpack.i.l.bf16 %v11847_v47  ;;  %v4516_v10 = vpop.permute.xlu1 %4515  ;;  %v13568_v16 = vunpack.i.l.bf16 %v11735_v26  ;;  %v13569_v56 = vunpack.i.h.bf16 %v11795_v51 }
 0xa58   : > { %4767 = vmatpush.msrb.mxu3 %v11721_v31  ;;  %4807 = vmatpush.msra.mxu2 %v4261_v58  ;;  %v4552_v44 = vsel %vm13566_vm14, %v13565_v5, %v6737_v33  ;;  %vm13570_vm9 = vcmp.lt.s32.totalorder %v6988_v36, 107  ;;  %v13571_v5 = vunpack.i.h.bf16 %v11733_v28  ;;  %v13572_v26 = vunpack.i.l.bf16 %v11971_v14 }
 0xa59   : > { %4824 = vmatpush.msrb.mxu0 %v4552_v44  ;;  %4847 = vmatpush.msrb.mxu1 %v11729_v6  ;;  %v4631_v31 = vsel %vm608_vm15, %v13567_v61, %v6713_v52  ;;  %v4634_v6 = vsel %vm608_vm15, %v6713_v52, %v13568_v16  ;;  %v4536_v58 = vsel %vm13570_vm9, %v13569_v56, %v6742_v25  ;;  %v6728_v44 = vunpack.i.h.bf16 %v11969_v27  ;;  %v4500_v61 = vpop.permute.xlu0 %4499  ;;  %vm13593_vm8 = vmmov %vm13570_vm9 }
 0xa5a   : > { %4768 = vmatmul.f32.vlgmr.msrb.gmra.mxu3 %v12097_v41  ;;  %4808 = vmatmul.f32.vlgmr.msra.gmra.mxu2 %v12097_v41  ;;  %v4520_v47 = vsel %vm489_vm7, %v13571_v5, %v4516_v10  ;;  %v4615_v52 = vsel %vm591_vm13, %v13572_v26, %v6718_v32  ;;  %v6733_v56 = vunpack.i.h.bf16 %v12044_v46  ;;  %v13574_v5 = vunpack.i.l.bf16 %v11954_v18 }
 0xa5b   : > { %4848 = vmatmul.f32.vlgmr.msrb.gmra.mxu1 %v12097_v41  ;;  %4859 = vmatpush.msra.mxu3 %v4631_v31  ;;  %v13573_v31 = vunpack.i.l.bf16 %v11700_v59  ;;  %v13575_v14 = vunpack.i.l.bf16 %v11670_v43  ;;  %v13576_v59 = vunpack.i.h.bf16 %v11698_v53  ;;  %vm13577_vm15 = vcmp.lt.s32.totalorder %v6988_v36, 109 }
 0xa5c   : > { %4899 = vmatpush.msrb.mxu2 %v4634_v6  ;;  %4825 = vmatpush.msrb.mxu0 %v4536_v58  ;;  %v4599_v6 = vsel %vm574_vm12, %v13574_v5, %v6723_v2  ;;  %v6738_v26 = vunpack.i.h.bf16 %v12035_v11  ;;  %v4583_v18 = vsel %vm557_vm11, %v6727_v24, %v6728_v44  ;;  %v13579_v43 = vunpack.i.h.bf16 %v11817_v50 }
 0xa5d   : > { %4860 = vmatpush.msra.mxu3 %v4615_v52  ;;  %v4618_v16 = vsel %vm591_vm13, %v6718_v32, %v13573_v31  ;;  %v4602_v58 = vsel %vm574_vm12, %v6723_v2, %v13575_v14  ;;  %v4504_v32 = vsel %vm13577_vm15, %v13576_v59, %v4500_v61  ;;  %v13580_v52 = vunpack.i.l.bf16 %v11765_v48  ;;  %vm13591_vm13 = vmmov %vm13570_vm9 }
 0xa5e   : > { %4900 = vmatpush.msrb.mxu2 %v4618_v16  ;;  %4826 = vmatpush.msrb.mxu0 %v4520_v47  ;;  %v13578_v47 = vunpack.i.l.bf16 %v11633_v15  ;;  %v6743_v16 = vunpack.i.h.bf16 %v12063_v29  ;;  %vm13581_vm12 = vcmp.lt.s32.totalorder %v6988_v36, 90  ;;  %v13582_v50 = vunpack.i.l.bf16 %v11680_v35 }
 0xa5f   : > { %4861 = vmatpush.msra.mxu3 %v4599_v6  ;;  %v4586_v31 = vsel %vm557_vm11, %v6728_v44, %v13580_v52  ;;  %v4567_v15 = vsel %vm13581_vm12, %v6732_v62, %v6733_v56  ;;  %v13583_v27 = vunpack.i.h.bf16 %v11755_v30  ;;  %v13584_v24 = vunpack.i.l.bf16 %v11707_v39  ;;  %vm13586_vm11 = vmmov %vm13566_vm14  ;;  %v4518_v44 = vpop.permute.xlu1 %4517 }
 0xa60   : > { %4901 = vmatpush.msrb.mxu2 %v4602_v58  ;;  %4827 = vmatpush.msrb.mxu0 %v4504_v32  ;;  %v4490_v2 = vsel %vm455_vm0, %v13579_v43, %v13578_v47  ;;  %vm13585_vm0 = vmmov %vm13581_vm12  ;;  %v4551_v46 = vsel %vm13586_vm11, %v6737_v33, %v6738_v26  ;;  %v13587_v35 = vunpack.i.l.bf16 %v11672_v3  ;;  %v13588_v30 = vunpack.i.h.bf16 %v11881_v20  ;;  %v4502_v33 = vpop.permute.xlu2 %4501 }
 0xa61   : > { %4862 = vmatpush.msra.mxu3 %v4583_v18  ;;  %5031 = vmatmul.msk.f32.vlgmr.msrb.gmra.mxu0 %vm725_vm6, %v11854_v13  ;;  %v4474_v48 = vsel %vm438_vm1, %v13583_v27, %v13582_v50  ;;  %v4570_v29 = vsel %vm13585_vm0, %v6733_v56, %v13584_v24  ;;  %v13589_v39 = vunpack.i.l.bf16 %v11676_v45  ;;  %vm13590_vm1 = vmmov %vm13586_vm11  ;;  %v4535_v11 = vsel %vm13591_vm13, %v6742_v25, %v6743_v16 }
 0xa62   : > { %4872 = vmatpush.msra.mxu0 %v4490_v2  ;;  %4902 = vmatpush.msrb.mxu2 %v4586_v31  ;;  %v4458_v62 = vsel %vm421_vm2, %v13588_v30, %v13587_v35  ;;  %v13592_v3 = vunpack.i.l.bf16 %v11795_v51  ;;  %v4519_v45 = vsel %vm489_vm7, %v4516_v10, %v4518_v44  ;;  %v13594_v5 = vunpack.i.l.bf16 %v11849_v22  ;;  %vm13597_vm2 = vmmov %vm13577_vm15  ;;  %v13626_v35 = vld [vmem:[#allocation4_spill] sm:$0xff] }
 0xa63   : > { %4863 = vmatpush.msra.mxu3 %v4567_v15  ;;  %v4554_v56 = vsel %vm13590_vm1, %v6738_v26, %v13589_v39  ;;  %v13595_v6 = vunpack.i.h.bf16 %v11849_v22  ;;  %v4503_v14 = vsel %vm13597_vm2, %v4500_v61, %v4502_v33  ;;  %v13598_v10 = vunpack.i.l.bf16 %v11785_v0 }
 0xa64   : > { %4873 = vmatpush.msra.mxu0 %v4474_v48  ;;  %4903 = vmatpush.msrb.mxu2 %v4570_v29  ;;  %v4538_v20 = vsel %vm13593_vm8, %v6743_v16, %v13592_v3  ;;  %v13599_v58 = vunpack.i.h.bf16 %v11785_v0  ;;  %v13600_v59 = vunpack.i.l.bf16 %v11698_v53  ;;  %v13602_v61 = vunpack.i.l.bf16 %v11912_v38  ;;  %v13629_v3 = vld [vmem:[#allocation9_spill] sm:$0xff] }
 0xa65   : > { %4864 = vmatpush.msra.mxu3 %v4551_v46  ;;  %v4435_v25 = vsel %vm400_vm3, %v13595_v6, %v13594_v5  ;;  %vm13601_vm3 = vmmov %vm13597_vm2  ;;  %v13603_v32 = vunpack.i.h.bf16 %v11912_v38  ;;  %v13604_v53 = vunpack.i.l.bf16 %v11879_v23  ;;  %v13605_v26 = vunpack.i.h.bf16 %v11879_v23 }
 0xa66   : > { %4874 = vmatpush.msra.mxu0 %v4458_v62  ;;  %4904 = vmatpush.msrb.mxu2 %v4554_v56  ;;  %v4419_v22 = vsel %vm383_vm4, %v13599_v58, %v13598_v10  ;;  %vm13606_vm4 = vcmp.lt.s32.totalorder %v6988_v36, 19  ;;  %v13607_v47 = vunpack.i.l.bf16 %v11815_v63  ;;  %v13608_v43 = vunpack.i.h.bf16 %v11815_v63  ;;  %v13627_v62 = vld [vmem:[#allocation6_spill] sm:$0xff] }
 0xa67   : > { %4865 = vmatpush.msra.mxu3 %v4535_v11  ;;  %v4403_v0 = vsel %vm366_vm5, %v13603_v32, %v13602_v61  ;;  %v4387_v18 = vsel %vm13606_vm4, %v13605_v26, %v13604_v53  ;;  %v13610_v2 = vunpack.i.l.bf16 %v11901_v4  ;;  %vm13612_vm5 = vcmp.lt.s32.totalorder %v6988_v36, 21 }
 0xa68   : > { %4875 = vmatpush.msra.mxu0 %v11599_v9  ;;  %4905 = vmatpush.msrb.mxu2 %v4538_v20  ;;  %v13596_v9 = vunpack.i.l.bf16 %v11733_v28  ;;  %v4506_v28 = vsel %vm13601_vm3, %v4502_v33, %v13600_v59  ;;  %v13613_v23 = vunpack.i.h.bf16 %v11787_v21  ;;  %v13614_v31 = vunpack.i.l.bf16 %v11787_v21 }
 0xa69   : > { %4866 = vmatpush.msra.mxu3 %v4519_v45  ;;  %v13616_v63 = vunpack.i.h.bf16 %v11860_v49  ;;  %v13617_v15 = vunpack.i.l.bf16 %v11860_v49  ;;  %vm13618_vm10 = vcmp.lt.s32.totalorder %v6988_v36, 38  ;;  %vm13620_vm14 = vcmp.lt.s32.totalorder %v6988_v36, 39 }
 0xa6a   : > { %4876 = vmatpush.msra.mxu0 %v4435_v25  ;;  %v4522_v51 = vsel %vm489_vm7, %v4518_v44, %v13596_v9  ;;  %vm13609_vm7 = vcmp.lt.s32.totalorder %v6988_v36, 20  ;;  %vm13621_vm9 = vcmp.lt.s32.totalorder %v6988_v36, 40  ;;  %vm13622_vm15 = vcmp.lt.s32.totalorder %v6988_v36, 41 }
 0xa6b   : > { %4906 = vmatpush.msrb.mxu2 %v4522_v51  ;;  %4867 = vmatpush.msra.mxu3 %v4503_v14  ;;  %v4371_v38 = vsel %vm13609_vm7, %v13608_v43, %v13607_v47  ;;  %v4323_v50 = vsel %vm13618_vm10, %v13617_v15, %v13616_v63  ;;  %v4291_v21 = vsel %vm13621_vm9, %v6647_v34, %v6648_v8  ;;  %vm13625_vm12 = vcmp.lt.s32.totalorder %v6988_v36, 42  ;;  %v4747_v8 = vpop.permute.xlu0 %4746 }
 0xa6c   : > { %4877 = vmatpush.msra.mxu0 %v4419_v22  ;;  %5032 = vmatmul.msk.f32.vlgmr.msra.gmra.mxu3 %vm725_vm6, %v11854_v13  ;;  %v4275_v49 = vsel %vm13622_vm15, %v6642_v42, %v6643_v57 }
 0xa6d   : > { %4907 = vmatpush.msrb.mxu2 %v4506_v28 }
 0xa6e   : > { %4878 = vmatpush.msra.mxu0 %v4403_v0  ;;  %5033 = vmatmul.msk.f32.vlgmr.msrb.gmra.mxu2 %vm725_vm6, %v11854_v13  ;;  %v13611_v13 = vunpack.i.h.bf16 %v11901_v4  ;;  %vm13615_vm6 = vcmp.lt.s32.totalorder %v6988_v36, 22  ;;  %v13619_v4 = vunpack.i.h.bf16 %v11731_v54  ;;  %v13623_v54 = vunpack.i.h.bf16 %v11705_v40 }
 0xa6f   : > { %v4339_v16 = vsel %vm13615_vm6, %v13614_v31, %v13613_v23 }
 0xa70   : > { %4879 = vmatpush.msra.mxu0 %v4387_v18  ;;  %v4355_v52 = vsel %vm13612_vm5, %v13611_v13, %v13610_v2  ;;  %v4307_v27 = vsel %vm13620_vm14, %v6652_v12, %v13619_v4  ;;  %v13624_v12 = vunpack.i.l.bf16 %v11705_v40 }
 0xa72   : > { %4880 = vmatpush.msra.mxu0 %v4371_v38  ;;  %v4259_v60 = vsel %vm13625_vm12, %v13624_v12, %v13623_v54 }
 0xa74   : > { %4881 = vmatpush.msra.mxu0 %v4355_v52 }
 0xa76   : > { %4882 = vmatpush.msra.mxu0 %v4339_v16 }
 0xa78   : > { %4883 = vmatpush.msra.mxu0 %v4323_v50 }
 0xa7a   : > { %4884 = vmatpush.msra.mxu0 %v4307_v27 }
 0xa7c   : > { %4885 = vmatpush.msra.mxu0 %v4291_v21 }
 0xa7e   : > { %4886 = vmatpush.msra.mxu0 %v4275_v49 }
 0xa80   : > { %4887 = vmatpush.msra.mxu0 %v4259_v60 }
 0xa81   : > { %4888 = vmatmul.f32.vlgmr.msra.gmra.mxu0 %v12097_v41 }
 0xaa8   : > { %v4789_v29 = vpop.f32.mrf.mxu1 }
 0xad8   : > { %v4849_v41 = vpop.f32.mrf.mxu1 }
 0xad9   : > { %v4850_v39 = vadd.f32 %v4849_v41, %v4747_v8 }
 0xadd   : > { %v4769_v34 = vpop.f32.mrf.mxu3  ;;  %v4809_v48 = vpop.f32.mrf.mxu2 }
 0xade   : > { %v4770_v24 = vadd.f32 %v4769_v34, %v4747_v8  ;;  %v4810_v7 = vadd.f32 %v4809_v48, %v4747_v8  ;;  %v4829_v46 = vpop.f32.mrf.mxu0 }
 0xae0   : > { %v4790_v42 = vadd.f32 %v4789_v29, %v4770_v24  ;;  %v4830_v57 = vadd.f32 %v4829_v46, %v4810_v7 }
 0xae2   : > { %v4912_v30 = vadd.f32 %v4790_v42, %v13626_v35  ;;  %v4913_v44 = vadd.f32 %v4830_v57, %v13627_v62 }
 0xae4   : > { %v4916_v36 = vmul.f32 %v4912_v30, %v13514_v55  ;;  %v4917_v40 = vmul.f32 %v4913_v44, %v13515_v19 }
 0xae6   : > { %4920 = vst [vmem:[%s197_s6] sm:$0xff] %v4916_v36 }
 0xae7   : > { %4921 = vst [vmem:[%s197_s6 + $0x8] sm:$0xff] %v4917_v40 }
 0xaef   : > { %v4869_v56 = vpop.f32.mrf.mxu3 }
 0xaf0   : > { %v4870_v11 = vadd.f32 %v4869_v56, %v4850_v39 }
 0xaf1   : > { %v4909_v5 = vpop.f32.mrf.mxu2 }
 0xaf2   : > { %v4914_v20 = vadd.f32 %v4870_v11, %v13629_v3 }
 0xaf4   : > { %v4918_v33 = vmul.f32 %v4914_v20, %v13519_v17 }
 0xaf6   : > { %4922 = vst [vmem:[%s197_s6 + $0x10] sm:$0xff] %v4918_v33 }
 0xafe   : > { %v4889_v45 = vpop.f32.mrf.mxu0 }
 0xaff   : > { %v4890_v6 = vadd.f32 %v4889_v45, %v4747_v8 }
 0xb01   : > { %v4910_v25 = vadd.f32 %v4909_v5, %v4890_v6 }
 0xb03   : > { %v4915_v9 = vadd.f32 %v4910_v25, %v10770_v1 }
 0xb05   : > { %v4919_v55 = vmul.f32 %v4915_v9, %v13518_v37 }
 0xb07   : > { %4923 = vst [vmem:[%s197_s6 + $0x18] sm:$0xff] %v4919_v55 }
 0xb08 PF: > { %s14_s15 = sadd.s32 1, %s6750_s15  }
 0xb09   : > { %p11_p4 = scmp.ge.s32.totalorder %s14_s15, 4  }
 0xb0b   :  { %13 = sbr.rel (!%p11_p4) target bundleno = 1 (0x1), region = 78 }

</bundles_post_ra>
